<compile_context>
chip_gen: v5e
topology: v5e:2x2
jax: 0.10.0
libtpu: 0.0.40
codegen_flags: <defaults>
</compile_context>

<pallas_src>
import numpy as np
import jax
import jax.numpy as jnp
from jax.experimental import pallas as pl
from jax.experimental.pallas import tpu as pltpu


_EPS = 1e-5
_TARGET_ROWS = 256   # aim for a flattened matmul M-dim that fills an MXU pass


def _softplus(x):
    # matches F.softplus (beta=1, threshold=20)
    return jnp.where(x > 20.0, x, jnp.log(1.0 + jnp.exp(x)))


def _gn_scale_shift(s1, s2, inv_count, member, member_t, gamma, beta):
    """Per-(batch, channel) affine for GroupNorm given per-channel sums.

    s1 / s2: (Bt, C) per-batch sum(x) / sum(x^2) over the normalized points.
    member:  (C, G) one-hot group membership; member_t: (G, C).
    Returns (scale, shift) with  GN(x) = x * scale + shift
                              == (x - mean) * rsqrt(var + eps) * gamma + beta.
    """
    mean_g = jnp.dot(s1, member, preferred_element_type=jnp.float32) * inv_count
    msq_g = jnp.dot(s2, member, preferred_element_type=jnp.float32) * inv_count
    var_g = jnp.maximum(msq_g - mean_g * mean_g, 0.0)   # clamp cancellation
    mean_c = jnp.dot(mean_g, member_t, preferred_element_type=jnp.float32)
    var_c = jnp.dot(var_g, member_t, preferred_element_type=jnp.float32)
    scale = jax.lax.rsqrt(var_c + _EPS) * gamma
    shift = beta - mean_c * scale
    return scale, shift


def _param_pred_kernel(*refs):
    x_ref = refs[0]                       # (Bt, N, 4) f32
    o_ref = refs[-1]                      # (Bt, 2)    f32
    rest = refs[1:-1]

    bt, n, _ = x_ref.shape
    m = bt * n

    # ---- prepool: Conv1d(k=1) -> GroupNorm -> ReLU stack --------------------
    # Conv1d with kernel size 1 over (B, C, N) is a per-point matmul; the
    # (Bt, N) axes are flattened so the MXU sees a single M = Bt*N matmul.
    h3 = x_ref[...]                       # (Bt, N, 4) f32
    pos = 0
    for _ in range(5):
        w, b, gamma, beta, member, member_t = rest[pos:pos + 6]
        pos += 6
        wv = w[...]
        cout = wv.shape[1]
        cg = cout // member.shape[1]

        h2 = h3.reshape(m, h3.shape[2])
        y = jnp.dot(h2.astype(wv.dtype), wv,
                    preferred_element_type=jnp.float32) + b[...]      # (M, Cout)
        y3 = y.reshape(bt, n, cout)

        # per-batch GroupNorm statistics (exact f32 sums over the point axis)
        s1 = jnp.sum(y3, axis=1)                                      # (Bt, Cout)
        s2 = jnp.sum(y3 * y3, axis=1)                                 # (Bt, Cout)
        scale, shift = _gn_scale_shift(s1, s2, 1.0 / (n * cg),
                                       member[...], member_t[...],
                                       gamma[...], beta[...])
        h3 = jnp.maximum(y3 * scale[:, None, :] + shift[:, None, :], 0.0)

    # ---- AdaptiveMaxPool1d(1): per-batch max over the point axis ------------
    h = jnp.max(h3, axis=1)                                           # (Bt, 1024)

    # ---- postpool: (Linear -> GroupNorm -> ReLU) x2, batched over Bt --------
    for _ in range(2):
        w, b, gamma, beta, member, member_t = rest[pos:pos + 6]
        pos += 6
        wv = w[...]
        cg = wv.shape[1] // member.shape[1]
        y = jnp.dot(h.astype(wv.dtype), wv,
                    preferred_element_type=jnp.float32) + b[...]      # (Bt, Cout)
        scale, shift = _gn_scale_shift(y, y * y, 1.0 / cg,
                                       member[...], member_t[...],
                                       gamma[...], beta[...])
        h = jnp.maximum(y * scale + shift, 0.0)

    # ---- final Linear (only beta/alpha columns) + softplus ------------------
    w, b = rest[pos:pos + 2]
    wv = w[...]
    raw = jnp.dot(h.astype(wv.dtype), wv,
                  preferred_element_type=jnp.float32) + b[...]        # (Bt, 2)
    o_ref[...] = _softplus(raw)


def _group_member_matrices(c, groups):
    """One-hot (C, G) group membership and its transpose, built on the host."""
    idx = np.arange(c) // (c // groups)
    member = (idx[:, None] == np.arange(groups)[None, :]).astype(np.float32)
    return jnp.asarray(member), jnp.asarray(member.T)


def _build_kernel_params(params, compute_dtype):
    """Flat kernel-input list: per GN layer [w, b, gamma, beta, member, member_t],
    then the final linear [w(:, :2), b(:, :2)].  Weights cast to compute_dtype."""
    (w1, b1, g1, gb1, w2, b2, g2, gb2, w3, b3, g3, gb3, w4, b4, g4, gb4,
     w5, b5, g5, gb5, lw1, lb1, g6, gb6, lw2, lb2, g7, gb7, lw3, lb3) = params

    gn_layers = [
        (w1, b1, g1, gb1, 8), (w2, b2, g2, gb2, 8), (w3, b3, g3, gb3, 8),
        (w4, b4, g4, gb4, 8), (w5, b5, g5, gb5, 16),
        (lw1, lb1, g6, gb6, 16), (lw2, lb2, g7, gb7, 16),
    ]
    out = []
    for w, b, gamma, beta, groups in gn_layers:
        member, member_t = _group_member_matrices(w.shape[1], groups)
        out += [w.astype(compute_dtype), b.astype(jnp.float32),
                gamma.astype(jnp.float32), beta.astype(jnp.float32),
                member, member_t]
    # only raw_weights[:, 0:2] (beta, alpha) are consumed downstream
    out += [lw3[:, :2].astype(compute_dtype), lb3[:, :2].astype(jnp.float32)]
    return out


def parameter_prediction_net(src, ref, params, *,
                             compute_dtype=jnp.bfloat16, block_b=None):
    """src: (B, J, 3), ref: (B, K, 3) -> (beta (B,), alpha (B,))."""
    B, J, _ = src.shape
    K = ref.shape[1]
    N = J + K

    # F.pad(..., (0,1), value=0/1) + concat along the point dim (tiny XLA glue;
    # could be folded into the kernel but it is not on the critical path).
    src_p = jnp.concatenate([src, jnp.zeros((B, J, 1), src.dtype)], axis=-1)
    ref_p = jnp.concatenate([ref, jnp.ones((B, K, 1), ref.dtype)], axis=-1)
    x = jnp.concatenate([src_p, ref_p], axis=1).astype(jnp.float32)   # (B, N, 4)

    # Choose how many batch elements to pack per grid step so the flattened
    # matmul M-dim (bt * N) is >= _TARGET_ROWS; keep bt sublane-aligned when
    # it does not cover the whole (padded) batch.
    if block_b is None:
        block_b = max(1, -(-_TARGET_ROWS // N))
    bt = block_b
    if bt < B:
        bt = ((bt + 7) // 8) * 8
    if bt >= B:
        bt, b_pad = B, B
    else:
        b_pad = -(-B // bt) * bt
    if b_pad != B:  # zero-padded batches produce finite garbage, sliced away below
        x = jnp.concatenate([x, jnp.zeros((b_pad - B, N, 4), jnp.float32)], axis=0)

    kparams = _build_kernel_params(params, compute_dtype)

    in_specs = [pl.BlockSpec((bt, N, 4), lambda i: (i, 0, 0))]
    for p in kparams:   # all params are 2D and constant over the grid
        in_specs.append(pl.BlockSpec(p.shape, lambda i: (0, 0)))

    out = pl.pallas_call(
        _param_pred_kernel,
        out_shape=jax.ShapeDtypeStruct((b_pad, 2), jnp.float32),
        grid_spec=pltpu.PrefetchScalarGridSpec(
            num_scalar_prefetch=0,
            grid=(b_pad // bt,),
            in_specs=in_specs,
            out_specs=pl.BlockSpec((bt, 2), lambda i: (i, 0)),
        ),
        compiler_params=pltpu.CompilerParams(
            dimension_semantics=("parallel",),   # batch axis: independent steps
        ),
    )(x, *kparams)

    out = out[:B]
    return out[:, 0], out[:, 1]


def init_params(key, weights_dim):
    """Deterministic synthetic parameters with the shapes ParameterPredictionNet.__init__ implies."""
    out_dim = 2 + int(np.prod(weights_dim))
    layer_defs = [
        (4, 64, 8), (64, 64, 8), (64, 64, 8), (64, 128, 8), (128, 1024, 16),   # prepool convs
        (1024, 512, 16), (512, 256, 16), (256, out_dim, None),                 # postpool linears
    ]
    params = []
    keys = jax.random.split(key, 2 * len(layer_defs))
    for i, (cin, cout, groups) in enumerate(layer_defs):
        bound = 1.0 / np.sqrt(cin)
        w = jax.random.uniform(keys[2 * i], (cin, cout), jnp.float32, -bound, bound)
        b = jax.random.uniform(keys[2 * i + 1], (1, cout), jnp.float32, -bound, bound)
        params += [w, b]
        if groups is not None:  # GroupNorm affine params (torch default: gamma=1, beta=0)
            params += [jnp.ones((1, cout), jnp.float32), jnp.zeros((1, cout), jnp.float32)]
    return params, out_dim


def reference_forward(src, ref, params, compute_dtype=jnp.float32):
    """Pure-JAX reference matching the torch forward.  `compute_dtype` applies
    the same matmul-operand rounding as the kernel (f32 accumulation)."""
    B, J, _ = src.shape
    K = ref.shape[1]
    src_p = jnp.concatenate([src, jnp.zeros((B, J, 1), src.dtype)], axis=-1)
    ref_p = jnp.concatenate([ref, jnp.ones((B, K, 1), ref.dtype)], axis=-1)
    x = jnp.concatenate([src_p, ref_p], axis=1).astype(jnp.float32)   # (B, N, 4)

    def dot(a, w):
        return jnp.dot(a.astype(compute_dtype), w.astype(compute_dtype),
                       preferred_element_type=jnp.float32)

    def gn(h, gamma, beta, g, eps=1e-5):
        n, c = h.shape
        hg = h.reshape(n, g, c // g)
        mean = hg.mean(axis=(0, 2), keepdims=True)
        var = ((hg - mean) ** 2).mean(axis=(0, 2), keepdims=True)
        hn = ((hg - mean) / jnp.sqrt(var + eps)).reshape(n, c)
        return hn * gamma + beta

    (w1, b1, g1, gb1, w2, b2, g2, gb2, w3, b3, g3, gb3, w4, b4, g4, gb4,
     w5, b5, g5, gb5, lw1, lb1, g6, gb6, lw2, lb2, g7, gb7, lw3, lb3) = params

    def single(xb):
        h = jax.nn.relu(gn(dot(xb, w1) + b1, g1, gb1, 8))
        h = jax.nn.relu(gn(dot(h, w2) + b2, g2, gb2, 8))
        h = jax.nn.relu(gn(dot(h, w3) + b3, g3, gb3, 8))
        h = jax.nn.relu(gn(dot(h, w4) + b4, g4, gb4, 8))
        h = jax.nn.relu(gn(dot(h, w5) + b5, g5, gb5, 16))
        pooled = h.max(axis=0, keepdims=True)
        h = jax.nn.relu(gn(dot(pooled, lw1) + lb1, g6, gb6, 16))
        h = jax.nn.relu(gn(dot(h, lw2) + lb2, g7, gb7, 16))
        raw = (dot(h, lw3) + lb3)[0]
        return _softplus(raw[0]), _softplus(raw[1])

    beta, alpha = jax.vmap(single)(x)
    return beta, alpha


if __name__ == "__main__":
    key = jax.random.PRNGKey(0)
    kp, ks, kr = jax.random.split(key, 3)

    weights_dim = [3]
    params, out_dim = init_params(kp, weights_dim)

    B, J, K = 2, 8, 8
    src = jax.random.normal(ks, (B, J, 3), jnp.float32)
    ref = jax.random.normal(kr, (B, K, 3), jnp.float32)

    # Default (performance) config: bf16 matmul operands, f32 everywhere else.
    # Compare against a reference with the same operand rounding.
    beta, alpha = parameter_prediction_net(src, ref, params)
    jax.block_until_ready((beta, alpha))
    beta_r, alpha_r = reference_forward(src, ref, params, compute_dtype=jnp.bfloat16)
    np.testing.assert_allclose(np.asarray(beta), np.asarray(beta_r), rtol=5e-3, atol=5e-3)
    np.testing.assert_allclose(np.asarray(alpha), np.asarray(alpha_r), rtol=5e-3, atol=5e-3)

    # Full-precision path against the exact f32 reference (tight tolerance).
    beta32, alpha32 = parameter_prediction_net(src, ref, params, compute_dtype=jnp.float32)
    jax.block_until_ready((beta32, alpha32))
    beta_r32, alpha_r32 = reference_forward(src, ref, params, compute_dtype=jnp.float32)
    np.testing.assert_allclose(np.asarray(beta32), np.asarray(beta_r32), rtol=2e-3, atol=2e-3)
    np.testing.assert_allclose(np.asarray(alpha32), np.asarray(alpha_r32), rtol=2e-3, atol=2e-3)

    print("KERNEL_OK")
</pallas_src>

<mosaic_0001>
module attributes {stable_mosaic.version = 11 : i64} {
  func.func @_param_pred_kernel(%arg0: i32, %arg1: memref<2x16x4xf32, #tpu.memory_space<vmem>>, %arg2: memref<4x64xbf16, #tpu.memory_space<vmem>>, %arg3: memref<1x64xf32, #tpu.memory_space<vmem>>, %arg4: memref<1x64xf32, #tpu.memory_space<vmem>>, %arg5: memref<1x64xf32, #tpu.memory_space<vmem>>, %arg6: memref<64x8xf32, #tpu.memory_space<vmem>>, %arg7: memref<8x64xf32, #tpu.memory_space<vmem>>, %arg8: memref<64x64xbf16, #tpu.memory_space<vmem>>, %arg9: memref<1x64xf32, #tpu.memory_space<vmem>>, %arg10: memref<1x64xf32, #tpu.memory_space<vmem>>, %arg11: memref<1x64xf32, #tpu.memory_space<vmem>>, %arg12: memref<64x8xf32, #tpu.memory_space<vmem>>, %arg13: memref<8x64xf32, #tpu.memory_space<vmem>>, %arg14: memref<64x64xbf16, #tpu.memory_space<vmem>>, %arg15: memref<1x64xf32, #tpu.memory_space<vmem>>, %arg16: memref<1x64xf32, #tpu.memory_space<vmem>>, %arg17: memref<1x64xf32, #tpu.memory_space<vmem>>, %arg18: memref<64x8xf32, #tpu.memory_space<vmem>>, %arg19: memref<8x64xf32, #tpu.memory_space<vmem>>, %arg20: memref<64x128xbf16, #tpu.memory_space<vmem>>, %arg21: memref<1x128xf32, #tpu.memory_space<vmem>>, %arg22: memref<1x128xf32, #tpu.memory_space<vmem>>, %arg23: memref<1x128xf32, #tpu.memory_space<vmem>>, %arg24: memref<128x8xf32, #tpu.memory_space<vmem>>, %arg25: memref<8x128xf32, #tpu.memory_space<vmem>>, %arg26: memref<128x1024xbf16, #tpu.memory_space<vmem>>, %arg27: memref<1x1024xf32, #tpu.memory_space<vmem>>, %arg28: memref<1x1024xf32, #tpu.memory_space<vmem>>, %arg29: memref<1x1024xf32, #tpu.memory_space<vmem>>, %arg30: memref<1024x16xf32, #tpu.memory_space<vmem>>, %arg31: memref<16x1024xf32, #tpu.memory_space<vmem>>, %arg32: memref<1024x512xbf16, #tpu.memory_space<vmem>>, %arg33: memref<1x512xf32, #tpu.memory_space<vmem>>, %arg34: memref<1x512xf32, #tpu.memory_space<vmem>>, %arg35: memref<1x512xf32, #tpu.memory_space<vmem>>, %arg36: memref<512x16xf32, #tpu.memory_space<vmem>>, %arg37: memref<16x512xf32, #tpu.memory_space<vmem>>, %arg38: memref<512x256xbf16, #tpu.memory_space<vmem>>, %arg39: memref<1x256xf32, #tpu.memory_space<vmem>>, %arg40: memref<1x256xf32, #tpu.memory_space<vmem>>, %arg41: memref<1x256xf32, #tpu.memory_space<vmem>>, %arg42: memref<256x16xf32, #tpu.memory_space<vmem>>, %arg43: memref<16x256xf32, #tpu.memory_space<vmem>>, %arg44: memref<256x2xbf16, #tpu.memory_space<vmem>>, %arg45: memref<1x2xf32, #tpu.memory_space<vmem>>, %arg46: memref<2x2xf32, #tpu.memory_space<vmem>>) attributes {dimension_semantics = [#tpu.dimension_semantics<parallel>], iteration_bounds = array<i64: 1>, scalar_prefetch = 0 : i64, scratch_operands = 0 : i64, tpu.core_type = #tpu.core_type<tc>, window_params = [{transform_indices = @transform_0, window_bounds = array<i64: 2, 16, 4>}, {pipeline_mode = #tpu.pipeline_mode<synchronous>, transform_indices = @transform_1, window_bounds = array<i64: 4, 64>}, {pipeline_mode = #tpu.pipeline_mode<synchronous>, transform_indices = @transform_2, window_bounds = array<i64: 1, 64>}, {pipeline_mode = #tpu.pipeline_mode<synchronous>, transform_indices = @transform_3, window_bounds = array<i64: 1, 64>}, {pipeline_mode = #tpu.pipeline_mode<synchronous>, transform_indices = @transform_4, window_bounds = array<i64: 1, 64>}, {pipeline_mode = #tpu.pipeline_mode<synchronous>, transform_indices = @transform_5, window_bounds = array<i64: 64, 8>}, {pipeline_mode = #tpu.pipeline_mode<synchronous>, transform_indices = @transform_6, window_bounds = array<i64: 8, 64>}, {pipeline_mode = #tpu.pipeline_mode<synchronous>, transform_indices = @transform_7, window_bounds = array<i64: 64, 64>}, {pipeline_mode = #tpu.pipeline_mode<synchronous>, transform_indices = @transform_8, window_bounds = array<i64: 1, 64>}, {pipeline_mode = #tpu.pipeline_mode<synchronous>, transform_indices = @transform_9, window_bounds = array<i64: 1, 64>}, {pipeline_mode = #tpu.pipeline_mode<synchronous>, transform_indices = @transform_10, window_bounds = array<i64: 1, 64>}, {pipeline_mode = #tpu.pipeline_mode<synchronous>, transform_indices = @transform_11, window_bounds = array<i64: 64, 8>}, {pipeline_mode = #tpu.pipeline_mode<synchronous>, transform_indices = @transform_12, window_bounds = array<i64: 8, 64>}, {pipeline_mode = #tpu.pipeline_mode<synchronous>, transform_indices = @transform_13, window_bounds = array<i64: 64, 64>}, {pipeline_mode = #tpu.pipeline_mode<synchronous>, transform_indices = @transform_14, window_bounds = array<i64: 1, 64>}, {pipeline_mode = #tpu.pipeline_mode<synchronous>, transform_indices = @transform_15, window_bounds = array<i64: 1, 64>}, {pipeline_mode = #tpu.pipeline_mode<synchronous>, transform_indices = @transform_16, window_bounds = array<i64: 1, 64>}, {pipeline_mode = #tpu.pipeline_mode<synchronous>, transform_indices = @transform_17, window_bounds = array<i64: 64, 8>}, {pipeline_mode = #tpu.pipeline_mode<synchronous>, transform_indices = @transform_18, window_bounds = array<i64: 8, 64>}, {pipeline_mode = #tpu.pipeline_mode<synchronous>, transform_indices = @transform_19, window_bounds = array<i64: 64, 128>}, {pipeline_mode = #tpu.pipeline_mode<synchronous>, transform_indices = @transform_20, window_bounds = array<i64: 1, 128>}, {pipeline_mode = #tpu.pipeline_mode<synchronous>, transform_indices = @transform_21, window_bounds = array<i64: 1, 128>}, {pipeline_mode = #tpu.pipeline_mode<synchronous>, transform_indices = @transform_22, window_bounds = array<i64: 1, 128>}, {pipeline_mode = #tpu.pipeline_mode<synchronous>, transform_indices = @transform_23, window_bounds = array<i64: 128, 8>}, {pipeline_mode = #tpu.pipeline_mode<synchronous>, transform_indices = @transform_24, window_bounds = array<i64: 8, 128>}, {pipeline_mode = #tpu.pipeline_mode<synchronous>, transform_indices = @transform_25, window_bounds = array<i64: 128, 1024>}, {pipeline_mode = #tpu.pipeline_mode<synchronous>, transform_indices = @transform_26, window_bounds = array<i64: 1, 1024>}, {pipeline_mode = #tpu.pipeline_mode<synchronous>, transform_indices = @transform_27, window_bounds = array<i64: 1, 1024>}, {pipeline_mode = #tpu.pipeline_mode<synchronous>, transform_indices = @transform_28, window_bounds = array<i64: 1, 1024>}, {pipeline_mode = #tpu.pipeline_mode<synchronous>, transform_indices = @transform_29, window_bounds = array<i64: 1024, 16>}, {pipeline_mode = #tpu.pipeline_mode<synchronous>, transform_indices = @transform_30, window_bounds = array<i64: 16, 1024>}, {pipeline_mode = #tpu.pipeline_mode<synchronous>, transform_indices = @transform_31, window_bounds = array<i64: 1024, 512>}, {pipeline_mode = #tpu.pipeline_mode<synchronous>, transform_indices = @transform_32, window_bounds = array<i64: 1, 512>}, {pipeline_mode = #tpu.pipeline_mode<synchronous>, transform_indices = @transform_33, window_bounds = array<i64: 1, 512>}, {pipeline_mode = #tpu.pipeline_mode<synchronous>, transform_indices = @transform_34, window_bounds = array<i64: 1, 512>}, {pipeline_mode = #tpu.pipeline_mode<synchronous>, transform_indices = @transform_35, window_bounds = array<i64: 512, 16>}, {pipeline_mode = #tpu.pipeline_mode<synchronous>, transform_indices = @transform_36, window_bounds = array<i64: 16, 512>}, {pipeline_mode = #tpu.pipeline_mode<synchronous>, transform_indices = @transform_37, window_bounds = array<i64: 512, 256>}, {pipeline_mode = #tpu.pipeline_mode<synchronous>, transform_indices = @transform_38, window_bounds = array<i64: 1, 256>}, {pipeline_mode = #tpu.pipeline_mode<synchronous>, transform_indices = @transform_39, window_bounds = array<i64: 1, 256>}, {pipeline_mode = #tpu.pipeline_mode<synchronous>, transform_indices = @transform_40, window_bounds = array<i64: 1, 256>}, {pipeline_mode = #tpu.pipeline_mode<synchronous>, transform_indices = @transform_41, window_bounds = array<i64: 256, 16>}, {pipeline_mode = #tpu.pipeline_mode<synchronous>, transform_indices = @transform_42, window_bounds = array<i64: 16, 256>}, {pipeline_mode = #tpu.pipeline_mode<synchronous>, transform_indices = @transform_43, window_bounds = array<i64: 256, 2>}, {pipeline_mode = #tpu.pipeline_mode<synchronous>, transform_indices = @transform_44, window_bounds = array<i64: 1, 2>}, {transform_indices = @transform_45, window_bounds = array<i64: 2, 2>}]} {
    %c0 = arith.constant 0 : index
    %c0_0 = arith.constant 0 : index
    %c0_1 = arith.constant 0 : index
    %0 = vector.load %arg1[%c0, %c0_0, %c0_1] : memref<2x16x4xf32, #tpu.memory_space<vmem>>, vector<2x16x4xf32>
    %c0_2 = arith.constant 0 : index
    %c0_3 = arith.constant 0 : index
    %1 = vector.load %arg2[%c0_2, %c0_3] : memref<4x64xbf16, #tpu.memory_space<vmem>>, vector<4x64xbf16>
    %2 = vector.shape_cast %0 : vector<2x16x4xf32> to vector<32x4xf32>
    %3 = arith.truncf %2 : vector<32x4xf32> to vector<32x4xbf16>
    %cst = arith.constant dense<0.000000e+00> : vector<32x64xf32>
    %4 = tpu.matmul %3, %1, %cst {dimension_numbers = #tpu.dot_dimension_numbers<[1], [0], [0], [1], [0, 0, 1, 1], [], []>} : vector<32x4xbf16>, vector<4x64xbf16>, vector<32x64xf32> -> vector<32x64xf32>
    %c0_4 = arith.constant 0 : index
    %c0_5 = arith.constant 0 : index
    %5 = vector.load %arg3[%c0_4, %c0_5] : memref<1x64xf32, #tpu.memory_space<vmem>>, vector<1x64xf32>
    %6 = vector.broadcast %5 : vector<1x64xf32> to vector<32x64xf32>
    %7 = arith.addf %4, %6 : vector<32x64xf32>
    %8 = vector.shape_cast %7 : vector<32x64xf32> to vector<2x16x64xf32>
    %cst_6 = arith.constant dense<0.000000e+00> : vector<2x64xf32>
    %9 = vector.multi_reduction <add>, %8, %cst_6 [1] : vector<2x16x64xf32> to vector<2x64xf32>
    %10 = arith.mulf %8, %8 : vector<2x16x64xf32>
    %cst_7 = arith.constant dense<0.000000e+00> : vector<2x64xf32>
    %11 = vector.multi_reduction <add>, %10, %cst_7 [1] : vector<2x16x64xf32> to vector<2x64xf32>
    %c0_8 = arith.constant 0 : index
    %c0_9 = arith.constant 0 : index
    %12 = vector.load %arg6[%c0_8, %c0_9] : memref<64x8xf32, #tpu.memory_space<vmem>>, vector<64x8xf32>
    %c0_10 = arith.constant 0 : index
    %c0_11 = arith.constant 0 : index
    %13 = vector.load %arg7[%c0_10, %c0_11] : memref<8x64xf32, #tpu.memory_space<vmem>>, vector<8x64xf32>
    %c0_12 = arith.constant 0 : index
    %c0_13 = arith.constant 0 : index
    %14 = vector.load %arg4[%c0_12, %c0_13] : memref<1x64xf32, #tpu.memory_space<vmem>>, vector<1x64xf32>
    %c0_14 = arith.constant 0 : index
    %c0_15 = arith.constant 0 : index
    %15 = vector.load %arg5[%c0_14, %c0_15] : memref<1x64xf32, #tpu.memory_space<vmem>>, vector<1x64xf32>
    %cst_16 = arith.constant dense<0.000000e+00> : vector<2x8xf32>
    %16 = tpu.matmul %9, %12, %cst_16 {dimension_numbers = #tpu.dot_dimension_numbers<[1], [0], [0], [1], [0, 0, 1, 1], [], []>} : vector<2x64xf32>, vector<64x8xf32>, vector<2x8xf32> -> vector<2x8xf32>
    %cst_17 = arith.constant 7.812500e-03 : f32
    %17 = vector.broadcast %cst_17 : f32 to vector<2x8xf32>
    %18 = arith.mulf %16, %17 : vector<2x8xf32>
    %cst_18 = arith.constant dense<0.000000e+00> : vector<2x8xf32>
    %19 = tpu.matmul %11, %12, %cst_18 {dimension_numbers = #tpu.dot_dimension_numbers<[1], [0], [0], [1], [0, 0, 1, 1], [], []>} : vector<2x64xf32>, vector<64x8xf32>, vector<2x8xf32> -> vector<2x8xf32>
    %cst_19 = arith.constant 7.812500e-03 : f32
    %20 = vector.broadcast %cst_19 : f32 to vector<2x8xf32>
    %21 = arith.mulf %19, %20 : vector<2x8xf32>
    %22 = arith.mulf %18, %18 : vector<2x8xf32>
    %23 = arith.subf %21, %22 : vector<2x8xf32>
    %cst_20 = arith.constant 0.000000e+00 : f32
    %24 = vector.broadcast %cst_20 : f32 to vector<2x8xf32>
    %25 = arith.maximumf %23, %24 : vector<2x8xf32>
    %cst_21 = arith.constant dense<0.000000e+00> : vector<2x64xf32>
    %26 = tpu.matmul %18, %13, %cst_21 {dimension_numbers = #tpu.dot_dimension_numbers<[1], [0], [0], [1], [0, 0, 1, 1], [], []>} : vector<2x8xf32>, vector<8x64xf32>, vector<2x64xf32> -> vector<2x64xf32>
    %cst_22 = arith.constant dense<0.000000e+00> : vector<2x64xf32>
    %27 = tpu.matmul %25, %13, %cst_22 {dimension_numbers = #tpu.dot_dimension_numbers<[1], [0], [0], [1], [0, 0, 1, 1], [], []>} : vector<2x8xf32>, vector<8x64xf32>, vector<2x64xf32> -> vector<2x64xf32>
    %cst_23 = arith.constant 9.99999974E-6 : f32
    %28 = vector.broadcast %cst_23 : f32 to vector<2x64xf32>
    %29 = arith.addf %27, %28 : vector<2x64xf32>
    %30 = math.rsqrt %29 : vector<2x64xf32>
    %31 = vector.broadcast %14 : vector<1x64xf32> to vector<2x64xf32>
    %32 = arith.mulf %30, %31 : vector<2x64xf32>
    %33 = arith.mulf %26, %32 : vector<2x64xf32>
    %34 = vector.broadcast %15 : vector<1x64xf32> to vector<2x64xf32>
    %35 = arith.subf %34, %33 : vector<2x64xf32>
    %36 = vector.shape_cast %32 : vector<2x64xf32> to vector<2x1x64xf32>
    %37 = vector.broadcast %36 : vector<2x1x64xf32> to vector<2x16x64xf32>
    %38 = arith.mulf %8, %37 : vector<2x16x64xf32>
    %39 = vector.shape_cast %35 : vector<2x64xf32> to vector<2x1x64xf32>
    %40 = vector.broadcast %39 : vector<2x1x64xf32> to vector<2x16x64xf32>
    %41 = arith.addf %38, %40 : vector<2x16x64xf32>
    %cst_24 = arith.constant 0.000000e+00 : f32
    %42 = vector.broadcast %cst_24 : f32 to vector<2x16x64xf32>
    %43 = arith.maximumf %41, %42 : vector<2x16x64xf32>
    %c0_25 = arith.constant 0 : index
    %c0_26 = arith.constant 0 : index
    %44 = vector.load %arg8[%c0_25, %c0_26] : memref<64x64xbf16, #tpu.memory_space<vmem>>, vector<64x64xbf16>
    %45 = vector.shape_cast %43 : vector<2x16x64xf32> to vector<32x64xf32>
    %46 = arith.truncf %45 : vector<32x64xf32> to vector<32x64xbf16>
    %cst_27 = arith.constant dense<0.000000e+00> : vector<32x64xf32>
    %47 = tpu.matmul %46, %44, %cst_27 {dimension_numbers = #tpu.dot_dimension_numbers<[1], [0], [0], [1], [0, 0, 1, 1], [], []>} : vector<32x64xbf16>, vector<64x64xbf16>, vector<32x64xf32> -> vector<32x64xf32>
    %c0_28 = arith.constant 0 : index
    %c0_29 = arith.constant 0 : index
    %48 = vector.load %arg9[%c0_28, %c0_29] : memref<1x64xf32, #tpu.memory_space<vmem>>, vector<1x64xf32>
    %49 = vector.broadcast %48 : vector<1x64xf32> to vector<32x64xf32>
    %50 = arith.addf %47, %49 : vector<32x64xf32>
    %51 = vector.shape_cast %50 : vector<32x64xf32> to vector<2x16x64xf32>
    %cst_30 = arith.constant dense<0.000000e+00> : vector<2x64xf32>
    %52 = vector.multi_reduction <add>, %51, %cst_30 [1] : vector<2x16x64xf32> to vector<2x64xf32>
    %53 = arith.mulf %51, %51 : vector<2x16x64xf32>
    %cst_31 = arith.constant dense<0.000000e+00> : vector<2x64xf32>
    %54 = vector.multi_reduction <add>, %53, %cst_31 [1] : vector<2x16x64xf32> to vector<2x64xf32>
    %c0_32 = arith.constant 0 : index
    %c0_33 = arith.constant 0 : index
    %55 = vector.load %arg12[%c0_32, %c0_33] : memref<64x8xf32, #tpu.memory_space<vmem>>, vector<64x8xf32>
    %c0_34 = arith.constant 0 : index
    %c0_35 = arith.constant 0 : index
    %56 = vector.load %arg13[%c0_34, %c0_35] : memref<8x64xf32, #tpu.memory_space<vmem>>, vector<8x64xf32>
    %c0_36 = arith.constant 0 : index
    %c0_37 = arith.constant 0 : index
    %57 = vector.load %arg10[%c0_36, %c0_37] : memref<1x64xf32, #tpu.memory_space<vmem>>, vector<1x64xf32>
    %c0_38 = arith.constant 0 : index
    %c0_39 = arith.constant 0 : index
    %58 = vector.load %arg11[%c0_38, %c0_39] : memref<1x64xf32, #tpu.memory_space<vmem>>, vector<1x64xf32>
    %cst_40 = arith.constant dense<0.000000e+00> : vector<2x8xf32>
    %59 = tpu.matmul %52, %55, %cst_40 {dimension_numbers = #tpu.dot_dimension_numbers<[1], [0], [0], [1], [0, 0, 1, 1], [], []>} : vector<2x64xf32>, vector<64x8xf32>, vector<2x8xf32> -> vector<2x8xf32>
    %cst_41 = arith.constant 7.812500e-03 : f32
    %60 = vector.broadcast %cst_41 : f32 to vector<2x8xf32>
    %61 = arith.mulf %59, %60 : vector<2x8xf32>
    %cst_42 = arith.constant dense<0.000000e+00> : vector<2x8xf32>
    %62 = tpu.matmul %54, %55, %cst_42 {dimension_numbers = #tpu.dot_dimension_numbers<[1], [0], [0], [1], [0, 0, 1, 1], [], []>} : vector<2x64xf32>, vector<64x8xf32>, vector<2x8xf32> -> vector<2x8xf32>
    %cst_43 = arith.constant 7.812500e-03 : f32
    %63 = vector.broadcast %cst_43 : f32 to vector<2x8xf32>
    %64 = arith.mulf %62, %63 : vector<2x8xf32>
    %65 = arith.mulf %61, %61 : vector<2x8xf32>
    %66 = arith.subf %64, %65 : vector<2x8xf32>
    %cst_44 = arith.constant 0.000000e+00 : f32
    %67 = vector.broadcast %cst_44 : f32 to vector<2x8xf32>
    %68 = arith.maximumf %66, %67 : vector<2x8xf32>
    %cst_45 = arith.constant dense<0.000000e+00> : vector<2x64xf32>
    %69 = tpu.matmul %61, %56, %cst_45 {dimension_numbers = #tpu.dot_dimension_numbers<[1], [0], [0], [1], [0, 0, 1, 1], [], []>} : vector<2x8xf32>, vector<8x64xf32>, vector<2x64xf32> -> vector<2x64xf32>
    %cst_46 = arith.constant dense<0.000000e+00> : vector<2x64xf32>
    %70 = tpu.matmul %68, %56, %cst_46 {dimension_numbers = #tpu.dot_dimension_numbers<[1], [0], [0], [1], [0, 0, 1, 1], [], []>} : vector<2x8xf32>, vector<8x64xf32>, vector<2x64xf32> -> vector<2x64xf32>
    %cst_47 = arith.constant 9.99999974E-6 : f32
    %71 = vector.broadcast %cst_47 : f32 to vector<2x64xf32>
    %72 = arith.addf %70, %71 : vector<2x64xf32>
    %73 = math.rsqrt %72 : vector<2x64xf32>
    %74 = vector.broadcast %57 : vector<1x64xf32> to vector<2x64xf32>
    %75 = arith.mulf %73, %74 : vector<2x64xf32>
    %76 = arith.mulf %69, %75 : vector<2x64xf32>
    %77 = vector.broadcast %58 : vector<1x64xf32> to vector<2x64xf32>
    %78 = arith.subf %77, %76 : vector<2x64xf32>
    %79 = vector.shape_cast %75 : vector<2x64xf32> to vector<2x1x64xf32>
    %80 = vector.broadcast %79 : vector<2x1x64xf32> to vector<2x16x64xf32>
    %81 = arith.mulf %51, %80 : vector<2x16x64xf32>
    %82 = vector.shape_cast %78 : vector<2x64xf32> to vector<2x1x64xf32>
    %83 = vector.broadcast %82 : vector<2x1x64xf32> to vector<2x16x64xf32>
    %84 = arith.addf %81, %83 : vector<2x16x64xf32>
    %cst_48 = arith.constant 0.000000e+00 : f32
    %85 = vector.broadcast %cst_48 : f32 to vector<2x16x64xf32>
    %86 = arith.maximumf %84, %85 : vector<2x16x64xf32>
    %c0_49 = arith.constant 0 : index
    %c0_50 = arith.constant 0 : index
    %87 = vector.load %arg14[%c0_49, %c0_50] : memref<64x64xbf16, #tpu.memory_space<vmem>>, vector<64x64xbf16>
    %88 = vector.shape_cast %86 : vector<2x16x64xf32> to vector<32x64xf32>
    %89 = arith.truncf %88 : vector<32x64xf32> to vector<32x64xbf16>
    %cst_51 = arith.constant dense<0.000000e+00> : vector<32x64xf32>
    %90 = tpu.matmul %89, %87, %cst_51 {dimension_numbers = #tpu.dot_dimension_numbers<[1], [0], [0], [1], [0, 0, 1, 1], [], []>} : vector<32x64xbf16>, vector<64x64xbf16>, vector<32x64xf32> -> vector<32x64xf32>
    %c0_52 = arith.constant 0 : index
    %c0_53 = arith.constant 0 : index
    %91 = vector.load %arg15[%c0_52, %c0_53] : memref<1x64xf32, #tpu.memory_space<vmem>>, vector<1x64xf32>
    %92 = vector.broadcast %91 : vector<1x64xf32> to vector<32x64xf32>
    %93 = arith.addf %90, %92 : vector<32x64xf32>
    %94 = vector.shape_cast %93 : vector<32x64xf32> to vector<2x16x64xf32>
    %cst_54 = arith.constant dense<0.000000e+00> : vector<2x64xf32>
    %95 = vector.multi_reduction <add>, %94, %cst_54 [1] : vector<2x16x64xf32> to vector<2x64xf32>
    %96 = arith.mulf %94, %94 : vector<2x16x64xf32>
    %cst_55 = arith.constant dense<0.000000e+00> : vector<2x64xf32>
    %97 = vector.multi_reduction <add>, %96, %cst_55 [1] : vector<2x16x64xf32> to vector<2x64xf32>
    %c0_56 = arith.constant 0 : index
    %c0_57 = arith.constant 0 : index
    %98 = vector.load %arg18[%c0_56, %c0_57] : memref<64x8xf32, #tpu.memory_space<vmem>>, vector<64x8xf32>
    %c0_58 = arith.constant 0 : index
    %c0_59 = arith.constant 0 : index
    %99 = vector.load %arg19[%c0_58, %c0_59] : memref<8x64xf32, #tpu.memory_space<vmem>>, vector<8x64xf32>
    %c0_60 = arith.constant 0 : index
    %c0_61 = arith.constant 0 : index
    %100 = vector.load %arg16[%c0_60, %c0_61] : memref<1x64xf32, #tpu.memory_space<vmem>>, vector<1x64xf32>
    %c0_62 = arith.constant 0 : index
    %c0_63 = arith.constant 0 : index
    %101 = vector.load %arg17[%c0_62, %c0_63] : memref<1x64xf32, #tpu.memory_space<vmem>>, vector<1x64xf32>
    %cst_64 = arith.constant dense<0.000000e+00> : vector<2x8xf32>
    %102 = tpu.matmul %95, %98, %cst_64 {dimension_numbers = #tpu.dot_dimension_numbers<[1], [0], [0], [1], [0, 0, 1, 1], [], []>} : vector<2x64xf32>, vector<64x8xf32>, vector<2x8xf32> -> vector<2x8xf32>
    %cst_65 = arith.constant 7.812500e-03 : f32
    %103 = vector.broadcast %cst_65 : f32 to vector<2x8xf32>
    %104 = arith.mulf %102, %103 : vector<2x8xf32>
    %cst_66 = arith.constant dense<0.000000e+00> : vector<2x8xf32>
    %105 = tpu.matmul %97, %98, %cst_66 {dimension_numbers = #tpu.dot_dimension_numbers<[1], [0], [0], [1], [0, 0, 1, 1], [], []>} : vector<2x64xf32>, vector<64x8xf32>, vector<2x8xf32> -> vector<2x8xf32>
    %cst_67 = arith.constant 7.812500e-03 : f32
    %106 = vector.broadcast %cst_67 : f32 to vector<2x8xf32>
    %107 = arith.mulf %105, %106 : vector<2x8xf32>
    %108 = arith.mulf %104, %104 : vector<2x8xf32>
    %109 = arith.subf %107, %108 : vector<2x8xf32>
    %cst_68 = arith.constant 0.000000e+00 : f32
    %110 = vector.broadcast %cst_68 : f32 to vector<2x8xf32>
    %111 = arith.maximumf %109, %110 : vector<2x8xf32>
    %cst_69 = arith.constant dense<0.000000e+00> : vector<2x64xf32>
    %112 = tpu.matmul %104, %99, %cst_69 {dimension_numbers = #tpu.dot_dimension_numbers<[1], [0], [0], [1], [0, 0, 1, 1], [], []>} : vector<2x8xf32>, vector<8x64xf32>, vector<2x64xf32> -> vector<2x64xf32>
    %cst_70 = arith.constant dense<0.000000e+00> : vector<2x64xf32>
    %113 = tpu.matmul %111, %99, %cst_70 {dimension_numbers = #tpu.dot_dimension_numbers<[1], [0], [0], [1], [0, 0, 1, 1], [], []>} : vector<2x8xf32>, vector<8x64xf32>, vector<2x64xf32> -> vector<2x64xf32>
    %cst_71 = arith.constant 9.99999974E-6 : f32
    %114 = vector.broadcast %cst_71 : f32 to vector<2x64xf32>
    %115 = arith.addf %113, %114 : vector<2x64xf32>
    %116 = math.rsqrt %115 : vector<2x64xf32>
    %117 = vector.broadcast %100 : vector<1x64xf32> to vector<2x64xf32>
    %118 = arith.mulf %116, %117 : vector<2x64xf32>
    %119 = arith.mulf %112, %118 : vector<2x64xf32>
    %120 = vector.broadcast %101 : vector<1x64xf32> to vector<2x64xf32>
    %121 = arith.subf %120, %119 : vector<2x64xf32>
    %122 = vector.shape_cast %118 : vector<2x64xf32> to vector<2x1x64xf32>
    %123 = vector.broadcast %122 : vector<2x1x64xf32> to vector<2x16x64xf32>
    %124 = arith.mulf %94, %123 : vector<2x16x64xf32>
    %125 = vector.shape_cast %121 : vector<2x64xf32> to vector<2x1x64xf32>
    %126 = vector.broadcast %125 : vector<2x1x64xf32> to vector<2x16x64xf32>
    %127 = arith.addf %124, %126 : vector<2x16x64xf32>
    %cst_72 = arith.constant 0.000000e+00 : f32
    %128 = vector.broadcast %cst_72 : f32 to vector<2x16x64xf32>
    %129 = arith.maximumf %127, %128 : vector<2x16x64xf32>
    %c0_73 = arith.constant 0 : index
    %c0_74 = arith.constant 0 : index
    %130 = vector.load %arg20[%c0_73, %c0_74] : memref<64x128xbf16, #tpu.memory_space<vmem>>, vector<64x128xbf16>
    %131 = vector.shape_cast %129 : vector<2x16x64xf32> to vector<32x64xf32>
    %132 = arith.truncf %131 : vector<32x64xf32> to vector<32x64xbf16>
    %cst_75 = arith.constant dense<0.000000e+00> : vector<32x128xf32>
    %133 = tpu.matmul %132, %130, %cst_75 {dimension_numbers = #tpu.dot_dimension_numbers<[1], [0], [0], [1], [0, 0, 1, 1], [], []>} : vector<32x64xbf16>, vector<64x128xbf16>, vector<32x128xf32> -> vector<32x128xf32>
    %c0_76 = arith.constant 0 : index
    %c0_77 = arith.constant 0 : index
    %134 = vector.load %arg21[%c0_76, %c0_77] : memref<1x128xf32, #tpu.memory_space<vmem>>, vector<1x128xf32>
    %135 = vector.broadcast %134 : vector<1x128xf32> to vector<32x128xf32>
    %136 = arith.addf %133, %135 : vector<32x128xf32>
    %137 = vector.shape_cast %136 : vector<32x128xf32> to vector<2x16x128xf32>
    %cst_78 = arith.constant dense<0.000000e+00> : vector<2x128xf32>
    %138 = vector.multi_reduction <add>, %137, %cst_78 [1] : vector<2x16x128xf32> to vector<2x128xf32>
    %139 = arith.mulf %137, %137 : vector<2x16x128xf32>
    %cst_79 = arith.constant dense<0.000000e+00> : vector<2x128xf32>
    %140 = vector.multi_reduction <add>, %139, %cst_79 [1] : vector<2x16x128xf32> to vector<2x128xf32>
    %c0_80 = arith.constant 0 : index
    %c0_81 = arith.constant 0 : index
    %141 = vector.load %arg24[%c0_80, %c0_81] : memref<128x8xf32, #tpu.memory_space<vmem>>, vector<128x8xf32>
    %c0_82 = arith.constant 0 : index
    %c0_83 = arith.constant 0 : index
    %142 = vector.load %arg25[%c0_82, %c0_83] : memref<8x128xf32, #tpu.memory_space<vmem>>, vector<8x128xf32>
    %c0_84 = arith.constant 0 : index
    %c0_85 = arith.constant 0 : index
    %143 = vector.load %arg22[%c0_84, %c0_85] : memref<1x128xf32, #tpu.memory_space<vmem>>, vector<1x128xf32>
    %c0_86 = arith.constant 0 : index
    %c0_87 = arith.constant 0 : index
    %144 = vector.load %arg23[%c0_86, %c0_87] : memref<1x128xf32, #tpu.memory_space<vmem>>, vector<1x128xf32>
    %cst_88 = arith.constant dense<0.000000e+00> : vector<2x8xf32>
    %145 = tpu.matmul %138, %141, %cst_88 {dimension_numbers = #tpu.dot_dimension_numbers<[1], [0], [0], [1], [0, 0, 1, 1], [], []>} : vector<2x128xf32>, vector<128x8xf32>, vector<2x8xf32> -> vector<2x8xf32>
    %cst_89 = arith.constant 3.906250e-03 : f32
    %146 = vector.broadcast %cst_89 : f32 to vector<2x8xf32>
    %147 = arith.mulf %145, %146 : vector<2x8xf32>
    %cst_90 = arith.constant dense<0.000000e+00> : vector<2x8xf32>
    %148 = tpu.matmul %140, %141, %cst_90 {dimension_numbers = #tpu.dot_dimension_numbers<[1], [0], [0], [1], [0, 0, 1, 1], [], []>} : vector<2x128xf32>, vector<128x8xf32>, vector<2x8xf32> -> vector<2x8xf32>
    %cst_91 = arith.constant 3.906250e-03 : f32
    %149 = vector.broadcast %cst_91 : f32 to vector<2x8xf32>
    %150 = arith.mulf %148, %149 : vector<2x8xf32>
    %151 = arith.mulf %147, %147 : vector<2x8xf32>
    %152 = arith.subf %150, %151 : vector<2x8xf32>
    %cst_92 = arith.constant 0.000000e+00 : f32
    %153 = vector.broadcast %cst_92 : f32 to vector<2x8xf32>
    %154 = arith.maximumf %152, %153 : vector<2x8xf32>
    %cst_93 = arith.constant dense<0.000000e+00> : vector<2x128xf32>
    %155 = tpu.matmul %147, %142, %cst_93 {dimension_numbers = #tpu.dot_dimension_numbers<[1], [0], [0], [1], [0, 0, 1, 1], [], []>} : vector<2x8xf32>, vector<8x128xf32>, vector<2x128xf32> -> vector<2x128xf32>
    %cst_94 = arith.constant dense<0.000000e+00> : vector<2x128xf32>
    %156 = tpu.matmul %154, %142, %cst_94 {dimension_numbers = #tpu.dot_dimension_numbers<[1], [0], [0], [1], [0, 0, 1, 1], [], []>} : vector<2x8xf32>, vector<8x128xf32>, vector<2x128xf32> -> vector<2x128xf32>
    %cst_95 = arith.constant 9.99999974E-6 : f32
    %157 = vector.broadcast %cst_95 : f32 to vector<2x128xf32>
    %158 = arith.addf %156, %157 : vector<2x128xf32>
    %159 = math.rsqrt %158 : vector<2x128xf32>
    %160 = vector.broadcast %143 : vector<1x128xf32> to vector<2x128xf32>
    %161 = arith.mulf %159, %160 : vector<2x128xf32>
    %162 = arith.mulf %155, %161 : vector<2x128xf32>
    %163 = vector.broadcast %144 : vector<1x128xf32> to vector<2x128xf32>
    %164 = arith.subf %163, %162 : vector<2x128xf32>
    %165 = vector.shape_cast %161 : vector<2x128xf32> to vector<2x1x128xf32>
    %166 = vector.broadcast %165 : vector<2x1x128xf32> to vector<2x16x128xf32>
    %167 = arith.mulf %137, %166 : vector<2x16x128xf32>
    %168 = vector.shape_cast %164 : vector<2x128xf32> to vector<2x1x128xf32>
    %169 = vector.broadcast %168 : vector<2x1x128xf32> to vector<2x16x128xf32>
    %170 = arith.addf %167, %169 : vector<2x16x128xf32>
    %cst_96 = arith.constant 0.000000e+00 : f32
    %171 = vector.broadcast %cst_96 : f32 to vector<2x16x128xf32>
    %172 = arith.maximumf %170, %171 : vector<2x16x128xf32>
    %c0_97 = arith.constant 0 : index
    %c0_98 = arith.constant 0 : index
    %173 = vector.load %arg26[%c0_97, %c0_98] : memref<128x1024xbf16, #tpu.memory_space<vmem>>, vector<128x1024xbf16>
    %174 = vector.shape_cast %172 : vector<2x16x128xf32> to vector<32x128xf32>
    %175 = arith.truncf %174 : vector<32x128xf32> to vector<32x128xbf16>
    %cst_99 = arith.constant dense<0.000000e+00> : vector<32x1024xf32>
    %176 = tpu.matmul %175, %173, %cst_99 {dimension_numbers = #tpu.dot_dimension_numbers<[1], [0], [0], [1], [0, 0, 1, 1], [], []>} : vector<32x128xbf16>, vector<128x1024xbf16>, vector<32x1024xf32> -> vector<32x1024xf32>
    %c0_100 = arith.constant 0 : index
    %c0_101 = arith.constant 0 : index
    %177 = vector.load %arg27[%c0_100, %c0_101] : memref<1x1024xf32, #tpu.memory_space<vmem>>, vector<1x1024xf32>
    %178 = vector.broadcast %177 : vector<1x1024xf32> to vector<32x1024xf32>
    %179 = arith.addf %176, %178 : vector<32x1024xf32>
    %180 = vector.shape_cast %179 : vector<32x1024xf32> to vector<2x16x1024xf32>
    %cst_102 = arith.constant dense<0.000000e+00> : vector<2x1024xf32>
    %181 = vector.multi_reduction <add>, %180, %cst_102 [1] : vector<2x16x1024xf32> to vector<2x1024xf32>
    %182 = arith.mulf %180, %180 : vector<2x16x1024xf32>
    %cst_103 = arith.constant dense<0.000000e+00> : vector<2x1024xf32>
    %183 = vector.multi_reduction <add>, %182, %cst_103 [1] : vector<2x16x1024xf32> to vector<2x1024xf32>
    %c0_104 = arith.constant 0 : index
    %c0_105 = arith.constant 0 : index
    %184 = vector.load %arg30[%c0_104, %c0_105] : memref<1024x16xf32, #tpu.memory_space<vmem>>, vector<1024x16xf32>
    %c0_106 = arith.constant 0 : index
    %c0_107 = arith.constant 0 : index
    %185 = vector.load %arg31[%c0_106, %c0_107] : memref<16x1024xf32, #tpu.memory_space<vmem>>, vector<16x1024xf32>
    %c0_108 = arith.constant 0 : index
    %c0_109 = arith.constant 0 : index
    %186 = vector.load %arg28[%c0_108, %c0_109] : memref<1x1024xf32, #tpu.memory_space<vmem>>, vector<1x1024xf32>
    %c0_110 = arith.constant 0 : index
    %c0_111 = arith.constant 0 : index
    %187 = vector.load %arg29[%c0_110, %c0_111] : memref<1x1024xf32, #tpu.memory_space<vmem>>, vector<1x1024xf32>
    %cst_112 = arith.constant dense<0.000000e+00> : vector<2x16xf32>
    %188 = tpu.matmul %181, %184, %cst_112 {dimension_numbers = #tpu.dot_dimension_numbers<[1], [0], [0], [1], [0, 0, 1, 1], [], []>} : vector<2x1024xf32>, vector<1024x16xf32>, vector<2x16xf32> -> vector<2x16xf32>
    %cst_113 = arith.constant 9.765625E-4 : f32
    %189 = vector.broadcast %cst_113 : f32 to vector<2x16xf32>
    %190 = arith.mulf %188, %189 : vector<2x16xf32>
    %cst_114 = arith.constant dense<0.000000e+00> : vector<2x16xf32>
    %191 = tpu.matmul %183, %184, %cst_114 {dimension_numbers = #tpu.dot_dimension_numbers<[1], [0], [0], [1], [0, 0, 1, 1], [], []>} : vector<2x1024xf32>, vector<1024x16xf32>, vector<2x16xf32> -> vector<2x16xf32>
    %cst_115 = arith.constant 9.765625E-4 : f32
    %192 = vector.broadcast %cst_115 : f32 to vector<2x16xf32>
    %193 = arith.mulf %191, %192 : vector<2x16xf32>
    %194 = arith.mulf %190, %190 : vector<2x16xf32>
    %195 = arith.subf %193, %194 : vector<2x16xf32>
    %cst_116 = arith.constant 0.000000e+00 : f32
    %196 = vector.broadcast %cst_116 : f32 to vector<2x16xf32>
    %197 = arith.maximumf %195, %196 : vector<2x16xf32>
    %cst_117 = arith.constant dense<0.000000e+00> : vector<2x1024xf32>
    %198 = tpu.matmul %190, %185, %cst_117 {dimension_numbers = #tpu.dot_dimension_numbers<[1], [0], [0], [1], [0, 0, 1, 1], [], []>} : vector<2x16xf32>, vector<16x1024xf32>, vector<2x1024xf32> -> vector<2x1024xf32>
    %cst_118 = arith.constant dense<0.000000e+00> : vector<2x1024xf32>
    %199 = tpu.matmul %197, %185, %cst_118 {dimension_numbers = #tpu.dot_dimension_numbers<[1], [0], [0], [1], [0, 0, 1, 1], [], []>} : vector<2x16xf32>, vector<16x1024xf32>, vector<2x1024xf32> -> vector<2x1024xf32>
    %cst_119 = arith.constant 9.99999974E-6 : f32
    %200 = vector.broadcast %cst_119 : f32 to vector<2x1024xf32>
    %201 = arith.addf %199, %200 : vector<2x1024xf32>
    %202 = math.rsqrt %201 : vector<2x1024xf32>
    %203 = vector.broadcast %186 : vector<1x1024xf32> to vector<2x1024xf32>
    %204 = arith.mulf %202, %203 : vector<2x1024xf32>
    %205 = arith.mulf %198, %204 : vector<2x1024xf32>
    %206 = vector.broadcast %187 : vector<1x1024xf32> to vector<2x1024xf32>
    %207 = arith.subf %206, %205 : vector<2x1024xf32>
    %208 = vector.shape_cast %204 : vector<2x1024xf32> to vector<2x1x1024xf32>
    %209 = vector.broadcast %208 : vector<2x1x1024xf32> to vector<2x16x1024xf32>
    %210 = arith.mulf %180, %209 : vector<2x16x1024xf32>
    %211 = vector.shape_cast %207 : vector<2x1024xf32> to vector<2x1x1024xf32>
    %212 = vector.broadcast %211 : vector<2x1x1024xf32> to vector<2x16x1024xf32>
    %213 = arith.addf %210, %212 : vector<2x16x1024xf32>
    %cst_120 = arith.constant 0.000000e+00 : f32
    %214 = vector.broadcast %cst_120 : f32 to vector<2x16x1024xf32>
    %215 = arith.maximumf %213, %214 : vector<2x16x1024xf32>
    %cst_121 = arith.constant dense<0xFF800000> : vector<2x1024xf32>
    %216 = vector.multi_reduction <maximumf>, %215, %cst_121 [1] : vector<2x16x1024xf32> to vector<2x1024xf32>
    %c0_122 = arith.constant 0 : index
    %c0_123 = arith.constant 0 : index
    %217 = vector.load %arg32[%c0_122, %c0_123] : memref<1024x512xbf16, #tpu.memory_space<vmem>>, vector<1024x512xbf16>
    %218 = arith.truncf %216 : vector<2x1024xf32> to vector<2x1024xbf16>
    %cst_124 = arith.constant dense<0.000000e+00> : vector<2x512xf32>
    %219 = tpu.matmul %218, %217, %cst_124 {dimension_numbers = #tpu.dot_dimension_numbers<[1], [0], [0], [1], [0, 0, 1, 1], [], []>} : vector<2x1024xbf16>, vector<1024x512xbf16>, vector<2x512xf32> -> vector<2x512xf32>
    %c0_125 = arith.constant 0 : index
    %c0_126 = arith.constant 0 : index
    %220 = vector.load %arg33[%c0_125, %c0_126] : memref<1x512xf32, #tpu.memory_space<vmem>>, vector<1x512xf32>
    %221 = vector.broadcast %220 : vector<1x512xf32> to vector<2x512xf32>
    %222 = arith.addf %219, %221 : vector<2x512xf32>
    %223 = arith.mulf %222, %222 : vector<2x512xf32>
    %c0_127 = arith.constant 0 : index
    %c0_128 = arith.constant 0 : index
    %224 = vector.load %arg36[%c0_127, %c0_128] : memref<512x16xf32, #tpu.memory_space<vmem>>, vector<512x16xf32>
    %c0_129 = arith.constant 0 : index
    %c0_130 = arith.constant 0 : index
    %225 = vector.load %arg37[%c0_129, %c0_130] : memref<16x512xf32, #tpu.memory_space<vmem>>, vector<16x512xf32>
    %c0_131 = arith.constant 0 : index
    %c0_132 = arith.constant 0 : index
    %226 = vector.load %arg34[%c0_131, %c0_132] : memref<1x512xf32, #tpu.memory_space<vmem>>, vector<1x512xf32>
    %c0_133 = arith.constant 0 : index
    %c0_134 = arith.constant 0 : index
    %227 = vector.load %arg35[%c0_133, %c0_134] : memref<1x512xf32, #tpu.memory_space<vmem>>, vector<1x512xf32>
    %cst_135 = arith.constant dense<0.000000e+00> : vector<2x16xf32>
    %228 = tpu.matmul %222, %224, %cst_135 {dimension_numbers = #tpu.dot_dimension_numbers<[1], [0], [0], [1], [0, 0, 1, 1], [], []>} : vector<2x512xf32>, vector<512x16xf32>, vector<2x16xf32> -> vector<2x16xf32>
    %cst_136 = arith.constant 3.125000e-02 : f32
    %229 = vector.broadcast %cst_136 : f32 to vector<2x16xf32>
    %230 = arith.mulf %228, %229 : vector<2x16xf32>
    %cst_137 = arith.constant dense<0.000000e+00> : vector<2x16xf32>
    %231 = tpu.matmul %223, %224, %cst_137 {dimension_numbers = #tpu.dot_dimension_numbers<[1], [0], [0], [1], [0, 0, 1, 1], [], []>} : vector<2x512xf32>, vector<512x16xf32>, vector<2x16xf32> -> vector<2x16xf32>
    %cst_138 = arith.constant 3.125000e-02 : f32
    %232 = vector.broadcast %cst_138 : f32 to vector<2x16xf32>
    %233 = arith.mulf %231, %232 : vector<2x16xf32>
    %234 = arith.mulf %230, %230 : vector<2x16xf32>
    %235 = arith.subf %233, %234 : vector<2x16xf32>
    %cst_139 = arith.constant 0.000000e+00 : f32
    %236 = vector.broadcast %cst_139 : f32 to vector<2x16xf32>
    %237 = arith.maximumf %235, %236 : vector<2x16xf32>
    %cst_140 = arith.constant dense<0.000000e+00> : vector<2x512xf32>
    %238 = tpu.matmul %230, %225, %cst_140 {dimension_numbers = #tpu.dot_dimension_numbers<[1], [0], [0], [1], [0, 0, 1, 1], [], []>} : vector<2x16xf32>, vector<16x512xf32>, vector<2x512xf32> -> vector<2x512xf32>
    %cst_141 = arith.constant dense<0.000000e+00> : vector<2x512xf32>
    %239 = tpu.matmul %237, %225, %cst_141 {dimension_numbers = #tpu.dot_dimension_numbers<[1], [0], [0], [1], [0, 0, 1, 1], [], []>} : vector<2x16xf32>, vector<16x512xf32>, vector<2x512xf32> -> vector<2x512xf32>
    %cst_142 = arith.constant 9.99999974E-6 : f32
    %240 = vector.broadcast %cst_142 : f32 to vector<2x512xf32>
    %241 = arith.addf %239, %240 : vector<2x512xf32>
    %242 = math.rsqrt %241 : vector<2x512xf32>
    %243 = vector.broadcast %226 : vector<1x512xf32> to vector<2x512xf32>
    %244 = arith.mulf %242, %243 : vector<2x512xf32>
    %245 = arith.mulf %238, %244 : vector<2x512xf32>
    %246 = vector.broadcast %227 : vector<1x512xf32> to vector<2x512xf32>
    %247 = arith.subf %246, %245 : vector<2x512xf32>
    %248 = arith.mulf %222, %244 : vector<2x512xf32>
    %249 = arith.addf %248, %247 : vector<2x512xf32>
    %cst_143 = arith.constant 0.000000e+00 : f32
    %250 = vector.broadcast %cst_143 : f32 to vector<2x512xf32>
    %251 = arith.maximumf %249, %250 : vector<2x512xf32>
    %c0_144 = arith.constant 0 : index
    %c0_145 = arith.constant 0 : index
    %252 = vector.load %arg38[%c0_144, %c0_145] : memref<512x256xbf16, #tpu.memory_space<vmem>>, vector<512x256xbf16>
    %253 = arith.truncf %251 : vector<2x512xf32> to vector<2x512xbf16>
    %cst_146 = arith.constant dense<0.000000e+00> : vector<2x256xf32>
    %254 = tpu.matmul %253, %252, %cst_146 {dimension_numbers = #tpu.dot_dimension_numbers<[1], [0], [0], [1], [0, 0, 1, 1], [], []>} : vector<2x512xbf16>, vector<512x256xbf16>, vector<2x256xf32> -> vector<2x256xf32>
    %c0_147 = arith.constant 0 : index
    %c0_148 = arith.constant 0 : index
    %255 = vector.load %arg39[%c0_147, %c0_148] : memref<1x256xf32, #tpu.memory_space<vmem>>, vector<1x256xf32>
    %256 = vector.broadcast %255 : vector<1x256xf32> to vector<2x256xf32>
    %257 = arith.addf %254, %256 : vector<2x256xf32>
    %258 = arith.mulf %257, %257 : vector<2x256xf32>
    %c0_149 = arith.constant 0 : index
    %c0_150 = arith.constant 0 : index
    %259 = vector.load %arg42[%c0_149, %c0_150] : memref<256x16xf32, #tpu.memory_space<vmem>>, vector<256x16xf32>
    %c0_151 = arith.constant 0 : index
    %c0_152 = arith.constant 0 : index
    %260 = vector.load %arg43[%c0_151, %c0_152] : memref<16x256xf32, #tpu.memory_space<vmem>>, vector<16x256xf32>
    %c0_153 = arith.constant 0 : index
    %c0_154 = arith.constant 0 : index
    %261 = vector.load %arg40[%c0_153, %c0_154] : memref<1x256xf32, #tpu.memory_space<vmem>>, vector<1x256xf32>
    %c0_155 = arith.constant 0 : index
    %c0_156 = arith.constant 0 : index
    %262 = vector.load %arg41[%c0_155, %c0_156] : memref<1x256xf32, #tpu.memory_space<vmem>>, vector<1x256xf32>
    %cst_157 = arith.constant dense<0.000000e+00> : vector<2x16xf32>
    %263 = tpu.matmul %257, %259, %cst_157 {dimension_numbers = #tpu.dot_dimension_numbers<[1], [0], [0], [1], [0, 0, 1, 1], [], []>} : vector<2x256xf32>, vector<256x16xf32>, vector<2x16xf32> -> vector<2x16xf32>
    %cst_158 = arith.constant 6.250000e-02 : f32
    %264 = vector.broadcast %cst_158 : f32 to vector<2x16xf32>
    %265 = arith.mulf %263, %264 : vector<2x16xf32>
    %cst_159 = arith.constant dense<0.000000e+00> : vector<2x16xf32>
    %266 = tpu.matmul %258, %259, %cst_159 {dimension_numbers = #tpu.dot_dimension_numbers<[1], [0], [0], [1], [0, 0, 1, 1], [], []>} : vector<2x256xf32>, vector<256x16xf32>, vector<2x16xf32> -> vector<2x16xf32>
    %cst_160 = arith.constant 6.250000e-02 : f32
    %267 = vector.broadcast %cst_160 : f32 to vector<2x16xf32>
    %268 = arith.mulf %266, %267 : vector<2x16xf32>
    %269 = arith.mulf %265, %265 : vector<2x16xf32>
    %270 = arith.subf %268, %269 : vector<2x16xf32>
    %cst_161 = arith.constant 0.000000e+00 : f32
    %271 = vector.broadcast %cst_161 : f32 to vector<2x16xf32>
    %272 = arith.maximumf %270, %271 : vector<2x16xf32>
    %cst_162 = arith.constant dense<0.000000e+00> : vector<2x256xf32>
    %273 = tpu.matmul %265, %260, %cst_162 {dimension_numbers = #tpu.dot_dimension_numbers<[1], [0], [0], [1], [0, 0, 1, 1], [], []>} : vector<2x16xf32>, vector<16x256xf32>, vector<2x256xf32> -> vector<2x256xf32>
    %cst_163 = arith.constant dense<0.000000e+00> : vector<2x256xf32>
    %274 = tpu.matmul %272, %260, %cst_163 {dimension_numbers = #tpu.dot_dimension_numbers<[1], [0], [0], [1], [0, 0, 1, 1], [], []>} : vector<2x16xf32>, vector<16x256xf32>, vector<2x256xf32> -> vector<2x256xf32>
    %cst_164 = arith.constant 9.99999974E-6 : f32
    %275 = vector.broadcast %cst_164 : f32 to vector<2x256xf32>
    %276 = arith.addf %274, %275 : vector<2x256xf32>
    %277 = math.rsqrt %276 : vector<2x256xf32>
    %278 = vector.broadcast %261 : vector<1x256xf32> to vector<2x256xf32>
    %279 = arith.mulf %277, %278 : vector<2x256xf32>
    %280 = arith.mulf %273, %279 : vector<2x256xf32>
    %281 = vector.broadcast %262 : vector<1x256xf32> to vector<2x256xf32>
    %282 = arith.subf %281, %280 : vector<2x256xf32>
    %283 = arith.mulf %257, %279 : vector<2x256xf32>
    %284 = arith.addf %283, %282 : vector<2x256xf32>
    %cst_165 = arith.constant 0.000000e+00 : f32
    %285 = vector.broadcast %cst_165 : f32 to vector<2x256xf32>
    %286 = arith.maximumf %284, %285 : vector<2x256xf32>
    %c0_166 = arith.constant 0 : index
    %c0_167 = arith.constant 0 : index
    %287 = vector.load %arg44[%c0_166, %c0_167] : memref<256x2xbf16, #tpu.memory_space<vmem>>, vector<256x2xbf16>
    %288 = arith.truncf %286 : vector<2x256xf32> to vector<2x256xbf16>
    %cst_168 = arith.constant dense<0.000000e+00> : vector<2x2xf32>
    %289 = tpu.matmul %288, %287, %cst_168 {dimension_numbers = #tpu.dot_dimension_numbers<[1], [0], [0], [1], [0, 0, 1, 1], [], []>} : vector<2x256xbf16>, vector<256x2xbf16>, vector<2x2xf32> -> vector<2x2xf32>
    %c0_169 = arith.constant 0 : index
    %c0_170 = arith.constant 0 : index
    %290 = vector.load %arg45[%c0_169, %c0_170] : memref<1x2xf32, #tpu.memory_space<vmem>>, vector<1x2xf32>
    %291 = vector.broadcast %290 : vector<1x2xf32> to vector<2x2xf32>
    %292 = arith.addf %289, %291 : vector<2x2xf32>
    %cst_171 = arith.constant 2.000000e+01 : f32
    %293 = vector.broadcast %cst_171 : f32 to vector<2x2xf32>
    %294 = arith.cmpf ogt, %292, %293 : vector<2x2xf32>
    %295 = math.exp %292 : vector<2x2xf32>
    %cst_172 = arith.constant 1.000000e+00 : f32
    %296 = vector.broadcast %cst_172 : f32 to vector<2x2xf32>
    %297 = arith.addf %296, %295 : vector<2x2xf32>
    %298 = math.log %297 : vector<2x2xf32>
    %299 = arith.select %294, %292, %298 : vector<2x2xi1>, vector<2x2xf32>
    %c0_173 = arith.constant 0 : index
    %c0_174 = arith.constant 0 : index
    %300 = vector.load %arg46[%c0_173, %c0_174] : memref<2x2xf32, #tpu.memory_space<vmem>>, vector<2x2xf32>
    tpu.vector_store %arg46[%c0_173, %c0_174], %299 {strides = array<i32>} : memref<2x2xf32, #tpu.memory_space<vmem>>, vector<2x2xf32>,
    return
  }
  func.func @transform_0(%arg0: i32) -> (i32, i32, i32) {
    %c0_i32 = arith.constant 0 : i32
    %c0_i32_0 = arith.constant 0 : i32
    %c0_i32_1 = arith.constant 0 : i32
    return %arg0, %c0_i32, %c0_i32_0 : i32, i32, i32
  }
  func.func @transform_1(%arg0: i32) -> (i32, i32) {
    %c0_i32 = arith.constant 0 : i32
    %c0_i32_0 = arith.constant 0 : i32
    %c0_i32_1 = arith.constant 0 : i32
    return %c0_i32, %c0_i32_0 : i32, i32
  }
  func.func @transform_2(%arg0: i32) -> (i32, i32) {
    %c0_i32 = arith.constant 0 : i32
    %c0_i32_0 = arith.constant 0 : i32
    %c0_i32_1 = arith.constant 0 : i32
    return %c0_i32, %c0_i32_0 : i32, i32
  }
  func.func @transform_3(%arg0: i32) -> (i32, i32) {
    %c0_i32 = arith.constant 0 : i32
    %c0_i32_0 = arith.constant 0 : i32
    %c0_i32_1 = arith.constant 0 : i32
    return %c0_i32, %c0_i32_0 : i32, i32
  }
  func.func @transform_4(%arg0: i32) -> (i32, i32) {
    %c0_i32 = arith.constant 0 : i32
    %c0_i32_0 = arith.constant 0 : i32
    %c0_i32_1 = arith.constant 0 : i32
    return %c0_i32, %c0_i32_0 : i32, i32
  }
  func.func @transform_5(%arg0: i32) -> (i32, i32) {
    %c0_i32 = arith.constant 0 : i32
    %c0_i32_0 = arith.constant 0 : i32
    %c0_i32_1 = arith.constant 0 : i32
    return %c0_i32, %c0_i32_0 : i32, i32
  }
  func.func @transform_6(%arg0: i32) -> (i32, i32) {
    %c0_i32 = arith.constant 0 : i32
    %c0_i32_0 = arith.constant 0 : i32
    %c0_i32_1 = arith.constant 0 : i32
    return %c0_i32, %c0_i32_0 : i32, i32
  }
  func.func @transform_7(%arg0: i32) -> (i32, i32) {
    %c0_i32 = arith.constant 0 : i32
    %c0_i32_0 = arith.constant 0 : i32
    %c0_i32_1 = arith.constant 0 : i32
    return %c0_i32, %c0_i32_0 : i32, i32
  }
  func.func @transform_8(%arg0: i32) -> (i32, i32) {
    %c0_i32 = arith.constant 0 : i32
    %c0_i32_0 = arith.constant 0 : i32
    %c0_i32_1 = arith.constant 0 : i32
    return %c0_i32, %c0_i32_0 : i32, i32
  }
  func.func @transform_9(%arg0: i32) -> (i32, i32) {
    %c0_i32 = arith.constant 0 : i32
    %c0_i32_0 = arith.constant 0 : i32
    %c0_i32_1 = arith.constant 0 : i32
    return %c0_i32, %c0_i32_0 : i32, i32
  }
  func.func @transform_10(%arg0: i32) -> (i32, i32) {
    %c0_i32 = arith.constant 0 : i32
    %c0_i32_0 = arith.constant 0 : i32
    %c0_i32_1 = arith.constant 0 : i32
    return %c0_i32, %c0_i32_0 : i32, i32
  }
  func.func @transform_11(%arg0: i32) -> (i32, i32) {
    %c0_i32 = arith.constant 0 : i32
    %c0_i32_0 = arith.constant 0 : i32
    %c0_i32_1 = arith.constant 0 : i32
    return %c0_i32, %c0_i32_0 : i32, i32
  }
  func.func @transform_12(%arg0: i32) -> (i32, i32) {
    %c0_i32 = arith.constant 0 : i32
    %c0_i32_0 = arith.constant 0 : i32
    %c0_i32_1 = arith.constant 0 : i32
    return %c0_i32, %c0_i32_0 : i32, i32
  }
  func.func @transform_13(%arg0: i32) -> (i32, i32) {
    %c0_i32 = arith.constant 0 : i32
    %c0_i32_0 = arith.constant 0 : i32
    %c0_i32_1 = arith.constant 0 : i32
    return %c0_i32, %c0_i32_0 : i32, i32
  }
  func.func @transform_14(%arg0: i32) -> (i32, i32) {
    %c0_i32 = arith.constant 0 : i32
    %c0_i32_0 = arith.constant 0 : i32
    %c0_i32_1 = arith.constant 0 : i32
    return %c0_i32, %c0_i32_0 : i32, i32
  }
  func.func @transform_15(%arg0: i32) -> (i32, i32) {
    %c0_i32 = arith.constant 0 : i32
    %c0_i32_0 = arith.constant 0 : i32
    %c0_i32_1 = arith.constant 0 : i32
    return %c0_i32, %c0_i32_0 : i32, i32
  }
  func.func @transform_16(%arg0: i32) -> (i32, i32) {
    %c0_i32 = arith.constant 0 : i32
    %c0_i32_0 = arith.constant 0 : i32
    %c0_i32_1 = arith.constant 0 : i32
    return %c0_i32, %c0_i32_0 : i32, i32
  }
  func.func @transform_17(%arg0: i32) -> (i32, i32) {
    %c0_i32 = arith.constant 0 : i32
    %c0_i32_0 = arith.constant 0 : i32
    %c0_i32_1 = arith.constant 0 : i32
    return %c0_i32, %c0_i32_0 : i32, i32
  }
  func.func @transform_18(%arg0: i32) -> (i32, i32) {
    %c0_i32 = arith.constant 0 : i32
    %c0_i32_0 = arith.constant 0 : i32
    %c0_i32_1 = arith.constant 0 : i32
    return %c0_i32, %c0_i32_0 : i32, i32
  }
  func.func @transform_19(%arg0: i32) -> (i32, i32) {
    %c0_i32 = arith.constant 0 : i32
    %c0_i32_0 = arith.constant 0 : i32
    %c0_i32_1 = arith.constant 0 : i32
    return %c0_i32, %c0_i32_0 : i32, i32
  }
  func.func @transform_20(%arg0: i32) -> (i32, i32) {
    %c0_i32 = arith.constant 0 : i32
    %c0_i32_0 = arith.constant 0 : i32
    %c0_i32_1 = arith.constant 0 : i32
    return %c0_i32, %c0_i32_0 : i32, i32
  }
  func.func @transform_21(%arg0: i32) -> (i32, i32) {
    %c0_i32 = arith.constant 0 : i32
    %c0_i32_0 = arith.constant 0 : i32
    %c0_i32_1 = arith.constant 0 : i32
    return %c0_i32, %c0_i32_0 : i32, i32
  }
  func.func @transform_22(%arg0: i32) -> (i32, i32) {
    %c0_i32 = arith.constant 0 : i32
    %c0_i32_0 = arith.constant 0 : i32
    %c0_i32_1 = arith.constant 0 : i32
    return %c0_i32, %c0_i32_0 : i32, i32
  }
  func.func @transform_23(%arg0: i32) -> (i32, i32) {
    %c0_i32 = arith.constant 0 : i32
    %c0_i32_0 = arith.constant 0 : i32
    %c0_i32_1 = arith.constant 0 : i32
    return %c0_i32, %c0_i32_0 : i32, i32
  }
  func.func @transform_24(%arg0: i32) -> (i32, i32) {
    %c0_i32 = arith.constant 0 : i32
    %c0_i32_0 = arith.constant 0 : i32
    %c0_i32_1 = arith.constant 0 : i32
    return %c0_i32, %c0_i32_0 : i32, i32
  }
  func.func @transform_25(%arg0: i32) -> (i32, i32) {
    %c0_i32 = arith.constant 0 : i32
    %c0_i32_0 = arith.constant 0 : i32
    %c0_i32_1 = arith.constant 0 : i32
    return %c0_i32, %c0_i32_0 : i32, i32
  }
  func.func @transform_26(%arg0: i32) -> (i32, i32) {
    %c0_i32 = arith.constant 0 : i32
    %c0_i32_0 = arith.constant 0 : i32
    %c0_i32_1 = arith.constant 0 : i32
    return %c0_i32, %c0_i32_0 : i32, i32
  }
  func.func @transform_27(%arg0: i32) -> (i32, i32) {
    %c0_i32 = arith.constant 0 : i32
    %c0_i32_0 = arith.constant 0 : i32
    %c0_i32_1 = arith.constant 0 : i32
    return %c0_i32, %c0_i32_0 : i32, i32
  }
  func.func @transform_28(%arg0: i32) -> (i32, i32) {
    %c0_i32 = arith.constant 0 : i32
    %c0_i32_0 = arith.constant 0 : i32
    %c0_i32_1 = arith.constant 0 : i32
    return %c0_i32, %c0_i32_0 : i32, i32
  }
  func.func @transform_29(%arg0: i32) -> (i32, i32) {
    %c0_i32 = arith.constant 0 : i32
    %c0_i32_0 = arith.constant 0 : i32
    %c0_i32_1 = arith.constant 0 : i32
    return %c0_i32, %c0_i32_0 : i32, i32
  }
  func.func @transform_30(%arg0: i32) -> (i32, i32) {
    %c0_i32 = arith.constant 0 : i32
    %c0_i32_0 = arith.constant 0 : i32
    %c0_i32_1 = arith.constant 0 : i32
    return %c0_i32, %c0_i32_0 : i32, i32
  }
  func.func @transform_31(%arg0: i32) -> (i32, i32) {
    %c0_i32 = arith.constant 0 : i32
    %c0_i32_0 = arith.constant 0 : i32
    %c0_i32_1 = arith.constant 0 : i32
    return %c0_i32, %c0_i32_0 : i32, i32
  }
  func.func @transform_32(%arg0: i32) -> (i32, i32) {
    %c0_i32 = arith.constant 0 : i32
    %c0_i32_0 = arith.constant 0 : i32
    %c0_i32_1 = arith.constant 0 : i32
    return %c0_i32, %c0_i32_0 : i32, i32
  }
  func.func @transform_33(%arg0: i32) -> (i32, i32) {
    %c0_i32 = arith.constant 0 : i32
    %c0_i32_0 = arith.constant 0 : i32
    %c0_i32_1 = arith.constant 0 : i32
    return %c0_i32, %c0_i32_0 : i32, i32
  }
  func.func @transform_34(%arg0: i32) -> (i32, i32) {
    %c0_i32 = arith.constant 0 : i32
    %c0_i32_0 = arith.constant 0 : i32
    %c0_i32_1 = arith.constant 0 : i32
    return %c0_i32, %c0_i32_0 : i32, i32
  }
  func.func @transform_35(%arg0: i32) -> (i32, i32) {
    %c0_i32 = arith.constant 0 : i32
    %c0_i32_0 = arith.constant 0 : i32
    %c0_i32_1 = arith.constant 0 : i32
    return %c0_i32, %c0_i32_0 : i32, i32
  }
  func.func @transform_36(%arg0: i32) -> (i32, i32) {
    %c0_i32 = arith.constant 0 : i32
    %c0_i32_0 = arith.constant 0 : i32
    %c0_i32_1 = arith.constant 0 : i32
    return %c0_i32, %c0_i32_0 : i32, i32
  }
  func.func @transform_37(%arg0: i32) -> (i32, i32) {
    %c0_i32 = arith.constant 0 : i32
    %c0_i32_0 = arith.constant 0 : i32
    %c0_i32_1 = arith.constant 0 : i32
    return %c0_i32, %c0_i32_0 : i32, i32
  }
  func.func @transform_38(%arg0: i32) -> (i32, i32) {
    %c0_i32 = arith.constant 0 : i32
    %c0_i32_0 = arith.constant 0 : i32
    %c0_i32_1 = arith.constant 0 : i32
    return %c0_i32, %c0_i32_0 : i32, i32
  }
  func.func @transform_39(%arg0: i32) -> (i32, i32) {
    %c0_i32 = arith.constant 0 : i32
    %c0_i32_0 = arith.constant 0 : i32
    %c0_i32_1 = arith.constant 0 : i32
    return %c0_i32, %c0_i32_0 : i32, i32
  }
  func.func @transform_40(%arg0: i32) -> (i32, i32) {
    %c0_i32 = arith.constant 0 : i32
    %c0_i32_0 = arith.constant 0 : i32
    %c0_i32_1 = arith.constant 0 : i32
    return %c0_i32, %c0_i32_0 : i32, i32
  }
  func.func @transform_41(%arg0: i32) -> (i32, i32) {
    %c0_i32 = arith.constant 0 : i32
    %c0_i32_0 = arith.constant 0 : i32
    %c0_i32_1 = arith.constant 0 : i32
    return %c0_i32, %c0_i32_0 : i32, i32
  }
  func.func @transform_42(%arg0: i32) -> (i32, i32) {
    %c0_i32 = arith.constant 0 : i32
    %c0_i32_0 = arith.constant 0 : i32
    %c0_i32_1 = arith.constant 0 : i32
    return %c0_i32, %c0_i32_0 : i32, i32
  }
  func.func @transform_43(%arg0: i32) -> (i32, i32) {
    %c0_i32 = arith.constant 0 : i32
    %c0_i32_0 = arith.constant 0 : i32
    %c0_i32_1 = arith.constant 0 : i32
    return %c0_i32, %c0_i32_0 : i32, i32
  }
  func.func @transform_44(%arg0: i32) -> (i32, i32) {
    %c0_i32 = arith.constant 0 : i32
    %c0_i32_0 = arith.constant 0 : i32
    %c0_i32_1 = arith.constant 0 : i32
    return %c0_i32, %c0_i32_0 : i32, i32
  }
  func.func @transform_45(%arg0: i32) -> (i32, i32) {
    %c0_i32 = arith.constant 0 : i32
    %c0_i32_0 = arith.constant 0 : i32
    return %arg0, %c0_i32 : i32, i32
  }
}

</mosaic_0001>

<bundles_post_ra>
// kernel: tpu_custom_call.1
= control target key start
LH: loop header
LB: loop body
LE: loop exit
PB: predicated region body
PF: predicated region fallthrough
CT: control target
= control target key end

     0   :  { %s9143_s6 = smov 1   ;;  %s9144_s10 = smov 2   ;;  %s12400_s0 = inlined_call_operand.smem [shape: u32[46], index: -1, kind: input, shape index: {}] }
   0x1   :  { %s9200_s5 = sld [smem:[%s12400_s0]]   ;;  %s9145_s14 = smov 3  }
   0x2   :  { %s9205_s9 = sld [smem:[%s12400_s0 + %s9143_s6]]   ;;  %s9146_s18 = smov 4  }
   0x3   :  { %s9210_s13 = sld [smem:[%s12400_s0 + %s9144_s10]]   ;;  %s9147_s22 = smov 5  }
   0x4   :  { %s9215_s17 = sld [smem:[%s12400_s0 + %s9145_s14]]   ;;  %s9148_s26 = smov 6  }
   0x5   :  { %s9220_s21 = sld [smem:[%s12400_s0 + %s9146_s18]]   ;;  %s9149_s30 = smov 7  }
   0x6   :  { %s9225_s25 = sld [smem:[%s12400_s0 + %s9147_s22]]   ;;  %s9150_s4 = smov 8  }
   0x7   :  { %s9230_s29 = sld [smem:[%s12400_s0 + %s9148_s26]]   ;;  %s9151_s10 = smov 9  }
   0x8   :  { %s9235_s3 = sld [smem:[%s12400_s0 + %s9149_s30]]   ;;  %s9152_s15 = smov 10  }
   0x9   :  { %s9240_s8 = sld [smem:[%s12400_s0 + %s9150_s4]]   ;;  %s9153_s20 = smov 11  }
   0xa   :  { %s9245_s14 = sld [smem:[%s12400_s0 + %s9151_s10]]   ;;  %s9154_s26 = smov 12  }
   0xb   :  { %s9250_s19 = sld [smem:[%s12400_s0 + %s9152_s15]]   ;;  %s9155_s1 = smov 13  }
   0xc   :  { %s9255_s24 = sld [smem:[%s12400_s0 + %s9153_s20]]   ;;  %s9156_s7 = smov 14  }
   0xd   :  { %s9260_s30 = sld [smem:[%s12400_s0 + %s9154_s26]]   ;;  %s9157_s15 = smov 15  }
   0xe   :  { %s9265_s6 = sld [smem:[%s12400_s0 + %s9155_s1]]   ;;  %s9158_s22 = smov 16  }
   0xf   :  { %s9270_s12 = sld [smem:[%s12400_s0 + %s9156_s7]]   ;;  %s9159_s28 = smov 17  }
  0x10   :  { %s9275_s20 = sld [smem:[%s12400_s0 + %s9157_s15]]   ;;  %s9160_s7 = smov 18  }
  0x11   :  { %12597 = sst [smem:[#allocation8_spill]] %s9250_s19  ;;  %s9161_s15 = smov 19  }
  0x12   :  { %s9280_s27 = sld [smem:[%s12400_s0 + %s9158_s22]]   ;;  %s9162_s22 = smov 20  }
  0x13   :  { %s9285_s4 = sld [smem:[%s12400_s0 + %s9159_s28]]   ;;  %s9163_s28 = smov 21  }
  0x15   :  { %12598 = sst [smem:[#allocation9_spill]] %s9270_s12 }
  0x16   :  { %12599 = sst [smem:[#allocation10_spill]] %s9275_s20 }
  0x17   :  { %s9290_s12 = sld [smem:[%s12400_s0 + %s9160_s7]]   ;;  %s9164_s7 = smov 22  }
  0x18   :  { %12600 = sst [smem:[#allocation11_spill]] %s9280_s27 }
  0x19   :  { %12601 = sst [smem:[#allocation12_spill]] %s9285_s4 }
  0x1a   :  { %s9295_s20 = sld [smem:[%s12400_s0 + %s9161_s15]]   ;;  %s9165_s15 = smov 23  }
  0x1b   :  { %s9300_s27 = sld [smem:[%s12400_s0 + %s9162_s22]]   ;;  %s9166_s22 = smov 24  }
  0x1c   :  { %s9305_s4 = sld [smem:[%s12400_s0 + %s9163_s28]]   ;;  %s9167_s28 = smov 25  }
  0x1d   :  { %12602 = sst [smem:[#allocation13_spill]] %s9290_s12 }
  0x1e   :  { %s9310_s12 = sld [smem:[%s12400_s0 + %s9164_s7]]   ;;  %s9168_s7 = smov 26  }
  0x20   :  { %12603 = sst [smem:[#allocation14_spill]] %s9295_s20 }
  0x21   :  { %12604 = sst [smem:[#allocation15_spill]] %s9300_s27 }
  0x22   :  { %12605 = sst [smem:[#allocation16_spill]] %s9305_s4 }
  0x23   :  { %s9315_s20 = sld [smem:[%s12400_s0 + %s9165_s15]]   ;;  %s9169_s15 = smov 27  }
  0x24   :  { %12606 = sst [smem:[#allocation17_spill]] %s9310_s12 }
  0x25   :  { %s9320_s27 = sld [smem:[%s12400_s0 + %s9166_s22]]   ;;  %s9170_s22 = smov 28  }
  0x26   :  { %s9325_s4 = sld [smem:[%s12400_s0 + %s9167_s28]]   ;;  %s9171_s28 = smov 29  }
  0x27   :  { %s9330_s12 = sld [smem:[%s12400_s0 + %s9168_s7]]   ;;  %s9172_s7 = smov 30  }
  0x29   :  { %12607 = sst [smem:[#allocation18_spill]] %s9315_s20 }
  0x2a   :  { %s9335_s20 = sld [smem:[%s12400_s0 + %s9169_s15]]   ;;  %s9173_s15 = smov 31  }
  0x2b   :  { %12608 = sst [smem:[#allocation19_spill]] %s9320_s27 }
  0x2c   :  { %12609 = sst [smem:[#allocation20_spill]] %s9325_s4 }
  0x2d   :  { %12610 = sst [smem:[#allocation21_spill]] %s9330_s12 }
  0x2e   :  { %s9340_s27 = sld [smem:[%s12400_s0 + %s9170_s22]]   ;;  %s9174_s22 = smov 32  }
  0x2f   :  { %s9345_s4 = sld [smem:[%s12400_s0 + %s9171_s28]]   ;;  %s9175_s28 = smov 33  }
  0x30   :  { %12611 = sst [smem:[#allocation22_spill]] %s9335_s20 }
  0x31   :  { %s9350_s12 = sld [smem:[%s12400_s0 + %s9172_s7]]   ;;  %s9176_s7 = smov 34  }
  0x32   :  { %s9355_s20 = sld [smem:[%s12400_s0 + %s9173_s15]]   ;;  %s9177_s15 = smov 35  }
  0x33   :  { %s9375_s19 = sld [smem:[%s12400_s0 + %s9177_s15]]   ;;  %s9181_s15 = smov 39  }
  0x34   :  { %12612 = sst [smem:[#allocation23_spill]] %s9340_s27 }
  0x35   :  { %12613 = sst [smem:[#allocation24_spill]] %s9345_s4 }
  0x36   :  { %s9360_s27 = sld [smem:[%s12400_s0 + %s9174_s22]]   ;;  %s9178_s22 = smov 36  }
  0x37   :  { %12614 = sst [smem:[#allocation25_spill]] %s9350_s12 }
  0x38   :  { %s9365_s4 = sld [smem:[%s12400_s0 + %s9175_s28]]   ;;  %s9179_s28 = smov 37  }
  0x39   :  { %s9370_s12 = sld [smem:[%s12400_s0 + %s9176_s7]]   ;;  %s9180_s7 = smov 38  }
  0x3a   :  { %12618 = sst [smem:[#allocation29_spill]] %s9375_s19 }
  0x3b   :  { %s9395_s19 = sld [smem:[%s12400_s0 + %s9181_s15]]   ;;  %s9185_s15 = smov 43  }
  0x3c   :  { %12615 = sst [smem:[#allocation26_spill]] %s9360_s27 }
  0x3d   :  { %s9380_s27 = sld [smem:[%s12400_s0 + %s9178_s22]]   ;;  %s9182_s22 = smov 40  }
  0x3e   :  { %12616 = sst [smem:[#allocation27_spill]] %s9365_s4 }
  0x3f   :  { %12617 = sst [smem:[#allocation28_spill]] %s9370_s12 }
  0x40   :  { %s9385_s4 = sld [smem:[%s12400_s0 + %s9179_s28]]   ;;  %s9183_s28 = smov 41  }
  0x41   :  { %s9390_s12 = sld [smem:[%s12400_s0 + %s9180_s7]]   ;;  %s9184_s7 = smov 42  }
  0x42   :  { %12622 = sst [smem:[#allocation33_spill]] %s9395_s19 }
  0x43   :  { %12619 = sst [smem:[#allocation30_spill]] %s9380_s27 }
  0x44   :  { %s9400_s27 = sld [smem:[%s12400_s0 + %s9182_s22]]   ;;  %s9186_s22 = smov 44  }
  0x45   :  { %s9415_s19 = sld [smem:[%s12400_s0 + %s9185_s15]]  }
  0x46   :  { %12620 = sst [smem:[#allocation31_spill]] %s9385_s4 }
  0x47   :  { %12621 = sst [smem:[#allocation32_spill]] %s9390_s12 }
  0x48   :  { %s9405_s4 = sld [smem:[%s12400_s0 + %s9183_s28]]   ;;  %s9187_s28 = smov 45  }
  0x49   :  { %s9410_s12 = sld [smem:[%s12400_s0 + %s9184_s7]]  }
  0x4a   :  { %12623 = sst [smem:[#allocation34_spill]] %s9400_s27 }
  0x4b   :  { %s9420_s27 = sld [smem:[%s12400_s0 + %s9186_s22]]  }
  0x4e   :  { %12624 = sst [smem:[#allocation35_spill]] %s9405_s4 }
  0x4f   :  { %s9425_s4 = sld [smem:[%s12400_s0 + %s9187_s28]]  }
  0x50   :  { %96 = vsyncpa [#allocation3], 0 }
  0x51   :  { %97 = vsyncpa [#allocation4], 0  ;;  %s164_s7 = sshll.u32 %s9355_s20, 4  ;;  %s9188_s10 = smov [#allocation2]   ;;  %s165_s7 = int_to_ptr.hbm [resolvable:$true] %s164_s7 }
  0x52   :  { %s166_s11 = sshll.u32 %s9188_s10, 4  ;;  %s9091_s15 = sshra.s32 %s165_s7, 4  ;;  %s167_s11 = int_to_ptr.vmem [resolvable:$true] %s166_s11  ;;  %s9092_s15 = int_to_ptr.hbm [resolvable:$true] %s9091_s15 }
  0x53   :  { %s9093_s16 = scalar_lea.hbm %s9092_s15, 2048  ;;  %s9095_s18 = scalar_lea.hbm %s9355_s20, 2048 }
  0x54   :  { %p9094_p0 = scmp.ne.s32.totalorder %s9092_s15, %s9093_s16  ;;  %p9096_p1 = scmp.lt.s32.totalorder %s9092_s15, %s9355_s20 }
  0x55   :  { %p9097_p2 = scmp.lt.s32.totalorder %s9095_s18, %s9093_s16 }
  0x57   :  { %p9098_p3 = por %p9097_p2, %p9096_p1 }
  0x59   :  { %p9099_p4 = pnand %p9098_p3, %p9094_p0 }
  0x5b   :  { %9102 = shalt.err (!%p9099_p4)
}
  0x5c   :  { %s9189_s0 = smov 256   ;;  %s9190_s22 = smov 16  }
  0x5d   :  { %172 = dma.hbm_to_vmem [thread:$0]  %s165_s7, 32768, %s167_s11, [#allocation3], %s9189_s0, %s9189_s0, %s9190_s22  }
  0x5e   :  { %9139 = dma.done.wait [#allocation3], 32768  }
  0x5f   :  { %9140 = vsyncadd [#allocation3], 4294934528  ;;  %vm222_vm0 = vcmask 1041408   ;;  %v208_v0 = vld [vmem:[%s9205_s9] sm:$0x3]  ;;  %v205_v2 = vld [vmem:[%s9200_s5 + $0x8] sm:$0xff] }
  0x60   :  { %v204_v1 = vld [vmem:[%s9200_s5] sm:$0xff]  ;;  %v224_v3 = vsel %vm222_vm0, %v208_v0, 0  ;;  %v206_v5 = vld [vmem:[%s9200_s5 + $0x10] sm:$0xff]  ;;  %v207_v6 = vld [vmem:[%s9200_s5 + $0x18] sm:$0xff]  ;;  %vm215_vm1 = vcmask 31744   ;;  %vm245_vm2 = vcmask 523264  }
  0x61   :  { %v209_v4 = vpack.c.bf16 %v205_v2, %v204_v1  ;;  %233 = vmatpush.bf16.msra.mxu0 %v224_v3  ;;  %8988 = vmatpush.bf16.msra.mxu3 %v224_v3  ;;  %v210_v7 = vpack.c.bf16 %v207_v6, %v206_v5  ;;  %v293_v8 = vld [vmem:[%s9225_s25 + $0x38] sm:$0xff]  ;;  %v292_v9 = vld [vmem:[%s9225_s25 + $0x30] sm:$0xff]  ;;  %v291_v10 = vld [vmem:[%s9225_s25 + $0x28] sm:$0xff]  ;;  %vm299_vm3 = vcmask 1041409   ;;  %vm353_vm4 = vcmask 64512   ;;  %s12625_s5 = sld [smem:[#allocation8_spill]] }
  0x62   :  { %311 = vmatpush.msra.mxu2 %v293_v8  ;;  %v290_v11 = vld [vmem:[%s9225_s25 + $0x20] sm:$0xff]  ;;  %v289_v12 = vld [vmem:[%s9225_s25 + $0x18] sm:$0xff]  ;;  %v288_v13 = vld [vmem:[%s9225_s25 + $0x10] sm:$0xff]  ;;  %s12626_s9 = sld [smem:[#allocation12_spill]] }
  0x63   :  { %v287_v14 = vld [vmem:[%s9225_s25 + $0x8] sm:$0xff]  ;;  %v286_v15 = vld [vmem:[%s9225_s25] sm:$0xff]  ;;  %s12630_s25 = sld [smem:[#allocation10_spill]] }
  0x64   :  { %6878 = vmatmul.msk.bf16.vlgmr.msra.gmra.mxu0 %vm215_vm1, %v209_v4  ;;  %6879 = vmatmul.msk.bf16.vlgmr.msra.gmra.mxu3 %vm215_vm1, %v210_v7  ;;  %v9038_v17 = vld [vmem:[%s9210_s13] ss:$0 sm:$0xff]  ;;  %s12627_s13 = sld [smem:[#allocation9_spill]] }
  0x65   :  { %312 = vmatpush.msra.mxu2 %v292_v9  ;;  %v294_v3 = vld [vmem:[%s9230_s29] sm:$0xff]  ;;  %s12631_s29 = sld [smem:[#allocation11_spill]] }
  0x66   :  { %372 = vmatpush.msrb.mxu3 %v294_v3  ;;  %s12640_s20 = sld [smem:[#allocation24_spill]] }
  0x67   :  { %313 = vmatpush.msra.mxu2 %v291_v10  ;;  %s12725_s23 = sld [smem:[#allocation21_spill]] }
  0x68   :  { %395 = vmatpush.msra.mxu3 %v294_v3  ;;  %s12892_s26 = sld [smem:[#allocation25_spill]] }
  0x69   :  { %314 = vmatpush.msra.mxu2 %v290_v11  ;;  %s12899_s28 = sld [smem:[#allocation22_spill]] }
  0x6a   :  { %s12900_s1 = sld [smem:[#allocation23_spill]] }
  0x6b   :  { %315 = vmatpush.msra.mxu2 %v289_v12  ;;  %s13072_s2 = sld [smem:[#allocation29_spill]] }
  0x6c   :  { %s13073_s7 = sld [smem:[#allocation26_spill]] }
  0x6d   :  { %316 = vmatpush.msra.mxu2 %v288_v13  ;;  %s13074_s10 = sld [smem:[#allocation30_spill]] }
  0x6e   :  { %s13075_s11 = sld [smem:[#allocation31_spill]] }
  0x6f   :  { %317 = vmatpush.msra.mxu2 %v287_v14  ;;  %s13076_s15 = sld [smem:[#allocation27_spill]] }
  0x70   :  { %s13077_s16 = sld [smem:[#allocation28_spill]] }
  0x71   :  { %318 = vmatpush.msra.mxu2 %v286_v15  ;;  %s13086_s18 = sld [smem:[#allocation35_spill]] }
  0x72   :  { %s13087_s0 = sld [smem:[#allocation32_spill]] }
  0x73   :  { %337 = vmatpush.msrb.mxu2 %v293_v8  ;;  %s13089_s22 = sld [smem:[#allocation34_spill]] }
  0x75   :  { %338 = vmatpush.msrb.mxu2 %v292_v9 }
  0x77   :  { %339 = vmatpush.msrb.mxu2 %v291_v10 }
  0x79   :  { %340 = vmatpush.msrb.mxu2 %v290_v11  ;;  %v8579_v11 = vld [vmem:[%s9235_s3 + $0x18] sm:$0xff] }
  0x7b   :  { %341 = vmatpush.msrb.mxu2 %v289_v12  ;;  %v8578_v12 = vld [vmem:[%s9235_s3 + $0x10] sm:$0xff] }
  0x7d   :  { %342 = vmatpush.msrb.mxu2 %v288_v13 }
  0x7f   :  { %343 = vmatpush.msrb.mxu2 %v287_v14  ;;  %v8577_v14 = vld [vmem:[%s9235_s3 + $0x8] sm:$0xff] }
  0x81   :  { %344 = vmatpush.msrb.mxu2 %v286_v15  ;;  %v8576_v15 = vld [vmem:[%s9235_s3] sm:$0xff]  ;;  %s12632_s3 = sld [smem:[#allocation18_spill]] }
  0xe1   :  { %v235_v16 = vpop.f32.mrf.mxu0 }
  0xe2   :  { %v9445_v18 = vadd.f32 %v9038_v17, %v235_v16 }
  0xe4   :  { %v264_v21 = vmul.f32 %v9445_v18, %v9445_v18  ;;  %v246_v23 = vsel %vm245_vm2, %v9445_v18, 0.0 }
  0xe6   :  { %v268_v28 = vsel %vm245_vm2, %v264_v21, 0.0 }
  0xe7   :  { %v240_v19 = vpop.f32.mrf.mxu3 }
  0xe8   :  { %v9453_v24 = vadd.f32 %v9038_v17, %v240_v19 }
  0xe9   :  { %v237_v20 = vpop.f32.mrf.mxu0 }
  0xea   :  { %v9449_v22 = vadd.f32 %v9038_v17, %v237_v20  ;;  %v266_v33 = vmul.f32 %v9453_v24, %v9453_v24  ;;  %v255_v36 = vsel %vm245_vm2, %v9453_v24, 0.0 }
  0xec   :  { %v247_v25 = vsel %vm245_vm2, %v9449_v22, 0.0  ;;  %v265_v26 = vmul.f32 %v9449_v22, %v9449_v22  ;;  %v277_v42 = vsel %vm245_vm2, %v266_v33, 0.0 }
  0xed   :  { %v248_v27 = vadd.f32 %v247_v25, %v246_v23 }
  0xee   :  { %v269_v29 = vsel %vm245_vm2, %v265_v26, 0.0  ;;  %v9039_v26 = vld [vmem:[%s9215_s17] ss:$0 sm:$0xff]  ;;  %s12628_s17 = sld [smem:[#allocation13_spill]] }
  0xef   :  { %v249_v30 = vrot.slane %v248_v27, 4  ;;  %v270_v31 = vadd.f32 %v269_v29, %v268_v28  ;;  %v242_v32 = vpop.f32.mrf.mxu3 }
  0xf0   :  { %v9463_v34 = vadd.f32 %v9038_v17, %v242_v32 }
  0xf1   :  { %v250_v35 = vadd.f32 %v249_v30, %v248_v27  ;;  %v271_v40 = vrot.slane %v270_v31, 4  ;;  %v9040_v30 = vld [vmem:[%s9220_s21] ss:$0 sm:$0xff]  ;;  %s12629_s21 = sld [smem:[#allocation14_spill]] }
  0xf2   :  { %v256_v37 = vsel %vm245_vm2, %v9463_v34, 0.0  ;;  %v267_v38 = vmul.f32 %v9463_v34, %v9463_v34 }
  0xf3   :  { %v251_v39 = vrot.slane %v250_v35, 2  ;;  %v257_v41 = vadd.f32 %v256_v37, %v255_v36  ;;  %v272_v46 = vadd.f32 %v271_v40, %v270_v31 }
  0xf4   :  { %v278_v43 = vsel %vm245_vm2, %v267_v38, 0.0 }
  0xf5   :  { %v258_v44 = vrot.slane %v257_v41, 4  ;;  %v279_v45 = vadd.f32 %v278_v43, %v277_v42  ;;  %v252_v49 = vadd.f32 %v251_v39, %v250_v35  ;;  %v273_v54 = vrot.slane %v272_v46, 2 }
  0xf7   :  { %v259_v47 = vadd.f32 %v258_v44, %v257_v41  ;;  %v280_v48 = vrot.slane %v279_v45, 4  ;;  %v253_v52 = vrot.slane %v252_v49, 1  ;;  %v274_v60 = vadd.f32 %v273_v54, %v272_v46  ;;  %v550_v54 = vld [vmem:[%s9255_s24 + $0x20] sm:$0xff] }
  0xf9   :  { %v260_v50 = vrot.slane %v259_v47, 2  ;;  %v281_v51 = vadd.f32 %v280_v48, %v279_v45  ;;  %v254_v58 = vadd.f32 %v253_v52, %v252_v49  ;;  %v275_v63 = vrot.slane %v274_v60, 1  ;;  %v553_v52 = vld [vmem:[%s9255_s24 + $0x38] sm:$0xff] }
  0xfa   :  { %570 = vmatpush.msra.mxu1 %v553_v52 }
  0xfb   :  { %v261_v53 = vadd.f32 %v260_v50, %v259_v47  ;;  %v282_v55 = vrot.slane %v281_v51, 2  ;;  %v276_v1 = vadd.f32 %v275_v63, %v274_v60 }
  0xfd   :  { %v262_v56 = vrot.slane %v261_v53, 1  ;;  %v283_v57 = vadd.f32 %v282_v55, %v281_v51  ;;  %v549_v55 = vld [vmem:[%s9255_s24 + $0x18] sm:$0xff] }
  0xff   :  { %v263_v59 = vadd.f32 %v262_v56, %v261_v53  ;;  %v284_v62 = vrot.slane %v283_v57, 1  ;;  %v552_v53 = vld [vmem:[%s9255_s24 + $0x30] sm:$0xff]  ;;  %v9041_v56 = vld [vmem:[%s9240_s8] ss:$0 sm:$0xff]  ;;  %s12633_s8 = sld [smem:[#allocation15_spill]] }
 0x100   :  { %571 = vmatpush.msra.mxu1 %v552_v53 }
 0x101   :  { %v300_v61 = vsel %vm299_vm3, %v263_v59, %v254_v58  ;;  %v285_v0 = vadd.f32 %v284_v62, %v283_v57  ;;  %v548_v57 = vld [vmem:[%s9255_s24 + $0x10] sm:$0xff]  ;;  %v547_v58 = vld [vmem:[%s9255_s24 + $0x8] sm:$0xff]  ;;  %v546_v59 = vld [vmem:[%s9255_s24] sm:$0xff] }
 0x102   :  { %6880 = vmatmul.msk.f32.vlgmr.msra.gmra.mxu2 %vm245_vm2, %v300_v61 }
 0x103   :  { %v326_v2 = vsel %vm299_vm3, %v285_v0, %v276_v1  ;;  %596 = vmatpush.msra.mxu2 %v553_v52 }
 0x105   :  { %597 = vmatpush.msra.mxu2 %v552_v53 }
 0x10a   :  { %6881 = vmatmul.msk.f32.vlgmr.msrb.gmra.mxu2 %vm245_vm2, %v326_v2 }
 0x185   :  { %v320_v4 = vpop.f32.mrf.mxu2 }
 0x186   :  { %v323_v5 = vmul.f32 0.0078125, %v320_v4 }
 0x188   :  { %6882 = vmatmul.msk.f32.vlgmr.msrb.gmra.mxu3 %vm353_vm4, %v323_v5  ;;  %v350_v7 = vmul.f32 %v323_v5, %v323_v5 }
 0x189   :  { %491 = vmatpush.bf16.msrb.mxu3 %v8579_v11 }
 0x18d   :  { %v346_v6 = vpop.f32.mrf.mxu2  ;;  %492 = vmatpush.bf16.msrb.mxu3 %v8578_v12 }
 0x18e   :  { %v349_v8 = vmul.f32 0.0078125, %v346_v6 }
 0x190   :  { %v351_v9 = vsub.f32 %v349_v8, %v350_v7 }
 0x191   :  { %493 = vmatpush.bf16.msrb.mxu3 %v8577_v14 }
 0x192   :  { %v352_v10 = vmax.f32 %v351_v9, 0.0 }
 0x194   :  { %6883 = vmatmul.msk.f32.vlgmr.msra.gmra.mxu3 %vm353_vm4, %v352_v10 }
 0x195   :  { %494 = vmatpush.bf16.msrb.mxu3 %v8576_v15 }
 0x20b   :  { %v374_v13 = vpop.f32.mrf.mxu3 }
 0x217   :  { %v397_v16 = vpop.f32.mrf.mxu3 }
 0x218   :  { %v398_v17 = vadd.f32 1e-05, %v397_v16 }
 0x21a   :  { %9051 = vrsqrt.f32 %v398_v17  ;;  %vm406_vm6 = vweird.f32 %v398_v17 }
 0x220   :  { %v9052_v19 = vpop.eup %9051 }
 0x221   :  { %v401_v20 = vmul.f32 %v9052_v19, %v398_v17  ;;  %vm407_vm5 = vweird.f32 %v9052_v19 }
 0x222   :  { %vm408_vm7 = vmor %vm406_vm6, %vm407_vm5 }
 0x223   :  { %v402_v21 = vmul.f32 %v9052_v19, %v401_v20 }
 0x225   :  { %v403_v23 = vmul.f32 0.5, %v402_v21 }
 0x227   :  { %v404_v25 = vsub.f32 1.5, %v403_v23 }
 0x229   :  { %v405_v27 = vmul.f32 %v9052_v19, %v404_v25 }
 0x22b   :  { %v409_v28 = vsel %vm408_vm7, %v9052_v19, %v405_v27 }
 0x22c   :  { %v413_v29 = vmul.f32 %v9039_v26, %v409_v28 }
 0x22e   :  { %v414_v31 = vmul.f32 %v413_v29, %v374_v13  ;;  %v421_v32 = vperm.slane %v413_v29, 0  ;;  %v420_v42 = vrot.slane %v413_v29, 1 }
 0x230   :  { %v418_v33 = vsub.f32 %v9040_v30, %v414_v31  ;;  %v425_v35 = vmul.f32 %v421_v32, %v9445_v18  ;;  %v426_v36 = vmul.f32 %v421_v32, %v9449_v22  ;;  %v422_v45 = vperm.slane %v420_v42, 0 }
 0x232   :  { %v431_v37 = vperm.slane %v418_v33, 0  ;;  %v430_v44 = vrot.slane %v418_v33, 1  ;;  %v427_v47 = vmul.f32 %v422_v45, %v9453_v24  ;;  %v428_v18 = vmul.f32 %v422_v45, %v9463_v34  ;;  %v551_v24 = vld [vmem:[%s9255_s24 + $0x28] sm:$0xff]  ;;  %s12635_s24 = sld [smem:[#allocation20_spill]] }
 0x233   :  { %572 = vmatpush.msra.mxu1 %v551_v24  ;;  %598 = vmatpush.msra.mxu2 %v551_v24 }
 0x234   :  { %v435_v38 = vadd.f32 %v431_v37, %v425_v35  ;;  %v436_v39 = vadd.f32 %v431_v37, %v426_v36  ;;  %v432_v46 = vperm.slane %v430_v44, 0 }
 0x235   :  { %573 = vmatpush.msra.mxu1 %v550_v54  ;;  %599 = vmatpush.msra.mxu2 %v550_v54  ;;  %v8582_v54 = vld [vmem:[%s9265_s6 + $0x10] sm:$0xff] }
 0x236   :  { %v439_v40 = vmax.f32 %v435_v38, 0.0  ;;  %v440_v41 = vmax.f32 %v436_v39, 0.0  ;;  %v437_v22 = vadd.f32 %v432_v46, %v427_v47  ;;  %v438_v48 = vadd.f32 %v432_v46, %v428_v18 }
 0x237   :  { %574 = vmatpush.msra.mxu1 %v549_v55  ;;  %600 = vmatpush.msra.mxu2 %v549_v55  ;;  %v8581_v55 = vld [vmem:[%s9265_s6 + $0x8] sm:$0xff] }
 0x238   :  { %v451_v43 = vpack.c.bf16 %v440_v41, %v439_v40  ;;  %v441_v49 = vmax.f32 %v437_v22, 0.0  ;;  %v442_v50 = vmax.f32 %v438_v48, 0.0  ;;  %v554_v22 = vld [vmem:[%s9260_s30] sm:$0xff]  ;;  %s12636_s30 = sld [smem:[#allocation16_spill]] }
 0x239   :  { %575 = vmatpush.msra.mxu1 %v548_v57  ;;  %601 = vmatpush.msra.mxu2 %v548_v57 }
 0x23a   :  { %6900 = vmatmul.msk.bf16.vlgmr.msrb.gmra.mxu3 %vm245_vm2, %v451_v43  ;;  %v452_v51 = vpack.c.bf16 %v442_v50, %v441_v49  ;;  %630 = vmatpush.msrb.mxu0 %v554_v22 }
 0x23b   :  { %576 = vmatpush.msra.mxu1 %v547_v58  ;;  %602 = vmatpush.msra.mxu2 %v547_v58 }
 0x23d   :  { %577 = vmatpush.msra.mxu1 %v546_v59  ;;  %603 = vmatpush.msra.mxu2 %v546_v59 }
 0x23f   :  { %653 = vmatpush.msrb.mxu1 %v554_v22 }
 0x24a   :  { %6901 = vmatmul.msk.bf16.gmra.mxu3 %vm245_vm2, %v452_v51 }
 0x2bd   :  { %v496_v34 = vpop.f32.mrf.mxu3 }
 0x2be   :  { %v9501_v61 = vadd.f32 %v9041_v56, %v496_v34  ;;  %v8583_v34 = vld [vmem:[%s9265_s6 + $0x18] sm:$0xff] }
 0x2bf   :  { %749 = vmatpush.bf16.msrb.mxu2 %v8583_v34 }
 0x2c0   :  { %v524_v0 = vmul.f32 %v9501_v61, %v9501_v61  ;;  %v506_v2 = vsel %vm245_vm2, %v9501_v61, 0.0 }
 0x2c2   :  { %v528_v6 = vsel %vm245_vm2, %v524_v0, 0.0 }
 0x2c3   :  { %750 = vmatpush.bf16.msrb.mxu2 %v8582_v54 }
 0x2c5   :  { %v498_v60 = vpop.f32.mrf.mxu3 }
 0x2c6   :  { %v9503_v62 = vadd.f32 %v9041_v56, %v498_v60 }
 0x2c7   :  { %751 = vmatpush.bf16.msrb.mxu2 %v8581_v55 }
 0x2c8   :  { %v525_v63 = vmul.f32 %v9503_v62, %v9503_v62  ;;  %v507_v1 = vsel %vm245_vm2, %v9503_v62, 0.0 }
 0x2c9   :  { %v508_v4 = vadd.f32 %v507_v1, %v506_v2  ;;  %v9042_v2 = vld [vmem:[%s9245_s14] ss:$0 sm:$0xff]  ;;  %s12634_s14 = sld [smem:[#allocation19_spill]] }
 0x2ca   :  { %v529_v3 = vsel %vm245_vm2, %v525_v63, 0.0 }
 0x2cb   :  { %v530_v7 = vadd.f32 %v529_v3, %v528_v6  ;;  %v509_v8 = vrot.slane %v508_v4, 4  ;;  %v9043_v6 = vld [vmem:[%s12625_s5] ss:$0 sm:$0xff] }
 0x2cd   :  { %v501_v5 = vpop.f32.mrf.mxu3  ;;  %v531_v10 = vrot.slane %v530_v7, 4  ;;  %v510_v11 = vadd.f32 %v509_v8, %v508_v4 }
 0x2ce   :  { %v9515_v9 = vadd.f32 %v9041_v56, %v501_v5 }
 0x2cf   :  { %v532_v15 = vadd.f32 %v531_v10, %v530_v7  ;;  %v511_v20 = vrot.slane %v510_v11, 2 }
 0x2d0   :  { %v526_v13 = vmul.f32 %v9515_v9, %v9515_v9  ;;  %v515_v16 = vsel %vm245_vm2, %v9515_v9, 0.0 }
 0x2d1   :  { %v533_v26 = vrot.slane %v532_v15, 2  ;;  %v512_v31 = vadd.f32 %v511_v20, %v510_v11 }
 0x2d2   :  { %v537_v23 = vsel %vm245_vm2, %v526_v13, 0.0 }
 0x2d3   :  { %v534_v32 = vadd.f32 %v533_v26, %v532_v15  ;;  %v513_v37 = vrot.slane %v512_v31, 1 }
 0x2d5   :  { %v503_v12 = vpop.f32.mrf.mxu3  ;;  %v535_v41 = vrot.slane %v534_v32, 1  ;;  %v514_v42 = vadd.f32 %v513_v37, %v512_v31  ;;  %v807_v37 = vld [vmem:[%s12626_s9 + $0x18] sm:$0xff] }
 0x2d6   :  { %v9519_v14 = vadd.f32 %v9041_v56, %v503_v12  ;;  %v8580_v56 = vld [vmem:[%s9265_s6] sm:$0xff]  ;;  %s12637_s6 = sld [smem:[#allocation17_spill]] }
 0x2d7   :  { %v536_v46 = vadd.f32 %v535_v41, %v534_v32  ;;  %752 = vmatpush.bf16.msrb.mxu2 %v8580_v56  ;;  %v804_v41 = vld [vmem:[%s12626_s9] sm:$0xff] }
 0x2d8   :  { %v516_v17 = vsel %vm245_vm2, %v9519_v14, 0.0  ;;  %v527_v19 = vmul.f32 %v9519_v14, %v9519_v14 }
 0x2d9   :  { %v517_v21 = vadd.f32 %v516_v17, %v515_v16 }
 0x2da   :  { %v538_v25 = vsel %vm245_vm2, %v527_v19, 0.0 }
 0x2db   :  { %v518_v27 = vrot.slane %v517_v21, 4  ;;  %v539_v28 = vadd.f32 %v538_v25, %v537_v23 }
 0x2dd   :  { %v519_v29 = vadd.f32 %v518_v27, %v517_v21  ;;  %v540_v30 = vrot.slane %v539_v28, 4 }
 0x2df   :  { %v520_v33 = vrot.slane %v519_v29, 2  ;;  %v541_v35 = vadd.f32 %v540_v30, %v539_v28 }
 0x2e1   :  { %v542_v36 = vrot.slane %v541_v35, 2  ;;  %v521_v38 = vadd.f32 %v520_v33, %v519_v29  ;;  %v811_v33 = vld [vmem:[%s12626_s9 + $0x38] sm:$0xff] }
 0x2e2   :  { %828 = vmatpush.msra.mxu0 %v811_v33 }
 0x2e3   :  { %v543_v39 = vadd.f32 %v542_v36, %v541_v35  ;;  %v522_v40 = vrot.slane %v521_v38, 1  ;;  %v810_v35 = vld [vmem:[%s12626_s9 + $0x30] sm:$0xff]  ;;  %v808_v36 = vld [vmem:[%s12626_s9 + $0x20] sm:$0xff] }
 0x2e4   :  { %829 = vmatpush.msra.mxu0 %v810_v35 }
 0x2e5   :  { %v523_v43 = vadd.f32 %v522_v40, %v521_v38  ;;  %v544_v44 = vrot.slane %v543_v39, 1  ;;  %v9044_v38 = vld [vmem:[%s12627_s13] ss:$0 sm:$0xff]  ;;  %v805_v40 = vld [vmem:[%s12626_s9 + $0x8] sm:$0xff] }
 0x2e7   :  { %v559_v45 = vsel %vm299_vm3, %v523_v43, %v514_v42  ;;  %v545_v47 = vadd.f32 %v544_v44, %v543_v39  ;;  %v806_v39 = vld [vmem:[%s12626_s9 + $0x10] sm:$0xff] }
 0x2e8   :  { %6902 = vmatmul.msk.f32.vlgmr.msra.gmra.mxu1 %vm245_vm2, %v559_v45 }
 0x2e9   :  { %v585_v18 = vsel %vm299_vm3, %v545_v47, %v536_v46  ;;  %854 = vmatpush.msra.mxu1 %v811_v33 }
 0x2ea   :  { %6903 = vmatmul.msk.f32.vlgmr.msra.gmra.mxu2 %vm245_vm2, %v585_v18 }
 0x2eb   :  { %855 = vmatpush.msra.mxu1 %v810_v35 }
 0x365   :  { %v579_v48 = vpop.f32.mrf.mxu1 }
 0x366   :  { %v582_v49 = vmul.f32 0.0078125, %v579_v48 }
 0x368   :  { %6904 = vmatmul.msk.f32.vlgmr.msrb.gmra.mxu0 %vm353_vm4, %v582_v49  ;;  %v609_v51 = vmul.f32 %v582_v49, %v582_v49 }
 0x36d   :  { %v605_v50 = vpop.f32.mrf.mxu2 }
 0x36e   :  { %v608_v52 = vmul.f32 0.0078125, %v605_v50 }
 0x370   :  { %v610_v53 = vsub.f32 %v608_v52, %v609_v51 }
 0x372   :  { %v611_v24 = vmax.f32 %v610_v53, 0.0 }
 0x374   :  { %6905 = vmatmul.msk.f32.vlgmr.msrb.gmra.mxu1 %vm353_vm4, %v611_v24 }
 0x3e5   :  { %v632_v7 = vpop.f32.mrf.mxu0 }
 0x3f1   :  { %v655_v57 = vpop.f32.mrf.mxu1 }
 0x3f2   :  { %v656_v58 = vadd.f32 1e-05, %v655_v57 }
 0x3f4   :  { %9053 = vrsqrt.f32 %v656_v58  ;;  %vm664_vm9 = vweird.f32 %v656_v58 }
 0x3fa   :  { %v9054_v59 = vpop.eup %9053 }
 0x3fb   :  { %v659_v60 = vmul.f32 %v9054_v59, %v656_v58  ;;  %vm665_vm8 = vweird.f32 %v9054_v59 }
 0x3fc   :  { %vm666_vm10 = vmor %vm664_vm9, %vm665_vm8 }
 0x3fd   :  { %v660_v63 = vmul.f32 %v9054_v59, %v659_v60 }
 0x3ff   :  { %v661_v0 = vmul.f32 0.5, %v660_v63 }
 0x401   :  { %v662_v1 = vsub.f32 1.5, %v661_v0 }
 0x403   :  { %v663_v3 = vmul.f32 %v9054_v59, %v662_v1 }
 0x405   :  { %v667_v4 = vsel %vm666_vm10, %v9054_v59, %v663_v3 }
 0x406   :  { %v671_v5 = vmul.f32 %v9042_v2, %v667_v4 }
 0x408   :  { %v672_v8 = vmul.f32 %v671_v5, %v632_v7  ;;  %v679_v10 = vperm.slane %v671_v5, 0  ;;  %v678_v21 = vrot.slane %v671_v5, 1 }
 0x40a   :  { %v676_v11 = vsub.f32 %v9043_v6, %v672_v8  ;;  %v683_v12 = vmul.f32 %v679_v10, %v9501_v61  ;;  %v684_v13 = vmul.f32 %v679_v10, %v9503_v62  ;;  %v680_v26 = vperm.slane %v678_v21, 0 }
 0x40c   :  { %v689_v15 = vperm.slane %v676_v11, 0  ;;  %v688_v25 = vrot.slane %v676_v11, 1  ;;  %v685_v28 = vmul.f32 %v680_v26, %v9515_v9  ;;  %v686_v61 = vmul.f32 %v680_v26, %v9519_v14  ;;  %v809_v9 = vld [vmem:[%s12626_s9 + $0x28] sm:$0xff]  ;;  %s6823_s9 = sshll.u32 %s9425_s4, 4  ;;  %s6824_s9 = int_to_ptr.hbm [resolvable:$true] %s6823_s9 }
 0x40d   :  { %830 = vmatpush.msra.mxu0 %v809_v9  ;;  %856 = vmatpush.msra.mxu1 %v809_v9 }
 0x40e   :  { %v693_v16 = vadd.f32 %v689_v15, %v683_v12  ;;  %v694_v17 = vadd.f32 %v689_v15, %v684_v13  ;;  %v690_v27 = vperm.slane %v688_v25, 0 }
 0x40f   :  { %831 = vmatpush.msra.mxu0 %v808_v36  ;;  %857 = vmatpush.msra.mxu1 %v808_v36  ;;  %v8586_v36 = vld [vmem:[%s12629_s21 + $0x10] sm:$0xff] }
 0x410   :  { %v697_v19 = vmax.f32 %v693_v16, 0.0  ;;  %v698_v20 = vmax.f32 %v694_v17, 0.0  ;;  %v695_v62 = vadd.f32 %v690_v27, %v685_v28  ;;  %v696_v29 = vadd.f32 %v690_v27, %v686_v61 }
 0x411   :  { %832 = vmatpush.msra.mxu0 %v807_v37  ;;  %858 = vmatpush.msra.mxu1 %v807_v37  ;;  %v8585_v37 = vld [vmem:[%s12629_s21 + $0x8] sm:$0xff] }
 0x412   :  { %v709_v23 = vpack.c.bf16 %v698_v20, %v697_v19  ;;  %v699_v30 = vmax.f32 %v695_v62, 0.0  ;;  %v700_v31 = vmax.f32 %v696_v29, 0.0  ;;  %v812_v62 = vld [vmem:[%s12628_s17] sm:$0xff]  ;;  %s9131_s17 = scalar_lea.hbm %s9425_s4, 2 }
 0x413   :  { %833 = vmatpush.msra.mxu0 %v806_v39  ;;  %859 = vmatpush.msra.mxu1 %v806_v39 }
 0x414   :  { %6922 = vmatmul.msk.bf16.vlgmr.msrb.gmra.mxu2 %vm245_vm2, %v709_v23  ;;  %v710_v32 = vpack.c.bf16 %v700_v31, %v699_v30  ;;  %888 = vmatpush.msra.mxu3 %v812_v62 }
 0x415   :  { %834 = vmatpush.msra.mxu0 %v805_v40  ;;  %860 = vmatpush.msra.mxu1 %v805_v40 }
 0x417   :  { %835 = vmatpush.msra.mxu0 %v804_v41  ;;  %861 = vmatpush.msra.mxu1 %v804_v41 }
 0x419   :  { %911 = vmatpush.msrb.mxu0 %v812_v62  ;;  %v9047_v62 = vld [vmem:[%s12633_s8] ss:$0 sm:$0xff] }
 0x424   :  { %6923 = vmatmul.msk.bf16.gmra.mxu2 %vm245_vm2, %v710_v32 }
 0x497   :  { %v754_v14 = vpop.f32.mrf.mxu2 }
 0x498   :  { %v9557_v43 = vadd.f32 %v9044_v38, %v754_v14  ;;  %v8587_v14 = vld [vmem:[%s12629_s21 + $0x18] sm:$0xff] }
 0x499   :  { %1007 = vmatpush.bf16.msrb.mxu1 %v8587_v14 }
 0x49a   :  { %v782_v46 = vmul.f32 %v9557_v43, %v9557_v43  ;;  %v764_v18 = vsel %vm245_vm2, %v9557_v43, 0.0 }
 0x49c   :  { %v786_v50 = vsel %vm245_vm2, %v782_v46, 0.0 }
 0x49d   :  { %1008 = vmatpush.bf16.msrb.mxu1 %v8586_v36 }
 0x49f   :  { %v756_v42 = vpop.f32.mrf.mxu2 }
 0x4a0   :  { %v9559_v44 = vadd.f32 %v9044_v38, %v756_v42 }
 0x4a1   :  { %1009 = vmatpush.bf16.msrb.mxu1 %v8585_v37 }
 0x4a2   :  { %v783_v45 = vmul.f32 %v9559_v44, %v9559_v44  ;;  %v765_v47 = vsel %vm245_vm2, %v9559_v44, 0.0 }
 0x4a3   :  { %v766_v48 = vadd.f32 %v765_v47, %v764_v18  ;;  %v9045_v18 = vld [vmem:[%s12630_s25] ss:$0 sm:$0xff] }
 0x4a4   :  { %v787_v22 = vsel %vm245_vm2, %v783_v45, 0.0 }
 0x4a5   :  { %v788_v51 = vadd.f32 %v787_v22, %v786_v50  ;;  %v767_v52 = vrot.slane %v766_v48, 4  ;;  %v9046_v50 = vld [vmem:[%s12631_s29] ss:$0 sm:$0xff] }
 0x4a7   :  { %v759_v49 = vpop.f32.mrf.mxu2  ;;  %v789_v24 = vrot.slane %v788_v51, 4  ;;  %v768_v34 = vadd.f32 %v767_v52, %v766_v48 }
 0x4a8   :  { %v9571_v53 = vadd.f32 %v9044_v38, %v759_v49 }
 0x4a9   :  { %v790_v57 = vadd.f32 %v789_v24, %v788_v51  ;;  %v769_v63 = vrot.slane %v768_v34, 2 }
 0x4aa   :  { %v784_v55 = vmul.f32 %v9571_v53, %v9571_v53  ;;  %v773_v58 = vsel %vm245_vm2, %v9571_v53, 0.0 }
 0x4ab   :  { %v791_v3 = vrot.slane %v790_v57, 2  ;;  %v770_v6 = vadd.f32 %v769_v63, %v768_v34 }
 0x4ac   :  { %v795_v1 = vsel %vm245_vm2, %v784_v55, 0.0 }
 0x4ad   :  { %v792_v10 = vadd.f32 %v791_v3, %v790_v57  ;;  %v771_v13 = vrot.slane %v770_v6, 1 }
 0x4af   :  { %v761_v54 = vpop.f32.mrf.mxu2  ;;  %v793_v20 = vrot.slane %v792_v10, 1  ;;  %v772_v21 = vadd.f32 %v771_v13, %v770_v6  ;;  %v1065_v13 = vld [vmem:[%s12632_s3 + $0x58] sm:$0xff] }
 0x4b0   :  { %v9575_v56 = vadd.f32 %v9044_v38, %v761_v54  ;;  %v8584_v38 = vld [vmem:[%s12629_s21] sm:$0xff] }
 0x4b1   :  { %v794_v27 = vadd.f32 %v793_v20, %v792_v10  ;;  %1010 = vmatpush.bf16.msrb.mxu1 %v8584_v38  ;;  %v1060_v20 = vld [vmem:[%s12632_s3 + $0x30] sm:$0xff] }
 0x4b2   :  { %v774_v59 = vsel %vm245_vm2, %v9575_v56, 0.0  ;;  %v785_v60 = vmul.f32 %v9575_v56, %v9575_v56 }
 0x4b3   :  { %v775_v0 = vadd.f32 %v774_v59, %v773_v58 }
 0x4b4   :  { %v796_v2 = vsel %vm245_vm2, %v785_v60, 0.0 }
 0x4b5   :  { %v776_v4 = vrot.slane %v775_v0, 4  ;;  %v797_v5 = vadd.f32 %v796_v2, %v795_v1 }
 0x4b7   :  { %v777_v7 = vadd.f32 %v776_v4, %v775_v0  ;;  %v798_v8 = vrot.slane %v797_v5, 4 }
 0x4b9   :  { %v778_v11 = vrot.slane %v777_v7, 2  ;;  %v799_v12 = vadd.f32 %v798_v8, %v797_v5 }
 0x4bb   :  { %v779_v15 = vadd.f32 %v778_v11, %v777_v7  ;;  %v800_v16 = vrot.slane %v799_v12, 2  ;;  %v1069_v11 = vld [vmem:[%s12632_s3 + $0x78] sm:$0xff] }
 0x4bc   :  { %1077 = vmatpush.msra.mxu2 %v1069_v11  ;;  %1102 = vmatpush.msrb.mxu3 %v1069_v11 }
 0x4bd   :  { %v780_v17 = vrot.slane %v779_v15, 1  ;;  %v801_v19 = vadd.f32 %v800_v16, %v799_v12  ;;  %v1068_v12 = vld [vmem:[%s12632_s3 + $0x70] sm:$0xff]  ;;  %v1063_v16 = vld [vmem:[%s12632_s3 + $0x48] sm:$0xff] }
 0x4be   :  { %1078 = vmatpush.msra.mxu2 %v1068_v12  ;;  %1103 = vmatpush.msrb.mxu3 %v1068_v12 }
 0x4bf   :  { %v781_v23 = vadd.f32 %v780_v17, %v779_v15  ;;  %v802_v25 = vrot.slane %v801_v19, 1  ;;  %v1064_v15 = vld [vmem:[%s12632_s3 + $0x50] sm:$0xff]  ;;  %v1062_v17 = vld [vmem:[%s12632_s3 + $0x40] sm:$0xff] }
 0x4c1   :  { %v817_v26 = vsel %vm299_vm3, %v781_v23, %v772_v21  ;;  %v803_v28 = vadd.f32 %v802_v25, %v801_v19  ;;  %v1061_v19 = vld [vmem:[%s12632_s3 + $0x38] sm:$0xff]  ;;  %v1059_v21 = vld [vmem:[%s12632_s3 + $0x28] sm:$0xff]  ;;  %v1058_v25 = vld [vmem:[%s12632_s3 + $0x20] sm:$0xff] }
 0x4c2   :  { %6924 = vmatmul.msk.f32.vlgmr.msra.gmra.mxu0 %vm245_vm2, %v817_v26  ;;  %v1057_v26 = vld [vmem:[%s12632_s3 + $0x18] sm:$0xff] }
 0x4c3   :  { %v843_v61 = vsel %vm299_vm3, %v803_v28, %v794_v27  ;;  %v1056_v27 = vld [vmem:[%s12632_s3 + $0x10] sm:$0xff]  ;;  %v1055_v28 = vld [vmem:[%s12632_s3 + $0x8] sm:$0xff] }
 0x4c4   :  { %6925 = vmatmul.msk.f32.vlgmr.msra.gmra.mxu1 %vm245_vm2, %v843_v61  ;;  %v1054_v61 = vld [vmem:[%s12632_s3] sm:$0xff] }
 0x53f   :  { %v837_v29 = vpop.f32.mrf.mxu0 }
 0x540   :  { %v840_v30 = vmul.f32 0.0078125, %v837_v29 }
 0x541   :  { %v863_v31 = vpop.f32.mrf.mxu1 }
 0x542   :  { %v867_v32 = vmul.f32 %v840_v30, %v840_v30  ;;  %v866_v33 = vmul.f32 0.0078125, %v863_v31  ;;  %6926 = vmatmul.msk.f32.vlgmr.msra.gmra.mxu3 %vm353_vm4, %v840_v30 }
 0x544   :  { %v868_v35 = vsub.f32 %v866_v33, %v867_v32 }
 0x546   :  { %v869_v9 = vmax.f32 %v868_v35, 0.0 }
 0x548   :  { %6927 = vmatmul.msk.f32.vlgmr.msrb.gmra.mxu0 %vm353_vm4, %v869_v9 }
 0x5c5   :  { %v913_v39 = vpop.f32.mrf.mxu0  ;;  %v890_v51 = vpop.f32.mrf.mxu3 }
 0x5c6   :  { %v914_v40 = vadd.f32 1e-05, %v913_v39 }
 0x5c8   :  { %9055 = vrsqrt.f32 %v914_v40  ;;  %vm922_vm12 = vweird.f32 %v914_v40 }
 0x5ce   :  { %v9056_v41 = vpop.eup %9055 }
 0x5cf   :  { %v917_v42 = vmul.f32 %v9056_v41, %v914_v40  ;;  %vm923_vm11 = vweird.f32 %v9056_v41 }
 0x5d0   :  { %vm924_vm13 = vmor %vm922_vm12, %vm923_vm11 }
 0x5d1   :  { %v918_v45 = vmul.f32 %v9056_v41, %v917_v42 }
 0x5d3   :  { %v919_v46 = vmul.f32 0.5, %v918_v45 }
 0x5d5   :  { %v920_v47 = vsub.f32 1.5, %v919_v46 }
 0x5d7   :  { %v921_v22 = vmul.f32 %v9056_v41, %v920_v47 }
 0x5d9   :  { %v925_v48 = vsel %vm924_vm13, %v9056_v41, %v921_v22 }
 0x5da   :  { %v929_v49 = vmul.f32 %v9045_v18, %v925_v48 }
 0x5dc   :  { %v930_v52 = vmul.f32 %v929_v49, %v890_v51  ;;  %v937_v24 = vperm.slane %v929_v49, 0  ;;  %v936_v0 = vrot.slane %v929_v49, 1 }
 0x5de   :  { %v934_v34 = vsub.f32 %v9046_v50, %v930_v52  ;;  %v941_v54 = vmul.f32 %v937_v24, %v9557_v43  ;;  %v942_v55 = vmul.f32 %v937_v24, %v9559_v44  ;;  %v938_v3 = vperm.slane %v936_v0, 0 }
 0x5e0   :  { %v947_v57 = vperm.slane %v934_v34, 0  ;;  %v946_v2 = vrot.slane %v934_v34, 1  ;;  %v943_v5 = vmul.f32 %v938_v3, %v9571_v53  ;;  %v944_v43 = vmul.f32 %v938_v3, %v9575_v56  ;;  %v1067_v53 = vld [vmem:[%s12632_s3 + $0x68] sm:$0xff]  ;;  %v1066_v56 = vld [vmem:[%s12632_s3 + $0x60] sm:$0xff] }
 0x5e1   :  { %1079 = vmatpush.msra.mxu2 %v1067_v53  ;;  %1104 = vmatpush.msrb.mxu3 %v1067_v53 }
 0x5e2   :  { %v951_v58 = vadd.f32 %v947_v57, %v941_v54  ;;  %v952_v59 = vadd.f32 %v947_v57, %v942_v55  ;;  %v948_v4 = vperm.slane %v946_v2, 0 }
 0x5e3   :  { %1080 = vmatpush.msra.mxu2 %v1066_v56  ;;  %1105 = vmatpush.msrb.mxu3 %v1066_v56  ;;  %v7174_v56 = vld [vmem:[%s12635_s24 + $0x1c0] sm:$0xf] }
 0x5e4   :  { %v955_v60 = vmax.f32 %v951_v58, 0.0  ;;  %v956_v63 = vmax.f32 %v952_v59, 0.0  ;;  %v953_v44 = vadd.f32 %v948_v4, %v943_v5  ;;  %v954_v6 = vadd.f32 %v948_v4, %v944_v43 }
 0x5e5   :  { %1081 = vmatpush.msra.mxu2 %v1065_v13  ;;  %1106 = vmatpush.msrb.mxu3 %v1065_v13  ;;  %v8648_v13 = vld [vmem:[%s12635_s24 + $0x1dc] sm:$0xf0] }
 0x5e6   :  { %v967_v1 = vpack.c.bf16 %v956_v63, %v955_v60  ;;  %v957_v7 = vmax.f32 %v953_v44, 0.0  ;;  %v958_v8 = vmax.f32 %v954_v6, 0.0  ;;  %v1070_v44 = vld [vmem:[%s12634_s14] sm:$0xff] }
 0x5e7   :  { %1082 = vmatpush.msra.mxu2 %v1064_v15  ;;  %1107 = vmatpush.msrb.mxu3 %v1064_v15  ;;  %v8644_v15 = vld [vmem:[%s12635_s24 + $0x1c4] sm:$0xf] }
 0x5e8   :  { %6944 = vmatmul.msk.bf16.vlgmr.msrb.gmra.mxu1 %vm245_vm2, %v967_v1  ;;  %v968_v10 = vpack.c.bf16 %v958_v8, %v957_v7  ;;  %1144 = vmatpush.msra.mxu0 %v1070_v44 }
 0x5e9   :  { %1083 = vmatpush.msra.mxu2 %v1063_v16  ;;  %1108 = vmatpush.msrb.mxu3 %v1063_v16  ;;  %v7175_v16 = vor.u32 %v8648_v13, %v7174_v56  ;;  %v7014_v56 = vld [vmem:[%s12635_s24 + $0x80] sm:$0xf] }
 0x5ea   :  { %1167 = vmatpush.msrb.mxu0 %v1070_v44  ;;  %v7048_v44 = vld [vmem:[%s12635_s24 + $0xe0] sm:$0xf0]  ;;  %v8608_v13 = vld [vmem:[%s12635_s24 + $0x9c] sm:$0xf0] }
 0x5eb   :  { %1084 = vmatpush.msra.mxu2 %v1062_v17  ;;  %1109 = vmatpush.msrb.mxu3 %v1062_v17  ;;  %v7176_v17 = vld [vmem:[%s12635_s24 + $0x1e0] sm:$0xf0] }
 0x5ec   :  { %1619 = vmatpush.bf16.msra.mxu1 %v7175_v16  ;;  %v7015_v16 = vor.u32 %v8608_v13, %v7014_v56  ;;  %v7168_v13 = vld [vmem:[%s12635_s24 + $0x1b8] sm:$0xf0] }
 0x5ed   :  { %1085 = vmatpush.msra.mxu2 %v1061_v19  ;;  %1110 = vmatpush.msrb.mxu3 %v1061_v19  ;;  %v7182_v19 = vld [vmem:[%s12635_s24 + $0x1c8] sm:$0xf] }
 0x5ef   :  { %1086 = vmatpush.msra.mxu2 %v1060_v20  ;;  %1111 = vmatpush.msrb.mxu3 %v1060_v20  ;;  %v8649_v20 = vld [vmem:[%s12635_s24 + $0x1e4] sm:$0xf0] }
 0x5f1   :  { %1087 = vmatpush.msra.mxu2 %v1059_v21  ;;  %1112 = vmatpush.msrb.mxu3 %v1059_v21  ;;  %v7179_v21 = vor.u32 %v8644_v15, %v7176_v17  ;;  %v8604_v15 = vld [vmem:[%s12635_s24 + $0x84] sm:$0xf] }
 0x5f2   :  { %v7016_v17 = vld [vmem:[%s12635_s24 + $0xa0] sm:$0xf0] }
 0x5f3   :  { %1088 = vmatpush.msra.mxu2 %v1058_v25  ;;  %1113 = vmatpush.msrb.mxu3 %v1058_v25  ;;  %v8645_v25 = vld [vmem:[%s12635_s24 + $0x1cc] sm:$0xf] }
 0x5f5   :  { %1089 = vmatpush.msra.mxu2 %v1057_v26  ;;  %1114 = vmatpush.msrb.mxu3 %v1057_v26  ;;  %v7184_v26 = vld [vmem:[%s12635_s24 + $0x1e8] sm:$0xf0] }
 0x5f7   :  { %1090 = vmatpush.msra.mxu2 %v1056_v27  ;;  %1115 = vmatpush.msrb.mxu3 %v1056_v27  ;;  %v7187_v27 = vor.u32 %v8645_v25, %v7184_v26  ;;  %v8605_v25 = vld [vmem:[%s12635_s24 + $0x8c] sm:$0xf] }
 0x5f8   :  { %6945 = vmatmul.msk.bf16.gmra.mxu1 %vm245_vm2, %v968_v10  ;;  %v7024_v26 = vld [vmem:[%s12635_s24 + $0xa8] sm:$0xf0]  ;;  %vm2562_vm2 = vcmask 130048  }
 0x5f9   :  { %1091 = vmatpush.msra.mxu2 %v1055_v28  ;;  %1116 = vmatpush.msrb.mxu3 %v1055_v28  ;;  %v7142_v28 = vld [vmem:[%s12635_s24 + $0x180] sm:$0xf] }
 0x5fb   :  { %1092 = vmatpush.msra.mxu2 %v1054_v61  ;;  %1117 = vmatpush.msrb.mxu3 %v1054_v61  ;;  %v8640_v61 = vld [vmem:[%s12635_s24 + $0x19c] sm:$0xf0] }
 0x5fd   :  { %1676 = vmatpush.bf16.msra.mxu3 %v7187_v27 }
 0x665   :  { %v1012_v23 = vpop.f32.mrf.mxu1 }
 0x666   :  { %v9623_v31 = vadd.f32 %v9047_v62, %v1012_v23  ;;  %v7183_v23 = vor.u32 %v8649_v20, %v7182_v19  ;;  %v7022_v19 = vld [vmem:[%s12635_s24 + $0x88] sm:$0xf] }
 0x667   :  { %v8609_v20 = vld [vmem:[%s12635_s24 + $0xa4] sm:$0xf0] }
 0x668   :  { %v1036_v33 = vmul.f32 %v9623_v31, %v9623_v31  ;;  %1657 = vmatpush.bf16.msrb.mxu2 %v7183_v23  ;;  %v7023_v23 = vor.u32 %v8609_v20, %v7022_v19  ;;  %v8630_v19 = vld [vmem:[%s12635_s24 + $0x154] sm:$0xf] }
 0x669   :  { %v7128_v20 = vld [vmem:[%s12635_s24 + $0x170] sm:$0xf0] }
 0x66d   :  { %v1014_v29 = vpop.f32.mrf.mxu1 }
 0x66e   :  { %v9621_v30 = vadd.f32 %v9047_v62, %v1014_v29  ;;  %v7143_v29 = vor.u32 %v8640_v61, %v7142_v28  ;;  %v7027_v28 = vor.u32 %v8605_v25, %v7024_v26  ;;  %v6982_v61 = vld [vmem:[%s12635_s24 + $0x40] sm:$0xf]  ;;  %v8635_v26 = vld [vmem:[%s12635_s24 + $0x174] sm:$0xf0] }
 0x670   :  { %v1037_v32 = vmul.f32 %v9621_v30, %v9621_v30  ;;  %v1022_v35 = vadd.f32 %v9621_v30, %v9623_v31  ;;  %1620 = vmatpush.bf16.msra.mxu1 %v7143_v29  ;;  %v8596_v29 = vld [vmem:[%s12635_s24 + $0x44] sm:$0xf] }
 0x672   :  { %v1040_v14 = vadd.f32 %v1037_v32, %v1036_v33  ;;  %v1023_v36 = vrot.slane %v1022_v35, 4  ;;  %v7144_v32 = vld [vmem:[%s12635_s24 + $0x1a0] sm:$0xf0]  ;;  %v7150_v33 = vld [vmem:[%s12635_s24 + $0x188] sm:$0xf] }
 0x674   :  { %v1041_v37 = vrot.slane %v1040_v14, 4  ;;  %v1024_v38 = vadd.f32 %v1023_v36, %v1022_v35  ;;  %v8641_v35 = vld [vmem:[%s12635_s24 + $0x1a4] sm:$0xf0]  ;;  %v8637_v36 = vld [vmem:[%s12635_s24 + $0x18c] sm:$0xf] }
 0x675   :  { %v1017_v9 = vpop.f32.mrf.mxu1 }
 0x676   :  { %v9631_v39 = vadd.f32 %v9047_v62, %v1017_v9  ;;  %v1042_v41 = vadd.f32 %v1041_v37, %v1040_v14  ;;  %v1025_v45 = vrot.slane %v1024_v38, 2  ;;  %v7151_v14 = vor.u32 %v8641_v35, %v7150_v33  ;;  %v7152_v37 = vld [vmem:[%s12635_s24 + $0x1a8] sm:$0xf0]  ;;  %v6984_v33 = vld [vmem:[%s12635_s24 + $0x60] sm:$0xf0] }
 0x677   :  { %v6990_v35 = vld [vmem:[%s12635_s24 + $0x48] sm:$0xf] }
 0x678   :  { %v1038_v46 = vmul.f32 %v9631_v39, %v9631_v39  ;;  %v1043_v22 = vrot.slane %v1042_v41, 2  ;;  %v1026_v50 = vadd.f32 %v1025_v45, %v1024_v38  ;;  %v7155_v38 = vor.u32 %v8637_v36, %v7152_v37  ;;  %1658 = vmatpush.bf16.msrb.mxu2 %v7151_v14  ;;  %v8628_v45 = vld [vmem:[%s12635_s24 + $0x144] sm:$0xf]  ;;  %v8597_v37 = vld [vmem:[%s12635_s24 + $0x4c] sm:$0xf] }
 0x679   :  { %v6987_v14 = vor.u32 %v8596_v29, %v6984_v33  ;;  %v7131_v29 = vor.u32 %v8630_v19, %v7128_v20  ;;  %v7094_v33 = vld [vmem:[%s12635_s24 + $0x110] sm:$0xf] }
 0x67a   :  { %v1044_v54 = vadd.f32 %v1043_v22, %v1042_v41  ;;  %v1027_v58 = vrot.slane %v1026_v50, 1  ;;  %v8632_v41 = vld [vmem:[%s12635_s24 + $0x15c] sm:$0xf0]  ;;  %1677 = vmatpush.bf16.msra.mxu3 %v7155_v38  ;;  %v8633_v22 = vld [vmem:[%s12635_s24 + $0x164] sm:$0xf0] }
 0x67b   :  { %v6992_v38 = vld [vmem:[%s12635_s24 + $0x68] sm:$0xf0]  ;;  %v8602_v20 = vld [vmem:[%s12635_s24 + $0x6c] sm:$0xf0] }
 0x67c   :  { %v1045_v60 = vrot.slane %v1044_v54, 1  ;;  %v1028_v0 = vadd.f32 %v1027_v58, %v1026_v50  ;;  %v8629_v50 = vld [vmem:[%s12635_s24 + $0x14c] sm:$0xf]  ;;  %v7086_v58 = vld [vmem:[%s12635_s24 + $0x108] sm:$0xf] }
 0x67d   :  { %v1019_v40 = vpop.f32.mrf.mxu1 }
 0x67e   :  { %v9633_v42 = vadd.f32 %v9047_v62, %v1019_v40  ;;  %v1046_v4 = vadd.f32 %v1045_v60, %v1044_v54  ;;  %v8636_v62 = vld [vmem:[%s12635_s24 + $0x184] sm:$0xf]  ;;  %v7110_v40 = vld [vmem:[%s12635_s24 + $0x140] sm:$0xf] }
 0x67f   :  { %v7147_v9 = vor.u32 %v8636_v62, %v7144_v32  ;;  %v8620_v54 = vld [vmem:[%s12635_s24 + $0x104] sm:$0xf]  ;;  %v8600_v62 = vld [vmem:[%s12635_s24 + $0x5c] sm:$0xf0] }
 0x680   :  { %v1029_v47 = vadd.f32 %v9633_v42, %v9631_v39  ;;  %v1039_v18 = vmul.f32 %v9633_v42, %v9633_v42  ;;  %v6983_v32 = vor.u32 %v8600_v62, %v6982_v61  ;;  %v7136_v61 = vld [vmem:[%s12635_s24 + $0x178] sm:$0xf0] }
 0x682   :  { %v1030_v48 = vrot.slane %v1029_v47, 4  ;;  %v1047_v49 = vadd.f32 %v1039_v18, %v1038_v46  ;;  %v7111_v46 = vor.u32 %v8632_v41, %v7110_v40  ;;  %v7118_v18 = vld [vmem:[%s12635_s24 + $0x148] sm:$0xf]  ;;  %v6995_v40 = vor.u32 %v8597_v37, %v6992_v38  ;;  %v6950_v41 = vld [vmem:[%s12635_s24] sm:$0xf] }
 0x683   :  { %v7102_v37 = vld [vmem:[%s12635_s24 + $0x118] sm:$0xf] }
 0x684   :  { %v1031_v51 = vadd.f32 %v1030_v48, %v1029_v47  ;;  %v1048_v52 = vrot.slane %v1047_v49, 4  ;;  %v7112_v47 = vld [vmem:[%s12635_s24 + $0x160] sm:$0xf0]  ;;  %1621 = vmatpush.bf16.msra.mxu1 %v7111_v46 }
 0x685   :  { %v7115_v48 = vor.u32 %v8628_v45, %v7112_v47  ;;  %v8592_v45 = vld [vmem:[%s12635_s24 + $0x1c] sm:$0xf0]  ;;  %v8588_v46 = vld [vmem:[%s12635_s24 + $0x4] sm:$0xf] }
 0x686   :  { %v1032_v24 = vrot.slane %v1031_v51, 2  ;;  %v1049_v34 = vadd.f32 %v1048_v52, %v1047_v49  ;;  %v7119_v49 = vor.u32 %v8633_v22, %v7118_v18  ;;  %v6951_v47 = vor.u32 %v8592_v45, %v6950_v41  ;;  %v6952_v18 = vld [vmem:[%s12635_s24 + $0x20] sm:$0xf0]  ;;  %v6958_v22 = vld [vmem:[%s12635_s24 + $0x8] sm:$0xf] }
 0x687   :  { %v8623_v41 = vld [vmem:[%s12635_s24 + $0x11c] sm:$0xf] }
 0x688   :  { %v1033_v55 = vadd.f32 %v1032_v24, %v1031_v51  ;;  %v1050_v57 = vrot.slane %v1049_v34, 2  ;;  %v7120_v51 = vld [vmem:[%s12635_s24 + $0x168] sm:$0xf0]  ;;  %1659 = vmatpush.bf16.msrb.mxu2 %v7119_v49  ;;  %v7078_v24 = vld [vmem:[%s12635_s24 + $0x100] sm:$0xf]  ;;  %v6955_v49 = vor.u32 %v8588_v46, %v6952_v18 }
 0x689   :  { %v7123_v52 = vor.u32 %v8629_v50, %v7120_v51  ;;  %v8589_v51 = vld [vmem:[%s12635_s24 + $0xc] sm:$0xf]  ;;  %v7104_v45 = vld [vmem:[%s12635_s24 + $0x138] sm:$0xf0] }
 0x68a   :  { %v1034_v59 = vrot.slane %v1033_v55, 1  ;;  %v1051_v63 = vadd.f32 %v1050_v57, %v1049_v34  ;;  %v8624_v34 = vld [vmem:[%s12635_s24 + $0x11c] sm:$0xf0]  ;;  %v7080_v57 = vld [vmem:[%s12635_s24 + $0x120] sm:$0xf0] }
 0x68b   :  { %1678 = vmatpush.bf16.msra.mxu3 %v7123_v52  ;;  %v7083_v60 = vor.u32 %v8620_v54, %v7080_v57  ;;  %v6960_v52 = vld [vmem:[%s12635_s24 + $0x28] sm:$0xf0]  ;;  %v8650_v57 = vld [vmem:[%s12635_s24 + $0x1ec] sm:$0xf0] }
 0x68c   :  { %v1035_v1 = vadd.f32 %v1034_v59, %v1033_v55  ;;  %v1052_v2 = vrot.slane %v1051_v63, 1  ;;  %v7079_v55 = vor.u32 %v8624_v34, %v7078_v24  ;;  %v8625_v59 = vld [vmem:[%s12635_s24 + $0x124] sm:$0xf0]  ;;  %v6963_v34 = vor.u32 %v8589_v51, %v6960_v52  ;;  %v9048_v51 = vld [vmem:[%s12636_s30] ss:$0 sm:$0xff] }
 0x68e   :  { %v1075_v3 = vsel %vm299_vm3, %v1035_v1, %v1028_v0  ;;  %v1053_v5 = vadd.f32 %v1052_v2, %v1051_v63  ;;  %v7087_v63 = vor.u32 %v8625_v59, %v7086_v58  ;;  %v8621_v0 = vld [vmem:[%s12635_s24 + $0x10c] sm:$0xf]  ;;  %1622 = vmatpush.bf16.msra.mxu1 %v7079_v55  ;;  %v7190_v55 = vld [vmem:[%s12635_s24 + $0x1d0] sm:$0xf]  ;;  %v8646_v58 = vld [vmem:[%s12635_s24 + $0x1d4] sm:$0xf] }
 0x68f   :  { %1093 = vmatmul.f32.vlgmr.msra.gmra.mxu2 %v1075_v3  ;;  %v7088_v1 = vld [vmem:[%s12635_s24 + $0x128] sm:$0xf0]  ;;  %v7046_v3 = vld [vmem:[%s12635_s24 + $0xc0] sm:$0xf]  ;;  %v7191_v59 = vor.u32 %v8650_v57, %v7190_v55  ;;  %v8614_v55 = vld [vmem:[%s12635_s24 + $0xd4] sm:$0xf] }
 0x690   :  { %v1100_v43 = vsel %vm299_vm3, %v1053_v5, %v1046_v4  ;;  %v7091_v2 = vor.u32 %v8621_v0, %v7088_v1  ;;  %1660 = vmatpush.bf16.msrb.mxu2 %v7087_v63  ;;  %v8616_v4 = vld [vmem:[%s12635_s24 + $0xdc] sm:$0xf0]  ;;  %v8612_v5 = vld [vmem:[%s12635_s24 + $0xc4] sm:$0xf]  ;;  %v7198_v63 = vld [vmem:[%s12635_s24 + $0x1d8] sm:$0xf] }
 0x691   :  { %1118 = vmatmul.f32.vlgmr.msrb.gmra.mxu3 %v1100_v43  ;;  %v7047_v43 = vor.u32 %v8616_v4, %v7046_v3  ;;  %v8651_v0 = vld [vmem:[%s12635_s24 + $0x1f4] sm:$0xf0]  ;;  %v8647_v3 = vld [vmem:[%s12635_s24 + $0x1dc] sm:$0xf]  ;;  %v9049_v57 = vld [vmem:[%s12637_s6] ss:$0 sm:$0xff] }
 0x692   :  { %1679 = vmatpush.bf16.msra.mxu3 %v7091_v2  ;;  %v7199_v2 = vor.u32 %v8651_v0, %v7198_v63  ;;  %v7200_v4 = vld [vmem:[%s12635_s24 + $0x1f8] sm:$0xf0] }
 0x693   :  { %1623 = vmatpush.bf16.msra.mxu1 %v7047_v43  ;;  %v7203_v43 = vor.u32 %v8647_v3, %v7200_v4  ;;  %v7072_v3 = vld [vmem:[%s12635_s24 + $0xf8] sm:$0xf0]  ;;  %v7030_v4 = vld [vmem:[%s12635_s24 + $0x90] sm:$0xf] }
 0x697   :  { %1624 = vmatpush.bf16.msra.mxu1 %v7015_v16  ;;  %v8634_v16 = vld [vmem:[%s12635_s24 + $0x16c] sm:$0xf0] }
 0x69b   :  { %1625 = vmatpush.bf16.msra.mxu1 %v6983_v32 }
 0x69f   :  { %1626 = vmatpush.bf16.msra.mxu1 %v6951_v47 }
 0x6a3   :  { %1695 = vmatpush.bf16.msrb.mxu1 %v7191_v59  ;;  %v7070_v59 = vld [vmem:[%s12635_s24 + $0xd8] sm:$0xf] }
 0x712   :  { %v1094_v6 = vpop.f32.mrf.mxu2 }
 0x713   :  { %v1097_v7 = vmul.f32 0.00390625, %v1094_v6  ;;  %v7054_v6 = vld [vmem:[%s12635_s24 + $0xc8] sm:$0xf] }
 0x714   :  { %v1119_v8 = vpop.f32.mrf.mxu3 }
 0x715   :  { %v1123_v10 = vmul.f32 %v1097_v7, %v1097_v7  ;;  %v1122_v11 = vmul.f32 0.00390625, %v1119_v8  ;;  %6946 = vmatmul.msk.f32.vlgmr.msra.gmra.mxu0 %vm353_vm4, %v1097_v7  ;;  %v8617_v7 = vld [vmem:[%s12635_s24 + $0xe4] sm:$0xf0]  ;;  %v7051_v8 = vor.u32 %v8612_v5, %v7048_v44  ;;  %v7158_v5 = vld [vmem:[%s12635_s24 + $0x190] sm:$0xf] }
 0x716   :  { %1638 = vmatpush.bf16.msra.mxu0 %v7179_v21  ;;  %v7019_v21 = vor.u32 %v8604_v15, %v7016_v17  ;;  %v8642_v44 = vld [vmem:[%s12635_s24 + $0x1ac] sm:$0xf0] }
 0x717   :  { %v1124_v12 = vsub.f32 %v1122_v11, %v1123_v10  ;;  %v7055_v10 = vor.u32 %v8617_v7, %v7054_v6  ;;  %v8613_v11 = vld [vmem:[%s12635_s24 + $0xcc] sm:$0xf]  ;;  %v8638_v6 = vld [vmem:[%s12635_s24 + $0x194] sm:$0xf]  ;;  %v7126_v15 = vld [vmem:[%s12635_s24 + $0x150] sm:$0xf] }
 0x718   :  { %v7160_v7 = vld [vmem:[%s12635_s24 + $0x1b0] sm:$0xf0]  ;;  %v7127_v25 = vor.u32 %v8634_v16, %v7126_v15  ;;  %v7040_v16 = vld [vmem:[%s12635_s24 + $0xb8] sm:$0xf0] }
 0x719   :  { %v1125_v53 = vmax.f32 %v1124_v12, 0.0  ;;  %v7056_v12 = vld [vmem:[%s12635_s24 + $0xe8] sm:$0xf0]  ;;  %1661 = vmatpush.bf16.msrb.mxu2 %v7055_v10  ;;  %v7163_v10 = vor.u32 %v8638_v6, %v7160_v7  ;;  %v8606_v6 = vld [vmem:[%s12635_s24 + $0x94] sm:$0xf] }
 0x71a   :  { %1639 = vmatpush.bf16.msra.mxu0 %v7147_v9  ;;  %v8601_v9 = vld [vmem:[%s12635_s24 + $0x64] sm:$0xf0]  ;;  %v7032_v7 = vld [vmem:[%s12635_s24 + $0xb0] sm:$0xf0] }
 0x71b   :  { %v6991_v36 = vor.u32 %v8601_v9, %v6990_v35  ;;  %v8626_v35 = vld [vmem:[%s12635_s24 + $0x12c] sm:$0xf0] }
 0x71c   :  { %v7095_v46 = vor.u32 %v8626_v35, %v7094_v33  ;;  %v6966_v33 = vld [vmem:[%s12635_s24 + $0x10] sm:$0xf] }
 0x71d   :  { %6947 = vmatmul.msk.f32.vlgmr.msrb.gmra.mxu0 %vm353_vm4, %v1125_v53  ;;  %v7059_v53 = vor.u32 %v8613_v11, %v7056_v12  ;;  %1662 = vmatpush.bf16.msrb.mxu2 %v7023_v23  ;;  %v7166_v11 = vld [vmem:[%s12635_s24 + $0x198] sm:$0xf] }
 0x71e   :  { %1640 = vmatpush.bf16.msra.mxu0 %v7115_v48  ;;  %v8593_v48 = vld [vmem:[%s12635_s24 + $0x24] sm:$0xf0]  ;;  %v8643_v12 = vld [vmem:[%s12635_s24 + $0x1b4] sm:$0xf0] }
 0x71f   :  { %1680 = vmatpush.bf16.msra.mxu3 %v7059_v53  ;;  %v6959_v50 = vor.u32 %v8593_v48, %v6958_v22  ;;  %v8639_v53 = vld [vmem:[%s12635_s24 + $0x19c] sm:$0xf]  ;;  %v7167_v56 = vor.u32 %v8643_v12, %v7166_v11  ;;  %v7107_v48 = vor.u32 %v8623_v41, %v7104_v45  ;;  %v7038_v11 = vld [vmem:[%s12635_s24 + $0x98] sm:$0xf] }
 0x720   :  { %v7171_v17 = vor.u32 %v8639_v53, %v7168_v13  ;;  %v8611_v12 = vld [vmem:[%s12635_s24 + $0xb4] sm:$0xf0]  ;;  %v8607_v53 = vld [vmem:[%s12635_s24 + $0x9c] sm:$0xf] }
 0x721   :  { %1663 = vmatpush.bf16.msrb.mxu2 %v6991_v36  ;;  %v7096_v36 = vld [vmem:[%s12635_s24 + $0x130] sm:$0xf0]  ;;  %v7039_v15 = vor.u32 %v8611_v12, %v7038_v11  ;;  %v7043_v19 = vor.u32 %v8607_v53, %v7040_v16  ;;  %v6974_v41 = vld [vmem:[%s12635_s24 + $0x18] sm:$0xf]  ;;  %v9856_v11 = vld [vmem:[%s12640_s20 + $0x168] sm:$0xff] }
 0x722   :  { %1641 = vmatpush.bf16.msra.mxu0 %v7083_v60  ;;  %v7192_v60 = vld [vmem:[%s12635_s24 + $0x1f0] sm:$0xf0]  ;;  %v8595_v45 = vld [vmem:[%s12635_s24 + $0x34] sm:$0xf0]  ;;  %12642 = vst [vmem:[#allocation37_spill] sm:$0xff] %v9856_v11  ;;  %v9859_v12 = vld [vmem:[%s12640_s20 + $0x1e8] sm:$0xff] }
 0x723   :  { %1681 = vmatpush.bf16.msra.mxu3 %v7027_v28  ;;  %v7195_v1 = vor.u32 %v8646_v58, %v7192_v60  ;;  %v8631_v28 = vld [vmem:[%s12635_s24 + $0x15c] sm:$0xf]  ;;  %v7064_v58 = vld [vmem:[%s12635_s24 + $0xf0] sm:$0xf0]  ;;  %v8619_v60 = vld [vmem:[%s12635_s24 + $0xf4] sm:$0xf0] }
 0x724   :  { %v7139_v9 = vor.u32 %v8631_v28, %v7136_v61  ;;  %v7067_v0 = vor.u32 %v8614_v55, %v7064_v58  ;;  %v8603_v28 = vld [vmem:[%s12635_s24 + $0x74] sm:$0xf0]  ;;  %12643 = vst [vmem:[#allocation38_spill] sm:$0xff] %v9859_v12  ;;  %v9878_v16 = vld [vmem:[%s12640_s20 + $0x50] sm:$0xff] }
 0x725   :  { %1664 = vmatpush.bf16.msrb.mxu2 %v6959_v50  ;;  %v9862_v53 = vld [vmem:[%s12640_s20 + $0x58] sm:$0xff] }
 0x726   :  { %1642 = vmatpush.bf16.msra.mxu0 %v7051_v8  ;;  %v7159_v8 = vor.u32 %v8642_v44, %v7158_v5  ;;  %v8610_v44 = vld [vmem:[%s12635_s24 + $0xac] sm:$0xf0] }
 0x727   :  { %1682 = vmatpush.bf16.msra.mxu3 %v6995_v40  ;;  %v8627_v40 = vld [vmem:[%s12635_s24 + $0x134] sm:$0xf0] }
 0x728   :  { %1696 = vmatpush.bf16.msrb.mxu1 %v7159_v8  ;;  %v7103_v22 = vor.u32 %v8627_v40, %v7102_v37  ;;  %v7031_v8 = vor.u32 %v8610_v44, %v7030_v4  ;;  %v8590_v37 = vld [vmem:[%s12635_s24 + $0x14] sm:$0xf]  ;;  %v9826_v4 = vld [vmem:[%s12640_s20 + $0x68] sm:$0xff]  ;;  %v9837_v44 = vld [vmem:[%s12640_s20 + $0x60] sm:$0xff] }
 0x729   :  { %1733 = vmatpush.bf16.msra.mxu2 %v7199_v2  ;;  %v8615_v2 = vld [vmem:[%s12635_s24 + $0xdc] sm:$0xf]  ;;  %v6968_v40 = vld [vmem:[%s12635_s24 + $0x30] sm:$0xf0] }
 0x72a   :  { %1643 = vmatpush.bf16.msra.mxu0 %v7019_v21  ;;  %v7134_v21 = vld [vmem:[%s12635_s24 + $0x158] sm:$0xf] }
 0x72b   :  { %1683 = vmatpush.bf16.msra.mxu3 %v6963_v34  ;;  %v7135_v32 = vor.u32 %v8635_v26, %v7134_v21  ;;  %v8618_v34 = vld [vmem:[%s12635_s24 + $0xec] sm:$0xf0]  ;;  %v8598_v21 = vld [vmem:[%s12635_s24 + $0x54] sm:$0xf]  ;;  %v7006_v26 = vld [vmem:[%s12635_s24 + $0x58] sm:$0xf] }
 0x72c   :  { %1697 = vmatpush.bf16.msrb.mxu1 %v7127_v25 }
 0x72d   :  { %1734 = vmatpush.bf16.msra.mxu2 %v7167_v56 }
 0x72e   :  { %1644 = vmatpush.bf16.msra.mxu0 %v6987_v14  ;;  %v8622_v14 = vld [vmem:[%s12635_s24 + $0x114] sm:$0xf] }
 0x72f   :  { %1752 = vmatpush.bf16.msrb.mxu3 %v7203_v43  ;;  %v7099_v18 = vor.u32 %v8622_v14, %v7096_v36  ;;  %v7075_v43 = vor.u32 %v8615_v2, %v7072_v3  ;;  %v8594_v36 = vld [vmem:[%s12635_s24 + $0x2c] sm:$0xf0] }
 0x730   :  { %1698 = vmatpush.bf16.msrb.mxu1 %v7095_v46  ;;  %v9818_v2 = vld [vmem:[%s12640_s20 + $0x70] sm:$0xff] }
 0x731   :  { %1735 = vmatpush.bf16.msra.mxu2 %v7135_v32  ;;  %v7008_v32 = vld [vmem:[%s12635_s24 + $0x78] sm:$0xf0]  ;;  %v9823_v3 = vld [vmem:[%s12640_s20 + $0xf0] sm:$0xff] }
 0x732   :  { %1645 = vmatpush.bf16.msra.mxu0 %v6955_v49 }
 0x733   :  { %1753 = vmatpush.bf16.msrb.mxu3 %v7171_v17  ;;  %v6998_v17 = vld [vmem:[%s12635_s24 + $0x50] sm:$0xf] }
 0x735   :  { %1736 = vmatpush.bf16.msra.mxu2 %v7103_v22  ;;  %v6971_v22 = vor.u32 %v8590_v37, %v6968_v40  ;;  %v9967_v37 = vld [vmem:[%s12640_s20 + $0x1c0] sm:$0xff] }
 0x736   :  { %1714 = vmatpush.bf16.msrb.mxu0 %v7195_v1  ;;  %v7071_v1 = vor.u32 %v8619_v60, %v7070_v59  ;;  %12661 = vst [vmem:[#allocation56_spill] sm:$0xff] %v9967_v37  ;;  %v9975_v40 = vld [vmem:[%s12640_s20 + $0xa0] sm:$0xff] }
 0x737   :  { %1754 = vmatpush.bf16.msrb.mxu3 %v7139_v9  ;;  %12663 = vst [vmem:[#allocation58_spill] sm:$0xff] %v9975_v40 }
 0x739   :  { %1737 = vmatpush.bf16.msra.mxu2 %v7071_v1 }
 0x73a   :  { %1715 = vmatpush.bf16.msrb.mxu0 %v7163_v10  ;;  %v7035_v10 = vor.u32 %v8606_v6, %v7032_v7  ;;  %v9840_v6 = vld [vmem:[%s12640_s20 + $0x1f8] sm:$0xff]  ;;  %v9843_v7 = vld [vmem:[%s12640_s20 + $0xe0] sm:$0xff] }
 0x73b   :  { %1755 = vmatpush.bf16.msrb.mxu3 %v7107_v48  ;;  %v8591_v48 = vld [vmem:[%s12635_s24 + $0x1c] sm:$0xf] }
 0x73d   :  { %1738 = vmatpush.bf16.msra.mxu2 %v7039_v15  ;;  %v9875_v15 = vld [vmem:[%s12640_s20 + $0x1e0] sm:$0xff] }
 0x73e   :  { %1716 = vmatpush.bf16.msrb.mxu0 %v7131_v29  ;;  %v8599_v29 = vld [vmem:[%s12635_s24 + $0x5c] sm:$0xf]  ;;  %12645 = vst [vmem:[#allocation40_spill] sm:$0xff] %v9875_v15 }
 0x73f   :  { %1756 = vmatpush.bf16.msrb.mxu3 %v7075_v43  ;;  %v9832_v43 = vld [vmem:[%s12640_s20 + $0x178] sm:$0xff] }
 0x742   :  { %1717 = vmatpush.bf16.msrb.mxu0 %v7099_v18  ;;  %v6967_v18 = vor.u32 %v8594_v36, %v6966_v33  ;;  %v9940_v33 = vld [vmem:[%s12640_s20 + $0x30] sm:$0xff]  ;;  %v9962_v36 = vld [vmem:[%s12640_s20 + $0x140] sm:$0xff] }
 0x743   :  { %1757 = vmatpush.bf16.msrb.mxu3 %v7043_v19  ;;  %v9888_v19 = vld [vmem:[%s12640_s20 + $0x158] sm:$0xff]  ;;  %12656 = vst [vmem:[#allocation51_spill] sm:$0xff] %v9940_v33 }
 0x744   :  { %12646 = vst [vmem:[#allocation41_spill] sm:$0xff] %v9888_v19 }
 0x745   :  { %12660 = vst [vmem:[#allocation55_spill] sm:$0xff] %v9962_v36 }
 0x746   :  { %1718 = vmatpush.bf16.msrb.mxu0 %v7067_v0 }
 0x74a   :  { %1719 = vmatpush.bf16.msrb.mxu0 %v7035_v10  ;;  %v9851_v10 = vld [vmem:[%s12640_s20 + $0x1f0] sm:$0xff] }
 0x792   :  { %v9694_v27 = vpop.f32.mrf.mxu0 }
 0x79a   :  { %v1169_v24 = vpop.f32.mrf.mxu0 }
 0x79b   :  { %v9712_v54 = vadd.f32 1e-05, %v1169_v24  ;;  %v7062_v24 = vld [vmem:[%s12635_s24 + $0xd0] sm:$0xf] }
 0x79d   :  { %9057 = vrsqrt.f32 %v9712_v54  ;;  %vm1178_vm15 = vweird.f32 %v9712_v54 }
 0x7a3   :  { %v9058_v23 = vpop.eup %9057 }
 0x7a4   :  { %v1173_v62 = vmul.f32 %v9058_v23, %v9712_v54  ;;  %vm1179_vm14 = vweird.f32 %v9058_v23  ;;  %v7063_v54 = vor.u32 %v8618_v34, %v7062_v24 }
 0x7a5   :  { %vm9749_vm1 = vmor %vm1178_vm15, %vm1179_vm14  ;;  %vm3044_vm15 = vcmask 1042434  }
 0x7a6   :  { %v1174_v38 = vmul.f32 %v9058_v23, %v1173_v62  ;;  %1699 = vmatpush.bf16.msrb.mxu1 %v7063_v54  ;;  %v7007_v62 = vor.u32 %v8603_v28, %v7006_v26  ;;  %v9907_v26 = vld [vmem:[%s12640_s20 + $0x1d0] sm:$0xff]  ;;  %v9914_v28 = vld [vmem:[%s12640_s20 + $0x40] sm:$0xff] }
 0x7a7   :  { %12649 = vst [vmem:[#allocation44_spill] sm:$0xff] %v9907_v26 }
 0x7a8   :  { %v1175_v47 = vmul.f32 0.5, %v1174_v38  ;;  %v7011_v38 = vor.u32 %v8599_v29, %v7008_v32  ;;  %1739 = vmatpush.bf16.msra.mxu2 %v7007_v62  ;;  %12650 = vst [vmem:[#allocation45_spill] sm:$0xff] %v9914_v28  ;;  %v9927_v62 = vld [vmem:[%s12640_s20 + $0x1c8] sm:$0xff]  ;;  %v9932_v29 = vld [vmem:[%s12640_s20 + $0x38] sm:$0xff] }
 0x7a9   :  { %12653 = vst [vmem:[#allocation48_spill] sm:$0xff] %v9927_v62  ;;  %v9935_v32 = vld [vmem:[%s12640_s20 + $0xb8] sm:$0xff] }
 0x7aa   :  { %v1176_v49 = vsub.f32 1.5, %v1175_v47  ;;  %1700 = vmatpush.bf16.msrb.mxu1 %v7031_v8  ;;  %1758 = vmatpush.bf16.msrb.mxu3 %v7011_v38  ;;  %v9848_v8 = vld [vmem:[%s12640_s20 + $0x170] sm:$0xff]  ;;  %12654 = vst [vmem:[#allocation49_spill] sm:$0xff] %v9932_v29  ;;  %v9972_v38 = vld [vmem:[%s12640_s20 + $0x20] sm:$0xff] }
 0x7ab   :  { %12641 = vst [vmem:[#allocation36_spill] sm:$0xff] %v9848_v8 }
 0x7ac   :  { %v1177_v52 = vmul.f32 %v9058_v23, %v1176_v49  ;;  %12655 = vst [vmem:[#allocation50_spill] sm:$0xff] %v9935_v32 }
 0x7ad   :  { %12662 = vst [vmem:[#allocation57_spill] sm:$0xff] %v9972_v38 }
 0x7ae   :  { %v1181_v63 = vsel %vm9749_vm1, %v9058_v23, %v1177_v52  ;;  %v7000_v23 = vld [vmem:[%s12635_s24 + $0x70] sm:$0xf0]  ;;  %vm3056_vm1 = vcmask 1043459  }
 0x7af   :  { %v9766_v5 = vmul.f32 %v9048_v51, %v1181_v63  ;;  %v7003_v61 = vor.u32 %v8598_v21, %v7000_v23  ;;  %v9894_v21 = vld [vmem:[%s12640_s20 + $0x48] sm:$0xff] }
 0x7b0   :  { %v9897_v23 = vld [vmem:[%s12640_s20 + $0xc8] sm:$0xff] }
 0x7b1   :  { %v1186_v56 = vmul.f32 %v9766_v5, %v9694_v27  ;;  %v1193_v13 = vperm.slane %v9766_v5, 0  ;;  %v6999_v27 = vor.u32 %v8602_v20, %v6998_v17  ;;  %1720 = vmatpush.bf16.msrb.mxu0 %v7003_v61  ;;  %v1192_v49 = vrot.slane %v9766_v5, 1  ;;  %v9829_v5 = vld [vmem:[%s12640_s20 + $0xe8] sm:$0xff]  ;;  %v9881_v17 = vld [vmem:[%s12640_s20 + $0xd0] sm:$0xff]  ;;  %v9891_v20 = vld [vmem:[%s12640_s20 + $0x1d8] sm:$0xff] }
 0x7b2   :  { %12647 = vst [vmem:[#allocation42_spill] sm:$0xff] %v9891_v20  ;;  %v9924_v61 = vld [vmem:[%s12640_s20 + $0x148] sm:$0xff] }
 0x7b3   :  { %v1190_v25 = vsub.f32 %v9049_v57, %v1186_v56  ;;  %v1197_v35 = vmul.f32 %v1193_v13, %v9623_v31  ;;  %v1198_v9 = vmul.f32 %v1193_v13, %v9621_v30  ;;  %1701 = vmatpush.bf16.msrb.mxu1 %v6999_v27  ;;  %v6975_v31 = vor.u32 %v8595_v45, %v6974_v41  ;;  %v6976_v30 = vld [vmem:[%s12635_s24 + $0x38] sm:$0xf0]  ;;  %v9872_v13 = vld [vmem:[%s12640_s20 + $0x160] sm:$0xff] }
 0x7b4   :  { %v6979_v34 = vor.u32 %v8591_v48, %v6976_v30  ;;  %v1194_v55 = vperm.slane %v1192_v49, 0  ;;  %v9865_v56 = vld [vmem:[%s12640_s20 + $0xd8] sm:$0xff]  ;;  %12644 = vst [vmem:[#allocation39_spill] sm:$0xff] %v9872_v13  ;;  %v9917_v27 = vld [vmem:[%s12640_s20 + $0xc0] sm:$0xff]  ;;  %v10007_v48 = vld [vmem:[%s12640_s20 + $0x90] sm:$0xff] }
 0x7b5   :  { %v1203_v14 = vperm.slane %v1190_v25, 0  ;;  %v1202_v52 = vrot.slane %v1190_v25, 1  ;;  %1721 = vmatpush.bf16.msrb.mxu0 %v6971_v22  ;;  %1740 = vmatpush.bf16.msra.mxu2 %v6975_v31  ;;  %v9904_v25 = vld [vmem:[%s12640_s20 + $0x150] sm:$0xff]  ;;  %12651 = vst [vmem:[#allocation46_spill] sm:$0xff] %v9917_v27  ;;  %v9978_v41 = vld [vmem:[%s12640_s20 + $0x138] sm:$0xff]  ;;  %v10010_v30 = vld [vmem:[%s12640_s20 + $0x128] sm:$0xff] }
 0x7b6   :  { %1759 = vmatpush.bf16.msrb.mxu3 %v6979_v34  ;;  %v1199_v54 = vmul.f32 %v1194_v55, %v9631_v39  ;;  %v1200_v58 = vmul.f32 %v1194_v55, %v9633_v42  ;;  %v9812_v39 = vld [vmem:[%s12640_s20 + $0x78] sm:$0xff]  ;;  %12648 = vst [vmem:[#allocation43_spill] sm:$0xff] %v9904_v25  ;;  %v9997_v22 = vld [vmem:[%s12640_s20 + $0x1b0] sm:$0xff]  ;;  %v10015_v49 = vld [vmem:[%s12640_s20 + $0x1a8] sm:$0xff] }
 0x7b7   :  { %v1207_v46 = vadd.f32 %v1203_v14, %v1197_v35  ;;  %v1208_v47 = vadd.f32 %v1203_v14, %v1198_v9  ;;  %1702 = vmatpush.bf16.msrb.mxu1 %v6967_v18  ;;  %v1204_v57 = vperm.slane %v1202_v52, 0  ;;  %v9815_v42 = vld [vmem:[%s12640_s20 + $0xf8] sm:$0xff]  ;;  %12652 = vst [vmem:[#allocation47_spill] sm:$0xff] %v9924_v61  ;;  %v9943_v35 = vld [vmem:[%s12640_s20 + $0xb0] sm:$0xff]  ;;  %v9956_v9 = vld [vmem:[%s12640_s20 + $0x28] sm:$0xff] }
 0x7b8   :  { %12657 = vst [vmem:[#allocation52_spill] sm:$0xff] %v9943_v35  ;;  %v9959_v14 = vld [vmem:[%s12640_s20 + $0xa8] sm:$0xff]  ;;  %v9983_v45 = vld [vmem:[%s12640_s20 + $0x1b8] sm:$0xff]  ;;  %v9994_v18 = vld [vmem:[%s12640_s20 + $0x130] sm:$0xff] }
 0x7b9   :  { %v1211_v50 = vmax.f32 %v1207_v46, 0.0  ;;  %v1212_v51 = vmax.f32 %v1208_v47, 0.0  ;;  %v1209_v59 = vadd.f32 %v1204_v57, %v1199_v54  ;;  %v1210_v60 = vadd.f32 %v1204_v57, %v1200_v58  ;;  %12658 = vst [vmem:[#allocation53_spill] sm:$0xff] %v9956_v9  ;;  %v9986_v46 = vld [vmem:[%s12640_s20 + $0x18] sm:$0xff]  ;;  %v10004_v31 = vld [vmem:[%s12640_s20 + $0x10] sm:$0xff]  ;;  %v10026_v52 = vld [vmem:[%s12640_s20 + $0x120] sm:$0xff] }
 0x7ba   :  { %12659 = vst [vmem:[#allocation54_spill] sm:$0xff] %v9959_v14  ;;  %v9989_v47 = vld [vmem:[%s12640_s20 + $0x98] sm:$0xff]  ;;  %v10036_v34 = vld [vmem:[%s12640_s20] sm:$0xff] }
 0x7bb   :  { %v9797_v24 = vpack.c.bf16 %v1212_v51, %v1211_v50  ;;  %v1213_v63 = vmax.f32 %v1209_v59, 0.0  ;;  %v1214_v0 = vmax.f32 %v1210_v60, 0.0  ;;  %12664 = vst [vmem:[#allocation59_spill] sm:$0xff] %v9978_v41  ;;  %v10020_v50 = vld [vmem:[%s12640_s20 + $0x8] sm:$0xff]  ;;  %v10039_v55 = vld [vmem:[%s12640_s20 + $0x80] sm:$0xff]  ;;  %v10042_v57 = vld [vmem:[%s12640_s20 + $0x118] sm:$0xff] }
 0x7bc   :  { %12665 = vst [vmem:[#allocation60_spill] sm:$0xff] %v9983_v45  ;;  %v10023_v51 = vld [vmem:[%s12640_s20 + $0x88] sm:$0xff]  ;;  %v10047_v54 = vld [vmem:[%s12640_s20 + $0x198] sm:$0xff]  ;;  %v10058_v60 = vld [vmem:[%s12640_s20 + $0x110] sm:$0xff] }
 0x7bd   :  { %1627 = vmatmul.bf16.vlgmr.msra.gmra.mxu1 %v9797_v24  ;;  %1646 = vmatmul.bf16.vlgmr.msra.gmra.mxu0 %v9797_v24  ;;  %v9805_v1 = vpack.c.bf16 %v1214_v0, %v1213_v63  ;;  %12666 = vst [vmem:[#allocation61_spill] sm:$0xff] %v9986_v46  ;;  %v10050_v58 = vld [vmem:[%s12640_s20 + $0x278] sm:$0xff]  ;;  %v10061_v63 = vld [vmem:[%s12640_s20 + $0x190] sm:$0xff] }
 0x7be   :  { %1665 = vmatmul.bf16.vlgmr.msrb.gmra.mxu2 %v9797_v24  ;;  %1684 = vmatmul.bf16.vlgmr.msra.gmra.mxu3 %v9797_v24  ;;  %12667 = vst [vmem:[#allocation62_spill] sm:$0xff] %v9989_v47  ;;  %v10053_v59 = vld [vmem:[%s12640_s20 + $0x2f8] sm:$0xff]  ;;  %v10066_v0 = vld [vmem:[%s12640_s20 + $0x270] sm:$0xff] }
 0x7bf   :  { %2205 = vmatpush.msra.mxu1 %v9812_v39  ;;  %2225 = vmatpush.msra.mxu0 %v9815_v42  ;;  %12668 = vst [vmem:[#allocation63_spill] sm:$0xff] %v9994_v18 }
 0x7c0   :  { %2245 = vmatpush.msrb.mxu2 %v9832_v43  ;;  %2265 = vmatpush.msra.mxu3 %v9840_v6  ;;  %12669 = vst [vmem:[#allocation64_spill] sm:$0xff] %v9997_v22 }
 0x7c1   :  { %2206 = vmatpush.msra.mxu1 %v9818_v2  ;;  %2226 = vmatpush.msra.mxu0 %v9823_v3  ;;  %12670 = vst [vmem:[#allocation65_spill] sm:$0xff] %v10004_v31 }
 0x7c2   :  { %2246 = vmatpush.msrb.mxu2 %v9848_v8  ;;  %2266 = vmatpush.msra.mxu3 %v9851_v10  ;;  %12671 = vst [vmem:[#allocation66_spill] sm:$0xff] %v10007_v48 }
 0x7c3   :  { %2207 = vmatpush.msra.mxu1 %v9826_v4  ;;  %2227 = vmatpush.msra.mxu0 %v9829_v5  ;;  %12672 = vst [vmem:[#allocation67_spill] sm:$0xff] %v10010_v30 }
 0x7c4   :  { %2247 = vmatpush.msrb.mxu2 %v9856_v11  ;;  %2267 = vmatpush.msra.mxu3 %v9859_v12  ;;  %12673 = vst [vmem:[#allocation68_spill] sm:$0xff] %v10015_v49 }
 0x7c5   :  { %2208 = vmatpush.msra.mxu1 %v9837_v44  ;;  %2228 = vmatpush.msra.mxu0 %v9843_v7  ;;  %12674 = vst [vmem:[#allocation69_spill] sm:$0xff] %v10020_v50 }
 0x7c6   :  { %2248 = vmatpush.msrb.mxu2 %v9872_v13  ;;  %2268 = vmatpush.msra.mxu3 %v9875_v15  ;;  %12675 = vst [vmem:[#allocation70_spill] sm:$0xff] %v10023_v51 }
 0x7c7   :  { %2209 = vmatpush.msra.mxu1 %v9862_v53  ;;  %2229 = vmatpush.msra.mxu0 %v9865_v56  ;;  %12676 = vst [vmem:[#allocation71_spill] sm:$0xff] %v10026_v52 }
 0x7c8   :  { %2249 = vmatpush.msrb.mxu2 %v9888_v19  ;;  %2269 = vmatpush.msra.mxu3 %v9891_v20  ;;  %12678 = vst [vmem:[#allocation73_spill] sm:$0xff] %v10036_v34 }
 0x7c9   :  { %2210 = vmatpush.msra.mxu1 %v9878_v16  ;;  %2230 = vmatpush.msra.mxu0 %v9881_v17  ;;  %12679 = vst [vmem:[#allocation74_spill] sm:$0xff] %v10039_v55 }
 0x7ca   :  { %2250 = vmatpush.msrb.mxu2 %v9904_v25  ;;  %2270 = vmatpush.msra.mxu3 %v9907_v26  ;;  %12680 = vst [vmem:[#allocation75_spill] sm:$0xff] %v10042_v57 }
 0x7cb   :  { %2211 = vmatpush.msra.mxu1 %v9894_v21  ;;  %2231 = vmatpush.msra.mxu0 %v9897_v23  ;;  %12681 = vst [vmem:[#allocation76_spill] sm:$0xff] %v10047_v54 }
 0x7cc   :  { %2251 = vmatpush.msrb.mxu2 %v9924_v61  ;;  %2271 = vmatpush.msra.mxu3 %v9927_v62  ;;  %12682 = vst [vmem:[#allocation77_spill] sm:$0xff] %v10050_v58  ;;  %v10352_v61 = vld [vmem:[%s12640_s20 + $0x300] sm:$0xff] }
 0x7cd   :  { %1632 = vmatmul.bf16.gmra.mxu1 %v9805_v1  ;;  %1651 = vmatmul.bf16.gmra.mxu0 %v9805_v1  ;;  %12683 = vst [vmem:[#allocation78_spill] sm:$0xff] %v10053_v59 }
 0x7ce   :  { %1670 = vmatmul.bf16.gmra.mxu2 %v9805_v1  ;;  %1689 = vmatmul.bf16.gmra.mxu3 %v9805_v1  ;;  %12684 = vst [vmem:[#allocation79_spill] sm:$0xff] %v10058_v60 }
 0x7cf   :  { %2212 = vmatpush.msra.mxu1 %v9914_v28  ;;  %2232 = vmatpush.msra.mxu0 %v9917_v27  ;;  %12685 = vst [vmem:[#allocation80_spill] sm:$0xff] %v10061_v63 }
 0x7d0   :  { %2252 = vmatpush.msrb.mxu2 %v9962_v36  ;;  %2272 = vmatpush.msra.mxu3 %v9967_v37  ;;  %12686 = vst [vmem:[#allocation81_spill] sm:$0xff] %v10066_v0 }
 0x7d1   :  { %2213 = vmatpush.msra.mxu1 %v9932_v29  ;;  %2233 = vmatpush.msra.mxu0 %v9935_v32  ;;  %12757 = vst [vmem:[#allocation151_spill] sm:$0xff] %v10352_v61 }
 0x7d2   :  { %2253 = vmatpush.msrb.mxu2 %v9978_v41  ;;  %2273 = vmatpush.msra.mxu3 %v9983_v45 }
 0x7d3   :  { %2214 = vmatpush.msra.mxu1 %v9940_v33  ;;  %2234 = vmatpush.msra.mxu0 %v9943_v35 }
 0x7d4   :  { %2254 = vmatpush.msrb.mxu2 %v9994_v18  ;;  %2274 = vmatpush.msra.mxu3 %v9997_v22  ;;  %v10290_v18 = vld [vmem:[%s12640_s20 + $0x320] sm:$0xff] }
 0x7d5   :  { %2215 = vmatpush.msra.mxu1 %v9956_v9  ;;  %2235 = vmatpush.msra.mxu0 %v9959_v14  ;;  %12741 = vst [vmem:[#allocation135_spill] sm:$0xff] %v10290_v18 }
 0x7d6   :  { %2255 = vmatpush.msrb.mxu2 %v10010_v30  ;;  %2275 = vmatpush.msra.mxu3 %v10015_v49  ;;  %v10270_v30 = vld [vmem:[%s12640_s20 + $0x290] sm:$0xff]  ;;  %v10287_v49 = vld [vmem:[%s12640_s20 + $0x288] sm:$0xff] }
 0x7d7   :  { %2216 = vmatpush.msra.mxu1 %v9972_v38  ;;  %2236 = vmatpush.msra.mxu0 %v9975_v40  ;;  %12736 = vst [vmem:[#allocation130_spill] sm:$0xff] %v10270_v30  ;;  %v10355_v40 = vld [vmem:[%s12640_s20 + $0x380] sm:$0xff] }
 0x7d8   :  { %2256 = vmatpush.msrb.mxu2 %v10026_v52  ;;  %v10220_v52 = vld [vmem:[%s12640_s20 + $0x340] sm:$0xff]  ;;  %12740 = vst [vmem:[#allocation134_spill] sm:$0xff] %v10287_v49 }
 0x7d9   :  { %2217 = vmatpush.msra.mxu1 %v9986_v46  ;;  %2237 = vmatpush.msra.mxu0 %v9989_v47  ;;  %12724 = vst [vmem:[#allocation119_spill] sm:$0xff] %v10220_v52 }
 0x7da   :  { %2257 = vmatpush.msrb.mxu2 %v10042_v57  ;;  %v10074_v57 = vld [vmem:[%s12640_s20 + $0x108] sm:$0xff]  ;;  %12758 = vst [vmem:[#allocation152_spill] sm:$0xff] %v10355_v40 }
 0x7db   :  { %2218 = vmatpush.msra.mxu1 %v10004_v31  ;;  %2238 = vmatpush.msra.mxu0 %v10007_v48  ;;  %12688 = vst [vmem:[#allocation83_spill] sm:$0xff] %v10074_v57 }
 0x7dc   :  { %2258 = vmatpush.msrb.mxu2 %v10058_v60  ;;  %v10087_v60 = vld [vmem:[%s12640_s20 + $0x2e8] sm:$0xff] }
 0x7dd   :  { %1703 = vmatmul.bf16.vlgmr.msrb.gmra.mxu1 %v9797_v24  ;;  %1722 = vmatmul.bf16.vlgmr.msrb.gmra.mxu0 %v9797_v24  ;;  %12691 = vst [vmem:[#allocation86_spill] sm:$0xff] %v10087_v60 }
 0x7de   :  { %1741 = vmatmul.bf16.vlgmr.msra.gmra.mxu2 %v9797_v24  ;;  %1760 = vmatmul.bf16.vlgmr.msrb.gmra.mxu3 %v9797_v24  ;;  %v10031_v24 = vld [vmem:[%s12640_s20 + $0x1a0] sm:$0xff] }
 0x7df   :  { %2219 = vmatpush.msra.mxu1 %v10020_v50  ;;  %2239 = vmatpush.msra.mxu0 %v10023_v51  ;;  %12677 = vst [vmem:[#allocation72_spill] sm:$0xff] %v10031_v24  ;;  %v10306_v51 = vld [vmem:[%s12640_s20 + $0x280] sm:$0xff]  ;;  %v10309_v50 = vld [vmem:[%s12640_s20 + $0x318] sm:$0xff] }
 0x7e0   :  { %2276 = vmatpush.msra.mxu3 %v10031_v24  ;;  %2259 = vmatpush.msrb.mxu2 %v10074_v57  ;;  %v10100_v57 = vld [vmem:[%s12640_s20 + $0x260] sm:$0xff]  ;;  %12745 = vst [vmem:[#allocation139_spill] sm:$0xff] %v10306_v51 }
 0x7e1   :  { %2220 = vmatpush.msra.mxu1 %v10036_v34  ;;  %2240 = vmatpush.msra.mxu0 %v10039_v55  ;;  %12694 = vst [vmem:[#allocation89_spill] sm:$0xff] %v10100_v57  ;;  %v10255_v24 = vld [vmem:[%s12725_s23] sm:$0xff]  ;;  %v10278_v34 = vld [vmem:[%s12640_s20 + $0x3a8] sm:$0xff] }
 0x7e2   :  { %2277 = vmatpush.msra.mxu3 %v10047_v54  ;;  %v10077_v54 = vld [vmem:[%s12640_s20 + $0x188] sm:$0xff]  ;;  %12738 = vst [vmem:[#allocation132_spill] sm:$0xff] %v10278_v34 }
 0x7e3   :  { %2285 = vmatpush.msrb.mxu1 %v10050_v58  ;;  %2305 = vmatpush.msrb.mxu0 %v10053_v59  ;;  %12689 = vst [vmem:[#allocation84_spill] sm:$0xff] %v10077_v54  ;;  %v10084_v59 = vld [vmem:[%s12640_s20 + $0x268] sm:$0xff] }
 0x7e4   :  { %2278 = vmatpush.msra.mxu3 %v10061_v63  ;;  %12690 = vst [vmem:[#allocation85_spill] sm:$0xff] %v10084_v59  ;;  %v10092_v63 = vld [vmem:[%s12640_s20 + $0x100] sm:$0xff] }
 0x7e5   :  { %2286 = vmatpush.msrb.mxu1 %v10066_v0  ;;  %12692 = vst [vmem:[#allocation87_spill] sm:$0xff] %v10092_v63  ;;  %v10095_v0 = vld [vmem:[%s12640_s20 + $0x180] sm:$0xff]  ;;  %2260 = vmatpush.msrb.mxu2 %v10092_v63  ;;  %v10116_v63 = vld [vmem:[%s12640_s20 + $0x258] sm:$0xff] }
 0x7e6   :  { %2279 = vmatpush.msra.mxu3 %v10077_v54  ;;  %12693 = vst [vmem:[#allocation88_spill] sm:$0xff] %v10095_v0  ;;  %v10103_v54 = vld [vmem:[%s12640_s20 + $0x2e0] sm:$0xff] }
 0x7e7   :  { %2287 = vmatpush.msrb.mxu1 %v10084_v59  ;;  %12695 = vst [vmem:[#allocation90_spill] sm:$0xff] %v10103_v54  ;;  %v10122_v59 = vld [vmem:[%s12640_s20 + $0x370] sm:$0xff] }
 0x7e8   :  { %2280 = vmatpush.msra.mxu3 %v10095_v0  ;;  %12698 = vst [vmem:[#allocation93_spill] sm:$0xff] %v10116_v63  ;;  %v10119_v0 = vld [vmem:[%s12640_s20 + $0x2d8] sm:$0xff] }
 0x7e9   :  { %2288 = vmatpush.msrb.mxu1 %v10100_v57  ;;  %12699 = vst [vmem:[#allocation94_spill] sm:$0xff] %v10119_v0  ;;  %v10138_v57 = vld [vmem:[%s12640_s20 + $0x368] sm:$0xff] }
 0x7ea   :  { %12700 = vst [vmem:[#allocation95_spill] sm:$0xff] %v10122_v59 }
 0x7eb   :  { %2289 = vmatpush.msrb.mxu1 %v10116_v63  ;;  %12704 = vst [vmem:[#allocation99_spill] sm:$0xff] %v10138_v57  ;;  %v10154_v63 = vld [vmem:[%s12640_s20 + $0x360] sm:$0xff] }
 0x7ec   :  { %12708 = vst [vmem:[#allocation103_spill] sm:$0xff] %v10154_v63 }
 0x7ed   :  { %1708 = vmatmul.bf16.gmra.mxu1 %v9805_v1  ;;  %1727 = vmatmul.bf16.gmra.mxu0 %v9805_v1  ;;  %12746 = vst [vmem:[#allocation140_spill] sm:$0xff] %v10309_v50 }
 0x7ee   :  { %1746 = vmatmul.bf16.gmra.mxu2 %v9805_v1  ;;  %1765 = vmatmul.bf16.gmra.mxu3 %v9805_v1  ;;  %v10069_v1 = vld [vmem:[%s12640_s20 + $0x2f0] sm:$0xff] }
 0x7ef   :  { %12687 = vst [vmem:[#allocation82_spill] sm:$0xff] %v10069_v1  ;;  %2306 = vmatpush.msrb.mxu0 %v10069_v1  ;;  %v10106_v1 = vld [vmem:[%s12640_s20 + $0x378] sm:$0xff] }
 0x7f0   :  { %12696 = vst [vmem:[#allocation91_spill] sm:$0xff] %v10106_v1  ;;  %2325 = vmatpush.msra.mxu2 %v10106_v1  ;;  %v10135_v1 = vld [vmem:[%s12640_s20 + $0x2d0] sm:$0xff] }
 0x7f1   :  { %2307 = vmatpush.msrb.mxu0 %v10087_v60  ;;  %v10111_v60 = vld [vmem:[%s12640_s20 + $0x3f8] sm:$0xff]  ;;  %12703 = vst [vmem:[#allocation98_spill] sm:$0xff] %v10135_v1 }
 0x7f2   :  { %12697 = vst [vmem:[#allocation92_spill] sm:$0xff] %v10111_v60  ;;  %2345 = vmatpush.msrb.mxu3 %v10111_v60  ;;  %2326 = vmatpush.msra.mxu2 %v10122_v59  ;;  %v10132_v60 = vld [vmem:[%s12640_s20 + $0x250] sm:$0xff]  ;;  %v10151_v59 = vld [vmem:[%s12640_s20 + $0x2c8] sm:$0xff] }
 0x7f3   :  { %2308 = vmatpush.msrb.mxu0 %v10103_v54  ;;  %v10127_v54 = vld [vmem:[%s12640_s20 + $0x3f0] sm:$0xff]  ;;  %12702 = vst [vmem:[#allocation97_spill] sm:$0xff] %v10132_v60  ;;  %2290 = vmatpush.msrb.mxu1 %v10132_v60  ;;  %v10170_v60 = vld [vmem:[%s12640_s20 + $0x358] sm:$0xff] }
 0x7f4   :  { %12701 = vst [vmem:[#allocation96_spill] sm:$0xff] %v10127_v54  ;;  %2346 = vmatpush.msrb.mxu3 %v10127_v54  ;;  %2327 = vmatpush.msra.mxu2 %v10138_v57  ;;  %v10148_v54 = vld [vmem:[%s12640_s20 + $0x248] sm:$0xff]  ;;  %v10167_v57 = vld [vmem:[%s12640_s20 + $0x2c0] sm:$0xff] }
 0x7f5   :  { %2309 = vmatpush.msrb.mxu0 %v10119_v0  ;;  %v10143_v0 = vld [vmem:[%s12640_s20 + $0x3e8] sm:$0xff]  ;;  %12706 = vst [vmem:[#allocation101_spill] sm:$0xff] %v10148_v54  ;;  %2291 = vmatpush.msrb.mxu1 %v10148_v54  ;;  %v10186_v54 = vld [vmem:[%s12640_s20 + $0x350] sm:$0xff] }
 0x7f6   :  { %12705 = vst [vmem:[#allocation100_spill] sm:$0xff] %v10143_v0  ;;  %2347 = vmatpush.msrb.mxu3 %v10143_v0  ;;  %2328 = vmatpush.msra.mxu2 %v10154_v63  ;;  %v10164_v0 = vld [vmem:[%s12640_s20 + $0x240] sm:$0xff]  ;;  %v10183_v63 = vld [vmem:[%s12640_s20 + $0x2b8] sm:$0xff] }
 0x7f7   :  { %2310 = vmatpush.msrb.mxu0 %v10135_v1  ;;  %12707 = vst [vmem:[#allocation102_spill] sm:$0xff] %v10151_v59  ;;  %v10159_v1 = vld [vmem:[%s12640_s20 + $0x3e0] sm:$0xff]  ;;  %2292 = vmatpush.msrb.mxu1 %v10164_v0 }
 0x7f8   :  { %12709 = vst [vmem:[#allocation104_spill] sm:$0xff] %v10159_v1  ;;  %2348 = vmatpush.msrb.mxu3 %v10159_v1  ;;  %2329 = vmatpush.msra.mxu2 %v10170_v60  ;;  %v10180_v1 = vld [vmem:[%s12640_s20 + $0x238] sm:$0xff] }
 0x7f9   :  { %2311 = vmatpush.msrb.mxu0 %v10151_v59  ;;  %12710 = vst [vmem:[#allocation105_spill] sm:$0xff] %v10164_v0  ;;  %v10175_v59 = vld [vmem:[%s12640_s20 + $0x3d8] sm:$0xff]  ;;  %2293 = vmatpush.msrb.mxu1 %v10180_v1  ;;  %v10202_v0 = vld [vmem:[%s12640_s20 + $0x348] sm:$0xff] }
 0x7fa   :  { %12711 = vst [vmem:[#allocation106_spill] sm:$0xff] %v10167_v57  ;;  %2349 = vmatpush.msrb.mxu3 %v10175_v59  ;;  %2330 = vmatpush.msra.mxu2 %v10186_v54 }
 0x7fb   :  { %12712 = vst [vmem:[#allocation107_spill] sm:$0xff] %v10170_v60  ;;  %2312 = vmatpush.msrb.mxu0 %v10167_v57  ;;  %v10191_v57 = vld [vmem:[%s12640_s20 + $0x3d0] sm:$0xff] }
 0x7fc   :  { %12713 = vst [vmem:[#allocation108_spill] sm:$0xff] %v10175_v59  ;;  %2350 = vmatpush.msrb.mxu3 %v10191_v57  ;;  %v10196_v59 = vld [vmem:[%s12640_s20 + $0x230] sm:$0xff]  ;;  %2331 = vmatpush.msra.mxu2 %v10202_v0 }
 0x7fd   :  { %12714 = vst [vmem:[#allocation109_spill] sm:$0xff] %v10180_v1  ;;  %2313 = vmatpush.msrb.mxu0 %v10183_v63  ;;  %v10199_v60 = vld [vmem:[%s12640_s20 + $0x2b0] sm:$0xff]  ;;  %2294 = vmatpush.msrb.mxu1 %v10196_v59 }
 0x7fe   :  { %12715 = vst [vmem:[#allocation110_spill] sm:$0xff] %v10183_v63  ;;  %v10217_v63 = vld [vmem:[%s12640_s20 + $0x2a8] sm:$0xff]  ;;  %2332 = vmatpush.msra.mxu2 %v10220_v52  ;;  %v10249_v52 = vld [vmem:[%s12640_s20 + $0x298] sm:$0xff] }
 0x7ff   :  { %12716 = vst [vmem:[#allocation111_spill] sm:$0xff] %v10186_v54  ;;  %2314 = vmatpush.msrb.mxu0 %v10199_v60  ;;  %v10209_v54 = vld [vmem:[%s12640_s20 + $0x3c8] sm:$0xff] }
 0x800   :  { %12717 = vst [vmem:[#allocation112_spill] sm:$0xff] %v10191_v57  ;;  %2351 = vmatpush.msrb.mxu3 %v10209_v54  ;;  %v10214_v57 = vld [vmem:[%s12640_s20 + $0x228] sm:$0xff] }
 0x801   :  { %12718 = vst [vmem:[#allocation113_spill] sm:$0xff] %v10196_v59  ;;  %2295 = vmatpush.msrb.mxu1 %v10214_v57  ;;  %2315 = vmatpush.msrb.mxu0 %v10217_v63  ;;  %v10236_v59 = vld [vmem:[%s12640_s20 + $0x338] sm:$0xff] }
 0x802   :  { %12719 = vst [vmem:[#allocation114_spill] sm:$0xff] %v10199_v60  ;;  %v10225_v60 = vld [vmem:[%s12640_s20 + $0x3c0] sm:$0xff]  ;;  %2333 = vmatpush.msra.mxu2 %v10236_v59 }
 0x803   :  { %12720 = vst [vmem:[#allocation115_spill] sm:$0xff] %v10202_v0  ;;  %2352 = vmatpush.msrb.mxu3 %v10225_v60  ;;  %v10233_v0 = vld [vmem:[%s12640_s20 + $0x2a0] sm:$0xff] }
 0x804   :  { %12721 = vst [vmem:[#allocation116_spill] sm:$0xff] %v10209_v54  ;;  %v10230_v54 = vld [vmem:[%s12640_s20 + $0x220] sm:$0xff]  ;;  %2316 = vmatpush.msrb.mxu0 %v10233_v0 }
 0x805   :  { %12722 = vst [vmem:[#allocation117_spill] sm:$0xff] %v10214_v57  ;;  %2296 = vmatpush.msrb.mxu1 %v10230_v54  ;;  %v10252_v57 = vld [vmem:[%s12640_s20 + $0x330] sm:$0xff] }
 0x806   :  { %12723 = vst [vmem:[#allocation118_spill] sm:$0xff] %v10217_v63  ;;  %v10241_v63 = vld [vmem:[%s12640_s20 + $0x3b8] sm:$0xff]  ;;  %2317 = vmatpush.msrb.mxu0 %v10249_v52  ;;  %2334 = vmatpush.msra.mxu2 %v10252_v57 }
 0x807   :  { %12726 = vst [vmem:[#allocation120_spill] sm:$0xff] %v10225_v60  ;;  %2353 = vmatpush.msrb.mxu3 %v10241_v63  ;;  %v10246_v60 = vld [vmem:[%s12640_s20 + $0x218] sm:$0xff] }
 0x808   :  { %12727 = vst [vmem:[#allocation121_spill] sm:$0xff] %v10230_v54  ;;  %2297 = vmatpush.msrb.mxu1 %v10246_v60  ;;  %2318 = vmatpush.msrb.mxu0 %v10270_v30  ;;  %v10295_v30 = vld [vmem:[%s12640_s20 + $0x3a0] sm:$0xff] }
 0x809   :  { %12728 = vst [vmem:[#allocation122_spill] sm:$0xff] %v10233_v0  ;;  %v10260_v0 = vld [vmem:[%s12640_s20 + $0x3b0] sm:$0xff] }
 0x80a   :  { %12729 = vst [vmem:[#allocation123_spill] sm:$0xff] %v10236_v59  ;;  %2354 = vmatpush.msrb.mxu3 %v10260_v0  ;;  %2319 = vmatpush.msrb.mxu0 %v10287_v49  ;;  %v10326_v49 = vld [vmem:[%s12640_s20 + $0x390] sm:$0xff] }
 0x80b   :  { %12730 = vst [vmem:[#allocation124_spill] sm:$0xff] %v10241_v63  ;;  %v10267_v63 = vld [vmem:[%s12640_s20 + $0x210] sm:$0xff] }
 0x80c   :  { %12731 = vst [vmem:[#allocation125_spill] sm:$0xff] %v10246_v60  ;;  %v10273_v60 = vld [vmem:[%s12640_s20 + $0x328] sm:$0xff]  ;;  %2298 = vmatpush.msrb.mxu1 %v10267_v63  ;;  %2355 = vmatpush.msrb.mxu3 %v10278_v34  ;;  %v1284_v34 = vperm.slane %v10255_v24, 1 }
 0x80d   :  { %12732 = vst [vmem:[#allocation126_spill] sm:$0xff] %v10249_v52  ;;  %2335 = vmatpush.msra.mxu2 %v10273_v60  ;;  %2320 = vmatpush.msrb.mxu0 %v10306_v51 }
 0x80e   :  { %12733 = vst [vmem:[#allocation127_spill] sm:$0xff] %v10252_v57  ;;  %v10284_v57 = vld [vmem:[%s12640_s20 + $0x208] sm:$0xff]  ;;  %2356 = vmatpush.msrb.mxu3 %v10295_v30 }
 0x80f   :  { %12734 = vst [vmem:[#allocation128_spill] sm:$0xff] %v10260_v0  ;;  %v1283_v0 = vperm.slane %v10255_v24, 0  ;;  %2299 = vmatpush.msrb.mxu1 %v10284_v57  ;;  %2336 = vmatpush.msra.mxu2 %v10290_v18 }
 0x810   :  { %12735 = vst [vmem:[#allocation129_spill] sm:$0xff] %v10267_v63 }
 0x811   :  { %12737 = vst [vmem:[#allocation131_spill] sm:$0xff] %v10273_v60  ;;  %v10303_v60 = vld [vmem:[%s12640_s20 + $0x200] sm:$0xff]  ;;  %2337 = vmatpush.msra.mxu2 %v10309_v50 }
 0x812   :  { %12739 = vst [vmem:[#allocation133_spill] sm:$0xff] %v10284_v57  ;;  %2300 = vmatpush.msrb.mxu1 %v10303_v60 }
 0x813   :  { %12742 = vst [vmem:[#allocation136_spill] sm:$0xff] %v10295_v30  ;;  %v10323_v30 = vld [vmem:[%s12640_s20 + $0x310] sm:$0xff] }
 0x814   :  { %12744 = vst [vmem:[#allocation138_spill] sm:$0xff] %v10303_v60  ;;  %2338 = vmatpush.msra.mxu2 %v10323_v30 }
 0x815   :  { %12750 = vst [vmem:[#allocation144_spill] sm:$0xff] %v10323_v30  ;;  %v1286_v30 = vperm.slane %v10255_v24, 3 }
 0x816   :  { %12751 = vst [vmem:[#allocation145_spill] sm:$0xff] %v10326_v49 }
 0x83a   :  { %v1628_v58 = vpop.f32.mrf.mxu1  ;;  %v10204_v1 = vpop.f32.mrf.mxu0 }
 0x83b   :  { %v10311_v57 = vadd.f32 %v1628_v58, %v1283_v0  ;;  %v10331_v51 = vadd.f32 %v10204_v1, %v1284_v34  ;;  %v1285_v1 = vperm.slane %v10255_v24, 2 }
 0x83d   :  { %12747 = vst [vmem:[#allocation141_spill] sm:$0xff] %v10311_v57 }
 0x83e   :  { %12752 = vst [vmem:[#allocation146_spill] sm:$0xff] %v10331_v51 }
 0x841   :  { %v1666_v54 = vpop.f32.mrf.mxu2  ;;  %v10262_v59 = vpop.f32.mrf.mxu3 }
 0x842   :  { %v1630_v52 = vpop.f32.mrf.mxu1  ;;  %v1649_v55 = vpop.f32.mrf.mxu0 }
 0x843   :  { %v10297_v63 = vadd.f32 %v1630_v52, %v1283_v0  ;;  %v10316_v52 = vld [vmem:[%s12640_s20 + $0x398] sm:$0xff]  ;;  %v10318_v18 = vadd.f32 %v1649_v55, %v1284_v34  ;;  %v10336_v55 = vld [vmem:[%s12640_s20 + $0x308] sm:$0xff] }
 0x844   :  { %12748 = vst [vmem:[#allocation142_spill] sm:$0xff] %v10316_v52  ;;  %2357 = vmatpush.msrb.mxu3 %v10316_v52  ;;  %v10339_v52 = vld [vmem:[%s12640_s20 + $0x388] sm:$0xff]  ;;  %2339 = vmatpush.msra.mxu2 %v10336_v55 }
 0x845   :  { %12743 = vst [vmem:[#allocation137_spill] sm:$0xff] %v10297_v63  ;;  %v1771_v58 = vadd.f32 %v10297_v63, %v10311_v57  ;;  %v1778_v50 = vadd.f32 %v10318_v18, %v10331_v51 }
 0x846   :  { %12749 = vst [vmem:[#allocation143_spill] sm:$0xff] %v10318_v18  ;;  %2358 = vmatpush.msrb.mxu3 %v10326_v49  ;;  %2340 = vmatpush.msra.mxu2 %v10352_v61 }
 0x847   :  { %12753 = vst [vmem:[#allocation147_spill] sm:$0xff] %v10336_v55  ;;  %v1772_v31 = vrot.slane %v1771_v58, 4  ;;  %v1779_v45 = vrot.slane %v1778_v50, 4  ;;  %v10357_v55 = vadd.f32 %v1666_v54, %v1285_v1 }
 0x848   :  { %12754 = vst [vmem:[#allocation148_spill] sm:$0xff] %v10339_v52  ;;  %2359 = vmatpush.msrb.mxu3 %v10339_v52 }
 0x849   :  { %v1668_v60 = vpop.f32.mrf.mxu2  ;;  %v1687_v22 = vpop.f32.mrf.mxu3  ;;  %v1773_v36 = vadd.f32 %v1772_v31, %v1771_v58  ;;  %12759 = vst [vmem:[#allocation153_spill] sm:$0xff] %v10357_v55  ;;  %v10362_v31 = vadd.f32 %v10262_v59, %v1286_v30  ;;  %v1780_v62 = vadd.f32 %v1779_v45, %v1778_v50 }
 0x84a   :  { %v1633_v41 = vpop.f32.mrf.mxu1  ;;  %v1652_v48 = vpop.f32.mrf.mxu0  ;;  %v10347_v49 = vadd.f32 %v1668_v60, %v1285_v1  ;;  %v10349_v47 = vadd.f32 %v1687_v22, %v1286_v30  ;;  %2360 = vmatpush.msrb.mxu3 %v10355_v40 }
 0x84b   :  { %12760 = vst [vmem:[#allocation154_spill] sm:$0xff] %v10362_v31  ;;  %v10364_v60 = vadd.f32 %v1633_v41, %v1283_v0  ;;  %v10370_v25 = vadd.f32 %v1652_v48, %v1284_v34  ;;  %v1774_v54 = vrot.slane %v1773_v36, 2 }
 0x84c   :  { %12755 = vst [vmem:[#allocation149_spill] sm:$0xff] %v10347_v49  ;;  %v1785_v14 = vadd.f32 %v10347_v49, %v10357_v55  ;;  %v1792_v61 = vadd.f32 %v10349_v47, %v10362_v31 }
 0x84d   :  { %12756 = vst [vmem:[#allocation150_spill] sm:$0xff] %v10349_v47  ;;  %v1775_v40 = vadd.f32 %v1774_v54, %v1773_v36 }
 0x84e   :  { %12761 = vst [vmem:[#allocation155_spill] sm:$0xff] %v10364_v60  ;;  %v1786_v45 = vrot.slane %v1785_v14, 4  ;;  %v1793_v48 = vrot.slane %v1792_v61, 4 }
 0x84f   :  { %12764 = vst [vmem:[#allocation158_spill] sm:$0xff] %v10370_v25 }
 0x851   :  { %v1671_v46 = vpop.f32.mrf.mxu2  ;;  %v1690_v37 = vpop.f32.mrf.mxu3 }
 0x852   :  { %v1635_v38 = vpop.f32.mrf.mxu1  ;;  %v1654_v52 = vpop.f32.mrf.mxu0  ;;  %v10380_v26 = vadd.f32 %v1671_v46, %v1285_v1  ;;  %v10386_v32 = vadd.f32 %v1690_v37, %v1286_v30 }
 0x853   :  { %v10366_v22 = vadd.f32 %v1635_v38, %v1283_v0  ;;  %v10368_v58 = vadd.f32 %v1654_v52, %v1284_v34  ;;  %v1781_v0 = vrot.slane %v1780_v62, 2 }
 0x854   :  { %12765 = vst [vmem:[#allocation159_spill] sm:$0xff] %v10380_v26 }
 0x855   :  { %12762 = vst [vmem:[#allocation156_spill] sm:$0xff] %v10366_v22  ;;  %v1827_v59 = vadd.f32 %v10366_v22, %v10364_v60  ;;  %v1834_v41 = vadd.f32 %v10368_v58, %v10370_v25  ;;  %v1782_v54 = vadd.f32 %v1781_v0, %v1780_v62  ;;  %v10397_v0 = vperm.slane %v10255_v24, 4 }
 0x856   :  { %12763 = vst [vmem:[#allocation157_spill] sm:$0xff] %v10368_v58 }
 0x857   :  { %v1828_v38 = vrot.slane %v1827_v59, 4  ;;  %v1835_v52 = vrot.slane %v1834_v41, 4  ;;  %12768 = vst [vmem:[#allocation162_spill] sm:$0xff] %v10386_v32  ;;  %v1783_v37 = vrot.slane %v1782_v54, 1 }
 0x859   :  { %v1829_v50 = vadd.f32 %v1828_v38, %v1827_v59  ;;  %v1673_v34 = vpop.f32.mrf.mxu2  ;;  %v1692_v9 = vpop.f32.mrf.mxu3  ;;  %v1836_v19 = vadd.f32 %v1835_v52, %v1834_v41  ;;  %v1794_v59 = vadd.f32 %v1793_v48, %v1792_v61  ;;  %v1787_v41 = vadd.f32 %v1786_v45, %v1785_v14 }
 0x85a   :  { %v10382_v35 = vadd.f32 %v1673_v34, %v1285_v1  ;;  %v10384_v33 = vadd.f32 %v1692_v9, %v1286_v30  ;;  %v1704_v20 = vpop.f32.mrf.mxu1  ;;  %v1723_v13 = vpop.f32.mrf.mxu0  ;;  %v1776_v52 = vrot.slane %v1775_v40, 1 }
 0x85b   :  { %v1830_v29 = vrot.slane %v1829_v50, 2  ;;  %v1837_v15 = vrot.slane %v1836_v19, 2  ;;  %v1795_v30 = vrot.slane %v1794_v59, 2 }
 0x85c   :  { %12766 = vst [vmem:[#allocation160_spill] sm:$0xff] %v10382_v35  ;;  %v1841_v36 = vadd.f32 %v10382_v35, %v10380_v26  ;;  %v1848_v46 = vadd.f32 %v10384_v33, %v10386_v32  ;;  %v1777_v48 = vadd.f32 %v1776_v52, %v1775_v40  ;;  %v10409_v40 = vadd.f32 %v1704_v20, %v10397_v0 }
 0x85d   :  { %12767 = vst [vmem:[#allocation161_spill] sm:$0xff] %v10384_v33  ;;  %v1831_v38 = vadd.f32 %v1830_v29, %v1829_v50  ;;  %v1838_v11 = vadd.f32 %v1837_v15, %v1836_v19  ;;  %v1788_v29 = vrot.slane %v1787_v41, 2  ;;  %v10400_v15 = vperm.slane %v10255_v24, 5 }
 0x85e   :  { %v1842_v1 = vrot.slane %v1841_v36, 4  ;;  %v1849_v9 = vrot.slane %v1848_v46, 4  ;;  %12770 = vst [vmem:[#allocation164_spill] sm:$0xff] %v10409_v40 }
 0x85f   :  { %v1832_v34 = vrot.slane %v1831_v38, 1  ;;  %v1839_v61 = vrot.slane %v1838_v11, 1  ;;  %v10421_v20 = vadd.f32 %v1723_v13, %v10400_v15  ;;  %v10432_v13 = vperm.slane %v10255_v24, 6 }
 0x860   :  { %v1843_v27 = vadd.f32 %v1842_v1, %v1841_v36  ;;  %v1850_v28 = vadd.f32 %v1849_v9, %v1848_v46  ;;  %v1784_v46 = vadd.f32 %v1783_v37, %v1782_v54  ;;  %v1891_v1 = vmul.f32 %v10297_v63, %v10297_v63  ;;  %v11182_v63 = vld [vmem:[#allocation2 + $0x6a0] sm:$0xf] }
 0x861   :  { %v10392_v12 = vpop.f32.mrf.mxu2  ;;  %v10394_v8 = vpop.f32.mrf.mxu3  ;;  %v1833_v62 = vadd.f32 %v1832_v34, %v1831_v38  ;;  %v1840_v38 = vadd.f32 %v1839_v61, %v1838_v11  ;;  %v1796_v9 = vadd.f32 %v1795_v30, %v1794_v59  ;;  %v1883_v11 = vmul.f32 %v10311_v57, %v10311_v57  ;;  %12772 = vst [vmem:[#allocation166_spill] sm:$0xff] %v10421_v20  ;;  %v11184_v57 = vld [vmem:[#allocation2 + $0x6ac] sm:$0xf0] }
 0x862   :  { %v1706_v14 = vpop.f32.mrf.mxu1  ;;  %v1725_v45 = vpop.f32.mrf.mxu0  ;;  %v1844_v50 = vrot.slane %v1843_v27, 2  ;;  %v1851_v33 = vrot.slane %v1850_v28, 2  ;;  %v1907_v30 = vmul.f32 %v10366_v22, %v10366_v22  ;;  %v11164_v22 = vld [vmem:[#allocation2 + $0x7cc] sm:$0xf0] }
 0x863   :  { %v10403_v19 = vadd.f32 %v1706_v14, %v10397_v0  ;;  %v2189_v36 = vsel %vm299_vm3, %v1833_v62, %v1777_v48  ;;  %v10412_v52 = vadd.f32 %v1725_v45, %v10400_v15  ;;  %v2190_v35 = vsel %vm299_vm3, %v1840_v38, %v1784_v46 }
 0x864   :  { %v1852_v34 = vadd.f32 %v1851_v33, %v1850_v28  ;;  %2221 = vmatmul.f32.vlgmr.msra.gmra.mxu1 %v2189_v36  ;;  %v1789_v14 = vadd.f32 %v1788_v29, %v1787_v41  ;;  %2241 = vmatmul.f32.vlgmr.msra.gmra.mxu0 %v2190_v35  ;;  %v1845_v54 = vadd.f32 %v1844_v50, %v1843_v27  ;;  %v1797_v41 = vrot.slane %v1796_v9, 1 }
 0x865   :  { %12769 = vst [vmem:[#allocation163_spill] sm:$0xff] %v10403_v19  ;;  %2398 = vmatpush.msra.mxu1 %v9812_v39  ;;  %v1892_v28 = vmul.f32 %v10318_v18, %v10318_v18  ;;  %v1799_v33 = vadd.f32 %v10403_v19, %v10409_v40  ;;  %2418 = vmatpush.msra.mxu0 %v9815_v42  ;;  %v10441_v45 = vperm.slane %v10255_v24, 7  ;;  %v11144_v18 = vld [vmem:[#allocation2 + $0x5c0] sm:$0xf] }
 0x866   :  { %12771 = vst [vmem:[#allocation165_spill] sm:$0xff] %v10412_v52  ;;  %v1853_v37 = vrot.slane %v1852_v34, 1  ;;  %v1884_v39 = vmul.f32 %v10331_v51, %v10331_v51  ;;  %v1915_v59 = vadd.f32 %v1891_v1, %v1883_v11  ;;  %v1806_v62 = vadd.f32 %v10412_v52, %v10421_v20  ;;  %v11162_v51 = vld [vmem:[#allocation2 + $0x7c0] sm:$0xf] }
 0x867   :  { %2399 = vmatpush.msra.mxu1 %v9818_v2  ;;  %2419 = vmatpush.msra.mxu0 %v9823_v3  ;;  %v1790_v61 = vrot.slane %v1789_v14, 1  ;;  %v1885_v29 = vmul.f32 %v10357_v55, %v10357_v55  ;;  %v1846_v48 = vrot.slane %v1845_v54, 1  ;;  %v1886_v36 = vmul.f32 %v10362_v31, %v10362_v31 }
 0x868   :  { %v1854_v50 = vadd.f32 %v1853_v37, %v1852_v34  ;;  %v1922_v46 = vadd.f32 %v1892_v28, %v1884_v39  ;;  %v1899_v3 = vmul.f32 %v10364_v60, %v10364_v60  ;;  %v1800_v38 = vrot.slane %v1799_v33, 4  ;;  %v11166_v60 = vld [vmem:[#allocation2 + $0x4a0] sm:$0xf] }
 0x869   :  { %v1744_v35 = vpop.f32.mrf.mxu2  ;;  %v1763_v27 = vpop.f32.mrf.mxu3  ;;  %2400 = vmatpush.msra.mxu1 %v9826_v4  ;;  %2420 = vmatpush.msra.mxu0 %v9829_v5  ;;  %v1916_v4 = vrot.slane %v1915_v59, 4  ;;  %v1893_v1 = vmul.f32 %v10347_v49, %v10347_v49  ;;  %v1798_v34 = vadd.f32 %v1797_v41, %v1796_v9  ;;  %v1908_v37 = vmul.f32 %v10368_v58, %v10368_v58  ;;  %v12813_v49 = vld [vmem:[#allocation65_spill] sm:$0xff]  ;;  %v12816_v58 = vld [vmem:[#allocation64_spill] sm:$0xff] }
 0x86a   :  { %v1709_v42 = vpop.f32.mrf.mxu1  ;;  %v1728_v2 = vpop.f32.mrf.mxu0  ;;  %v10452_v24 = vadd.f32 %v1744_v35, %v10432_v13  ;;  %v1971_v11 = vadd.f32 %v1907_v30, %v1899_v3  ;;  %v1807_v28 = vrot.slane %v1806_v62, 4  ;;  %v1791_v39 = vadd.f32 %v1790_v61, %v1789_v14 }
 0x86b   :  { %2401 = vmatpush.msra.mxu1 %v9837_v44  ;;  %2421 = vmatpush.msra.mxu0 %v9843_v7  ;;  %v10460_v5 = vadd.f32 %v10392_v12, %v10432_v13  ;;  %v10463_v44 = vadd.f32 %v1763_v27, %v10441_v45  ;;  %v1847_v35 = vadd.f32 %v1846_v48, %v1845_v54  ;;  %v1923_v41 = vrot.slane %v1922_v46, 4 }
 0x86c   :  { %12773 = vst [vmem:[#allocation167_spill] sm:$0xff] %v10452_v24  ;;  %v2192_v9 = vsel %vm299_vm3, %v1854_v50, %v1798_v34  ;;  %v1894_v30 = vmul.f32 %v10349_v47, %v10349_v47  ;;  %v1900_v14 = vmul.f32 %v10370_v25, %v10370_v25  ;;  %v1801_v7 = vadd.f32 %v1800_v38, %v1799_v33  ;;  %v12810_v47 = vld [vmem:[#allocation62_spill] sm:$0xff] }
 0x86d   :  { %2402 = vmatpush.msra.mxu1 %v9862_v53  ;;  %12774 = vst [vmem:[#allocation168_spill] sm:$0xff] %v10460_v5  ;;  %2281 = vmatmul.f32.vlgmr.msra.gmra.mxu3 %v2192_v9  ;;  %v10473_v12 = vadd.f32 %v10394_v8, %v10441_v45  ;;  %v1813_v53 = vadd.f32 %v10452_v24, %v10460_v5  ;;  %v1972_v3 = vrot.slane %v1971_v11, 4  ;;  %v11142_v25 = vld [vmem:[#allocation2 + $0x4cc] sm:$0xf0] }
 0x86e   :  { %12775 = vst [vmem:[#allocation169_spill] sm:$0xff] %v10463_v44  ;;  %2422 = vmatpush.msra.mxu0 %v9865_v56  ;;  %v2191_v54 = vsel %vm299_vm3, %v1847_v35, %v1791_v39  ;;  %2458 = vmatpush.msra.mxu3 %v9840_v6  ;;  %v1978_v48 = vadd.f32 %v1908_v37, %v1900_v14  ;;  %v12781_v37 = vld [vmem:[#allocation36_spill] sm:$0xff]  ;;  %v12785_v39 = vld [vmem:[#allocation37_spill] sm:$0xff] }
 0x86f   :  { %12776 = vst [vmem:[#allocation170_spill] sm:$0xff] %v10473_v12  ;;  %2403 = vmatpush.msra.mxu1 %v9878_v16  ;;  %v1808_v33 = vadd.f32 %v1807_v28, %v1806_v62  ;;  %v10481_v50 = vadd.f32 %v1709_v42, %v10397_v0  ;;  %2261 = vmatmul.f32.vlgmr.msrb.gmra.mxu2 %v2191_v54  ;;  %v12782_v28 = vld [vmem:[#allocation38_spill] sm:$0xff]  ;;  %v12786_v35 = vld [vmem:[#allocation40_spill] sm:$0xff]  ;;  %v12788_v14 = vld [vmem:[#allocation161_spill] sm:$0xff] }
 0x870   :  { %2423 = vmatpush.msra.mxu0 %v9881_v17  ;;  %v1820_v38 = vadd.f32 %v10463_v44, %v10473_v12  ;;  %2438 = vmatpush.msrb.mxu2 %v9832_v43  ;;  %v10494_v62 = vadd.f32 %v1916_v4, %v1915_v59  ;;  %v10496_v42 = vadd.f32 %v1923_v41, %v1922_v46  ;;  %v1802_v17 = vrot.slane %v1801_v7, 2  ;;  %v12787_v41 = vld [vmem:[#allocation160_spill] sm:$0xff] }
 0x871   :  { %v1747_v27 = vpop.f32.mrf.mxu2  ;;  %v1766_v61 = vpop.f32.mrf.mxu3  ;;  %12777 = vst [vmem:[#allocation171_spill] sm:$0xff] %v10481_v50  ;;  %2459 = vmatpush.msra.mxu3 %v9851_v10  ;;  %v10499_v34 = vadd.f32 %v1728_v2, %v10400_v15  ;;  %2404 = vmatpush.msra.mxu1 %v9894_v21  ;;  %v10503_v43 = vadd.f32 %v1893_v1, %v1885_v29  ;;  %v1979_v2 = vrot.slane %v1978_v48, 4  ;;  %v12783_v29 = vld [vmem:[#allocation45_spill] sm:$0xff]  ;;  %v1809_v4 = vrot.slane %v1808_v33, 2 }
 0x872   :  { %v1711_v8 = vpop.f32.mrf.mxu1  ;;  %v1730_v56 = vpop.f32.mrf.mxu0  ;;  %2424 = vmatpush.msra.mxu0 %v9897_v23  ;;  %v10505_v10 = vadd.f32 %v1894_v30, %v1886_v36  ;;  %2439 = vmatpush.msrb.mxu2 %v12781_v37  ;;  %v1902_v21 = vmul.f32 %v10386_v32, %v10386_v32  ;;  %v12784_v36 = vld [vmem:[#allocation46_spill] sm:$0xff]  ;;  %v10519_v46 = vadd.f32 %v1972_v3, %v1971_v11  ;;  %v1821_v1 = vrot.slane %v1820_v38, 4  ;;  %v12789_v37 = vld [vmem:[#allocation49_spill] sm:$0xff] }
 0x873   :  { %v10489_v6 = vadd.f32 %v1711_v8, %v10397_v0  ;;  %v10492_v16 = vadd.f32 %v1730_v56, %v10400_v15  ;;  %12780 = vst [vmem:[#allocation174_spill] sm:$0xff] %v10499_v34  ;;  %v1814_v0 = vrot.slane %v1813_v53, 4  ;;  %2460 = vmatpush.msra.mxu3 %v12782_v28  ;;  %v1901_v15 = vmul.f32 %v10380_v26, %v10380_v26  ;;  %v12790_v28 = vld [vmem:[#allocation50_spill] sm:$0xff] }
 0x874   :  { %2405 = vmatpush.msra.mxu1 %v12783_v29  ;;  %2425 = vmatpush.msra.mxu0 %v12784_v36  ;;  %v1909_v30 = vmul.f32 %v12787_v41, %v12787_v41  ;;  %v1910_v54 = vmul.f32 %v12788_v14, %v12788_v14  ;;  %v1803_v8 = vadd.f32 %v1802_v17, %v1801_v7  ;;  %v12792_v29 = vld [vmem:[#allocation39_spill] sm:$0xff]  ;;  %v1918_v14 = vrot.slane %v10494_v62, 2 }
 0x875   :  { %12778 = vst [vmem:[#allocation172_spill] sm:$0xff] %v10489_v6  ;;  %v1855_v59 = vadd.f32 %v10489_v6, %v10481_v50  ;;  %v1862_v23 = vadd.f32 %v10492_v16, %v10499_v34  ;;  %2440 = vmatpush.msrb.mxu2 %v12785_v39  ;;  %2461 = vmatpush.msra.mxu3 %v12786_v35  ;;  %v12793_v39 = vld [vmem:[#allocation42_spill] sm:$0xff]  ;;  %v12794_v17 = vld [vmem:[#allocation51_spill] sm:$0xff] }
 0x876   :  { %12779 = vst [vmem:[#allocation173_spill] sm:$0xff] %v10492_v16  ;;  %2406 = vmatpush.msra.mxu1 %v12789_v37  ;;  %2426 = vmatpush.msra.mxu0 %v12790_v28  ;;  %v10529_v11 = vadd.f32 %v1814_v0, %v1813_v53  ;;  %v10532_v3 = vadd.f32 %v1747_v27, %v10432_v13  ;;  %v12795_v37 = vld [vmem:[#allocation52_spill] sm:$0xff]  ;;  %v12799_v28 = vld [vmem:[#allocation41_spill] sm:$0xff]  ;;  %v12811_v41 = vld [vmem:[#allocation55_spill] sm:$0xff] }
 0x877   :  { %v1856_v9 = vrot.slane %v1855_v59, 4  ;;  %v1863_v56 = vrot.slane %v1862_v23, 4  ;;  %2441 = vmatpush.msrb.mxu2 %v12792_v29  ;;  %2462 = vmatpush.msra.mxu3 %v12793_v39  ;;  %v1822_v0 = vadd.f32 %v1821_v1, %v1820_v38  ;;  %v12800_v29 = vld [vmem:[#allocation44_spill] sm:$0xff]  ;;  %v1985_v39 = vadd.f32 %v1909_v30, %v1901_v15  ;;  %v12803_v1 = vld [vmem:[#allocation43_spill] sm:$0xff] }
 0x878   :  { %12791 = vst [vmem:[#allocation36_spill] sm:$0xff] %v10532_v3  ;;  %2407 = vmatpush.msra.mxu1 %v12794_v17  ;;  %2427 = vmatpush.msra.mxu0 %v12795_v37  ;;  %v12804_v37 = vld [vmem:[#allocation48_spill] sm:$0xff]  ;;  %v1804_v30 = vrot.slane %v1803_v8, 1 }
 0x879   :  { %v1857_v36 = vadd.f32 %v1856_v9, %v1855_v59  ;;  %v1749_v35 = vpop.f32.mrf.mxu2  ;;  %v1768_v32 = vpop.f32.mrf.mxu3  ;;  %v1864_v7 = vadd.f32 %v1863_v56, %v1862_v23  ;;  %v10546_v59 = vadd.f32 %v1766_v61, %v10441_v45  ;;  %2442 = vmatpush.msrb.mxu2 %v12799_v28  ;;  %2463 = vmatpush.msra.mxu3 %v12800_v29  ;;  %v1823_v29 = vrot.slane %v1822_v0, 2 }
 0x87a   :  { %v10540_v53 = vadd.f32 %v1749_v35, %v10432_v13  ;;  %v10543_v27 = vadd.f32 %v1768_v32, %v10441_v45  ;;  %v1810_v23 = vadd.f32 %v1809_v4, %v1808_v33  ;;  %v10550_v56 = vadd.f32 %v1979_v2, %v1978_v48  ;;  %v12801_v35 = vld [vmem:[#allocation53_spill] sm:$0xff]  ;;  %v12802_v32 = vld [vmem:[#allocation54_spill] sm:$0xff] }
 0x87b   :  { %12798 = vst [vmem:[#allocation46_spill] sm:$0xff] %v10546_v59  ;;  %v1858_v9 = vrot.slane %v1857_v36, 2  ;;  %v1865_v17 = vrot.slane %v1864_v7, 2  ;;  %2408 = vmatpush.msra.mxu1 %v12801_v35  ;;  %2428 = vmatpush.msra.mxu0 %v12802_v32  ;;  %v1930_v45 = vrot.slane %v10503_v43, 4  ;;  %v1992_v61 = vadd.f32 %v1910_v54, %v1902_v21  ;;  %v12805_v2 = vld [vmem:[#allocation57_spill] sm:$0xff]  ;;  %v12806_v4 = vld [vmem:[#allocation58_spill] sm:$0xff] }
 0x87c   :  { %12796 = vst [vmem:[#allocation38_spill] sm:$0xff] %v10540_v53  ;;  %v1869_v13 = vadd.f32 %v10540_v53, %v10532_v3  ;;  %2443 = vmatpush.msrb.mxu2 %v12803_v1  ;;  %2464 = vmatpush.msra.mxu3 %v12804_v37  ;;  %v1876_v48 = vadd.f32 %v10543_v27, %v10546_v59  ;;  %v1816_v33 = vrot.slane %v10529_v11, 2  ;;  %v12807_v35 = vld [vmem:[#allocation47_spill] sm:$0xff]  ;;  %v12808_v54 = vld [vmem:[#allocation56_spill] sm:$0xff]  ;;  %v1986_v32 = vrot.slane %v1985_v39, 4  ;;  %v12809_v37 = vld [vmem:[#allocation61_spill] sm:$0xff] }
 0x87d   :  { %12797 = vst [vmem:[#allocation45_spill] sm:$0xff] %v10543_v27  ;;  %v1859_v38 = vadd.f32 %v1858_v9, %v1857_v36  ;;  %2409 = vmatpush.msra.mxu1 %v12805_v2  ;;  %2429 = vmatpush.msra.mxu0 %v12806_v4  ;;  %v1866_v28 = vadd.f32 %v1865_v17, %v1864_v7  ;;  %v1811_v9 = vrot.slane %v1810_v23, 1  ;;  %v1974_v4 = vrot.slane %v10519_v46, 2 }
 0x87e   :  { %v1870_v15 = vrot.slane %v1869_v13, 4  ;;  %2444 = vmatpush.msrb.mxu2 %v12807_v35  ;;  %v1877_v21 = vrot.slane %v1876_v48, 4  ;;  %2465 = vmatpush.msra.mxu3 %v12808_v54  ;;  %v1919_v2 = vadd.f32 %v1918_v14, %v10494_v62  ;;  %v1993_v7 = vrot.slane %v1992_v61, 4  ;;  %v12812_v35 = vld [vmem:[#allocation60_spill] sm:$0xff]  ;;  %v12815_v14 = vld [vmem:[#allocation59_spill] sm:$0xff] }
 0x87f   :  { %v1860_v36 = vrot.slane %v1859_v38, 1  ;;  %2410 = vmatpush.msra.mxu1 %v12809_v37  ;;  %2430 = vmatpush.msra.mxu0 %v12810_v47  ;;  %v1867_v31 = vrot.slane %v1866_v28, 1  ;;  %v1981_v47 = vrot.slane %v10550_v56, 2  ;;  %v1824_v55 = vadd.f32 %v1823_v29, %v1822_v0  ;;  %v12819_v0 = vld [vmem:[#allocation63_spill] sm:$0xff] }
 0x880   :  { %v1871_v1 = vadd.f32 %v1870_v15, %v1869_v13  ;;  %v1878_v17 = vadd.f32 %v1877_v21, %v1876_v48  ;;  %2445 = vmatpush.msrb.mxu2 %v12811_v41  ;;  %2466 = vmatpush.msra.mxu3 %v12812_v35  ;;  %v12814_v13 = vld [vmem:[#allocation66_spill] sm:$0xff]  ;;  %v1805_v15 = vadd.f32 %v1804_v30, %v1803_v8  ;;  %v12820_v30 = vld [vmem:[#allocation68_spill] sm:$0xff]  ;;  %v1920_v29 = vrot.slane %v1919_v2, 1 }
 0x881   :  { %v1861_v54 = vadd.f32 %v1860_v36, %v1859_v38  ;;  %2411 = vmatpush.msra.mxu1 %v12813_v49  ;;  %2431 = vmatpush.msra.mxu0 %v12814_v13  ;;  %v1868_v37 = vadd.f32 %v1867_v31, %v1866_v28  ;;  %v1812_v48 = vadd.f32 %v1811_v9, %v1810_v23  ;;  %v1937_v49 = vrot.slane %v10505_v10, 4  ;;  %v12817_v36 = vld [vmem:[#allocation69_spill] sm:$0xff]  ;;  %v12818_v31 = vld [vmem:[#allocation70_spill] sm:$0xff]  ;;  %v12823_v9 = vld [vmem:[#allocation67_spill] sm:$0xff] }
 0x882   :  { %v1872_v26 = vrot.slane %v1871_v1, 2  ;;  %v1879_v62 = vrot.slane %v1878_v17, 2  ;;  %2446 = vmatpush.msrb.mxu2 %v12815_v14  ;;  %2467 = vmatpush.msra.mxu3 %v12816_v58  ;;  %v1817_v41 = vadd.f32 %v1816_v33, %v10529_v11  ;;  %v10579_v38 = vadd.f32 %v1930_v45, %v10503_v43  ;;  %v12821_v33 = vld [vmem:[#allocation73_spill] sm:$0xff] }
 0x883   :  { %v1987_v21 = vadd.f32 %v1986_v32, %v1985_v39  ;;  %2412 = vmatpush.msra.mxu1 %v12817_v36  ;;  %2432 = vmatpush.msra.mxu0 %v12818_v31  ;;  %v2193_v58 = vsel %vm299_vm3, %v1861_v54, %v1805_v15  ;;  %v2194_v23 = vsel %vm299_vm3, %v1868_v37, %v1812_v48  ;;  %v1925_v43 = vrot.slane %v10496_v42, 2  ;;  %v12822_v39 = vld [vmem:[#allocation74_spill] sm:$0xff]  ;;  %v12824_v32 = vld [vmem:[#allocation72_spill] sm:$0xff]  ;;  %v12827_v48 = vld [vmem:[#allocation77_spill] sm:$0xff] }
 0x884   :  { %v1873_v8 = vadd.f32 %v1872_v26, %v1871_v1  ;;  %2447 = vmatpush.msrb.mxu2 %v12819_v0  ;;  %2468 = vmatpush.msra.mxu3 %v12820_v30  ;;  %v1880_v11 = vadd.f32 %v1879_v62, %v1878_v17  ;;  %v1994_v45 = vadd.f32 %v1993_v7, %v1992_v61  ;;  %v1818_v1 = vrot.slane %v1817_v41, 1  ;;  %v12825_v61 = vld [vmem:[#allocation71_spill] sm:$0xff]  ;;  %v12826_v7 = vld [vmem:[#allocation76_spill] sm:$0xff] }
 0x885   :  { %2413 = vmatpush.msra.mxu1 %v12821_v33  ;;  %2433 = vmatpush.msra.mxu0 %v12822_v39  ;;  %v1975_v26 = vadd.f32 %v1974_v4, %v10519_v46  ;;  %v1825_v35 = vrot.slane %v1824_v55, 1  ;;  %v1982_v17 = vadd.f32 %v1981_v47, %v10550_v56  ;;  %v1938_v13 = vadd.f32 %v1937_v49, %v10505_v10  ;;  %v12828_v56 = vld [vmem:[#allocation78_spill] sm:$0xff]  ;;  %v12829_v49 = vld [vmem:[#allocation75_spill] sm:$0xff]  ;;  %v12830_v36 = vld [vmem:[#allocation80_spill] sm:$0xff] }
 0x886   :  { %v1874_v28 = vrot.slane %v1873_v8, 1  ;;  %2448 = vmatpush.msrb.mxu2 %v12823_v9  ;;  %2469 = vmatpush.msra.mxu3 %v12824_v32  ;;  %v1881_v54 = vrot.slane %v1880_v11, 1  ;;  %v1926_v46 = vadd.f32 %v1925_v43, %v10496_v42  ;;  %v1988_v4 = vrot.slane %v1987_v21, 2  ;;  %v12832_v43 = vld [vmem:[#allocation82_spill] sm:$0xff]  ;;  %v12833_v33 = vld [vmem:[#allocation79_spill] sm:$0xff]  ;;  %v12835_v32 = vld [vmem:[#allocation85_spill] sm:$0xff] }
 0x887   :  { %2301 = vmatmul.f32.vlgmr.msrb.gmra.mxu1 %v2193_v58  ;;  %2321 = vmatmul.f32.vlgmr.msrb.gmra.mxu0 %v2194_v23  ;;  %v1995_v62 = vrot.slane %v1994_v45, 2  ;;  %v1895_v14 = vmul.f32 %v10403_v19, %v10403_v19  ;;  %v1921_v10 = vadd.f32 %v1920_v29, %v1919_v2  ;;  %v1976_v47 = vrot.slane %v1975_v26, 1  ;;  %v11138_v19 = vld [vmem:[#allocation2 + $0x7ec] sm:$0xf0] }
 0x888   :  { %2449 = vmatpush.msrb.mxu2 %v12825_v61  ;;  %2470 = vmatpush.msra.mxu3 %v12826_v7  ;;  %v1875_v15 = vadd.f32 %v1874_v28, %v1873_v8  ;;  %v1882_v37 = vadd.f32 %v1881_v54, %v1880_v11  ;;  %v1819_v31 = vadd.f32 %v1818_v1, %v1817_v41  ;;  %v1983_v0 = vrot.slane %v1982_v17, 1  ;;  %v12831_v11 = vld [vmem:[#allocation81_spill] sm:$0xff]  ;;  %v12836_v1 = vld [vmem:[#allocation86_spill] sm:$0xff]  ;;  %v12837_v7 = vld [vmem:[#allocation83_spill] sm:$0xff] }
 0x889   :  { %2478 = vmatpush.msrb.mxu1 %v12827_v48  ;;  %2498 = vmatpush.msrb.mxu0 %v12828_v56  ;;  %v1826_v8 = vadd.f32 %v1825_v35, %v1824_v55  ;;  %v1932_v42 = vrot.slane %v10579_v38, 2  ;;  %v1939_v30 = vrot.slane %v1938_v13, 2  ;;  %v1896_v58 = vmul.f32 %v10412_v52, %v10412_v52  ;;  %v12834_v55 = vld [vmem:[#allocation84_spill] sm:$0xff] }
 0x88a   :  { %2450 = vmatpush.msrb.mxu2 %v12829_v49  ;;  %2471 = vmatpush.msra.mxu3 %v12830_v36  ;;  %v1911_v23 = vmul.f32 %v10489_v6, %v10489_v6  ;;  %v1912_v2 = vmul.f32 %v10492_v16, %v10492_v16  ;;  %v2195_v41 = vsel %vm299_vm3, %v1875_v15, %v1819_v31  ;;  %v1927_v28 = vrot.slane %v1926_v46, 1  ;;  %v12838_v48 = vld [vmem:[#allocation88_spill] sm:$0xff]  ;;  %v12841_v31 = vld [vmem:[#allocation90_spill] sm:$0xff] }
 0x88b   :  { %2479 = vmatpush.msrb.mxu1 %v12831_v11  ;;  %2499 = vmatpush.msrb.mxu0 %v12832_v43  ;;  %v2196_v39 = vsel %vm299_vm3, %v1882_v37, %v1826_v8  ;;  %v1989_v29 = vadd.f32 %v1988_v4, %v1987_v21  ;;  %v1903_v9 = vmul.f32 %v10481_v50, %v10481_v50  ;;  %v12842_v8 = vld [vmem:[#allocation91_spill] sm:$0xff]  ;;  %v11103_v16 = vld [vmem:[#allocation2 + $0x20c] sm:$0xf0] }
 0x88c   :  { %2451 = vmatpush.msrb.mxu2 %v12833_v33  ;;  %2472 = vmatpush.msra.mxu3 %v12834_v55  ;;  %v1977_v35 = vadd.f32 %v1976_v47, %v1975_v26  ;;  %v1996_v54 = vadd.f32 %v1995_v62, %v1994_v45  ;;  %v1904_v61 = vmul.f32 %v10499_v34, %v10499_v34  ;;  %v12839_v62 = vld [vmem:[#allocation87_spill] sm:$0xff]  ;;  %v12840_v47 = vld [vmem:[#allocation89_spill] sm:$0xff] }
 0x88d   :  { %2480 = vmatpush.msrb.mxu1 %v12835_v32  ;;  %2500 = vmatpush.msrb.mxu0 %v12836_v1  ;;  %v1984_v15 = vadd.f32 %v1983_v0, %v1982_v17  ;;  %v1933_v37 = vadd.f32 %v1932_v42, %v10579_v38  ;;  %v1887_v21 = vmul.f32 %v10409_v40, %v10409_v40  ;;  %v1990_v36 = vrot.slane %v1989_v29, 1  ;;  %v11118_v34 = vld [vmem:[#allocation2 + $0x4ec] sm:$0xf0]  ;;  %v11120_v52 = vld [vmem:[#allocation2 + $0x5e0] sm:$0xf] }
 0x88e   :  { %2452 = vmatpush.msrb.mxu2 %v12837_v7  ;;  %2473 = vmatpush.msra.mxu3 %v12838_v48  ;;  %v1999_v4 = vadd.f32 %v1911_v23, %v1903_v9  ;;  %v1940_v56 = vadd.f32 %v1939_v30, %v1938_v13  ;;  %v1888_v45 = vmul.f32 %v10421_v20, %v10421_v20  ;;  %v1997_v0 = vrot.slane %v1996_v54, 1  ;;  %v12843_v23 = vld [vmem:[#allocation92_spill] sm:$0xff]  ;;  %v12848_v7 = vld [vmem:[#allocation97_spill] sm:$0xff] }
 0x88f   :  { %2341 = vmatmul.f32.vlgmr.msra.gmra.mxu2 %v2195_v41  ;;  %2361 = vmatmul.f32.vlgmr.msrb.gmra.mxu3 %v2196_v39  ;;  %v2006_v26 = vadd.f32 %v1912_v2, %v1904_v61  ;;  %v1928_v49 = vadd.f32 %v1927_v28, %v1926_v46  ;;  %v1943_v17 = vadd.f32 %v1895_v14, %v1887_v21  ;;  %v1934_v14 = vrot.slane %v1933_v37, 1  ;;  %v12845_v39 = vld [vmem:[#allocation94_spill] sm:$0xff]  ;;  %v12846_v28 = vld [vmem:[#allocation95_spill] sm:$0xff]  ;;  %v12847_v61 = vld [vmem:[#allocation96_spill] sm:$0xff] }
 0x890   :  { %2453 = vmatpush.msrb.mxu2 %v12839_v62  ;;  %2481 = vmatpush.msrb.mxu1 %v12840_v47  ;;  %v1913_v38 = vmul.f32 %v10540_v53, %v10540_v53  ;;  %v2382_v13 = vsel %vm299_vm3, %v1977_v35, %v1921_v10  ;;  %v1950_v42 = vadd.f32 %v1896_v58, %v1888_v45  ;;  %v2000_v43 = vrot.slane %v1999_v4, 4  ;;  %v12844_v10 = vld [vmem:[#allocation93_spill] sm:$0xff]  ;;  %v12849_v62 = vld [vmem:[#allocation98_spill] sm:$0xff]  ;;  %v12850_v47 = vld [vmem:[#allocation99_spill] sm:$0xff] }
 0x891   :  { %2501 = vmatpush.msrb.mxu0 %v12841_v31  ;;  %v1914_v30 = vmul.f32 %v10543_v27, %v10543_v27  ;;  %2538 = vmatpush.msrb.mxu3 %v12843_v23  ;;  %v2383_v46 = vsel %vm299_vm3, %v1984_v15, %v1928_v49  ;;  %v1897_v2 = vmul.f32 %v10452_v24, %v10452_v24  ;;  %v1941_v58 = vrot.slane %v1940_v56, 1  ;;  %v12851_v31 = vld [vmem:[#allocation100_spill] sm:$0xff]  ;;  %v11095_v53 = vld [vmem:[#allocation2 + $0xc] sm:$0xf0] }
 0x892   :  { %2518 = vmatpush.msra.mxu2 %v12842_v8  ;;  %2414 = vmatmul.f32.vlgmr.msra.gmra.mxu1 %v2382_v13  ;;  %v1905_v11 = vmul.f32 %v10532_v3, %v10532_v3  ;;  %v1898_v33 = vmul.f32 %v10463_v44, %v10463_v44  ;;  %v1906_v55 = vmul.f32 %v10546_v59, %v10546_v59  ;;  %v2007_v41 = vrot.slane %v2006_v26, 4  ;;  %v11097_v3 = vld [vmem:[#allocation2 + $0x100] sm:$0xf]  ;;  %v11099_v24 = vld [vmem:[#allocation2 + $0x10c] sm:$0xf0] }
 0x893   :  { %2434 = vmatmul.f32.vlgmr.msra.gmra.mxu0 %v2383_v46  ;;  %2482 = vmatpush.msrb.mxu1 %v12844_v10  ;;  %v1991_v9 = vadd.f32 %v1990_v36, %v1989_v29  ;;  %v1889_v32 = vmul.f32 %v10460_v5, %v10460_v5  ;;  %v1944_v1 = vrot.slane %v1943_v17, 4  ;;  %v1998_v48 = vadd.f32 %v1997_v0, %v1996_v54  ;;  %v12853_v54 = vld [vmem:[#allocation102_spill] sm:$0xff]  ;;  %v12854_v0 = vld [vmem:[#allocation103_spill] sm:$0xff]  ;;  %v12855_v10 = vld [vmem:[#allocation104_spill] sm:$0xff] }
 0x894   :  { %2502 = vmatpush.msrb.mxu0 %v12845_v39  ;;  %2519 = vmatpush.msra.mxu2 %v12846_v28  ;;  %v2013_v35 = vadd.f32 %v1913_v38, %v1905_v11  ;;  %v1890_v15 = vmul.f32 %v10473_v12, %v10473_v12  ;;  %v1951_v21 = vrot.slane %v1950_v42, 4  ;;  %v2020_v45 = vadd.f32 %v1914_v30, %v1906_v55  ;;  %v12852_v38 = vld [vmem:[#allocation101_spill] sm:$0xff]  ;;  %v12859_v55 = vld [vmem:[#allocation108_spill] sm:$0xff] }
 0x895   :  { %2539 = vmatpush.msrb.mxu3 %v12847_v61  ;;  %2483 = vmatpush.msrb.mxu1 %v12848_v7  ;;  %v1935_v29 = vadd.f32 %v1934_v14, %v1933_v37  ;;  %v1957_v49 = vadd.f32 %v1897_v2, %v1889_v32  ;;  %v2001_v36 = vadd.f32 %v2000_v43, %v1999_v4  ;;  %v12856_v2 = vld [vmem:[#allocation105_spill] sm:$0xff]  ;;  %v12857_v43 = vld [vmem:[#allocation106_spill] sm:$0xff]  ;;  %v11101_v5 = vld [vmem:[#allocation2 + $0x200] sm:$0xf] }
 0x896   :  { %2503 = vmatpush.msrb.mxu0 %v12849_v62  ;;  %2520 = vmatpush.msra.mxu2 %v12850_v47  ;;  %v1942_v8 = vadd.f32 %v1941_v58, %v1940_v56  ;;  %v1964_v13 = vadd.f32 %v1898_v33, %v1890_v15  ;;  %v2008_v23 = vadd.f32 %v2007_v41, %v2006_v26  ;;  %v2014_v11 = vrot.slane %v2013_v35, 4  ;;  %v12858_v58 = vld [vmem:[#allocation107_spill] sm:$0xff]  ;;  %v12864_v61 = vld [vmem:[#allocation113_spill] sm:$0xff]  ;;  %v12865_v15 = vld [vmem:[#allocation114_spill] sm:$0xff] }
 0x897   :  { %2540 = vmatpush.msrb.mxu3 %v12851_v31  ;;  %2484 = vmatpush.msrb.mxu1 %v12852_v38  ;;  %v2384_v30 = vsel %vm299_vm3, %v1991_v9, %v1935_v29  ;;  %v1945_v46 = vadd.f32 %v1944_v1, %v1943_v17  ;;  %v1952_v4 = vadd.f32 %v1951_v21, %v1950_v42  ;;  %v2021_v14 = vrot.slane %v2020_v45, 4  ;;  %v12860_v17 = vld [vmem:[#allocation109_spill] sm:$0xff]  ;;  %v12861_v9 = vld [vmem:[#allocation110_spill] sm:$0xff]  ;;  %v12862_v42 = vld [vmem:[#allocation111_spill] sm:$0xff] }
 0x898   :  { %2504 = vmatpush.msrb.mxu0 %v12853_v54  ;;  %2521 = vmatpush.msra.mxu2 %v12854_v0  ;;  %v2385_v37 = vsel %vm299_vm3, %v1998_v48, %v1942_v8  ;;  %v1958_v56 = vrot.slane %v1957_v49, 4  ;;  %v2002_v26 = vrot.slane %v2001_v36, 2  ;;  %v1965_v33 = vrot.slane %v1964_v13, 4  ;;  %v12863_v1 = vld [vmem:[#allocation112_spill] sm:$0xff]  ;;  %v12866_v21 = vld [vmem:[#allocation115_spill] sm:$0xff]  ;;  %v12869_v38 = vld [vmem:[#allocation118_spill] sm:$0xff] }
 0x899   :  { %2541 = vmatpush.msrb.mxu3 %v12855_v10  ;;  %2454 = vmatmul.f32.vlgmr.msrb.gmra.mxu2 %v2384_v30  ;;  %v2009_v41 = vrot.slane %v2008_v23, 2  ;;  %v1946_v39 = vrot.slane %v1945_v46, 2  ;;  %v2015_v28 = vadd.f32 %v2014_v11, %v2013_v35  ;;  %v2022_v32 = vadd.f32 %v2021_v14, %v2020_v45  ;;  %v12867_v29 = vld [vmem:[#allocation116_spill] sm:$0xff]  ;;  %v12868_v35 = vld [vmem:[#allocation117_spill] sm:$0xff]  ;;  %v12870_v45 = vld [vmem:[#allocation119_spill] sm:$0xff]  ;;  %12920 = vst [vmem:[#allocation44_spill] sm:$0xff] %v11097_v3 }
 0x89a   :  { %2474 = vmatmul.f32.vlgmr.msra.gmra.mxu3 %v2385_v37  ;;  %2485 = vmatpush.msrb.mxu1 %v12856_v2  ;;  %v1953_v7 = vrot.slane %v1952_v4, 2  ;;  %v1959_v48 = vadd.f32 %v1958_v56, %v1957_v49  ;;  %v2003_v62 = vadd.f32 %v2002_v26, %v2001_v36  ;;  %v1966_v47 = vadd.f32 %v1965_v33, %v1964_v13  ;;  %v12871_v0 = vld [vmem:[#allocation120_spill] sm:$0xff]  ;;  %v12872_v49 = vld [vmem:[#allocation121_spill] sm:$0xff]  ;;  %v12873_v10 = vld [vmem:[#allocation122_spill] sm:$0xff] }
 0x89b   :  { %2505 = vmatpush.msrb.mxu0 %v12857_v43  ;;  %2522 = vmatpush.msra.mxu2 %v12858_v58  ;;  %v2010_v31 = vadd.f32 %v2009_v41, %v2008_v23  ;;  %v1947_v8 = vadd.f32 %v1946_v39, %v1945_v46  ;;  %v2016_v54 = vrot.slane %v2015_v28, 2  ;;  %v2023_v11 = vrot.slane %v2022_v32, 2  ;;  %v12874_v36 = vld [vmem:[#allocation123_spill] sm:$0xff]  ;;  %v12875_v23 = vld [vmem:[#allocation124_spill] sm:$0xff]  ;;  %v12876_v2 = vld [vmem:[#allocation125_spill] sm:$0xff]  ;;  %12921 = vst [vmem:[#allocation53_spill] sm:$0xff] %v11101_v5 }
 0x89c   :  { %2542 = vmatpush.msrb.mxu3 %v12859_v55  ;;  %2486 = vmatpush.msrb.mxu1 %v12860_v17  ;;  %v1954_v30 = vadd.f32 %v1953_v7, %v1952_v4  ;;  %v2004_v13 = vrot.slane %v2003_v62, 1  ;;  %v1960_v37 = vrot.slane %v1959_v48, 2  ;;  %v1967_v14 = vrot.slane %v1966_v47, 2  ;;  %v12877_v46 = vld [vmem:[#allocation126_spill] sm:$0xff]  ;;  %v12878_v26 = vld [vmem:[#allocation127_spill] sm:$0xff]  ;;  %v12879_v4 = vld [vmem:[#allocation128_spill] sm:$0xff] }
 0x89d   :  { %2506 = vmatpush.msrb.mxu0 %v12861_v9  ;;  %2523 = vmatpush.msra.mxu2 %v12862_v42  ;;  %v2011_v56 = vrot.slane %v2010_v31, 1  ;;  %v1948_v43 = vrot.slane %v1947_v8, 1  ;;  %v2017_v58 = vadd.f32 %v2016_v54, %v2015_v28  ;;  %v12880_v33 = vld [vmem:[#allocation129_spill] sm:$0xff]  ;;  %v2024_v17 = vadd.f32 %v2023_v11, %v2022_v32  ;;  %v12881_v41 = vld [vmem:[#allocation130_spill] sm:$0xff]  ;;  %v12882_v39 = vld [vmem:[#allocation131_spill] sm:$0xff]  ;;  %12922 = vst [vmem:[#allocation54_spill] sm:$0xff] %v11103_v16 }
 0x89e   :  { %2543 = vmatpush.msrb.mxu3 %v12863_v1  ;;  %2487 = vmatpush.msrb.mxu1 %v12864_v61  ;;  %v1955_v55 = vrot.slane %v1954_v30, 1  ;;  %v2005_v9 = vadd.f32 %v2004_v13, %v2003_v62  ;;  %v1961_v42 = vadd.f32 %v1960_v37, %v1959_v48  ;;  %v12883_v1 = vld [vmem:[#allocation132_spill] sm:$0xff]  ;;  %v12884_v61 = vld [vmem:[#allocation133_spill] sm:$0xff]  ;;  %v12886_v28 = vld [vmem:[#allocation135_spill] sm:$0xff] }
 0x89f   :  { %2507 = vmatpush.msrb.mxu0 %v12865_v15  ;;  %2524 = vmatpush.msra.mxu2 %v12866_v21  ;;  %v2012_v7 = vadd.f32 %v2011_v56, %v2010_v31  ;;  %v1968_v15 = vadd.f32 %v1967_v14, %v1966_v47  ;;  %v12885_v21 = vld [vmem:[#allocation134_spill] sm:$0xff]  ;;  %v2025_v54 = vrot.slane %v2024_v17, 1  ;;  %v12889_v62 = vld [vmem:[#allocation139_spill] sm:$0xff]  ;;  %v12890_v48 = vld [vmem:[#allocation140_spill] sm:$0xff] }
 0x8a0   :  { %2544 = vmatpush.msrb.mxu3 %v12867_v29  ;;  %2488 = vmatpush.msrb.mxu1 %v12868_v35  ;;  %v1949_v29 = vadd.f32 %v1948_v43, %v1947_v8  ;;  %v2018_v35 = vrot.slane %v2017_v58, 1  ;;  %v12888_v32 = vld [vmem:[#allocation138_spill] sm:$0xff]  ;;  %v1962_v31 = vrot.slane %v1961_v42, 1  ;;  %v12893_v11 = vld [vmem:[#allocation144_spill] sm:$0xff]  ;;  %v12895_v13 = vld [vmem:[#allocation147_spill] sm:$0xff] }
 0x8a1   :  { %2508 = vmatpush.msrb.mxu0 %v12869_v38  ;;  %2525 = vmatpush.msra.mxu2 %v12870_v45  ;;  %v12887_v38 = vld [vmem:[#allocation136_spill] sm:$0xff]  ;;  %v1956_v45 = vadd.f32 %v1955_v55, %v1954_v30  ;;  %v12891_v47 = vld [vmem:[#allocation142_spill] sm:$0xff]  ;;  %v1969_v8 = vrot.slane %v1968_v15, 1 }
 0x8a2   :  { %2545 = vmatpush.msrb.mxu3 %v12871_v0  ;;  %2489 = vmatpush.msrb.mxu1 %v12872_v49  ;;  %v2386_v0 = vsel %vm299_vm3, %v2005_v9, %v1949_v29  ;;  %v2019_v30 = vadd.f32 %v2018_v35, %v2017_v58  ;;  %v1963_v37 = vadd.f32 %v1962_v31, %v1961_v42  ;;  %v12896_v14 = vld [vmem:[#allocation148_spill] sm:$0xff]  ;;  %v2165_v9 = vld [vmem:[%s12892_s26 + $0x50] sm:$0xff] }
 0x8a3   :  { %2509 = vmatpush.msrb.mxu0 %v12873_v10  ;;  %2526 = vmatpush.msra.mxu2 %v12874_v36  ;;  %v2387_v49 = vsel %vm299_vm3, %v2012_v7, %v1956_v45  ;;  %v12894_v10 = vld [vmem:[#allocation145_spill] sm:$0xff]  ;;  %v2026_v36 = vadd.f32 %v2025_v54, %v2024_v17  ;;  %v2163_v43 = vld [vmem:[%s12892_s26 + $0x40] sm:$0xff] }
 0x8a4   :  { %2546 = vmatpush.msrb.mxu3 %v12875_v23  ;;  %2490 = vmatpush.msrb.mxu1 %v12876_v2  ;;  %v1970_v23 = vadd.f32 %v1969_v8, %v1968_v15  ;;  %v12897_v2 = vld [vmem:[#allocation151_spill] sm:$0xff]  ;;  %v2388_v56 = vsel %vm299_vm3, %v2019_v30, %v1963_v37  ;;  %v10716_v58 = vld [vmem:[%s12892_s26 + $0x48] sm:$0xff]  ;;  %v2161_v15 = vld [vmem:[%s12892_s26 + $0x30] sm:$0xff] }
 0x8a5   :  { %2510 = vmatpush.msrb.mxu0 %v12877_v46  ;;  %2527 = vmatpush.msra.mxu2 %v12878_v26  ;;  %v12898_v46 = vld [vmem:[#allocation152_spill] sm:$0xff]  ;;  %v11160_v20 = vld [vmem:[#allocation2 + $0x6cc] sm:$0xf0] }
 0x8a6   :  { %2547 = vmatpush.msrb.mxu3 %v12879_v4  ;;  %2491 = vmatpush.msrb.mxu1 %v12880_v33  ;;  %v2389_v26 = vsel %vm299_vm3, %v2026_v36, %v1970_v23  ;;  %v2166_v4 = vld [vmem:[%s12892_s26 + $0x58] sm:$0xff]  ;;  %v2155_v55 = vld [vmem:[%s12892_s26] sm:$0xff]  ;;  %v2156_v17 = vld [vmem:[%s12892_s26 + $0x8] sm:$0xff] }
 0x8a7   :  { %2511 = vmatpush.msrb.mxu0 %v12881_v41  ;;  %2528 = vmatpush.msra.mxu2 %v12882_v39  ;;  %v2170_v33 = vld [vmem:[%s12892_s26 + $0x78] sm:$0xff]  ;;  %v2167_v42 = vld [vmem:[%s12892_s26 + $0x60] sm:$0xff]  ;;  %v2168_v30 = vld [vmem:[%s12892_s26 + $0x68] sm:$0xff] }
 0x8a8   :  { %2548 = vmatpush.msrb.mxu3 %v12883_v1  ;;  %2492 = vmatpush.msrb.mxu1 %v12884_v61  ;;  %v2158_v41 = vld [vmem:[%s12892_s26 + $0x18] sm:$0xff]  ;;  %v2169_v1 = vld [vmem:[%s12892_s26 + $0x70] sm:$0xff]  ;;  %v2159_v7 = vld [vmem:[%s12892_s26 + $0x20] sm:$0xff] }
 0x8a9   :  { %2512 = vmatpush.msrb.mxu0 %v12885_v21  ;;  %2529 = vmatpush.msra.mxu2 %v12886_v28  ;;  %v2162_v39 = vld [vmem:[%s12892_s26 + $0x38] sm:$0xff]  ;;  %v2157_v61 = vld [vmem:[%s12892_s26 + $0x10] sm:$0xff]  ;;  %v11136_v50 = vld [vmem:[#allocation2 + $0x7e0] sm:$0xf] }
 0x8aa   :  { %2549 = vmatpush.msrb.mxu3 %v12887_v38  ;;  %2493 = vmatpush.msrb.mxu1 %v12888_v32  ;;  %v11140_v40 = vld [vmem:[#allocation2 + $0x4c0] sm:$0xf]  ;;  %v11229_v5 = vld [vmem:[#allocation2 + $0x46c] sm:$0xf0] }
 0x8ab   :  { %2513 = vmatpush.msrb.mxu0 %v12889_v62  ;;  %2530 = vmatpush.msra.mxu2 %v12890_v48  ;;  %v11158_v6 = vld [vmem:[#allocation2 + $0x6c0] sm:$0xf]  ;;  %v11233_v3 = vld [vmem:[#allocation2 + $0x56c] sm:$0xf0] }
 0x8ac   :  { %2550 = vmatpush.msrb.mxu3 %v12891_v47  ;;  %2494 = vmatmul.f32.vlgmr.msrb.gmra.mxu1 %v2386_v0  ;;  %v11231_v16 = vld [vmem:[#allocation2 + $0x560] sm:$0xf]  ;;  %12931 = vst [vmem:[#allocation62_spill] sm:$0xff] %v11233_v3 }
 0x8ad   :  { %2514 = vmatmul.f32.vlgmr.msrb.gmra.mxu0 %v2387_v49  ;;  %2531 = vmatpush.msra.mxu2 %v12893_v11  ;;  %12930 = vst [vmem:[#allocation61_spill] sm:$0xff] %v11231_v16 }
 0x8ae   :  { %2551 = vmatpush.msrb.mxu3 %v12894_v10  ;;  %2580 = vmatpush.msra.mxu1 %v2163_v43  ;;  %v2160_v10 = vld [vmem:[%s12892_s26 + $0x28] sm:$0xff] }
 0x8af   :  { %2532 = vmatpush.msra.mxu2 %v12895_v13  ;;  %2600 = vmatpush.msra.mxu0 %v10716_v58 }
 0x8b0   :  { %2552 = vmatpush.msrb.mxu3 %v12896_v14  ;;  %2581 = vmatpush.msra.mxu1 %v2155_v55 }
 0x8b1   :  { %2533 = vmatpush.msra.mxu2 %v12897_v2  ;;  %2601 = vmatpush.msra.mxu0 %v2156_v17 }
 0x8b2   :  { %2553 = vmatpush.msrb.mxu3 %v12898_v46  ;;  %2534 = vmatmul.f32.vlgmr.msra.gmra.mxu2 %v2388_v56 }
 0x8b3   :  { %2554 = vmatmul.f32.vlgmr.msrb.gmra.mxu3 %v2389_v26  ;;  %2640 = vmatpush.msrb.mxu2 %v2166_v4 }
 0x8b4   :  { %2720 = vmatpush.msra.mxu3 %v2170_v33  ;;  %2620 = vmatpush.msrb.mxu1 %v2165_v9 }
 0x8b5   :  { %2641 = vmatpush.msrb.mxu2 %v2158_v41  ;;  %2660 = vmatpush.msrb.mxu0 %v2167_v42 }
 0x8b6   :  { %2721 = vmatpush.msra.mxu3 %v2162_v39  ;;  %2621 = vmatpush.msrb.mxu1 %v2157_v61 }
 0x8b7   :  { %2700 = vmatpush.msra.mxu2 %v2169_v1  ;;  %2661 = vmatpush.msrb.mxu0 %v2159_v7 }
 0x8b8   :  { %2803 = vmatpush.msrb.mxu3 %v2166_v4 }
 0x8b9   :  { %2701 = vmatpush.msra.mxu2 %v2161_v15 }
 0x8ba   :  { %2804 = vmatpush.msrb.mxu3 %v2158_v41 }
 0x8e1   :  { %v2222_v21 = vpop.f32.mrf.mxu1  ;;  %v2242_v28 = vpop.f32.mrf.mxu0 }
 0x8e2   :  { %v2243_v35 = vadd.f32 %v2242_v28, %v2222_v21 }
 0x8f0   :  { %v2282_v32 = vpop.f32.mrf.mxu3 }
 0x8f2   :  { %v2262_v29 = vpop.f32.mrf.mxu2 }
 0x8f3   :  { %v2263_v38 = vadd.f32 %v2262_v29, %v2243_v35 }
 0x8f5   :  { %v2283_v54 = vadd.f32 %v2282_v32, %v2263_v38 }
 0x904   :  { %v2302_v45 = vpop.f32.mrf.mxu1  ;;  %v2322_v48 = vpop.f32.mrf.mxu0 }
 0x905   :  { %v2303_v62 = vadd.f32 %v2302_v45, %v2283_v54 }
 0x907   :  { %v2323_v0 = vadd.f32 %v2322_v48, %v2303_v62 }
 0x90f   :  { %v2415_v36 = vpop.f32.mrf.mxu1 }
 0x910   :  { %v2435_v13 = vpop.f32.mrf.mxu0 }
 0x911   :  { %v2436_v14 = vadd.f32 %v2435_v13, %v2415_v36  ;;  %v10780_v36 = vld [vmem:[%s12899_s28] sm:$0xff] }
 0x912   :  { %v2342_v31 = vpop.f32.mrf.mxu2  ;;  %v2362_v49 = vpop.f32.mrf.mxu3  ;;  %v10783_v13 = vld [vmem:[%s12900_s1] sm:$0xff] }
 0x913   :  { %v2343_v47 = vadd.f32 %v2342_v31, %v2323_v0 }
 0x915   :  { %v2363_v8 = vadd.f32 %v2362_v49, %v2343_v47 }
 0x917   :  { %v2365_v11 = vmul.f32 0.0009765625, %v2363_v8 }
 0x919   :  { %7204 = vmatmul.msk.f32.vlgmr.msra.gmra.mxu1 %vm2562_vm2, %v2365_v11  ;;  %7205 = vmatmul.msk.f32.vlgmr.msra.gmra.mxu0 %vm2562_vm2, %v2365_v11 }
 0x91a   :  { %7207 = vmatmul.msk.f32.vlgmr.msrb.gmra.mxu2 %vm2562_vm2, %v2365_v11  ;;  %7211 = vmatmul.msk.f32.vlgmr.msra.gmra.mxu3 %vm2562_vm2, %v2365_v11 }
 0x91b   :  { %2680 = vmatpush.msra.mxu1 %v2168_v30  ;;  %2743 = vmatpush.msra.mxu0 %v2163_v43 }
 0x91c   :  { %2783 = vmatpush.msrb.mxu2 %v2165_v9  ;;  %2883 = vmatpush.msra.mxu3 %v2170_v33  ;;  %v2455_v37 = vpop.f32.mrf.mxu2 }
 0x91d   :  { %2681 = vmatpush.msra.mxu1 %v2160_v10  ;;  %2744 = vmatpush.msra.mxu0 %v2155_v55  ;;  %v2456_v23 = vadd.f32 %v2455_v37, %v2436_v14  ;;  %v2475_v2 = vpop.f32.mrf.mxu3 }
 0x91e   :  { %2784 = vmatpush.msrb.mxu2 %v2157_v61  ;;  %2884 = vmatpush.msra.mxu3 %v2162_v39  ;;  %v2559_v39 = vmul.f32 %v2365_v11, %v2365_v11 }
 0x91f   :  { %v2476_v46 = vadd.f32 %v2475_v2, %v2456_v23  ;;  %v2970_v2 = vperm.slane %v10780_v36, 0 }
 0x921   :  { %7206 = vmatmul.msk.f32.vlgmr.msrb.gmra.mxu1 %vm2562_vm2, %v2365_v11  ;;  %7208 = vmatmul.msk.f32.vlgmr.msrb.gmra.mxu0 %vm2562_vm2, %v2365_v11 }
 0x922   :  { %7210 = vmatmul.msk.f32.vlgmr.msra.gmra.mxu2 %vm2562_vm2, %v2365_v11  ;;  %2763 = vmatpush.msrb.mxu1 %v10716_v58 }
 0x923   :  { %2823 = vmatpush.msrb.mxu0 %v2167_v42  ;;  %2863 = vmatpush.msra.mxu2 %v2169_v1 }
 0x924   :  { %2764 = vmatpush.msrb.mxu1 %v2156_v17 }
 0x925   :  { %2824 = vmatpush.msrb.mxu0 %v2159_v7  ;;  %2864 = vmatpush.msra.mxu2 %v2161_v15 }
 0x929   :  { %7209 = vmatmul.msk.f32.vlgmr.msra.gmra.mxu1 %vm2562_vm2, %v2365_v11  ;;  %v2495_v56 = vpop.f32.mrf.mxu1 }
 0x92a   :  { %2843 = vmatpush.msra.mxu1 %v2168_v30  ;;  %v2496_v26 = vadd.f32 %v2495_v56, %v2476_v46  ;;  %v2515_v43 = vpop.f32.mrf.mxu0 }
 0x92c   :  { %2844 = vmatpush.msra.mxu1 %v2160_v10  ;;  %v2516_v58 = vadd.f32 %v2515_v43, %v2496_v26  ;;  %v2971_v43 = vperm.slane %v10780_v36, 1 }
 0x935   :  { %v2535_v4 = vpop.f32.mrf.mxu2 }
 0x936   :  { %v2536_v33 = vadd.f32 %v2535_v4, %v2516_v58  ;;  %v2555_v55 = vpop.f32.mrf.mxu3  ;;  %v2972_v4 = vperm.slane %v10780_v36, 2 }
 0x938   :  { %v2556_v17 = vadd.f32 %v2555_v55, %v2536_v33  ;;  %v3007_v55 = vperm.slane %v10783_v13, 4 }
 0x93a   :  { %v2558_v41 = vmul.f32 0.0009765625, %v2556_v17  ;;  %v2973_v17 = vperm.slane %v10780_v36, 3 }
 0x93c   :  { %v2560_v9 = vsub.f32 %v2558_v41, %v2559_v39 }
 0x93e   :  { %v2561_v42 = vmax.f32 %v2560_v9, 0.0 }
 0x940   :  { %7212 = vmatmul.msk.f32.vlgmr.msra.gmra.mxu0 %vm2562_vm2, %v2561_v42  ;;  %7213 = vmatmul.msk.f32.vlgmr.msrb.gmra.mxu1 %vm2562_vm2, %v2561_v42 }
 0x941   :  { %7214 = vmatmul.msk.f32.vlgmr.msrb.gmra.mxu2 %vm2562_vm2, %v2561_v42  ;;  %7215 = vmatmul.msk.f32.vlgmr.msrb.gmra.mxu3 %vm2562_vm2, %v2561_v42 }
 0x948   :  { %7216 = vmatmul.msk.f32.vlgmr.msrb.gmra.mxu0 %vm2562_vm2, %v2561_v42  ;;  %7217 = vmatmul.msk.f32.vlgmr.msra.gmra.mxu1 %vm2562_vm2, %v2561_v42 }
 0x949   :  { %7218 = vmatmul.msk.f32.vlgmr.msra.gmra.mxu2 %vm2562_vm2, %v2561_v42  ;;  %7219 = vmatmul.msk.f32.vlgmr.msra.gmra.mxu3 %vm2562_vm2, %v2561_v42 }
 0x996   :  { %v10750_v1 = vpop.f32.mrf.mxu1  ;;  %v10752_v61 = vpop.f32.mrf.mxu0 }
 0x99d   :  { %v10756_v15 = vpop.f32.mrf.mxu2  ;;  %v10762_v29 = vpop.f32.mrf.mxu3 }
 0x99e   :  { %v10754_v7 = vpop.f32.mrf.mxu1  ;;  %v10758_v21 = vpop.f32.mrf.mxu0 }
 0x9a5   :  { %v10764_v35 = vpop.f32.mrf.mxu2 }
 0x9a6   :  { %v10760_v28 = vpop.f32.mrf.mxu1 }
 0x9bd   :  { %v2746_v38 = vpop.f32.mrf.mxu0  ;;  %v2766_v32 = vpop.f32.mrf.mxu1 }
 0x9be   :  { %v10766_v45 = vadd.f32 1e-05, %v2746_v38  ;;  %v2767_v54 = vadd.f32 1e-05, %v2766_v32 }
 0x9c0   :  { %9059 = vrsqrt.f32 %v10766_v45  ;;  %vm2895_vm4 = vweird.f32 %v10766_v45  ;;  %vm2905_vm5 = vweird.f32 %v2767_v54 }
 0x9c1   :  { %9061 = vrsqrt.f32 %v2767_v54 }
 0x9c4   :  { %v2786_v62 = vpop.f32.mrf.mxu2  ;;  %v2806_v48 = vpop.f32.mrf.mxu3 }
 0x9c5   :  { %v10769_v0 = vadd.f32 1e-05, %v2786_v62  ;;  %v10771_v31 = vadd.f32 1e-05, %v2806_v48  ;;  %v2826_v47 = vpop.f32.mrf.mxu0  ;;  %v2846_v49 = vpop.f32.mrf.mxu1 }
 0x9c6   :  { %v10773_v8 = vpop.eup %9059  ;;  %v10775_v11 = vadd.f32 1e-05, %v2826_v47  ;;  %v10777_v30 = vadd.f32 1e-05, %v2846_v49 }
 0x9c7   :  { %v9062_v10 = vpop.eup %9061  ;;  %v2890_v37 = vmul.f32 %v10773_v8, %v10766_v45  ;;  %9063 = vrsqrt.f32 %v10769_v0  ;;  %vm2896_vm7 = vweird.f32 %v10773_v8  ;;  %vm2915_vm9 = vweird.f32 %v10769_v0 }
 0x9c8   :  { %v2900_v14 = vmul.f32 %v9062_v10, %v2767_v54  ;;  %9065 = vrsqrt.f32 %v10771_v31  ;;  %vm2906_vm6 = vweird.f32 %v9062_v10  ;;  %vm2925_vm10 = vweird.f32 %v10771_v31  ;;  %vm10832_vm11 = vmor %vm2895_vm4, %vm2896_vm7 }
 0x9c9   :  { %v2891_v23 = vmul.f32 %v10773_v8, %v2890_v37  ;;  %9067 = vrsqrt.f32 %v10775_v11  ;;  %vm2907_vm8 = vmor %vm2905_vm5, %vm2906_vm6  ;;  %vm2935_vm14 = vweird.f32 %v10775_v11  ;;  %vm3042_vm5 = vcmask 1040384  }
 0x9ca   :  { %v2901_v46 = vmul.f32 %v9062_v10, %v2900_v14  ;;  %9069 = vrsqrt.f32 %v10777_v30 }
 0x9cb   :  { %v2892_v26 = vmul.f32 0.5, %v2891_v23 }
 0x9cc   :  { %v2902_v33 = vmul.f32 0.5, %v2901_v46  ;;  %v2866_v39 = vpop.f32.mrf.mxu2  ;;  %v2886_v9 = vpop.f32.mrf.mxu3 }
 0x9cd   :  { %v9064_v42 = vpop.eup %9063  ;;  %v2893_v38 = vsub.f32 1.5, %v2892_v26  ;;  %v10801_v32 = vadd.f32 1e-05, %v2866_v39  ;;  %v10813_v23 = vadd.f32 1e-05, %v2886_v9 }
 0x9ce   :  { %v10803_v62 = vpop.eup %9065  ;;  %v2903_v48 = vsub.f32 1.5, %v2902_v33  ;;  %v2910_v47 = vmul.f32 %v9064_v42, %v10769_v0  ;;  %vm2916_vm12 = vweird.f32 %v9064_v42 }
 0x9cf   :  { %v10807_v37 = vpop.eup %9067  ;;  %v2920_v14 = vmul.f32 %v10803_v62, %v10771_v31  ;;  %9071 = vrsqrt.f32 %v10801_v32  ;;  %v2894_v26 = vmul.f32 %v10773_v8, %v2893_v38  ;;  %vm2926_vm13 = vweird.f32 %v10803_v62  ;;  %vm2917_vm6 = vmor %vm2915_vm9, %vm2916_vm12 }
 0x9d0   :  { %v10815_v46 = vpop.eup %9069  ;;  %v2904_v33 = vmul.f32 %v9062_v10, %v2903_v48  ;;  %v2911_v39 = vmul.f32 %v9064_v42, %v2910_v47  ;;  %v2930_v56 = vmul.f32 %v10807_v37, %v10775_v11  ;;  %9073 = vrsqrt.f32 %v10813_v23 }
 0x9d1   :  { %v2921_v41 = vmul.f32 %v10803_v62, %v2920_v14  ;;  %v2940_v9 = vmul.f32 %v10815_v46, %v10777_v30  ;;  %vm2936_vm4 = vweird.f32 %v10807_v37  ;;  %vm2946_vm7 = vweird.f32 %v10815_v46 }
 0x9d2   :  { %v2908_v49 = vsel %vm2907_vm8, %v9062_v10, %v2904_v33  ;;  %v2912_v58 = vmul.f32 0.5, %v2911_v39  ;;  %v2931_v38 = vmul.f32 %v10807_v37, %v2930_v56  ;;  %v2898_v10 = vsel %vm10832_vm11, %v10773_v8, %v2894_v26  ;;  %vm2927_vm8 = vmor %vm2925_vm10, %vm2926_vm13 }
 0x9d3   :  { %v10836_v48 = vmul.f32 %v2971_v43, %v2908_v49  ;;  %v2922_v47 = vmul.f32 0.5, %v2921_v41  ;;  %v2941_v14 = vmul.f32 %v10815_v46, %v2940_v9  ;;  %vm3058_vm9 = vcmask 1042433   ;;  %vm2937_vm11 = vmor %vm2935_vm14, %vm2936_vm4 }
 0x9d4   :  { %v2913_v33 = vsub.f32 1.5, %v2912_v58  ;;  %v2932_v56 = vmul.f32 0.5, %v2931_v38  ;;  %v2986_v58 = vmul.f32 %v2970_v2, %v2898_v10  ;;  %vm2945_vm12 = vweird.f32 %v10777_v30 }
 0x9d5   :  { %v10843_v39 = vpop.eup %9071  ;;  %v2923_v45 = vsub.f32 1.5, %v2922_v47  ;;  %v2942_v43 = vmul.f32 0.5, %v2941_v14  ;;  %v2995_v26 = vmul.f32 %v10836_v48, %v10752_v61  ;;  %v2975_v31 = vperm.slane %v10780_v36, 5  ;;  %vm2947_vm10 = vmor %vm2945_vm12, %vm2946_vm7 }
 0x9d6   :  { %v2914_v49 = vmul.f32 %v9064_v42, %v2913_v33  ;;  %v2933_v41 = vsub.f32 1.5, %v2932_v56  ;;  %v2950_v8 = vmul.f32 %v10843_v39, %v10801_v32  ;;  %v12903_v33 = vperm.slane %v10783_v13, 1 }
 0x9d7   :  { %v2924_v9 = vmul.f32 %v10803_v62, %v2923_v45  ;;  %v2943_v54 = vsub.f32 1.5, %v2942_v43  ;;  %v3008_v30 = vperm.slane %v10783_v13, 5  ;;  %v2976_v45 = vperm.slane %v10780_v36, 6 }
 0x9d8   :  { %v2918_v38 = vsel %vm2917_vm6, %v9064_v42, %v2914_v49  ;;  %v2934_v2 = vmul.f32 %v10807_v37, %v2933_v41  ;;  %v2951_v61 = vmul.f32 %v10843_v39, %v2950_v8  ;;  %v10874_v42 = vpop.eup %9073  ;;  %v3020_v56 = vsub.f32 %v12903_v33, %v2995_v26 }
 0x9d9   :  { %v2988_v47 = vmul.f32 %v2972_v4, %v2918_v38  ;;  %v2928_v0 = vsel %vm2927_vm8, %v10803_v62, %v2924_v9  ;;  %v2944_v4 = vmul.f32 %v10815_v46, %v2943_v54  ;;  %v2994_v43 = vmul.f32 %v2986_v58, %v10750_v1 }
 0x9da   :  { %v2989_v14 = vmul.f32 %v2973_v17, %v2928_v0  ;;  %v2938_v10 = vsel %vm2937_vm11, %v10807_v37, %v2934_v2  ;;  %v2952_v62 = vmul.f32 0.5, %v2951_v61  ;;  %v12904_v37 = vperm.slane %v10780_v36, 4 }
 0x9db   :  { %v2996_v11 = vmul.f32 %v2988_v47, %v10754_v7  ;;  %v2948_v41 = vsel %vm2947_vm10, %v10815_v46, %v2944_v4  ;;  %v3036_v8 = vrot.slane %v2988_v47, 6  ;;  %v2960_v9 = vmul.f32 %v10874_v42, %v10813_v23  ;;  %v10942_v47 = vld [vmem:[#allocation2 + $0x1c0] sm:$0xf] }
 0x9dc   :  { %v2997_v17 = vmul.f32 %v2989_v14, %v10756_v15  ;;  %v10891_v49 = vmul.f32 %v12904_v37, %v2938_v10  ;;  %v3037_v26 = vrot.slane %v2989_v14, 5  ;;  %v2953_v7 = vsub.f32 1.5, %v2952_v62  ;;  %v7334_v37 = vld [vmem:[#allocation2 + $0xe0] sm:$0xf]  ;;  %v8678_v14 = vld [vmem:[#allocation2 + $0xcc] sm:$0xf0] }
 0x9dd   :  { %v3035_v38 = vrot.slane %v10836_v48, 7  ;;  %v12905_v2 = vperm.slane %v10783_v13, 2  ;;  %v12906_v1 = vperm.slane %v10783_v13, 3  ;;  %v10901_v61 = vmul.f32 %v2975_v31, %v2948_v41  ;;  %v8682_v41 = vld [vmem:[#allocation2 + $0xec] sm:$0xf0] }
 0x9de   :  { %vm3047_vm13 = vcmask 1044484   ;;  %v3141_v0 = vrot.slane %v3020_v56, 7  ;;  %v2998_v46 = vmul.f32 %v10891_v49, %v10758_v21  ;;  %v12907_v10 = vperm.slane %v10783_v13, 0 }
 0x9df   :  { %v3021_v54 = vsub.f32 %v12905_v2, %v2996_v11  ;;  %v3022_v15 = vsub.f32 %v12906_v1, %v2997_v17  ;;  %vm2955_vm14 = vweird.f32 %v10801_v32  ;;  %vm2956_vm4 = vweird.f32 %v10843_v39 }
 0x9e0   :  { %v3019_v48 = vsub.f32 %v12907_v10, %v2994_v43  ;;  %v3045_v31 = vsel %vm3044_vm15, %v3036_v8, %v3037_v26  ;;  %v3057_v62 = vsel %vm3056_vm1, %v3036_v8, %v3037_v26  ;;  %vm3060_vm6 = vcmask 1045509   ;;  %vm2957_vm7 = vmor %vm2955_vm14, %vm2956_vm4  ;;  %v7318_v10 = vld [vmem:[#allocation2 + $0xc0] sm:$0xf] }
 0x9e1   :  { %v2954_v21 = vmul.f32 %v10843_v39, %v2953_v7  ;;  %v2961_v33 = vmul.f32 %v10874_v42, %v2960_v9  ;;  %v3043_v56 = vsel %vm3042_vm5, %v2986_v58, %v3035_v38  ;;  %v3142_v11 = vrot.slane %v3021_v54, 6  ;;  %v7462_v7 = vld [vmem:[#allocation2 + $0x1e0] sm:$0xf]  ;;  %v8714_v9 = vld [vmem:[#allocation2 + $0x1ec] sm:$0xf0] }
 0x9e2   :  { %v3143_v17 = vrot.slane %v3022_v15, 5  ;;  %v2999_v43 = vmul.f32 %v10901_v61, %v10760_v28  ;;  %v3055_v2 = vsel %vm299_vm3, %v2986_v58, %v3035_v38  ;;  %v3148_v1 = vsel %vm3042_vm5, %v3019_v48, %v3141_v0  ;;  %v7590_v28 = vld [vmem:[#allocation2 + $0x2e0] sm:$0xf]  ;;  %v8746_v54 = vld [vmem:[#allocation2 + $0x2ec] sm:$0xf0] }
 0x9e3   :  { %v3155_v8 = vsel %vm299_vm3, %v3019_v48, %v3141_v0  ;;  %v10924_v26 = vsub.f32 %v3007_v55, %v2998_v46  ;;  %v7718_v15 = vld [vmem:[#allocation2 + $0x3e0] sm:$0xf]  ;;  %v10931_v58 = vsel %vm222_vm0, %v3043_v56, %v3045_v31  ;;  %v10934_v38 = vsel %vm3058_vm9, %v3055_v2, %v3057_v62  ;;  %v8778_v46 = vld [vmem:[#allocation2 + $0x3ec] sm:$0xf0] }
 0x9e4   :  { %v2958_v0 = vsel %vm2957_vm7, %v10843_v39, %v2954_v21  ;;  %v2962_v55 = vmul.f32 0.5, %v2961_v33  ;;  %v3038_v48 = vrot.slane %v10891_v49, 4  ;;  %v3039_v32 = vrot.slane %v10901_v61, 3  ;;  %v8710_v21 = vld [vmem:[#allocation2 + $0x1cc] sm:$0xf0] }
 0x9e5   :  { %v10939_v4 = vmul.f32 %v2976_v45, %v2958_v0  ;;  %vm2966_vm5 = vweird.f32 %v10874_v42  ;;  %v3149_v31 = vsel %vm3044_vm15, %v3142_v11, %v3143_v17  ;;  %v3156_v62 = vsel %vm3056_vm1, %v3142_v11, %v3143_v17  ;;  %v7574_v33 = vld [vmem:[#allocation2 + $0x2c0] sm:$0xf]  ;;  %v8742_v2 = vld [vmem:[#allocation2 + $0x2cc] sm:$0xf0] }
 0x9e6   :  { %v10946_v56 = vsub.f32 %v3008_v30, %v2999_v43  ;;  %v2963_v39 = vsub.f32 1.5, %v2962_v55  ;;  %v3144_v49 = vrot.slane %v10924_v26, 4  ;;  %vm2965_vm8 = vweird.f32 %v10813_v23  ;;  %v7702_v0 = vld [vmem:[#allocation2 + $0x3c0] sm:$0xf]  ;;  %v8774_v30 = vld [vmem:[#allocation2 + $0x3cc] sm:$0xf0] }
 0x9e7   :  { %v3000_v45 = vmul.f32 %v10939_v4, %v10764_v35  ;;  %v7335_v61 = vor.u32 %v8682_v41, %v7334_v37  ;;  %v7463_v59 = vor.u32 %v8714_v9, %v7462_v7  ;;  %v7591_v44 = vor.u32 %v8746_v54, %v7590_v28  ;;  %v10953_v17 = vld [vmem:[#allocation2 + $0xa0] sm:$0xf]  ;;  %v10955_v43 = vld [vmem:[#allocation2 + $0xac] sm:$0xf0]  ;;  %vm2967_vm15 = vmor %vm2965_vm8, %vm2966_vm5 }
 0x9e8   :  { %v2964_v27 = vmul.f32 %v10874_v42, %v2963_v39  ;;  %v7719_v11 = vor.u32 %v8778_v46, %v7718_v15  ;;  %v10958_v55 = vsel %vm222_vm0, %v3148_v1, %v3149_v31  ;;  %v10961_v35 = vsel %vm3058_vm9, %v3155_v8, %v3156_v62  ;;  %v10968_v41 = vld [vmem:[#allocation2 + $0x1a0] sm:$0xf]  ;;  %v10970_v7 = vld [vmem:[#allocation2 + $0x1ac] sm:$0xf0] }
 0x9e9   :  { %v10964_v23 = vsel %vm3047_vm13, %v3038_v48, %v3039_v32  ;;  %4989 = vmatpush.bf16.msra.mxu0 %v7335_v61  ;;  %v7319_v37 = vor.u32 %v8678_v14, %v7318_v10  ;;  %v3145_v9 = vrot.slane %v10946_v56, 3  ;;  %5002 = vmatpush.bf16.msrb.mxu1 %v7463_v59  ;;  %v7447_v8 = vor.u32 %v8710_v21, %v10942_v47  ;;  %v10975_v54 = vld [vmem:[#allocation2 + $0x2a0] sm:$0xf]  ;;  %v8738_v15 = vld [vmem:[#allocation2 + $0x2ac] sm:$0xf0] }
 0x9ea   :  { %v2968_v1 = vsel %vm2967_vm15, %v10874_v42, %v2964_v27  ;;  %5015 = vmatpush.bf16.msrb.mxu2 %v7591_v44  ;;  %v7575_v28 = vor.u32 %v8742_v2, %v7574_v33  ;;  %v12908_v46 = vperm.slane %v10783_v13, 6  ;;  %v3040_v14 = vrot.slane %v10939_v4, 2  ;;  %5028 = vmatpush.bf16.msrb.mxu3 %v7719_v11  ;;  %v10984_v27 = vld [vmem:[#allocation2 + $0x3a0] sm:$0xf]  ;;  %v10986_v44 = vld [vmem:[#allocation2 + $0x3ac] sm:$0xf0] }
 0x9eb   :  { %v12909_v10 = vperm.slane %v10780_v36, 7  ;;  %v7703_v56 = vor.u32 %v8774_v30, %v7702_v0  ;;  %v3061_v59 = vsel %vm3060_vm6, %v3038_v48, %v3039_v32  ;;  %vm3049_vm0 = vcmask 1046534   ;;  %v10989_v42 = vld [vmem:[#allocation2 + $0x80] sm:$0xf]  ;;  %v10991_v47 = vld [vmem:[#allocation2 + $0x8c] sm:$0xf0] }
 0x9ec   :  { %v10979_v31 = vsub.f32 %v12908_v46, %v3000_v45  ;;  %vm3051_vm1 = vcmask 1045508   ;;  %vm3062_vm9 = vcmask 1046528   ;;  %v10993_v39 = vld [vmem:[#allocation2 + $0x180] sm:$0xf]  ;;  %v10995_v4 = vld [vmem:[#allocation2 + $0x18c] sm:$0xf0]  ;;  %v7303_v48 = vor.u32 %v10955_v43, %v10953_v17 }
 0x9ed   :  { %v2993_v62 = vmul.f32 %v12909_v10, %v2968_v1  ;;  %v10997_v36 = vld [vmem:[#allocation2 + $0x280] sm:$0xf]  ;;  %v10999_v21 = vld [vmem:[#allocation2 + $0x28c] sm:$0xf0]  ;;  %vm3064_vm11 = vcmask 1046533   ;;  %4990 = vmatpush.bf16.msra.mxu0 %v7319_v37  ;;  %v11015_v11 = vsel %vm3047_vm13, %v3144_v49, %v3145_v9  ;;  %vm3053_vm12 = vcmask 1043456   ;;  %5003 = vmatpush.bf16.msrb.mxu1 %v7447_v8 }
 0x9ee   :  { %v11004_v32 = vld [vmem:[#allocation2 + $0x380] sm:$0xf]  ;;  %v11006_v61 = vld [vmem:[#allocation2 + $0x38c] sm:$0xf0]  ;;  %5016 = vmatpush.bf16.msrb.mxu2 %v7575_v28  ;;  %v7559_v30 = vor.u32 %v8738_v15, %v10975_v54  ;;  %v3146_v37 = vrot.slane %v10979_v31, 2  ;;  %v12910_v1 = vperm.slane %v10783_v13, 7  ;;  %5029 = vmatpush.bf16.msrb.mxu3 %v7703_v56  ;;  %v7687_v8 = vor.u32 %v10986_v44, %v10984_v27 }
 0x9ef   :  { %v3001_v33 = vmul.f32 %v2993_v62, %v10762_v29  ;;  %v3041_v45 = vrot.slane %v2993_v62, 1  ;;  %v11008_v2 = vld [vmem:[#allocation2 + $0x60] sm:$0xf]  ;;  %v11010_v0 = vld [vmem:[#allocation2 + $0x6c] sm:$0xf0]  ;;  %v7431_v29 = vor.u32 %v10970_v7, %v10968_v41  ;;  %v3158_v13 = vsel %vm3060_vm6, %v3144_v49, %v3145_v9 }
 0x9f0   :  { %v11020_v17 = vld [vmem:[#allocation2 + $0x160] sm:$0xf]  ;;  %v11022_v43 = vld [vmem:[#allocation2 + $0x16c] sm:$0xf0]  ;;  %vm3066_vm10 = vcmask 1044481   ;;  %v7287_v26 = vor.u32 %v10991_v47, %v10989_v42  ;;  %v7415_v49 = vor.u32 %v10995_v4, %v10993_v39  ;;  %v7543_v9 = vor.u32 %v10999_v21, %v10997_v36 }
 0x9f1   :  { %v3026_v46 = vsub.f32 %v12910_v1, %v3001_v33  ;;  %v3063_v10 = vsel %vm3062_vm9, %v3041_v45, %v3040_v14  ;;  %v11030_v28 = vld [vmem:[#allocation2 + $0x260] sm:$0xf]  ;;  %v11032_v41 = vld [vmem:[#allocation2 + $0x26c] sm:$0xf0]  ;;  %v3050_v62 = vsel %vm3049_vm0, %v3040_v14, %v3041_v45  ;;  %4991 = vmatpush.bf16.msra.mxu0 %v7303_v48  ;;  %5004 = vmatpush.bf16.msrb.mxu1 %v7431_v29 }
 0x9f2   :  { %v11034_v7 = vld [vmem:[#allocation2 + $0x360] sm:$0xf]  ;;  %v11036_v54 = vld [vmem:[#allocation2 + $0x36c] sm:$0xf0]  ;;  %v3065_v56 = vsel %vm3064_vm11, %v3061_v59, %v3063_v10  ;;  %5017 = vmatpush.bf16.msrb.mxu2 %v7559_v30  ;;  %v7671_v45 = vor.u32 %v11006_v61, %v11004_v32  ;;  %v3052_v61 = vsel %vm3051_vm1, %v10964_v23, %v3050_v62  ;;  %5030 = vmatpush.bf16.msrb.mxu3 %v7687_v8 }
 0x9f3   :  { %v11038_v15 = vld [vmem:[#allocation2 + $0x40] sm:$0xf]  ;;  %v11040_v31 = vld [vmem:[#allocation2 + $0x4c] sm:$0xf0]  ;;  %v3147_v12 = vrot.slane %v3026_v46, 1  ;;  %v3067_v46 = vsel %vm3066_vm10, %v10934_v38, %v3065_v56 }
 0x9f4   :  { %v11047_v27 = vld [vmem:[#allocation2 + $0x140] sm:$0xf]  ;;  %v11049_v44 = vld [vmem:[#allocation2 + $0x14c] sm:$0xf0] }
 0x9f5   :  { %v11051_v33 = vld [vmem:[#allocation2 + $0x240] sm:$0xf]  ;;  %v11053_v1 = vld [vmem:[#allocation2 + $0x24c] sm:$0xf0]  ;;  %v3152_v10 = vsel %vm3049_vm0, %v3146_v37, %v3147_v12  ;;  %v3159_v42 = vsel %vm3062_vm9, %v3147_v12, %v3146_v37  ;;  %4992 = vmatpush.bf16.msra.mxu0 %v7287_v26  ;;  %v11152_v26 = vrot.slane %v3067_v46, 1  ;;  %5005 = vmatpush.bf16.msrb.mxu1 %v7415_v49 }
 0x9f6   :  { %v11061_v14 = vld [vmem:[#allocation2 + $0x340] sm:$0xf]  ;;  %v11063_v59 = vld [vmem:[#allocation2 + $0x34c] sm:$0xf0]  ;;  %v3160_v23 = vsel %vm3064_vm11, %v3158_v13, %v3159_v42  ;;  %v3153_v12 = vsel %vm3051_vm1, %v11015_v11, %v3152_v10  ;;  %5018 = vmatpush.bf16.msrb.mxu2 %v7543_v9  ;;  %5031 = vmatpush.bf16.msrb.mxu3 %v7671_v45 }
 0x9f7   :  { %12911 = vst [vmem:[#allocation37_spill] sm:$0xff] %v11061_v14  ;;  %v11071_v47 = vld [vmem:[#allocation2 + $0x20] sm:$0xf]  ;;  %v11073_v39 = vld [vmem:[#allocation2 + $0x2c] sm:$0xf0]  ;;  %v3161_v37 = vsel %vm3066_vm10, %v10961_v35, %v3160_v23  ;;  %v11150_v35 = vsel %vm3053_vm12, %v10931_v58, %v3052_v61  ;;  %v3077_v16 = vperm.slane %v11152_v26, 0 }
 0x9f8   :  { %12912 = vst [vmem:[#allocation40_spill] sm:$0xff] %v11071_v47  ;;  %v11075_v4 = vld [vmem:[#allocation2 + $0x120] sm:$0xf]  ;;  %v11077_v36 = vld [vmem:[#allocation2 + $0x12c] sm:$0xf0]  ;;  %v11154_v10 = vrot.slane %v3161_v37, 1  ;;  %v11200_v37 = vsel %vm3053_vm12, %v10958_v55, %v3153_v12  ;;  %v12929_v55 = vor.u32 %v11010_v0, %v11008_v2  ;;  %v12932_v2 = vor.u32 %v11022_v43, %v11020_v17 }
 0x9f9   :  { %12913 = vst [vmem:[#allocation49_spill] sm:$0xff] %v11073_v39  ;;  %v11079_v21 = vld [vmem:[#allocation2 + $0x220] sm:$0xf]  ;;  %v11081_v29 = vld [vmem:[#allocation2 + $0x22c] sm:$0xf0]  ;;  %v12933_v0 = vor.u32 %v11032_v41, %v11030_v28  ;;  %v12937_v17 = vor.u32 %v11036_v54, %v11034_v7  ;;  %v3069_v7 = vperm.slane %v11150_v35, 0 }
 0x9fa   :  { %12914 = vst [vmem:[#allocation50_spill] sm:$0xff] %v11075_v4  ;;  %v11083_v30 = vld [vmem:[#allocation2 + $0x320] sm:$0xf]  ;;  %v11085_v32 = vld [vmem:[#allocation2 + $0x32c] sm:$0xf0]  ;;  %4993 = vmatpush.bf16.msra.mxu0 %v12929_v55  ;;  %5006 = vmatpush.bf16.msrb.mxu1 %v12932_v2  ;;  %v12944_v55 = vor.u32 %v11040_v31, %v11038_v15  ;;  %v12948_v15 = vor.u32 %v11049_v44, %v11047_v27  ;;  %v3163_v41 = vperm.slane %v11200_v37, 0 }
 0x9fb   :  { %12915 = vst [vmem:[#allocation39_spill] sm:$0xff] %v11077_v36  ;;  %v11093_v48 = vld [vmem:[#allocation2] sm:$0xf]  ;;  %v11114_v62 = vld [vmem:[#allocation2 + $0x30c] sm:$0xf0]  ;;  %5019 = vmatpush.bf16.msrb.mxu2 %v12933_v0  ;;  %5032 = vmatpush.bf16.msrb.mxu3 %v12937_v17  ;;  %v12949_v31 = vor.u32 %v11053_v1, %v11051_v33 }
 0x9fc   :  { %12916 = vst [vmem:[#allocation42_spill] sm:$0xff] %v11079_v21  ;;  %v11112_v8 = vld [vmem:[#allocation2 + $0x300] sm:$0xf]  ;;  %v11122_v13 = vld [vmem:[#allocation2 + $0x5ec] sm:$0xf0] }
 0x9fd   :  { %12917 = vst [vmem:[#allocation51_spill] sm:$0xff] %v11081_v29  ;;  %v11116_v56 = vld [vmem:[#allocation2 + $0x4e0] sm:$0xf]  ;;  %v11126_v38 = vld [vmem:[#allocation2 + $0x6ec] sm:$0xf0] }
 0x9fe   :  { %12918 = vst [vmem:[#allocation52_spill] sm:$0xff] %v11083_v30  ;;  %v11124_v42 = vld [vmem:[#allocation2 + $0x6e0] sm:$0xf]  ;;  %v11146_v11 = vld [vmem:[#allocation2 + $0x5cc] sm:$0xf0]  ;;  %4994 = vmatpush.bf16.msra.mxu0 %v12944_v55  ;;  %5007 = vmatpush.bf16.msrb.mxu1 %v12948_v15 }
 0x9ff   :  { %12919 = vst [vmem:[#allocation41_spill] sm:$0xff] %v11085_v32  ;;  %v11168_v58 = vld [vmem:[#allocation2 + $0x4ac] sm:$0xf0]  ;;  %v11170_v61 = vld [vmem:[#allocation2 + $0x5a0] sm:$0xf]  ;;  %5020 = vmatpush.bf16.msrb.mxu2 %v12949_v31 }
 0xa00   :  { %12923 = vst [vmem:[#allocation43_spill] sm:$0xff] %v11124_v42  ;;  %v11172_v46 = vld [vmem:[#allocation2 + $0x5ac] sm:$0xf0]  ;;  %v11190_v45 = vld [vmem:[#allocation2 + $0x480] sm:$0xf] }
 0xa01   :  { %12924 = vst [vmem:[#allocation48_spill] sm:$0xff] %v11154_v10  ;;  %v11186_v10 = vld [vmem:[#allocation2 + $0x7a0] sm:$0xf]  ;;  %v11188_v14 = vld [vmem:[#allocation2 + $0x7ac] sm:$0xf0] }
 0xa02   :  { %12925 = vst [vmem:[#allocation57_spill] sm:$0xff] %v11190_v45  ;;  %v11192_v49 = vld [vmem:[#allocation2 + $0x48c] sm:$0xf0]  ;;  %v11194_v47 = vld [vmem:[#allocation2 + $0x580] sm:$0xf] }
 0xa03   :  { %12926 = vst [vmem:[#allocation58_spill] sm:$0xff] %v11194_v47  ;;  %v11196_v9 = vld [vmem:[#allocation2 + $0x58c] sm:$0xf0]  ;;  %v11208_v21 = vld [vmem:[#allocation2 + $0x680] sm:$0xf] }
 0xa04   :  { %12927 = vst [vmem:[#allocation47_spill] sm:$0xff] %v11196_v9  ;;  %v11210_v29 = vld [vmem:[#allocation2 + $0x68c] sm:$0xf0]  ;;  %v11212_v4 = vld [vmem:[#allocation2 + $0x780] sm:$0xf] }
 0xa05   :  { %v11214_v36 = vld [vmem:[#allocation2 + $0x78c] sm:$0xf0]  ;;  %v11216_v39 = vld [vmem:[#allocation2 + $0x460] sm:$0xf] }
 0xa06   :  { %12928 = vst [vmem:[#allocation56_spill] sm:$0xff] %v11216_v39  ;;  %v11247_v32 = vld [vmem:[#allocation2 + $0x660] sm:$0xf]  ;;  %v11249_v12 = vld [vmem:[#allocation2 + $0x66c] sm:$0xf0] }
 0xa07   :  { %12934 = vst [vmem:[#allocation55_spill] sm:$0xff] %v11247_v32  ;;  %v11251_v42 = vld [vmem:[#allocation2 + $0x760] sm:$0xf]  ;;  %v11264_v0 = vld [vmem:[#allocation2 + $0x76c] sm:$0xf0] }
 0xa08   :  { %12935 = vst [vmem:[#allocation60_spill] sm:$0xff] %v11249_v12  ;;  %v11266_v30 = vld [vmem:[#allocation2 + $0x440] sm:$0xf]  ;;  %v11268_v23 = vld [vmem:[#allocation2 + $0x44c] sm:$0xf0] }
 0xa09   :  { %12936 = vst [vmem:[#allocation65_spill] sm:$0xff] %v11251_v42  ;;  %v11278_v28 = vld [vmem:[#allocation2 + $0x540] sm:$0xf]  ;;  %v11280_v2 = vld [vmem:[#allocation2 + $0x54c] sm:$0xf0] }
 0xa0a   :  { %12938 = vst [vmem:[#allocation66_spill] sm:$0xff] %v11264_v0  ;;  %v11282_v43 = vld [vmem:[#allocation2 + $0x640] sm:$0xf]  ;;  %v11295_v47 = vld [vmem:[#allocation2 + $0x64c] sm:$0xf0] }
 0xa0b   :  { %12939 = vst [vmem:[#allocation59_spill] sm:$0xff] %v11266_v30  ;;  %v11297_v9 = vld [vmem:[#allocation2 + $0x740] sm:$0xf]  ;;  %v11299_v45 = vld [vmem:[#allocation2 + $0x74c] sm:$0xf0] }
 0xa0c   :  { %12940 = vst [vmem:[#allocation64_spill] sm:$0xff] %v11268_v23  ;;  %v11311_v17 = vld [vmem:[#allocation2 + $0x420] sm:$0xf]  ;;  %v11313_v54 = vld [vmem:[#allocation2 + $0x42c] sm:$0xf0] }
 0xa0d   :  { %12941 = vst [vmem:[#allocation69_spill] sm:$0xff] %v11278_v28  ;;  %v12952_v27 = vld [vmem:[#allocation37_spill] sm:$0xff]  ;;  %v11324_v15 = vld [vmem:[#allocation2 + $0x520] sm:$0xf]  ;;  %v12968_v3 = vld [vmem:[#allocation50_spill] sm:$0xff] }
 0xa0e   :  { %12942 = vst [vmem:[#allocation70_spill] sm:$0xff] %v11280_v2  ;;  %v12953_v44 = vor.u32 %v11063_v59, %v12952_v27  ;;  %v11326_v31 = vld [vmem:[#allocation2 + $0x52c] sm:$0xf0]  ;;  %v12956_v55 = vld [vmem:[#allocation48_spill] sm:$0xff] }
 0xa0f   :  { %12943 = vst [vmem:[#allocation63_spill] sm:$0xff] %v11282_v43  ;;  %v3171_v42 = vperm.slane %v12956_v55, 0  ;;  %v11338_v1 = vld [vmem:[#allocation2 + $0x62c] sm:$0xf0]  ;;  %v11340_v33 = vld [vmem:[#allocation2 + $0x720] sm:$0xf] }
 0xa10   :  { %12945 = vst [vmem:[#allocation68_spill] sm:$0xff] %v11295_v47  ;;  %5033 = vmatpush.bf16.msrb.mxu3 %v12953_v44  ;;  %v11336_v44 = vld [vmem:[#allocation2 + $0x620] sm:$0xf]  ;;  %v12958_v28 = vld [vmem:[#allocation141_spill] sm:$0xff] }
 0xa11   :  { %12946 = vst [vmem:[#allocation73_spill] sm:$0xff] %v11297_v9  ;;  %v3101_v2 = vmul.f32 %v3069_v7, %v12958_v28  ;;  %v12959_v30 = vld [vmem:[#allocation49_spill] sm:$0xff]  ;;  %v12960_v23 = vld [vmem:[#allocation40_spill] sm:$0xff]  ;;  %v12965_v9 = vld [vmem:[#allocation155_spill] sm:$0xff] }
 0xa12   :  { %12947 = vst [vmem:[#allocation74_spill] sm:$0xff] %v11299_v45  ;;  %v12961_v32 = vor.u32 %v12959_v30, %v12960_v23  ;;  %v11348_v43 = vld [vmem:[#allocation2 + $0x72c] sm:$0xf0]  ;;  %v11350_v59 = vld [vmem:[#allocation2 + $0x400] sm:$0xf]  ;;  %v3117_v45 = vmul.f32 %v3077_v16, %v12965_v9 }
 0xa13   :  { %12950 = vst [vmem:[#allocation67_spill] sm:$0xff] %v11311_v17  ;;  %v11352_v27 = vld [vmem:[#allocation2 + $0x40c] sm:$0xf0]  ;;  %v12966_v47 = vld [vmem:[#allocation156_spill] sm:$0xff]  ;;  %v12967_v28 = vld [vmem:[#allocation39_spill] sm:$0xff] }
 0xa14   :  { %12951 = vst [vmem:[#allocation72_spill] sm:$0xff] %v11313_v54  ;;  %4995 = vmatpush.bf16.msra.mxu0 %v12961_v32  ;;  %v12964_v17 = vld [vmem:[#allocation137_spill] sm:$0xff]  ;;  %v3125_v12 = vmul.f32 %v3077_v16, %v12966_v47  ;;  %v12969_v39 = vor.u32 %v12967_v28, %v12968_v3  ;;  %v12970_v30 = vld [vmem:[#allocation51_spill] sm:$0xff]  ;;  %v12971_v32 = vld [vmem:[#allocation42_spill] sm:$0xff]  ;;  %v3211_v28 = vadd.f32 %v3171_v42, %v3117_v45 }
 0xa15   :  { %12954 = vst [vmem:[#allocation71_spill] sm:$0xff] %v11324_v15  ;;  %v3109_v54 = vmul.f32 %v3069_v7, %v12964_v17  ;;  %v12972_v23 = vor.u32 %v12970_v30, %v12971_v32  ;;  %v3070_v7 = vperm.slane %v11150_v35, 1  ;;  %v12973_v9 = vld [vmem:[#allocation41_spill] sm:$0xff]  ;;  %v12974_v17 = vld [vmem:[#allocation52_spill] sm:$0xff]  ;;  %v3078_v32 = vperm.slane %v11152_v26, 1 }
 0xa16   :  { %12955 = vst [vmem:[#allocation76_spill] sm:$0xff] %v11326_v31  ;;  %5008 = vmatpush.bf16.msrb.mxu1 %v12969_v39  ;;  %v3195_v31 = vadd.f32 %v3163_v41, %v3101_v2  ;;  %v12975_v16 = vor.u32 %v12973_v9, %v12974_v17  ;;  %v11371_v47 = vld [vmem:[#allocation2 + $0x500] sm:$0xf]  ;;  %v11373_v3 = vld [vmem:[#allocation2 + $0x50c] sm:$0xf0]  ;;  %v3219_v30 = vadd.f32 %v3171_v42, %v3125_v12 }
 0xa17   :  { %12957 = vst [vmem:[#allocation77_spill] sm:$0xff] %v11340_v33  ;;  %5021 = vmatpush.bf16.msrb.mxu2 %v12972_v23  ;;  %v3203_v39 = vadd.f32 %v3163_v41, %v3109_v54  ;;  %v11380_v15 = vld [vmem:[#allocation2 + $0x600] sm:$0xf]  ;;  %v11382_v0 = vld [vmem:[#allocation2 + $0x60c] sm:$0xf0]  ;;  %v12980_v42 = vor.u32 %v11095_v53, %v11093_v48  ;;  %v3243_v23 = vmax.f32 %v3211_v28, 0.0 }
 0xa18   :  { %12962 = vst [vmem:[#allocation78_spill] sm:$0xff] %v11350_v59  ;;  %5034 = vmatpush.bf16.msrb.mxu3 %v12975_v16  ;;  %v11384_v9 = vld [vmem:[#allocation2 + $0x700] sm:$0xf]  ;;  %v12978_v17 = vld [vmem:[#allocation146_spill] sm:$0xff]  ;;  %v3227_v54 = vmax.f32 %v3195_v31, 0.0  ;;  %v3251_v48 = vmax.f32 %v3219_v30, 0.0  ;;  %v12988_v31 = vor.u32 %v11114_v62, %v11112_v8 }
 0xa19   :  { %12963 = vst [vmem:[#allocation75_spill] sm:$0xff] %v11352_v27  ;;  %v3102_v16 = vmul.f32 %v3070_v7, %v12978_v17  ;;  %v12979_v33 = vld [vmem:[#allocation143_spill] sm:$0xff]  ;;  %4996 = vmatpush.bf16.msra.mxu0 %v12980_v42  ;;  %v11393_v12 = vld [vmem:[#allocation2 + $0x70c] sm:$0xf0]  ;;  %v3235_v2 = vmax.f32 %v3203_v39, 0.0  ;;  %v12990_v39 = vor.u32 %v11122_v13, %v11120_v52  ;;  %v3079_v62 = vperm.slane %v11152_v26, 2 }
 0xa1a   :  { %12976 = vst [vmem:[#allocation80_spill] sm:$0xff] %v11371_v47  ;;  %v3110_v41 = vmul.f32 %v3070_v7, %v12979_v33  ;;  %v12981_v47 = vld [vmem:[#allocation44_spill] sm:$0xff]  ;;  %v12983_v59 = vld [vmem:[#allocation54_spill] sm:$0xff]  ;;  %v12984_v17 = vld [vmem:[#allocation53_spill] sm:$0xff]  ;;  %v8119_v53 = vor.u32 %v11393_v12, %v11384_v9  ;;  %v3315_v8 = vmax.f32 %v3243_v23, %v3251_v48  ;;  %v12996_v48 = vor.u32 %v11142_v25, %v11140_v40 }
 0xa1b   :  { %12977 = vst [vmem:[#allocation81_spill] sm:$0xff] %v11373_v3  ;;  %v12982_v3 = vor.u32 %v11099_v24, %v12981_v47  ;;  %v12985_v27 = vor.u32 %v12983_v59, %v12984_v17  ;;  %v12986_v33 = vld [vmem:[#allocation158_spill] sm:$0xff]  ;;  %v12987_v42 = vld [vmem:[#allocation157_spill] sm:$0xff]  ;;  %v12989_v24 = vor.u32 %v11118_v34, %v11116_v56  ;;  %v3259_v47 = vmax.f32 %v3227_v54, %v3235_v2  ;;  %v12991_v28 = vld [vmem:[#allocation43_spill] sm:$0xff] }
 0xa1c   :  { %v3118_v7 = vmul.f32 %v3078_v32, %v12986_v33  ;;  %v3126_v45 = vmul.f32 %v3078_v32, %v12987_v42  ;;  %5035 = vmatpush.bf16.msrb.mxu3 %v12988_v31  ;;  %v3164_v59 = vperm.slane %v11200_v37, 1  ;;  %v12992_v30 = vor.u32 %v11126_v38, %v12991_v28  ;;  %v12994_v42 = vld [vmem:[#allocation153_spill] sm:$0xff] }
 0xa1d   :  { %5009 = vmatpush.bf16.msrb.mxu1 %v12982_v3  ;;  %5022 = vmatpush.bf16.msrb.mxu2 %v12985_v27  ;;  %v3172_v27 = vperm.slane %v12956_v55, 1  ;;  %v3071_v3 = vperm.slane %v11150_v35, 2  ;;  %v3165_v34 = vperm.slane %v11200_v37, 2  ;;  %v3173_v56 = vperm.slane %v12956_v55, 2  ;;  %v12995_v31 = vld [vmem:[#allocation149_spill] sm:$0xff] }
 0xa1e   :  { %5041 = vmatpush.bf16.msrb.mxu0 %v12989_v24  ;;  %v12993_v32 = vor.u32 %v11138_v19, %v11136_v50  ;;  %v3260_v2 = vrot.slane %v3259_v47, 4  ;;  %v3196_v54 = vadd.f32 %v3164_v59, %v3102_v16  ;;  %v3204_v17 = vadd.f32 %v3164_v59, %v3110_v41  ;;  %v13000_v59 = vld [vmem:[#allocation160_spill] sm:$0xff] }
 0xa1f   :  { %v3212_v52 = vadd.f32 %v3172_v27, %v3118_v7  ;;  %v3316_v13 = vrot.slane %v3315_v8, 4  ;;  %v3220_v33 = vadd.f32 %v3172_v27, %v3126_v45  ;;  %v3103_v38 = vmul.f32 %v3071_v3, %v12994_v42  ;;  %v12999_v45 = vld [vmem:[#allocation159_spill] sm:$0xff] }
 0xa20   :  { %5080 = vmatpush.bf16.msra.mxu3 %v12993_v32  ;;  %v3111_v23 = vmul.f32 %v3071_v3, %v12995_v31  ;;  %v3261_v24 = vmax.f32 %v3259_v47, %v3260_v2  ;;  %v3236_v28 = vmax.f32 %v3204_v17, 0.0  ;;  %v12997_v19 = vor.u32 %v11146_v11, %v11144_v18 }
 0xa21   :  { %5054 = vmatpush.bf16.msra.mxu1 %v12990_v39  ;;  %5067 = vmatpush.bf16.msra.mxu2 %v12992_v30  ;;  %v3228_v39 = vmax.f32 %v3196_v54, 0.0  ;;  %v3244_v30 = vmax.f32 %v3212_v52, 0.0  ;;  %v12998_v50 = vor.u32 %v11160_v20, %v11158_v6  ;;  %v3317_v16 = vmax.f32 %v3315_v8, %v3316_v13 }
 0xa22   :  { %5042 = vmatpush.bf16.msrb.mxu0 %v12996_v48  ;;  %v3252_v41 = vmax.f32 %v3220_v33, 0.0  ;;  %v3119_v7 = vmul.f32 %v3079_v62, %v12999_v45  ;;  %v3127_v27 = vmul.f32 %v3079_v62, %v13000_v59  ;;  %v13001_v25 = vor.u32 %v11164_v22, %v11162_v51 }
 0xa23   :  { %v3262_v40 = vrot.slane %v3261_v24, 2  ;;  %v3266_v47 = vmax.f32 %v3228_v39, %v3236_v28  ;;  %v3197_v3 = vadd.f32 %v3165_v34, %v3103_v38  ;;  %v3205_v32 = vadd.f32 %v3165_v34, %v3111_v23  ;;  %v13008_v28 = vld [vmem:[#allocation154_spill] sm:$0xff] }
 0xa24   :  { %5081 = vmatpush.bf16.msra.mxu3 %v13001_v25  ;;  %v3318_v18 = vrot.slane %v3317_v16, 2  ;;  %v3322_v11 = vmax.f32 %v3244_v30, %v3252_v41  ;;  %v3213_v2 = vadd.f32 %v3173_v56, %v3119_v7  ;;  %v3221_v54 = vadd.f32 %v3173_v56, %v3127_v27  ;;  %v13010_v30 = vld [vmem:[#allocation58_spill] sm:$0xff] }
 0xa25   :  { %5055 = vmatpush.bf16.msra.mxu1 %v12997_v19  ;;  %5068 = vmatpush.bf16.msra.mxu2 %v12998_v50  ;;  %v13002_v20 = vor.u32 %v11168_v58, %v11166_v60  ;;  %v3263_v6 = vmax.f32 %v3261_v24, %v3262_v40  ;;  %v3267_v8 = vrot.slane %v3266_v47, 4  ;;  %v3229_v17 = vmax.f32 %v3197_v3, 0.0  ;;  %v13013_v7 = vld [vmem:[#allocation150_spill] sm:$0xff] }
 0xa26   :  { %v3237_v62 = vmax.f32 %v3205_v32, 0.0  ;;  %v13003_v51 = vor.u32 %v11172_v46, %v11170_v61  ;;  %v13004_v22 = vor.u32 %v11184_v57, %v11182_v63  ;;  %v3319_v34 = vmax.f32 %v3317_v16, %v3318_v18  ;;  %v13006_v57 = vld [vmem:[#allocation57_spill] sm:$0xff] }
 0xa27   :  { %5043 = vmatpush.bf16.msrb.mxu0 %v13002_v20  ;;  %v3323_v52 = vrot.slane %v3322_v11, 4  ;;  %v3245_v13 = vmax.f32 %v3213_v2, 0.0  ;;  %v3253_v56 = vmax.f32 %v3221_v54, 0.0  ;;  %v13005_v60 = vor.u32 %v11188_v14, %v11186_v10  ;;  %v13009_v10 = vld [vmem:[#allocation47_spill] sm:$0xff]  ;;  %v13016_v2 = vld [vmem:[#allocation161_spill] sm:$0xff] }
 0xa28   :  { %v3264_v58 = vrot.slane %v3263_v6, 1  ;;  %v3268_v33 = vmax.f32 %v3266_v47, %v3267_v8  ;;  %v3273_v42 = vmax.f32 %v3229_v17, %v3237_v62  ;;  %v3072_v38 = vperm.slane %v11150_v35, 3  ;;  %v13015_v47 = vld [vmem:[#allocation162_spill] sm:$0xff]  ;;  %v13020_v17 = vld [vmem:[#allocation61_spill] sm:$0xff] }
 0xa29   :  { %5056 = vmatpush.bf16.msra.mxu1 %v13003_v51  ;;  %5069 = vmatpush.bf16.msra.mxu2 %v13004_v22  ;;  %v3320_v31 = vrot.slane %v3319_v34, 1  ;;  %v3324_v61 = vmax.f32 %v3322_v11, %v3323_v52  ;;  %v3329_v46 = vmax.f32 %v3245_v13, %v3253_v56  ;;  %v3080_v23 = vperm.slane %v11152_v26, 3  ;;  %v13022_v51 = vld [vmem:[#allocation60_spill] sm:$0xff]  ;;  %v13023_v22 = vld [vmem:[#allocation55_spill] sm:$0xff] }
 0xa2a   :  { %5082 = vmatpush.bf16.msra.mxu3 %v13005_v60  ;;  %v13007_v63 = vor.u32 %v11192_v49, %v13006_v57  ;;  %v3265_v48 = vmax.f32 %v3263_v6, %v3264_v58  ;;  %v3269_v24 = vrot.slane %v3268_v33, 2  ;;  %v3274_v39 = vrot.slane %v3273_v42, 4  ;;  %v13026_v58 = vld [vmem:[#allocation65_spill] sm:$0xff] }
 0xa2b   :  { %v3104_v14 = vmul.f32 %v3072_v38, %v13008_v28  ;;  %v13011_v19 = vor.u32 %v13009_v10, %v13010_v30  ;;  %v13012_v50 = vor.u32 %v11210_v29, %v11208_v21  ;;  %v3321_v16 = vmax.f32 %v3319_v34, %v3320_v31  ;;  %v13017_v29 = vld [vmem:[#allocation56_spill] sm:$0xff]  ;;  %v11493_v28 = vld [vmem:[#allocation2 + $0x1f0] sm:$0xf0] }
 0xa2c   :  { %5044 = vmatpush.bf16.msrb.mxu0 %v13007_v63  ;;  %v3325_v41 = vrot.slane %v3324_v61, 2  ;;  %v3330_v45 = vrot.slane %v3329_v46, 4  ;;  %v3112_v59 = vmul.f32 %v3072_v38, %v13013_v7  ;;  %v13014_v49 = vor.u32 %v11214_v36, %v11212_v4  ;;  %v13019_v36 = vld [vmem:[#allocation62_spill] sm:$0xff]  ;;  %v11495_v10 = vld [vmem:[#allocation2 + $0x2e4] sm:$0xf] }
 0xa2d   :  { %5057 = vmatpush.bf16.msra.mxu1 %v13011_v19  ;;  %5070 = vmatpush.bf16.msra.mxu2 %v13012_v50  ;;  %v3627_v27 = vpack.c.bf16 %v3265_v48, %v3265_v48  ;;  %v3270_v25 = vmax.f32 %v3268_v33, %v3269_v24  ;;  %v3275_v40 = vmax.f32 %v3273_v42, %v3274_v39  ;;  %v3166_v4 = vperm.slane %v11200_v37, 3  ;;  %v11491_v39 = vld [vmem:[#allocation2 + $0x1e4] sm:$0xf]  ;;  %v11497_v30 = vld [vmem:[#allocation2 + $0x2f0] sm:$0xf0] }
 0xa2e   :  { %5083 = vmatpush.bf16.msra.mxu3 %v13014_v49  ;;  %v3120_v3 = vmul.f32 %v3080_v23, %v13015_v47  ;;  %v3635_v32 = vpack.c.bf16 %v3321_v16, %v3321_v16  ;;  %v3326_v18 = vmax.f32 %v3324_v61, %v3325_v41  ;;  %v3331_v11 = vmax.f32 %v3329_v46, %v3330_v45  ;;  %v11486_v46 = vld [vmem:[#allocation2 + $0xe4] sm:$0xf]  ;;  %v11506_v49 = vld [vmem:[#allocation2 + $0x3f0] sm:$0xf0] }
 0xa2f   :  { %v3128_v21 = vmul.f32 %v3080_v23, %v13016_v2  ;;  %v13018_v54 = vor.u32 %v11229_v5, %v13017_v29  ;;  %v3669_v20 = vunpack.c.l.b16 %v3627_v27  ;;  %v3271_v6 = vrot.slane %v3270_v25, 1  ;;  %v13025_v5 = vld [vmem:[#allocation66_spill] sm:$0xff]  ;;  %v13028_v19 = vld [vmem:[#allocation64_spill] sm:$0xff] }
 0xa30   :  { %v3276_v8 = vrot.slane %v3275_v40, 2  ;;  %v13021_v62 = vor.u32 %v13019_v36, %v13020_v17  ;;  %v13024_v34 = vor.u32 %v13022_v51, %v13023_v22  ;;  %v3677_v52 = vunpack.c.l.b16 %v3635_v32  ;;  %v11488_v23 = vld [vmem:[#allocation2 + $0xf0] sm:$0xf0]  ;;  %v13034_v47 = vld [vmem:[#allocation68_spill] sm:$0xff] }
 0xa31   :  { %5045 = vmatpush.bf16.msrb.mxu0 %v13018_v54  ;;  %v3327_v13 = vrot.slane %v3326_v18, 1  ;;  %v3332_v56 = vrot.slane %v3331_v11, 2  ;;  %v3174_v60 = vperm.slane %v12956_v55, 3  ;;  %v13027_v33 = vor.u32 %v13025_v5, %v13026_v58  ;;  %v13031_v27 = vld [vmem:[#allocation70_spill] sm:$0xff]  ;;  %v11514_v54 = vld [vmem:[#allocation2 + $0xc4] sm:$0xf] }
 0xa32   :  { %5058 = vmatpush.bf16.msra.mxu1 %v13021_v62  ;;  %5071 = vmatpush.bf16.msra.mxu2 %v13024_v34  ;;  %v3272_v42 = vmax.f32 %v3270_v25, %v3271_v6  ;;  %v3277_v38 = vmax.f32 %v3275_v40, %v3276_v8  ;;  %v3198_v31 = vadd.f32 %v3166_v4, %v3104_v14  ;;  %v13029_v14 = vld [vmem:[#allocation59_spill] sm:$0xff]  ;;  %v13032_v25 = vld [vmem:[#allocation69_spill] sm:$0xff]  ;;  %v11522_v51 = vld [vmem:[#allocation2 + $0x1c4] sm:$0xf] }
 0xa33   :  { %5084 = vmatpush.bf16.msra.mxu3 %v13027_v33  ;;  %v3206_v61 = vadd.f32 %v3166_v4, %v3112_v59  ;;  %v3685_v57 = vsel %vm299_vm3, %v3677_v52, %v3669_v20  ;;  %v3328_v63 = vmax.f32 %v3326_v18, %v3327_v13  ;;  %v3333_v48 = vmax.f32 %v3331_v11, %v3332_v56  ;;  %v11504_v59 = vld [vmem:[#allocation2 + $0x3e4] sm:$0xf]  ;;  %v11516_v20 = vld [vmem:[#allocation2 + $0xd0] sm:$0xf0]  ;;  %v13038_v6 = vld [vmem:[#allocation73_spill] sm:$0xff] }
 0xa34   :  { %v3214_v24 = vadd.f32 %v3174_v60, %v3120_v3  ;;  %v13030_v50 = vor.u32 %v13028_v19, %v13029_v14  ;;  %v11502_v16 = vpack.c.b16 %v3685_v57, %v3685_v57  ;;  %v3628_v41 = vpack.c.bf16 %v3272_v42, %v3272_v42  ;;  %v13035_v3 = vld [vmem:[#allocation63_spill] sm:$0xff]  ;;  %v11524_v22 = vld [vmem:[#allocation2 + $0x1d0] sm:$0xf0]  ;;  %v11526_v34 = vld [vmem:[#allocation2 + $0x2c4] sm:$0xf] }
 0xa35   :  { %v3278_v45 = vrot.slane %v3277_v38, 1  ;;  %v3222_v7 = vadd.f32 %v3174_v60, %v3128_v21  ;;  %v13033_v40 = vor.u32 %v13031_v27, %v13032_v25  ;;  %v13036_v32 = vor.u32 %v13034_v47, %v13035_v3  ;;  %v13037_v21 = vld [vmem:[#allocation74_spill] sm:$0xff]  ;;  %v11532_v58 = vld [vmem:[#allocation2 + $0x3c4] sm:$0xf]  ;;  %v13047_v3 = vld [vmem:[#allocation77_spill] sm:$0xff] }
 0xa36   :  { %5046 = vmatpush.bf16.msrb.mxu0 %v13030_v50  ;;  %v3636_v18 = vpack.c.bf16 %v3328_v63, %v3328_v63  ;;  %v3334_v11 = vrot.slane %v3333_v48, 1  ;;  %v3230_v2 = vmax.f32 %v3198_v31, 0.0  ;;  %v3238_v29 = vmax.f32 %v3206_v61, 0.0  ;;  %v11528_v52 = vld [vmem:[#allocation2 + $0x2d0] sm:$0xf0]  ;;  %v13040_v31 = vld [vmem:[#allocation72_spill] sm:$0xff] }
 0xa37   :  { %5059 = vmatpush.bf16.msra.mxu1 %v13033_v40  ;;  %5072 = vmatpush.bf16.msra.mxu2 %v13036_v32  ;;  %v13039_v8 = vor.u32 %v13037_v21, %v13038_v6  ;;  %v3670_v4 = vunpack.c.l.b16 %v3628_v41  ;;  %v3279_v36 = vmax.f32 %v3277_v38, %v3278_v45  ;;  %v3246_v17 = vmax.f32 %v3214_v24, 0.0  ;;  %v11534_v33 = vld [vmem:[#allocation2 + $0x3d0] sm:$0xf0]  ;;  %v11536_v42 = vld [vmem:[#allocation2 + $0xa4] sm:$0xf]  ;;  %v13041_v61 = vld [vmem:[#allocation67_spill] sm:$0xff] }
 0xa38   :  { %4997 = vmatmul.bf16.vlgmr.msra.gmra.mxu0 %v11502_v16  ;;  %v3254_v62 = vmax.f32 %v3222_v7, 0.0  ;;  %v3678_v13 = vunpack.c.l.b16 %v3636_v18  ;;  %v3335_v56 = vmax.f32 %v3333_v48, %v3334_v11  ;;  %v3280_v60 = vmax.f32 %v3230_v2, %v3238_v29  ;;  %v11538_v38 = vld [vmem:[#allocation2 + $0xb0] sm:$0xf0]  ;;  %v11551_v14 = vld [vmem:[#allocation2 + $0x2a4] sm:$0xf]  ;;  %v13044_v45 = vld [vmem:[#allocation71_spill] sm:$0xff] }
 0xa39   :  { %5085 = vmatpush.bf16.msra.mxu3 %v13039_v8  ;;  %v7339_v5 = vor.u32 %v11486_v46, %v11488_v23  ;;  %v13042_v57 = vor.u32 %v13040_v31, %v13041_v61  ;;  %v3629_v63 = vpack.c.bf16 %v3279_v36, %v3279_v36  ;;  %v7467_v48 = vor.u32 %v11491_v39, %v11493_v28  ;;  %v11547_v23 = vld [vmem:[#allocation2 + $0x1a4] sm:$0xf]  ;;  %v11549_v19 = vld [vmem:[#allocation2 + $0x1b0] sm:$0xf0] }
 0xa3a   :  { %v3336_v24 = vmax.f32 %v3246_v17, %v3254_v62  ;;  %v7595_v46 = vor.u32 %v11495_v10, %v11497_v30  ;;  %v11553_v50 = vld [vmem:[#allocation2 + $0x2b0] sm:$0xf0]  ;;  %v13043_v41 = vld [vmem:[#allocation76_spill] sm:$0xff]  ;;  %v13046_v27 = vor.u32 %v11338_v1, %v11336_v44  ;;  %v3686_v39 = vsel %vm299_vm3, %v3678_v13, %v3670_v4  ;;  %v13049_v62 = vld [vmem:[#allocation75_spill] sm:$0xff] }
 0xa3b   :  { %5047 = vmatpush.bf16.msrb.mxu0 %v13042_v57  ;;  %v13045_v7 = vor.u32 %v13043_v41, %v13044_v45  ;;  %v3637_v28 = vpack.c.bf16 %v3335_v56, %v3335_v56  ;;  %v3281_v10 = vrot.slane %v3280_v60, 4  ;;  %v7723_v30 = vor.u32 %v11504_v59, %v11506_v49  ;;  %v11564_v25 = vld [vmem:[#allocation2 + $0x3a4] sm:$0xf]  ;;  %v11566_v40 = vld [vmem:[#allocation2 + $0x3b0] sm:$0xf0] }
 0xa3c   :  { %5073 = vmatpush.bf16.msra.mxu2 %v13046_v27  ;;  %v11568_v47 = vld [vmem:[#allocation2 + $0x84] sm:$0xf]  ;;  %v13048_v32 = vor.u32 %v11348_v43, %v13047_v3  ;;  %v11573_v18 = vpack.c.b16 %v3686_v39, %v3686_v39  ;;  %v3671_v1 = vunpack.c.l.b16 %v3629_v63  ;;  %v3337_v44 = vrot.slane %v3336_v24, 4  ;;  %v11577_v2 = vld [vmem:[#allocation2 + $0x90] sm:$0xf0]  ;;  %v13058_v3 = vld [vmem:[#allocation171_spill] sm:$0xff] }
 0xa3d   :  { %5060 = vmatpush.bf16.msra.mxu1 %v13045_v7  ;;  %v7323_v11 = vor.u32 %v11514_v54, %v11516_v20  ;;  %v11579_v29 = vld [vmem:[#allocation2 + $0x184] sm:$0xf]  ;;  %v3679_v21 = vunpack.c.l.b16 %v3637_v28  ;;  %v3282_v6 = vmax.f32 %v3280_v60, %v3281_v10  ;;  %v7451_v8 = vor.u32 %v11522_v51, %v11524_v22  ;;  %v11585_v4 = vld [vmem:[#allocation2 + $0x190] sm:$0xf0]  ;;  %v13052_v60 = vld [vmem:[#allocation81_spill] sm:$0xff] }
 0xa3e   :  { %5086 = vmatpush.bf16.msra.mxu3 %v13048_v32  ;;  %v7579_v43 = vor.u32 %v11526_v34, %v11528_v52  ;;  %v11587_v36 = vld [vmem:[#allocation2 + $0x284] sm:$0xf]  ;;  %v11589_v17 = vld [vmem:[#allocation2 + $0x290] sm:$0xf0]  ;;  %5010 = vmatmul.bf16.vlgmr.msrb.gmra.mxu1 %v11573_v18  ;;  %v3338_v13 = vmax.f32 %v3336_v24, %v3337_v44  ;;  %v7707_v56 = vor.u32 %v11532_v58, %v11534_v33  ;;  %v3073_v52 = vperm.slane %v11150_v35, 4 }
 0xa3f   :  { %v13050_v54 = vld [vmem:[#allocation78_spill] sm:$0xff]  ;;  %v7307_v51 = vor.u32 %v11536_v42, %v11538_v38  ;;  %v11599_v22 = vld [vmem:[#allocation2 + $0x384] sm:$0xf]  ;;  %v13055_v57 = vor.u32 %v11382_v0, %v11380_v15  ;;  %v3687_v63 = vsel %vm299_vm3, %v3679_v21, %v3671_v1  ;;  %v3283_v24 = vrot.slane %v3282_v6, 2 }
 0xa40   :  { %v13051_v20 = vor.u32 %v13049_v62, %v13050_v54  ;;  %v11601_v34 = vld [vmem:[#allocation2 + $0x390] sm:$0xf0]  ;;  %v13053_v31 = vld [vmem:[#allocation80_spill] sm:$0xff]  ;;  %v7435_v42 = vor.u32 %v11547_v23, %v11549_v19  ;;  %v7563_v38 = vor.u32 %v11551_v14, %v11553_v50  ;;  %v11618_v41 = vpack.c.b16 %v3687_v63, %v3687_v63  ;;  %v13057_v50 = vld [vmem:[#allocation163_spill] sm:$0xff] }
 0xa41   :  { %v13054_v61 = vor.u32 %v13052_v60, %v13053_v31  ;;  %5074 = vmatpush.bf16.msra.mxu2 %v13055_v57  ;;  %v3339_v45 = vrot.slane %v3338_v13, 2  ;;  %v7691_v0 = vor.u32 %v11564_v25, %v11566_v40  ;;  %v7291_v15 = vor.u32 %v11568_v47, %v11577_v2  ;;  %v13059_v1 = vld [vmem:[#allocation172_spill] sm:$0xff] }
 0xa42   :  { %5048 = vmatpush.bf16.msrb.mxu0 %v13051_v20  ;;  %5087 = vmatpush.bf16.msra.mxu3 %v8119_v53  ;;  %v3284_v7 = vmax.f32 %v3282_v6, %v3283_v24  ;;  %v7419_v23 = vor.u32 %v11579_v29, %v11585_v4  ;;  %v7547_v19 = vor.u32 %v11587_v36, %v11589_v17  ;;  %v3081_v53 = vperm.slane %v11152_v26, 4  ;;  %v13060_v4 = vld [vmem:[#allocation166_spill] sm:$0xff] }
 0xa43   :  { %5061 = vmatpush.bf16.msra.mxu1 %v13054_v61  ;;  %v7675_v9 = vor.u32 %v11599_v22, %v11601_v34  ;;  %5023 = vmatmul.bf16.vlgmr.msrb.gmra.mxu2 %v11618_v41  ;;  %v3340_v12 = vmax.f32 %v3338_v13, %v3339_v45  ;;  %v3113_v27 = vmul.f32 %v3073_v52, %v13057_v50  ;;  %v3175_v28 = vperm.slane %v12956_v55, 4  ;;  %v13061_v13 = vld [vmem:[#allocation165_spill] sm:$0xff]  ;;  %v13062_v61 = vld [vmem:[#allocation174_spill] sm:$0xff] }
 0xa44   :  { %v3285_v39 = vrot.slane %v3284_v7, 1  ;;  %v3074_v10 = vperm.slane %v11150_v35, 5  ;;  %v3121_v32 = vmul.f32 %v3081_v53, %v13058_v3  ;;  %v3129_v44 = vmul.f32 %v3081_v53, %v13059_v1 }
 0xa45   :  { %5119 = vmatpush.bf16.msrb.mxu2 %v7595_v46  ;;  %v3341_v47 = vrot.slane %v3340_v12, 1  ;;  %v3082_v2 = vperm.slane %v11152_v26, 5  ;;  %v3076_v36 = vperm.slane %v11150_v35, 7  ;;  %v3084_v17 = vperm.slane %v11152_v26, 7 }
 0xa46   :  { %5093 = vmatpush.bf16.msra.mxu0 %v7339_v5  ;;  %v13056_v5 = vld [vmem:[#allocation164_spill] sm:$0xff]  ;;  %v3286_v29 = vmax.f32 %v3284_v7, %v3285_v39  ;;  %v3106_v46 = vmul.f32 %v3074_v10, %v13060_v4  ;;  %v3215_v54 = vadd.f32 %v3175_v28, %v3121_v32  ;;  %v3223_v20 = vadd.f32 %v3175_v28, %v3129_v44 }
 0xa47   :  { %5106 = vmatpush.bf16.msrb.mxu1 %v7467_v48  ;;  %v3105_v14 = vmul.f32 %v3073_v52, %v13056_v5  ;;  %v3167_v48 = vperm.slane %v11200_v37, 4  ;;  %v3342_v62 = vmax.f32 %v3340_v12, %v3341_v47  ;;  %v3114_v52 = vmul.f32 %v3074_v10, %v13061_v13  ;;  %v13064_v32 = vld [vmem:[#allocation168_spill] sm:$0xff] }
 0xa48   :  { %v3630_v60 = vpack.c.bf16 %v3286_v29, %v3286_v29  ;;  %v3122_v57 = vmul.f32 %v3082_v2, %v13062_v61  ;;  %v3247_v24 = vmax.f32 %v3215_v54, 0.0  ;;  %v3255_v45 = vmax.f32 %v3223_v20, 0.0  ;;  %v13066_v20 = vld [vmem:[#allocation36_spill] sm:$0xff] }
 0xa49   :  { %v3199_v21 = vadd.f32 %v3167_v48, %v3105_v14  ;;  %v3207_v6 = vadd.f32 %v3167_v48, %v3113_v27  ;;  %5120 = vmatpush.bf16.msrb.mxu2 %v7579_v43  ;;  %v3638_v63 = vpack.c.bf16 %v3342_v62, %v3342_v62  ;;  %v3168_v12 = vperm.slane %v11200_v37, 5  ;;  %v13065_v62 = vld [vmem:[#allocation167_spill] sm:$0xff] }
 0xa4a   :  { %5094 = vmatpush.bf16.msra.mxu0 %v7323_v11  ;;  %v3672_v53 = vunpack.c.l.b16 %v3630_v60  ;;  %v3176_v14 = vperm.slane %v12956_v55, 5  ;;  %v3343_v27 = vmax.f32 %v3247_v24, %v3255_v45  ;;  %v3075_v43 = vperm.slane %v11150_v35, 6 }
 0xa4b   :  { %5107 = vmatpush.bf16.msrb.mxu1 %v7451_v8  ;;  %v3231_v11 = vmax.f32 %v3199_v21, 0.0  ;;  %v3239_v31 = vmax.f32 %v3207_v6, 0.0  ;;  %v13063_v8 = vld [vmem:[#allocation173_spill] sm:$0xff]  ;;  %v3680_v50 = vunpack.c.l.b16 %v3638_v63  ;;  %v3083_v39 = vperm.slane %v11152_v26, 6 }
 0xa4c   :  { %v3130_v7 = vmul.f32 %v3082_v2, %v13063_v8  ;;  %v3208_v28 = vadd.f32 %v3168_v12, %v3114_v52  ;;  %v3216_v10 = vadd.f32 %v3176_v14, %v3122_v57  ;;  %v3107_v1 = vmul.f32 %v3075_v43, %v13064_v32  ;;  %v13067_v52 = vld [vmem:[#allocation38_spill] sm:$0xff] }
 0xa4d   :  { %v3287_v5 = vmax.f32 %v3231_v11, %v3239_v31  ;;  %5121 = vmatpush.bf16.msrb.mxu2 %v7563_v38  ;;  %v3688_v47 = vsel %vm299_vm3, %v3680_v50, %v3672_v53  ;;  %v3123_v13 = vmul.f32 %v3083_v39, %v13066_v20  ;;  %v3169_v31 = vperm.slane %v11200_v37, 6 }
 0xa4e   :  { %5095 = vmatpush.bf16.msra.mxu0 %v7307_v51  ;;  %v3200_v51 = vadd.f32 %v3168_v12, %v3106_v46  ;;  %v3224_v3 = vadd.f32 %v3176_v14, %v3130_v7  ;;  %v11650_v44 = vpack.c.b16 %v3688_v47, %v3688_v47  ;;  %v3240_v21 = vmax.f32 %v3208_v28, 0.0 }
 0xa4f   :  { %5108 = vmatpush.bf16.msrb.mxu1 %v7435_v42  ;;  %v3288_v48 = vrot.slane %v3287_v5, 4  ;;  %v3344_v42 = vrot.slane %v3343_v27, 4  ;;  %v3248_v4 = vmax.f32 %v3216_v10, 0.0  ;;  %v3115_v46 = vmul.f32 %v3075_v43, %v13065_v62  ;;  %v13071_v62 = vld [vmem:[#allocation45_spill] sm:$0xff] }
 0xa50   :  { %v3232_v29 = vmax.f32 %v3200_v51, 0.0  ;;  %v3256_v38 = vmax.f32 %v3224_v3, 0.0  ;;  %5036 = vmatmul.bf16.vlgmr.msrb.gmra.mxu3 %v11650_v44  ;;  %v3177_v61 = vperm.slane %v12956_v55, 6  ;;  %v3201_v45 = vadd.f32 %v3169_v31, %v3107_v1  ;;  %v13068_v51 = vld [vmem:[#allocation170_spill] sm:$0xff]  ;;  %v13069_v3 = vld [vmem:[#allocation169_spill] sm:$0xff] }
 0xa51   :  { %v3289_v2 = vmax.f32 %v3287_v5, %v3288_v48  ;;  %v3345_v6 = vmax.f32 %v3343_v27, %v3344_v42  ;;  %5122 = vmatpush.bf16.msrb.mxu2 %v7547_v19  ;;  %5132 = vmatpush.bf16.msrb.mxu3 %v7723_v30  ;;  %v3209_v8 = vadd.f32 %v3169_v31, %v3115_v46  ;;  %v13070_v1 = vld [vmem:[#allocation46_spill] sm:$0xff]  ;;  %v3178_v40 = vperm.slane %v12956_v55, 7 }
 0xa52   :  { %5096 = vmatpush.bf16.msra.mxu0 %v7291_v15  ;;  %v3294_v54 = vmax.f32 %v3232_v29, %v3240_v21  ;;  %v3350_v11 = vmax.f32 %v3248_v4, %v3256_v38  ;;  %v3217_v59 = vadd.f32 %v3177_v61, %v3123_v13  ;;  %v3233_v12 = vmax.f32 %v3201_v45, 0.0  ;;  %v8664_v29 = vld [vmem:[#allocation2 + $0x64] sm:$0xf]  ;;  %v7272_v21 = vld [vmem:[#allocation2 + $0x70] sm:$0xf0] }
 0xa53   :  { %5109 = vmatpush.bf16.msrb.mxu1 %v7419_v23  ;;  %v3290_v15 = vrot.slane %v3289_v2, 2  ;;  %v3131_v23 = vmul.f32 %v3083_v39, %v13067_v52  ;;  %v3346_v60 = vrot.slane %v3345_v6, 2  ;;  %v3241_v14 = vmax.f32 %v3209_v8, 0.0  ;;  %v7528_v55 = vld [vmem:[#allocation2 + $0x270] sm:$0xf0] }
 0xa54   :  { %v3295_v63 = vrot.slane %v3294_v54, 4  ;;  %v3351_v24 = vrot.slane %v3350_v11, 4  ;;  %v3249_v27 = vmax.f32 %v3217_v59, 0.0  ;;  %v3108_v28 = vmul.f32 %v3076_v36, %v13068_v51 }
 0xa55   :  { %v3291_v57 = vmax.f32 %v3289_v2, %v3290_v15  ;;  %v3347_v19 = vmax.f32 %v3345_v6, %v3346_v60  ;;  %v3225_v49 = vadd.f32 %v3177_v61, %v3131_v23  ;;  %5133 = vmatpush.bf16.msrb.mxu3 %v7707_v56  ;;  %v3301_v48 = vmax.f32 %v3233_v12, %v3241_v14  ;;  %v8696_v61 = vld [vmem:[#allocation2 + $0x164] sm:$0xf]  ;;  %v7384_v14 = vld [vmem:[#allocation2 + $0x150] sm:$0xf0] }
 0xa56   :  { %v3296_v53 = vmax.f32 %v3294_v54, %v3295_v63  ;;  %v3352_v5 = vmax.f32 %v3350_v11, %v3351_v24  ;;  %v3116_v32 = vmul.f32 %v3076_v36, %v13069_v3  ;;  %v3124_v2 = vmul.f32 %v3084_v17, %v13070_v1  ;;  %v8728_v63 = vld [vmem:[#allocation2 + $0x264] sm:$0xf]  ;;  %v7240_v1 = vld [vmem:[#allocation2 + $0x30] sm:$0xf0] }
 0xa57   :  { %v3292_v7 = vrot.slane %v3291_v57, 1  ;;  %v3348_v30 = vrot.slane %v3347_v19, 1  ;;  %v3257_v26 = vmax.f32 %v3225_v49, 0.0  ;;  %v3302_v56 = vrot.slane %v3301_v48, 4  ;;  %v8760_v24 = vld [vmem:[#allocation2 + $0x364] sm:$0xf] }
 0xa58   :  { %v3297_v35 = vrot.slane %v3296_v53, 2  ;;  %v3353_v39 = vrot.slane %v3352_v5, 2  ;;  %v3132_v46 = vmul.f32 %v3084_v17, %v13071_v62  ;;  %v3170_v13 = vperm.slane %v11200_v37, 7  ;;  %v8692_v12 = vld [vmem:[#allocation2 + $0x144] sm:$0xf] }
 0xa59   :  { %v3293_v50 = vmax.f32 %v3291_v57, %v3292_v7  ;;  %v3349_v43 = vmax.f32 %v3347_v19, %v3348_v30  ;;  %v3357_v42 = vmax.f32 %v3249_v27, %v3257_v26  ;;  %5134 = vmatpush.bf16.msrb.mxu3 %v7691_v0  ;;  %v3303_v20 = vmax.f32 %v3301_v48, %v3302_v56  ;;  %v7400_v57 = vld [vmem:[#allocation2 + $0x170] sm:$0xf0]  ;;  %v8660_v7 = vld [vmem:[#allocation2 + $0x44] sm:$0xf] }
 0xa5a   :  { %v3298_v47 = vmax.f32 %v3296_v53, %v3297_v35  ;;  %v3354_v33 = vmax.f32 %v3352_v5, %v3353_v39  ;;  %v7275_v0 = vor.u32 %v8664_v29, %v7272_v21  ;;  %v3202_v31 = vadd.f32 %v3170_v13, %v3108_v28  ;;  %v7256_v53 = vld [vmem:[#allocation2 + $0x50] sm:$0xf0]  ;;  %v8656_v56 = vld [vmem:[#allocation2 + $0x24] sm:$0xf] }
 0xa5b   :  { %v3631_v10 = vpack.c.bf16 %v3293_v50, %v3293_v50  ;;  %v3639_v58 = vpack.c.bf16 %v3349_v43, %v3349_v43  ;;  %v3358_v38 = vrot.slane %v3357_v42, 4  ;;  %v3304_v11 = vrot.slane %v3303_v20, 2  ;;  %v8724_v50 = vld [vmem:[#allocation2 + $0x244] sm:$0xf]  ;;  %v7512_v39 = vld [vmem:[#allocation2 + $0x250] sm:$0xf0] }
 0xa5c   :  { %v3299_v4 = vrot.slane %v3298_v47, 1  ;;  %v3355_v54 = vrot.slane %v3354_v33, 1  ;;  %v3210_v19 = vadd.f32 %v3170_v13, %v3116_v32  ;;  %5097 = vmatpush.bf16.msra.mxu0 %v7275_v0  ;;  %v3218_v22 = vadd.f32 %v3178_v40, %v3124_v2  ;;  %v8688_v2 = vld [vmem:[#allocation2 + $0x124] sm:$0xf]  ;;  %v7496_v13 = vld [vmem:[#allocation2 + $0x230] sm:$0xf0] }
 0xa5d   :  { %v3673_v6 = vunpack.c.l.b16 %v3631_v10  ;;  %v3681_v15 = vunpack.c.l.b16 %v3639_v58  ;;  %v3359_v25 = vmax.f32 %v3357_v42, %v3358_v38  ;;  %5135 = vmatpush.bf16.msrb.mxu3 %v7675_v9  ;;  %v3305_v8 = vmax.f32 %v3303_v20, %v3304_v11  ;;  %v7656_v9 = vld [vmem:[#allocation2 + $0x370] sm:$0xf0]  ;;  %v8720_v62 = vld [vmem:[#allocation2 + $0x224] sm:$0xf] }
 0xa5e   :  { %v3300_v52 = vmax.f32 %v3298_v47, %v3299_v4  ;;  %v3356_v60 = vmax.f32 %v3354_v33, %v3355_v54  ;;  %v3226_v34 = vadd.f32 %v3178_v40, %v3132_v46  ;;  %v3234_v30 = vmax.f32 %v3202_v31, 0.0  ;;  %v8756_v47 = vld [vmem:[#allocation2 + $0x344] sm:$0xf]  ;;  %v7640_v42 = vld [vmem:[#allocation2 + $0x350] sm:$0xf0] }
 0xa5f   :  { %v3689_v23 = vsel %vm299_vm3, %v3681_v15, %v3673_v6  ;;  %v3360_v17 = vrot.slane %v3359_v25, 2  ;;  %v3242_v5 = vmax.f32 %v3210_v19, 0.0  ;;  %v3306_v27 = vrot.slane %v3305_v8, 1  ;;  %v7368_v38 = vld [vmem:[#allocation2 + $0x130] sm:$0xf0] }
 0xa60   :  { %v11682_v36 = vpack.c.b16 %v3689_v23, %v3689_v23  ;;  %v3632_v37 = vpack.c.bf16 %v3300_v52, %v3300_v52  ;;  %v3640_v45 = vpack.c.bf16 %v3356_v60, %v3356_v60  ;;  %v3250_v26 = vmax.f32 %v3218_v22, 0.0  ;;  %v8752_v52 = vld [vmem:[#allocation2 + $0x324] sm:$0xf]  ;;  %v7624_v23 = vld [vmem:[#allocation2 + $0x330] sm:$0xf0] }
 0xa61   :  { %v3361_v49 = vmax.f32 %v3359_v25, %v3360_v17  ;;  %v3258_v43 = vmax.f32 %v3226_v34, 0.0  ;;  %v3308_v51 = vmax.f32 %v3234_v30, %v3242_v5  ;;  %v7403_v28 = vor.u32 %v8696_v61, %v7400_v57  ;;  %v8652_v60 = vld [vmem:[#allocation2 + $0x4] sm:$0xf]  ;;  %v7224_v11 = vld [vmem:[#allocation2 + $0x10] sm:$0xf0] }
 0xa62   :  { %5049 = vmatmul.bf16.vlgmr.msrb.gmra.mxu0 %v11682_v36  ;;  %v3674_v59 = vunpack.c.l.b16 %v3632_v37  ;;  %v3682_v35 = vunpack.c.l.b16 %v3640_v45  ;;  %v7531_v10 = vor.u32 %v8728_v63, %v7528_v55  ;;  %v3307_v32 = vmax.f32 %v3305_v8, %v3306_v27  ;;  %v8684_v63 = vld [vmem:[#allocation2 + $0x104] sm:$0xf]  ;;  %v7352_v37 = vld [vmem:[#allocation2 + $0x110] sm:$0xf0] }
 0xa63   :  { %v3362_v48 = vrot.slane %v3361_v49, 1  ;;  %v3364_v58 = vmax.f32 %v3250_v26, %v3258_v43  ;;  %v7659_v33 = vor.u32 %v8760_v24, %v7656_v9  ;;  %v3309_v6 = vrot.slane %v3308_v51, 4  ;;  %5110 = vmatpush.bf16.msrb.mxu1 %v7403_v28  ;;  %v8716_v17 = vld [vmem:[#allocation2 + $0x204] sm:$0xf]  ;;  %v7848_v22 = vld [vmem:[#allocation2 + $0x4f0] sm:$0xf0] }
 0xa64   :  { %v3690_v3 = vsel %vm299_vm3, %v3682_v35, %v3674_v59  ;;  %5123 = vmatpush.bf16.msrb.mxu2 %v7531_v10  ;;  %v7259_v4 = vor.u32 %v8660_v7, %v7256_v53  ;;  %v3633_v46 = vpack.c.bf16 %v3307_v32, %v3307_v32  ;;  %v7387_v54 = vor.u32 %v8692_v12, %v7384_v14  ;;  %v8808_v8 = vld [vmem:[#allocation2 + $0x4e4] sm:$0xf]  ;;  %v7480_v7 = vld [vmem:[#allocation2 + $0x210] sm:$0xf0] }
 0xa65   :  { %v11686_v29 = vpack.c.b16 %v3690_v3, %v3690_v3  ;;  %v3363_v21 = vmax.f32 %v3361_v49, %v3362_v48  ;;  %v3365_v15 = vrot.slane %v3364_v58, 4  ;;  %5136 = vmatpush.bf16.msrb.mxu3 %v7659_v33  ;;  %v7515_v20 = vor.u32 %v8724_v50, %v7512_v39  ;;  %v8748_v53 = vld [vmem:[#allocation2 + $0x304] sm:$0xf]  ;;  %v7608_v5 = vld [vmem:[#allocation2 + $0x310] sm:$0xf0] }
 0xa66   :  { %v3310_v40 = vmax.f32 %v3308_v51, %v3309_v6  ;;  %5098 = vmatpush.bf16.msra.mxu0 %v7259_v4  ;;  %v7643_v0 = vor.u32 %v8756_v47, %v7640_v42  ;;  %v3675_v31 = vunpack.c.l.b16 %v3633_v46  ;;  %v7243_v57 = vor.u32 %v8656_v56, %v7240_v1  ;;  %v8840_v12 = vld [vmem:[#allocation2 + $0x5e4] sm:$0xf]  ;;  %v7976_v14 = vld [vmem:[#allocation2 + $0x5f0] sm:$0xf0] }
 0xa67   :  { %5062 = vmatmul.bf16.vlgmr.msra.gmra.mxu1 %v11686_v29  ;;  %v3641_v25 = vpack.c.bf16 %v3363_v21, %v3363_v21  ;;  %v3366_v61 = vmax.f32 %v3364_v58, %v3365_v15  ;;  %v7371_v24 = vor.u32 %v8688_v2, %v7368_v38  ;;  %v7499_v45 = vor.u32 %v8720_v62, %v7496_v13  ;;  %v8872_v26 = vld [vmem:[#allocation2 + $0x6e4] sm:$0xf]  ;;  %v8104_v43 = vld [vmem:[#allocation2 + $0x6f0] sm:$0xf0] }
 0xa68   :  { %v3311_v55 = vrot.slane %v3310_v40, 2  ;;  %5111 = vmatpush.bf16.msrb.mxu1 %v7387_v54  ;;  %5124 = vmatpush.bf16.msrb.mxu2 %v7515_v20  ;;  %v7627_v9 = vor.u32 %v8752_v52, %v7624_v23  ;;  %v7227_v30 = vor.u32 %v8652_v60, %v7224_v11  ;;  %v7851_v27 = vor.u32 %v8808_v8, %v7848_v22  ;;  %v8804_v28 = vld [vmem:[#allocation2 + $0x4c4] sm:$0xf]  ;;  %v7832_v10 = vld [vmem:[#allocation2 + $0x4d0] sm:$0xf0] }
 0xa69   :  { %v3683_v19 = vunpack.c.l.b16 %v3641_v25  ;;  %v3367_v34 = vrot.slane %v3366_v61, 2  ;;  %5137 = vmatpush.bf16.msrb.mxu3 %v7643_v0  ;;  %v7355_v48 = vor.u32 %v8684_v63, %v7352_v37  ;;  %v7483_v51 = vor.u32 %v8716_v17, %v7480_v7  ;;  %v8836_v33 = vld [vmem:[#allocation2 + $0x5c4] sm:$0xf]  ;;  %v7960_v56 = vld [vmem:[#allocation2 + $0x5d0] sm:$0xf0] }
 0xa6a   :  { %v3312_v49 = vmax.f32 %v3310_v40, %v3311_v55  ;;  %5099 = vmatpush.bf16.msra.mxu0 %v7243_v57  ;;  %v7611_v42 = vor.u32 %v8748_v53, %v7608_v5  ;;  %v7979_v3 = vor.u32 %v8840_v12, %v7976_v14  ;;  %v8107_v58 = vor.u32 %v8872_v26, %v8104_v43  ;;  %v8868_v21 = vld [vmem:[#allocation2 + $0x6c4] sm:$0xf]  ;;  %v8088_v6 = vld [vmem:[#allocation2 + $0x6d0] sm:$0xf0] }
 0xa6b   :  { %v3691_v59 = vsel %vm299_vm3, %v3683_v19, %v3675_v31  ;;  %v3368_v35 = vmax.f32 %v3366_v61, %v3367_v34  ;;  %v7835_v2 = vor.u32 %v8804_v28, %v7832_v10  ;;  %v8800_v38 = vld [vmem:[#allocation2 + $0x4a4] sm:$0xf]  ;;  %v7816_v62 = vld [vmem:[#allocation2 + $0x4b0] sm:$0xf0]  ;;  %v7963_v54 = vor.u32 %v8836_v33, %v7960_v56 }
 0xa6c   :  { %v11690_v50 = vpack.c.b16 %v3691_v59, %v3691_v59  ;;  %v3313_v39 = vrot.slane %v3312_v49, 1  ;;  %5112 = vmatpush.bf16.msrb.mxu1 %v7371_v24  ;;  %5125 = vmatpush.bf16.msrb.mxu2 %v7499_v45  ;;  %v8904_v15 = vld [vmem:[#allocation2 + $0x7e4] sm:$0xf]  ;;  %v8232_v20 = vld [vmem:[#allocation2 + $0x7f0] sm:$0xf0]  ;;  %v8091_v13 = vor.u32 %v8868_v21, %v8088_v6  ;;  %v7819_v23 = vor.u32 %v8800_v38, %v7816_v62 }
 0xa6d   :  { %v3369_v47 = vrot.slane %v3368_v35, 1  ;;  %5138 = vmatpush.bf16.msrb.mxu3 %v7627_v9  ;;  %v8832_v52 = vld [vmem:[#allocation2 + $0x5a4] sm:$0xf]  ;;  %v7944_v25 = vld [vmem:[#allocation2 + $0x5b0] sm:$0xf0]  ;;  %v8235_v63 = vor.u32 %v8904_v15, %v8232_v20 }
 0xa6e   :  { %5075 = vmatmul.bf16.vlgmr.msra.gmra.mxu2 %v11690_v50  ;;  %v3314_v32 = vmax.f32 %v3312_v49, %v3313_v39  ;;  %5100 = vmatpush.bf16.msra.mxu0 %v7227_v30  ;;  %v8864_v60 = vld [vmem:[#allocation2 + $0x6a4] sm:$0xf]  ;;  %v8072_v11 = vld [vmem:[#allocation2 + $0x6b0] sm:$0xf0]  ;;  %v7947_v37 = vor.u32 %v8832_v52, %v7944_v25 }
 0xa6f   :  { %v3370_v1 = vmax.f32 %v3368_v35, %v3369_v47  ;;  %v8796_v31 = vld [vmem:[#allocation2 + $0x484] sm:$0xf]  ;;  %v7800_v61 = vld [vmem:[#allocation2 + $0x490] sm:$0xf0]  ;;  %v8075_v24 = vor.u32 %v8864_v60, %v8072_v11  ;;  %v8683_v60 = vld [vmem:[#allocation2 + $0xf4] sm:$0xf0] }
 0xa70   :  { %v3634_v4 = vpack.c.bf16 %v3314_v32, %v3314_v32  ;;  %5113 = vmatpush.bf16.msrb.mxu1 %v7355_v48  ;;  %5126 = vmatpush.bf16.msrb.mxu2 %v7483_v51  ;;  %v8900_v19 = vld [vmem:[#allocation2 + $0x7c4] sm:$0xf]  ;;  %v8216_v55 = vld [vmem:[#allocation2 + $0x7d0] sm:$0xf0]  ;;  %v7803_v8 = vor.u32 %v8796_v31, %v7800_v61 }
 0xa71   :  { %v3642_v46 = vpack.c.bf16 %v3370_v1, %v3370_v1  ;;  %5139 = vmatpush.bf16.msrb.mxu3 %v7611_v42  ;;  %v8828_v45 = vld [vmem:[#allocation2 + $0x584] sm:$0xf]  ;;  %v7928_v22 = vld [vmem:[#allocation2 + $0x590] sm:$0xf0]  ;;  %v8219_v59 = vor.u32 %v8900_v19, %v8216_v55 }
 0xa72   :  { %5145 = vmatpush.bf16.msrb.mxu0 %v7851_v27  ;;  %v3676_v40 = vunpack.c.l.b16 %v3634_v4  ;;  %v8860_v34 = vld [vmem:[#allocation2 + $0x684] sm:$0xf]  ;;  %v8056_v9 = vld [vmem:[#allocation2 + $0x690] sm:$0xf0]  ;;  %v7931_v5 = vor.u32 %v8828_v45, %v7928_v22  ;;  %v7598_v22 = vld [vmem:[#allocation2 + $0x2e8] sm:$0xf] }
 0xa73   :  { %5101 = vmatmul.bf16.vlgmr.msra.gmra.mxu0 %v11502_v16  ;;  %v3684_v0 = vunpack.c.l.b16 %v3642_v46  ;;  %v8792_v7 = vld [vmem:[#allocation2 + $0x464] sm:$0xf]  ;;  %v7784_v53 = vld [vmem:[#allocation2 + $0x470] sm:$0xf0]  ;;  %v8059_v12 = vor.u32 %v8860_v34, %v8056_v9  ;;  %v8747_v34 = vld [vmem:[#allocation2 + $0x2f4] sm:$0xf0] }
 0xa74   :  { %5158 = vmatpush.bf16.msra.mxu1 %v7979_v3  ;;  %5171 = vmatpush.bf16.msra.mxu2 %v8107_v58  ;;  %v8896_v49 = vld [vmem:[#allocation2 + $0x7a4] sm:$0xf]  ;;  %v8200_v30 = vld [vmem:[#allocation2 + $0x7b0] sm:$0xf0]  ;;  %v7787_v35 = vor.u32 %v8792_v7, %v7784_v53 }
 0xa75   :  { %v3692_v57 = vsel %vm299_vm3, %v3684_v0, %v3676_v40  ;;  %v8824_v14 = vld [vmem:[#allocation2 + $0x564] sm:$0xf]  ;;  %v7912_v27 = vld [vmem:[#allocation2 + $0x570] sm:$0xf0]  ;;  %v8203_v51 = vor.u32 %v8896_v49, %v8200_v30 }
 0xa76   :  { %5146 = vmatpush.bf16.msrb.mxu0 %v7835_v2  ;;  %v11695_v17 = vpack.c.b16 %v3692_v57, %v3692_v57  ;;  %v8856_v26 = vld [vmem:[#allocation2 + $0x664] sm:$0xf]  ;;  %v8040_v43 = vld [vmem:[#allocation2 + $0x670] sm:$0xf0]  ;;  %v7915_v47 = vor.u32 %v8824_v14, %v7912_v27  ;;  %v8679_v14 = vld [vmem:[#allocation2 + $0xd4] sm:$0xf0] }
 0xa77   :  { %5114 = vmatmul.bf16.vlgmr.msrb.gmra.mxu1 %v11573_v18  ;;  %v8788_v39 = vld [vmem:[#allocation2 + $0x444] sm:$0xf]  ;;  %v7768_v48 = vld [vmem:[#allocation2 + $0x450] sm:$0xf0]  ;;  %v8043_v42 = vor.u32 %v8856_v26, %v8040_v43  ;;  %v8711_v27 = vld [vmem:[#allocation2 + $0x1d4] sm:$0xf0] }
 0xa78   :  { %5159 = vmatpush.bf16.msra.mxu1 %v7963_v54  ;;  %5172 = vmatpush.bf16.msra.mxu2 %v8091_v13  ;;  %v8892_v28 = vld [vmem:[#allocation2 + $0x784] sm:$0xf]  ;;  %v8184_v10 = vld [vmem:[#allocation2 + $0x790] sm:$0xf0]  ;;  %v7771_v32 = vor.u32 %v8788_v39, %v7768_v48  ;;  %v7582_v26 = vld [vmem:[#allocation2 + $0x2c8] sm:$0xf] }
 0xa79   :  { %5088 = vmatmul.bf16.vlgmr.msra.gmra.mxu3 %v11695_v17  ;;  %v8820_v3 = vld [vmem:[#allocation2 + $0x544] sm:$0xf]  ;;  %v7896_v58 = vld [vmem:[#allocation2 + $0x550] sm:$0xf0]  ;;  %v8187_v21 = vor.u32 %v8892_v28, %v8184_v10  ;;  %v8743_v43 = vld [vmem:[#allocation2 + $0x2d4] sm:$0xf0] }
 0xa7a   :  { %5147 = vmatpush.bf16.msrb.mxu0 %v7819_v23  ;;  %5184 = vmatpush.bf16.msra.mxu3 %v8235_v63  ;;  %v8852_v33 = vld [vmem:[#allocation2 + $0x644] sm:$0xf]  ;;  %v8024_v56 = vld [vmem:[#allocation2 + $0x650] sm:$0xf0]  ;;  %v7899_v38 = vor.u32 %v8820_v3, %v7896_v58  ;;  %v7342_v23 = vld [vmem:[#allocation2 + $0xe8] sm:$0xf]  ;;  %v7583_v3 = vor.u32 %v8743_v43, %v7582_v26 }
 0xa7b   :  { %v8784_v1 = vld [vmem:[#allocation2 + $0x424] sm:$0xf]  ;;  %v7752_v2 = vld [vmem:[#allocation2 + $0x430] sm:$0xf0]  ;;  %v8027_v62 = vor.u32 %v8852_v33, %v8024_v56  ;;  %v7343_v45 = vor.u32 %v8683_v60, %v7342_v23  ;;  %v7726_v28 = vld [vmem:[#allocation2 + $0x3e8] sm:$0xf] }
 0xa7c   :  { %5160 = vmatpush.bf16.msra.mxu1 %v7947_v37  ;;  %5173 = vmatpush.bf16.msra.mxu2 %v8075_v24  ;;  %v8888_v6 = vld [vmem:[#allocation2 + $0x764] sm:$0xf]  ;;  %v8168_v4 = vld [vmem:[#allocation2 + $0x770] sm:$0xf0]  ;;  %v7755_v15 = vor.u32 %v8784_v1, %v7752_v2  ;;  %v7470_v24 = vld [vmem:[#allocation2 + $0x1e8] sm:$0xf] }
 0xa7d   :  { %v8816_v46 = vld [vmem:[#allocation2 + $0x524] sm:$0xf]  ;;  %v7880_v54 = vld [vmem:[#allocation2 + $0x530] sm:$0xf0]  ;;  %v8171_v40 = vor.u32 %v8888_v6, %v8168_v4  ;;  %v8779_v10 = vld [vmem:[#allocation2 + $0x3f4] sm:$0xf0] }
 0xa7e   :  { %5148 = vmatpush.bf16.msrb.mxu0 %v7803_v8  ;;  %5127 = vmatmul.bf16.vlgmr.msrb.gmra.mxu2 %v11618_v41  ;;  %v8848_v20 = vld [vmem:[#allocation2 + $0x624] sm:$0xf]  ;;  %v8008_v13 = vld [vmem:[#allocation2 + $0x630] sm:$0xf0]  ;;  %v7883_v31 = vor.u32 %v8816_v46, %v7880_v54  ;;  %v8715_v8 = vld [vmem:[#allocation2 + $0x1f4] sm:$0xf0]  ;;  %v7727_v6 = vor.u32 %v8779_v10, %v7726_v28 }
 0xa7f   :  { %5185 = vmatpush.bf16.msra.mxu3 %v8219_v59  ;;  %v8780_v52 = vld [vmem:[#allocation2 + $0x404] sm:$0xf]  ;;  %v7736_v25 = vld [vmem:[#allocation2 + $0x410] sm:$0xf0]  ;;  %v8011_v61 = vor.u32 %v8848_v20, %v8008_v13  ;;  %v7471_v30 = vor.u32 %v8715_v8, %v7470_v24  ;;  %v8675_v58 = vld [vmem:[#allocation2 + $0xb4] sm:$0xf0] }
 0xa80   :  { %5161 = vmatpush.bf16.msra.mxu1 %v7931_v5  ;;  %5174 = vmatpush.bf16.msra.mxu2 %v8059_v12  ;;  %v8884_v0 = vld [vmem:[#allocation2 + $0x744] sm:$0xf]  ;;  %v8152_v11 = vld [vmem:[#allocation2 + $0x750] sm:$0xf0]  ;;  %v7739_v37 = vor.u32 %v8780_v52, %v7736_v25  ;;  %v7599_v5 = vor.u32 %v8747_v34, %v7598_v22  ;;  %v7326_v12 = vld [vmem:[#allocation2 + $0xc8] sm:$0xf] }
 0xa81   :  { %v8812_v57 = vld [vmem:[#allocation2 + $0x504] sm:$0xf]  ;;  %v7864_v63 = vld [vmem:[#allocation2 + $0x510] sm:$0xf0]  ;;  %v8155_v9 = vor.u32 %v8884_v0, %v8152_v11  ;;  %v7438_v33 = vld [vmem:[#allocation2 + $0x1a8] sm:$0xf] }
 0xa82   :  { %5149 = vmatpush.bf16.msrb.mxu0 %v7787_v35  ;;  %v8844_v19 = vld [vmem:[#allocation2 + $0x604] sm:$0xf]  ;;  %v7992_v55 = vld [vmem:[#allocation2 + $0x610] sm:$0xf0]  ;;  %v7867_v59 = vor.u32 %v8812_v57, %v7864_v63  ;;  %v7454_v35 = vld [vmem:[#allocation2 + $0x1c8] sm:$0xf] }
 0xa83   :  { %5186 = vmatpush.bf16.msra.mxu3 %v8203_v51  ;;  %v8880_v7 = vld [vmem:[#allocation2 + $0x724] sm:$0xf]  ;;  %v8136_v53 = vld [vmem:[#allocation2 + $0x730] sm:$0xf0]  ;;  %v7995_v49 = vor.u32 %v8844_v19, %v7992_v55  ;;  %v8707_v56 = vld [vmem:[#allocation2 + $0x1b4] sm:$0xf0] }
 0xa84   :  { %5162 = vmatpush.bf16.msra.mxu1 %v7915_v47  ;;  %5175 = vmatpush.bf16.msra.mxu2 %v8043_v42  ;;  %v8139_v39 = vor.u32 %v8880_v7, %v8136_v53  ;;  %v8876_v48 = vld [vmem:[#allocation2 + $0x704] sm:$0xf]  ;;  %v8120_v51 = vld [vmem:[#allocation2 + $0x710] sm:$0xf0]  ;;  %v7327_v47 = vor.u32 %v8679_v14, %v7326_v12  ;;  %v7455_v42 = vor.u32 %v8711_v27, %v7454_v35  ;;  %v7566_v1 = vld [vmem:[#allocation2 + $0x2a8] sm:$0xf] }
 0xa85   :  { %v8739_v2 = vld [vmem:[#allocation2 + $0x2b4] sm:$0xf0]  ;;  %v7710_v4 = vld [vmem:[#allocation2 + $0x3c8] sm:$0xf]  ;;  %v7439_v46 = vor.u32 %v8707_v56, %v7438_v33 }
 0xa86   :  { %5150 = vmatpush.bf16.msrb.mxu0 %v7771_v32  ;;  %v7310_v32 = vld [vmem:[#allocation2 + $0xa8] sm:$0xf]  ;;  %v8671_v20 = vld [vmem:[#allocation2 + $0x94] sm:$0xf0] }
 0xa87   :  { %5187 = vmatpush.bf16.msra.mxu3 %v8187_v21  ;;  %v8123_v21 = vor.u32 %v8876_v48, %v8120_v51  ;;  %v7294_v54 = vld [vmem:[#allocation2 + $0x88] sm:$0xf]  ;;  %v8703_v52 = vld [vmem:[#allocation2 + $0x194] sm:$0xf0] }
 0xa88   :  { %5163 = vmatpush.bf16.msra.mxu1 %v7899_v38  ;;  %5176 = vmatpush.bf16.msra.mxu2 %v8027_v62  ;;  %v8775_v38 = vld [vmem:[#allocation2 + $0x3d4] sm:$0xf0]  ;;  %v7311_v62 = vor.u32 %v8675_v58, %v7310_v32  ;;  %v7422_v13 = vld [vmem:[#allocation2 + $0x188] sm:$0xf]  ;;  %v7295_v11 = vor.u32 %v8671_v20, %v7294_v54 }
 0xa89   :  { %5140 = vmatmul.bf16.vlgmr.msrb.gmra.mxu3 %v11650_v44  ;;  %v7550_v25 = vld [vmem:[#allocation2 + $0x288] sm:$0xf]  ;;  %v7711_v0 = vor.u32 %v8775_v38, %v7710_v4  ;;  %v8771_v60 = vld [vmem:[#allocation2 + $0x3b4] sm:$0xf0] }
 0xa8a   :  { %5151 = vmatpush.bf16.msrb.mxu0 %v7755_v15  ;;  %v7567_v15 = vor.u32 %v8739_v2, %v7566_v1  ;;  %v7694_v23 = vld [vmem:[#allocation2 + $0x3a8] sm:$0xf]  ;;  %v8667_v63 = vld [vmem:[#allocation2 + $0x74] sm:$0xf0] }
 0xa8b   :  { %5188 = vmatpush.bf16.msra.mxu3 %v8171_v40  ;;  %v8735_v40 = vld [vmem:[#allocation2 + $0x294] sm:$0xf0]  ;;  %v7278_v57 = vld [vmem:[#allocation2 + $0x68] sm:$0xf] }
 0xa8c   :  { %5164 = vmatpush.bf16.msra.mxu1 %v7883_v31  ;;  %5177 = vmatpush.bf16.msra.mxu2 %v8011_v61  ;;  %v7423_v31 = vor.u32 %v8703_v52, %v7422_v13  ;;  %v7551_v61 = vor.u32 %v8735_v40, %v7550_v25  ;;  %v8699_v19 = vld [vmem:[#allocation2 + $0x174] sm:$0xf0]  ;;  %v7534_v55 = vld [vmem:[#allocation2 + $0x268] sm:$0xf]  ;;  %v7279_v34 = vor.u32 %v8667_v63, %v7278_v57 }
 0xa8d   :  { %v8731_v24 = vld [vmem:[#allocation2 + $0x274] sm:$0xf0]  ;;  %v7678_v8 = vld [vmem:[#allocation2 + $0x388] sm:$0xf] }
 0xa8e   :  { %5152 = vmatpush.bf16.msrb.mxu0 %v7739_v37  ;;  %v7406_v37 = vld [vmem:[#allocation2 + $0x168] sm:$0xf]  ;;  %v8767_v22 = vld [vmem:[#allocation2 + $0x394] sm:$0xf0]  ;;  %v7535_v7 = vor.u32 %v8731_v24, %v7534_v55 }
 0xa8f   :  { %5189 = vmatpush.bf16.msra.mxu3 %v8155_v9  ;;  %v7407_v9 = vor.u32 %v8699_v19, %v7406_v37  ;;  %v7262_v53 = vld [vmem:[#allocation2 + $0x48] sm:$0xf]  ;;  %v8727_v12 = vld [vmem:[#allocation2 + $0x254] sm:$0xf0]  ;;  %v7679_v14 = vor.u32 %v8767_v22, %v7678_v8 }
 0xa90   :  { %5165 = vmatpush.bf16.msra.mxu1 %v7867_v59  ;;  %5178 = vmatpush.bf16.msra.mxu2 %v7995_v49  ;;  %v8663_v59 = vld [vmem:[#allocation2 + $0x54] sm:$0xf0]  ;;  %v7390_v49 = vld [vmem:[#allocation2 + $0x148] sm:$0xf] }
 0xa91   :  { %5153 = vmatmul.bf16.vlgmr.msrb.gmra.mxu0 %v11682_v36  ;;  %v7662_v35 = vld [vmem:[#allocation2 + $0x368] sm:$0xf]  ;;  %v8763_v27 = vld [vmem:[#allocation2 + $0x374] sm:$0xf0]  ;;  %v7263_v26 = vor.u32 %v8663_v59, %v7262_v53 }
 0xa92   :  { %5197 = vmatpush.bf16.msra.mxu0 %v7343_v45  ;;  %v7695_v45 = vor.u32 %v8771_v60, %v7694_v23  ;;  %v7246_v48 = vld [vmem:[#allocation2 + $0x28] sm:$0xf]  ;;  %v8659_v51 = vld [vmem:[#allocation2 + $0x34] sm:$0xf0] }
 0xa93   :  { %5190 = vmatpush.bf16.msra.mxu3 %v8139_v39  ;;  %5166 = vmatmul.bf16.vlgmr.msra.gmra.mxu1 %v11686_v29  ;;  %v7374_v28 = vld [vmem:[#allocation2 + $0x128] sm:$0xf]  ;;  %v8691_v10 = vld [vmem:[#allocation2 + $0x134] sm:$0xf0]  ;;  %v7247_v33 = vor.u32 %v8659_v51, %v7246_v48 }
 0xa94   :  { %5210 = vmatpush.bf16.msrb.mxu1 %v7471_v30  ;;  %5223 = vmatpush.bf16.msrb.mxu2 %v7599_v5  ;;  %v8695_v30 = vld [vmem:[#allocation2 + $0x154] sm:$0xf0]  ;;  %v7518_v5 = vld [vmem:[#allocation2 + $0x248] sm:$0xf]  ;;  %v7375_v1 = vor.u32 %v8691_v10, %v7374_v28 }
 0xa95   :  { %5179 = vmatmul.bf16.vlgmr.msra.gmra.mxu2 %v11690_v50  ;;  %v7391_v43 = vor.u32 %v8695_v30, %v7390_v49  ;;  %v7519_v39 = vor.u32 %v8727_v12, %v7518_v5  ;;  %v7646_v32 = vld [vmem:[#allocation2 + $0x348] sm:$0xf]  ;;  %v8759_v58 = vld [vmem:[#allocation2 + $0x354] sm:$0xf0] }
 0xa96   :  { %5198 = vmatpush.bf16.msra.mxu0 %v7327_v47  ;;  %v7502_v47 = vld [vmem:[#allocation2 + $0x228] sm:$0xf]  ;;  %v8687_v4 = vld [vmem:[#allocation2 + $0x114] sm:$0xf0]  ;;  %v7647_v13 = vor.u32 %v8759_v58, %v7646_v32 }
 0xa97   :  { %5191 = vmatpush.bf16.msra.mxu3 %v8123_v21  ;;  %v7230_v56 = vld [vmem:[#allocation2 + $0x8] sm:$0xf]  ;;  %v8655_v21 = vld [vmem:[#allocation2 + $0x14] sm:$0xf0] }
 0xa98   :  { %5211 = vmatpush.bf16.msrb.mxu1 %v7455_v42  ;;  %5224 = vmatpush.bf16.msrb.mxu2 %v7583_v3  ;;  %v8723_v42 = vld [vmem:[#allocation2 + $0x234] sm:$0xf0]  ;;  %v7663_v3 = vor.u32 %v8763_v27, %v7662_v35  ;;  %v7486_v38 = vld [vmem:[#allocation2 + $0x208] sm:$0xf]  ;;  %v7231_v52 = vor.u32 %v8655_v21, %v7230_v56 }
 0xa99   :  { %v7503_v2 = vor.u32 %v8723_v42, %v7502_v47  ;;  %v7982_v54 = vld [vmem:[#allocation2 + $0x5e8] sm:$0xf]  ;;  %v8843_v20 = vld [vmem:[#allocation2 + $0x5f4] sm:$0xf0] }
 0xa9a   :  { %5199 = vmatpush.bf16.msra.mxu0 %v7311_v62  ;;  %5192 = vmatmul.bf16.vlgmr.msra.gmra.mxu3 %v11695_v17  ;;  %v8719_v62 = vld [vmem:[#allocation2 + $0x214] sm:$0xf0]  ;;  %v8110_v25 = vld [vmem:[#allocation2 + $0x6e8] sm:$0xf] }
 0xa9b   :  { %5236 = vmatpush.bf16.msrb.mxu3 %v7727_v6  ;;  %v7358_v6 = vld [vmem:[#allocation2 + $0x108] sm:$0xf]  ;;  %v8875_v40 = vld [vmem:[#allocation2 + $0x6f4] sm:$0xf0] }
 0xa9c   :  { %5212 = vmatpush.bf16.msrb.mxu1 %v7439_v46  ;;  %5225 = vmatpush.bf16.msrb.mxu2 %v7567_v15  ;;  %v7854_v46 = vld [vmem:[#allocation2 + $0x4e8] sm:$0xf]  ;;  %v8811_v15 = vld [vmem:[#allocation2 + $0x4f4] sm:$0xf0]  ;;  %v7359_v60 = vor.u32 %v8687_v4, %v7358_v6  ;;  %v8111_v63 = vor.u32 %v8875_v40, %v8110_v25 }
 0xa9d   :  { %v8755_v23 = vld [vmem:[#allocation2 + $0x334] sm:$0xf0]  ;;  %v7838_v57 = vld [vmem:[#allocation2 + $0x4c8] sm:$0xf] }
 0xa9e   :  { %5200 = vmatpush.bf16.msra.mxu0 %v7295_v11  ;;  %v7487_v11 = vor.u32 %v8719_v62, %v7486_v38  ;;  %v8807_v37 = vld [vmem:[#allocation2 + $0x4d4] sm:$0xf0]  ;;  %v7966_v19 = vld [vmem:[#allocation2 + $0x5c8] sm:$0xf] }
 0xa9f   :  { %5237 = vmatpush.bf16.msrb.mxu3 %v7711_v0  ;;  %v7630_v0 = vld [vmem:[#allocation2 + $0x328] sm:$0xf]  ;;  %v8839_v55 = vld [vmem:[#allocation2 + $0x5d4] sm:$0xf0]  ;;  %v7839_v53 = vor.u32 %v8807_v37, %v7838_v57 }
 0xaa0   :  { %5213 = vmatpush.bf16.msrb.mxu1 %v7423_v31  ;;  %5226 = vmatpush.bf16.msrb.mxu2 %v7551_v61  ;;  %v7855_v31 = vor.u32 %v8811_v15, %v7854_v46  ;;  %v7983_v61 = vor.u32 %v8843_v20, %v7982_v54  ;;  %v7631_v24 = vor.u32 %v8755_v23, %v7630_v0  ;;  %v8871_v8 = vld [vmem:[#allocation2 + $0x6d4] sm:$0xf0]  ;;  %v7614_v22 = vld [vmem:[#allocation2 + $0x308] sm:$0xf] }
 0xaa1   :  { %v7967_v59 = vor.u32 %v8839_v55, %v7966_v19  ;;  %v7822_v49 = vld [vmem:[#allocation2 + $0x4a8] sm:$0xf]  ;;  %v8803_v5 = vld [vmem:[#allocation2 + $0x4b4] sm:$0xf0] }
 0xaa2   :  { %5201 = vmatpush.bf16.msra.mxu0 %v7279_v34  ;;  %v8751_v34 = vld [vmem:[#allocation2 + $0x314] sm:$0xf0]  ;;  %v7950_v12 = vld [vmem:[#allocation2 + $0x5a8] sm:$0xf]  ;;  %v7823_v51 = vor.u32 %v8803_v5, %v7822_v49 }
 0xaa3   :  { %5238 = vmatpush.bf16.msrb.mxu3 %v7695_v45  ;;  %v8094_v45 = vld [vmem:[#allocation2 + $0x6c8] sm:$0xf]  ;;  %v7615_v35 = vor.u32 %v8751_v34, %v7614_v22  ;;  %v8903_v48 = vld [vmem:[#allocation2 + $0x7d4] sm:$0xf0] }
 0xaa4   :  { %5214 = vmatpush.bf16.msrb.mxu1 %v7407_v9  ;;  %5227 = vmatpush.bf16.msrb.mxu2 %v7535_v7  ;;  %v8238_v9 = vld [vmem:[#allocation2 + $0x7e8] sm:$0xf]  ;;  %v8907_v7 = vld [vmem:[#allocation2 + $0x7f4] sm:$0xf0]  ;;  %v8095_v30 = vor.u32 %v8871_v8, %v8094_v45 }
 0xaa5   :  { %v8078_v27 = vld [vmem:[#allocation2 + $0x6a8] sm:$0xf]  ;;  %v8799_v42 = vld [vmem:[#allocation2 + $0x494] sm:$0xf0] }
 0xaa6   :  { %5202 = vmatpush.bf16.msra.mxu0 %v7263_v26  ;;  %v8867_v26 = vld [vmem:[#allocation2 + $0x6b4] sm:$0xf0]  ;;  %v7806_v10 = vld [vmem:[#allocation2 + $0x488] sm:$0xf] }
 0xaa7   :  { %5239 = vmatpush.bf16.msrb.mxu3 %v7679_v14  ;;  %v8835_v14 = vld [vmem:[#allocation2 + $0x5b4] sm:$0xf0]  ;;  %v8079_v47 = vor.u32 %v8867_v26, %v8078_v27  ;;  %v8062_v58 = vld [vmem:[#allocation2 + $0x688] sm:$0xf]  ;;  %v7807_v21 = vor.u32 %v8799_v42, %v7806_v10  ;;  %v8681_v42 = vld [vmem:[#allocation2 + $0xec] sm:$0xf] }
 0xaa8   :  { %5215 = vmatpush.bf16.msrb.mxu1 %v7391_v43  ;;  %5228 = vmatpush.bf16.msrb.mxu2 %v7519_v39  ;;  %v8239_v43 = vor.u32 %v8907_v7, %v8238_v9  ;;  %v8222_v39 = vld [vmem:[#allocation2 + $0x7c8] sm:$0xf]  ;;  %v7951_v28 = vor.u32 %v8835_v14, %v7950_v12  ;;  %v8831_v32 = vld [vmem:[#allocation2 + $0x594] sm:$0xf0] }
 0xaa9   :  { %v8223_v56 = vor.u32 %v8903_v48, %v8222_v39  ;;  %v7790_v4 = vld [vmem:[#allocation2 + $0x468] sm:$0xf]  ;;  %v8795_v62 = vld [vmem:[#allocation2 + $0x474] sm:$0xf0] }
 0xaaa   :  { %5203 = vmatpush.bf16.msra.mxu0 %v7247_v33  ;;  %v8863_v33 = vld [vmem:[#allocation2 + $0x694] sm:$0xf0]  ;;  %v7918_v46 = vld [vmem:[#allocation2 + $0x568] sm:$0xf]  ;;  %v7791_v40 = vor.u32 %v8795_v62, %v7790_v4 }
 0xaab   :  { %5240 = vmatpush.bf16.msrb.mxu3 %v7663_v3  ;;  %v7934_v3 = vld [vmem:[#allocation2 + $0x588] sm:$0xf]  ;;  %v8063_v38 = vor.u32 %v8863_v33, %v8062_v58  ;;  %v8827_v15 = vld [vmem:[#allocation2 + $0x574] sm:$0xf0]  ;;  %v7472_v33 = vld [vmem:[#allocation2 + $0x1f8] sm:$0xf0] }
 0xaac   :  { %5216 = vmatpush.bf16.msrb.mxu1 %v7375_v1  ;;  %5229 = vmatpush.bf16.msrb.mxu2 %v7503_v2  ;;  %v8206_v1 = vld [vmem:[#allocation2 + $0x7a8] sm:$0xf]  ;;  %v8899_v2 = vld [vmem:[#allocation2 + $0x7b4] sm:$0xf0]  ;;  %v7935_v6 = vor.u32 %v8831_v32, %v7934_v3  ;;  %v7919_v0 = vor.u32 %v8827_v15, %v7918_v46  ;;  %v7344_v3 = vld [vmem:[#allocation2 + $0xf8] sm:$0xf0] }
 0xaad   :  { %v8046_v54 = vld [vmem:[#allocation2 + $0x668] sm:$0xf]  ;;  %v8859_v20 = vld [vmem:[#allocation2 + $0x674] sm:$0xf0]  ;;  %v8713_v32 = vld [vmem:[#allocation2 + $0x1ec] sm:$0xf]  ;;  %v7347_v46 = vor.u32 %v8681_v42, %v7344_v3 }
 0xaae   :  { %5204 = vmatpush.bf16.msra.mxu0 %v7231_v52  ;;  %v8190_v52 = vld [vmem:[#allocation2 + $0x788] sm:$0xf]  ;;  %v8895_v25 = vld [vmem:[#allocation2 + $0x794] sm:$0xf0]  ;;  %v7475_v15 = vor.u32 %v8713_v32, %v7472_v33  ;;  %v8665_v32 = vld [vmem:[#allocation2 + $0x6c] sm:$0xf] }
 0xaaf   :  { %5241 = vmatpush.bf16.msrb.mxu3 %v7647_v13  ;;  %v8207_v13 = vor.u32 %v8899_v2, %v8206_v1  ;;  %v7774_v23 = vld [vmem:[#allocation2 + $0x448] sm:$0xf]  ;;  %v8823_v57 = vld [vmem:[#allocation2 + $0x554] sm:$0xf0]  ;;  %v8191_v19 = vor.u32 %v8895_v25, %v8190_v52  ;;  %v7600_v1 = vld [vmem:[#allocation2 + $0x2f8] sm:$0xf0] }
 0xab0   :  { %5217 = vmatpush.bf16.msrb.mxu1 %v7359_v60  ;;  %5230 = vmatpush.bf16.msrb.mxu2 %v7487_v11  ;;  %v8047_v11 = vor.u32 %v8859_v20, %v8046_v54  ;;  %v8855_v37 = vld [vmem:[#allocation2 + $0x654] sm:$0xf0]  ;;  %v8174_v55 = vld [vmem:[#allocation2 + $0x768] sm:$0xf]  ;;  %v8677_v20 = vld [vmem:[#allocation2 + $0xcc] sm:$0xf] }
 0xab1   :  { %5205 = vmatmul.bf16.vlgmr.msra.gmra.mxu0 %v11502_v16  ;;  %v7758_v22 = vld [vmem:[#allocation2 + $0x428] sm:$0xf]  ;;  %v8787_v7 = vld [vmem:[#allocation2 + $0x434] sm:$0xf0]  ;;  %v8709_v52 = vld [vmem:[#allocation2 + $0x1cc] sm:$0xf] }
 0xab2   :  { %5249 = vmatpush.bf16.msrb.mxu0 %v7855_v31  ;;  %v8791_v31 = vld [vmem:[#allocation2 + $0x454] sm:$0xf0]  ;;  %v8014_v49 = vld [vmem:[#allocation2 + $0x628] sm:$0xf] }
 0xab3   :  { %5242 = vmatpush.bf16.msrb.mxu3 %v7631_v24  ;;  %5218 = vmatmul.bf16.vlgmr.msrb.gmra.mxu1 %v11573_v18  ;;  %v8891_v24 = vld [vmem:[#allocation2 + $0x774] sm:$0xf0]  ;;  %v7775_v45 = vor.u32 %v8791_v31, %v7774_v23  ;;  %v8158_v12 = vld [vmem:[#allocation2 + $0x748] sm:$0xf]  ;;  %v8741_v23 = vld [vmem:[#allocation2 + $0x2cc] sm:$0xf] }
 0xab4   :  { %5262 = vmatpush.bf16.msra.mxu1 %v7983_v61  ;;  %5275 = vmatpush.bf16.msra.mxu2 %v8111_v63  ;;  %v7902_v61 = vld [vmem:[#allocation2 + $0x548] sm:$0xf]  ;;  %v8175_v5 = vor.u32 %v8891_v24, %v8174_v55  ;;  %v8887_v14 = vld [vmem:[#allocation2 + $0x754] sm:$0xf0]  ;;  %v8673_v24 = vld [vmem:[#allocation2 + $0xac] sm:$0xf] }
 0xab5   :  { %5231 = vmatmul.bf16.vlgmr.msrb.gmra.mxu2 %v11618_v41  ;;  %v11709_v60 = vpop.f32.mrf.mxu0  ;;  %v8030_v63 = vld [vmem:[#allocation2 + $0x648] sm:$0xf]  ;;  %v7903_v8 = vor.u32 %v8823_v57, %v7902_v61  ;;  %v8159_v58 = vor.u32 %v8887_v14, %v8158_v12  ;;  %v8879_v61 = vld [vmem:[#allocation2 + $0x714] sm:$0xf0]  ;;  %v8777_v57 = vld [vmem:[#allocation2 + $0x3ec] sm:$0xf] }
 0xab6   :  { %5250 = vmatpush.bf16.msrb.mxu0 %v7839_v53  ;;  %v8031_v9 = vor.u32 %v8855_v37, %v8030_v63  ;;  %v7886_v53 = vld [vmem:[#allocation2 + $0x528] sm:$0xf]  ;;  %v7728_v63 = vld [vmem:[#allocation2 + $0x3f8] sm:$0xf0]  ;;  %v8669_v14 = vld [vmem:[#allocation2 + $0x8c] sm:$0xf] }
 0xab7   :  { %5243 = vmatpush.bf16.msrb.mxu3 %v7615_v35  ;;  %v7759_v35 = vor.u32 %v8787_v7, %v7758_v22  ;;  %v7742_v26 = vld [vmem:[#allocation2 + $0x408] sm:$0xf]  ;;  %v8705_v22 = vld [vmem:[#allocation2 + $0x1ac] sm:$0xf]  ;;  %v7731_v7 = vor.u32 %v8777_v57, %v7728_v63 }
 0xab8   :  { %5263 = vmatpush.bf16.msra.mxu1 %v7967_v59  ;;  %5276 = vmatpush.bf16.msra.mxu2 %v8095_v30  ;;  %v8819_v59 = vld [vmem:[#allocation2 + $0x534] sm:$0xf0]  ;;  %v7870_v39 = vld [vmem:[#allocation2 + $0x508] sm:$0xf] }
 0xab9   :  { %v8851_v30 = vld [vmem:[#allocation2 + $0x634] sm:$0xf0]  ;;  %v7887_v27 = vor.u32 %v8819_v59, %v7886_v53  ;;  %v7998_v10 = vld [vmem:[#allocation2 + $0x608] sm:$0xf]  ;;  %v8737_v53 = vld [vmem:[#allocation2 + $0x2ac] sm:$0xf] }
 0xaba   :  { %5251 = vmatpush.bf16.msrb.mxu0 %v7823_v51  ;;  %5244 = vmatmul.bf16.vlgmr.msrb.gmra.mxu3 %v11650_v44  ;;  %v8015_v51 = vor.u32 %v8851_v30, %v8014_v49  ;;  %v8142_v2 = vld [vmem:[#allocation2 + $0x728] sm:$0xf]  ;;  %v7568_v59 = vld [vmem:[#allocation2 + $0x2b8] sm:$0xf0]  ;;  %v8773_v49 = vld [vmem:[#allocation2 + $0x3cc] sm:$0xf] }
 0xabb   :  { %5288 = vmatpush.bf16.msra.mxu3 %v8239_v43  ;;  %v11711_v34 = vpop.f32.mrf.mxu1  ;;  %v8783_v43 = vld [vmem:[#allocation2 + $0x414] sm:$0xf0]  ;;  %v8126_v31 = vld [vmem:[#allocation2 + $0x708] sm:$0xf]  ;;  %v7712_v30 = vld [vmem:[#allocation2 + $0x3d8] sm:$0xf0] }
 0xabc   :  { %5264 = vmatpush.bf16.msra.mxu1 %v7951_v28  ;;  %5277 = vmatpush.bf16.msra.mxu2 %v8079_v47  ;;  %v8815_v28 = vld [vmem:[#allocation2 + $0x514] sm:$0xf0] }
 0xabd   :  { %v5000_v48 = vpop.f32.mrf.mxu0  ;;  %v8847_v47 = vld [vmem:[#allocation2 + $0x614] sm:$0xf0]  ;;  %v7871_v4 = vor.u32 %v8815_v28, %v7870_v39  ;;  %v7424_v39 = vld [vmem:[#allocation2 + $0x198] sm:$0xf0] }
 0xabe   :  { %5252 = vmatpush.bf16.msrb.mxu0 %v7807_v21  ;;  %v8883_v21 = vld [vmem:[#allocation2 + $0x734] sm:$0xf0]  ;;  %v7999_v62 = vor.u32 %v8847_v47, %v7998_v10  ;;  %v7715_v48 = vor.u32 %v8773_v49, %v7712_v30  ;;  %v7552_v28 = vld [vmem:[#allocation2 + $0x298] sm:$0xf0]  ;;  %v8769_v10 = vld [vmem:[#allocation2 + $0x3ac] sm:$0xf] }
 0xabf   :  { %5289 = vmatpush.bf16.msra.mxu3 %v8223_v56  ;;  %v8745_v56 = vld [vmem:[#allocation2 + $0x2ec] sm:$0xf]  ;;  %v7696_v47 = vld [vmem:[#allocation2 + $0x3b8] sm:$0xf0] }
 0xac0   :  { %5265 = vmatpush.bf16.msra.mxu1 %v7935_v6  ;;  %5278 = vmatpush.bf16.msra.mxu2 %v8063_v38  ;;  %v7743_v6 = vor.u32 %v8783_v43, %v7742_v26  ;;  %v7603_v54 = vor.u32 %v8745_v56, %v7600_v1  ;;  %v7571_v26 = vor.u32 %v8737_v53, %v7568_v59  ;;  %v8701_v43 = vld [vmem:[#allocation2 + $0x18c] sm:$0xf]  ;;  %v7648_v59 = vld [vmem:[#allocation2 + $0x358] sm:$0xf0] }
 0xac1   :  { %v7427_v3 = vor.u32 %v8701_v43, %v7424_v39  ;;  %v8697_v1 = vld [vmem:[#allocation2 + $0x16c] sm:$0xf] }
 0xac2   :  { %5253 = vmatpush.bf16.msrb.mxu0 %v7791_v40  ;;  %v8143_v40 = vor.u32 %v8883_v21, %v8142_v2  ;;  %v7408_v2 = vld [vmem:[#allocation2 + $0x178] sm:$0xf0]  ;;  %v7699_v21 = vor.u32 %v8769_v10, %v7696_v47  ;;  %v8757_v53 = vld [vmem:[#allocation2 + $0x34c] sm:$0xf] }
 0xac3   :  { %5290 = vmatpush.bf16.msra.mxu3 %v8207_v13  ;;  %v5013_v38 = vpop.f32.mrf.mxu1  ;;  %v7328_v13 = vld [vmem:[#allocation2 + $0xd8] sm:$0xf0]  ;;  %v8753_v43 = vld [vmem:[#allocation2 + $0x32c] sm:$0xf] }
 0xac4   :  { %5266 = vmatpush.bf16.msra.mxu1 %v7919_v0  ;;  %5279 = vmatpush.bf16.msra.mxu2 %v8047_v11  ;;  %v7456_v0 = vld [vmem:[#allocation2 + $0x1d8] sm:$0xf0]  ;;  %v7331_v37 = vor.u32 %v8677_v20, %v7328_v13  ;;  %v8765_v38 = vld [vmem:[#allocation2 + $0x38c] sm:$0xf] }
 0xac5   :  { %v7584_v11 = vld [vmem:[#allocation2 + $0x2d8] sm:$0xf0]  ;;  %v8717_v39 = vld [vmem:[#allocation2 + $0x20c] sm:$0xf] }
 0xac6   :  { %5254 = vmatpush.bf16.msrb.mxu0 %v7775_v45  ;;  %v11713_v25 = vpop.f32.mrf.mxu2  ;;  %v7587_v55 = vor.u32 %v8741_v23, %v7584_v11  ;;  %v7312_v45 = vld [vmem:[#allocation2 + $0xb8] sm:$0xf0]  ;;  %v8725_v23 = vld [vmem:[#allocation2 + $0x24c] sm:$0xf] }
 0xac7   :  { %5291 = vmatpush.bf16.msra.mxu3 %v8191_v19  ;;  %v7459_v19 = vor.u32 %v8709_v52, %v7456_v0  ;;  %v7264_v20 = vld [vmem:[#allocation2 + $0x58] sm:$0xf0]  ;;  %v8693_v52 = vld [vmem:[#allocation2 + $0x14c] sm:$0xf] }
 0xac8   :  { %5267 = vmatpush.bf16.msra.mxu1 %v7903_v8  ;;  %5280 = vmatpush.bf16.msra.mxu2 %v8031_v9  ;;  %v8127_v8 = vor.u32 %v8879_v61, %v8126_v31  ;;  %v7440_v9 = vld [vmem:[#allocation2 + $0x1b8] sm:$0xf0]  ;;  %v8761_v31 = vld [vmem:[#allocation2 + $0x36c] sm:$0xf] }
 0xac9   :  { %v7443_v12 = vor.u32 %v8705_v22, %v7440_v9  ;;  %v7520_v11 = vld [vmem:[#allocation2 + $0x258] sm:$0xf0]  ;;  %v8721_v9 = vld [vmem:[#allocation2 + $0x22c] sm:$0xf] }
 0xaca   :  { %5255 = vmatpush.bf16.msrb.mxu0 %v7759_v35  ;;  %v7296_v35 = vld [vmem:[#allocation2 + $0x98] sm:$0xf0]  ;;  %v8841_v47 = vld [vmem:[#allocation2 + $0x5ec] sm:$0xf] }
 0xacb   :  { %5292 = vmatpush.bf16.msra.mxu3 %v8175_v5  ;;  %v7315_v5 = vor.u32 %v8673_v24, %v7312_v45  ;;  %v7299_v42 = vor.u32 %v8669_v14, %v7296_v35  ;;  %v7664_v61 = vld [vmem:[#allocation2 + $0x378] sm:$0xf0]  ;;  %v8689_v45 = vld [vmem:[#allocation2 + $0x12c] sm:$0xf] }
 0xacc   :  { %5268 = vmatpush.bf16.msra.mxu1 %v7887_v27  ;;  %5281 = vmatpush.bf16.msra.mxu2 %v8015_v51  ;;  %v8733_v51 = vld [vmem:[#allocation2 + $0x28c] sm:$0xf]  ;;  %v7667_v22 = vor.u32 %v8761_v31, %v7664_v61  ;;  %v7232_v14 = vld [vmem:[#allocation2 + $0x18] sm:$0xf0] }
 0xacd   :  { %v7555_v33 = vor.u32 %v8733_v51, %v7552_v28  ;;  %v8685_v35 = vld [vmem:[#allocation2 + $0x10c] sm:$0xf]  ;;  %v7856_v51 = vld [vmem:[#allocation2 + $0x4f8] sm:$0xf0]  ;;  %v7651_v28 = vor.u32 %v8757_v53, %v7648_v59 }
 0xace   :  { %5256 = vmatpush.bf16.msrb.mxu0 %v7743_v6  ;;  %v5026_v27 = vpop.f32.mrf.mxu2  ;;  %v8729_v6 = vld [vmem:[#allocation2 + $0x26c] sm:$0xf]  ;;  %v7488_v10 = vld [vmem:[#allocation2 + $0x218] sm:$0xf0] }
 0xacf   :  { %5293 = vmatpush.bf16.msra.mxu3 %v8159_v58  ;;  %v7280_v58 = vld [vmem:[#allocation2 + $0x78] sm:$0xf0] }
 0xad0   :  { %5269 = vmatpush.bf16.msra.mxu1 %v7871_v4  ;;  %5282 = vmatpush.bf16.msra.mxu2 %v7999_v62  ;;  %v7536_v4 = vld [vmem:[#allocation2 + $0x278] sm:$0xf0] }
 0xad1   :  { %5257 = vmatmul.bf16.vlgmr.msrb.gmra.mxu0 %v11682_v36  ;;  %v7680_v62 = vld [vmem:[#allocation2 + $0x398] sm:$0xf0]  ;;  %v7539_v13 = vor.u32 %v8729_v6, %v7536_v4  ;;  %v7491_v6 = vor.u32 %v8717_v39, %v7488_v10  ;;  %v8793_v10 = vld [vmem:[#allocation2 + $0x46c] sm:$0xf] }
 0xad2   :  { %5301 = vmatpush.bf16.msra.mxu0 %v7347_v46  ;;  %v7283_v46 = vor.u32 %v8665_v32, %v7280_v58  ;;  %v7683_v0 = vor.u32 %v8765_v38, %v7680_v62  ;;  %v7360_v27 = vld [vmem:[#allocation2 + $0x118] sm:$0xf0]  ;;  %v8873_v58 = vld [vmem:[#allocation2 + $0x6ec] sm:$0xf] }
 0xad3   :  { %5294 = vmatpush.bf16.msra.mxu3 %v8143_v40  ;;  %5270 = vmatmul.bf16.vlgmr.msra.gmra.mxu1 %v11686_v29  ;;  %v11719_v56 = vpop.f32.mrf.mxu3  ;;  %v7392_v40 = vld [vmem:[#allocation2 + $0x158] sm:$0xf0]  ;;  %v8805_v38 = vld [vmem:[#allocation2 + $0x4cc] sm:$0xf] }
 0xad4   :  { %5314 = vmatpush.bf16.msrb.mxu1 %v7475_v15  ;;  %5327 = vmatpush.bf16.msrb.mxu2 %v7603_v54  ;;  %v7411_v15 = vor.u32 %v8697_v1, %v7408_v2  ;;  %v8661_v54 = vld [vmem:[#allocation2 + $0x4c] sm:$0xf]  ;;  %v7395_v63 = vor.u32 %v8693_v52, %v7392_v40  ;;  %v7363_v1 = vor.u32 %v8685_v35, %v7360_v27  ;;  %v7840_v62 = vld [vmem:[#allocation2 + $0x4d8] sm:$0xf0] }
 0xad5   :  { %5283 = vmatmul.bf16.vlgmr.msra.gmra.mxu2 %v11690_v50  ;;  %v7267_v57 = vor.u32 %v8661_v54, %v7264_v20  ;;  %v8837_v20 = vld [vmem:[#allocation2 + $0x5cc] sm:$0xf]  ;;  %v7616_v52 = vld [vmem:[#allocation2 + $0x318] sm:$0xf0]  ;;  %v7843_v61 = vor.u32 %v8805_v38, %v7840_v62 }
 0xad6   :  { %5302 = vmatpush.bf16.msra.mxu0 %v7331_v37  ;;  %v8657_v37 = vld [vmem:[#allocation2 + $0x2c] sm:$0xf]  ;;  %v8240_v31 = vld [vmem:[#allocation2 + $0x7f8] sm:$0xf0] }
 0xad7   :  { %5295 = vmatpush.bf16.msra.mxu3 %v8127_v8  ;;  %v7376_v8 = vld [vmem:[#allocation2 + $0x138] sm:$0xf0]  ;;  %v8829_v27 = vld [vmem:[#allocation2 + $0x58c] sm:$0xf] }
 0xad8   :  { %5315 = vmatpush.bf16.msrb.mxu1 %v7459_v19  ;;  %5328 = vmatpush.bf16.msrb.mxu2 %v7587_v55  ;;  %v7248_v19 = vld [vmem:[#allocation2 + $0x38] sm:$0xf0]  ;;  %v7523_v55 = vor.u32 %v8725_v23, %v7520_v11  ;;  %v8905_v11 = vld [vmem:[#allocation2 + $0x7ec] sm:$0xf] }
 0xad9   :  { %v7251_v49 = vor.u32 %v8657_v37, %v7248_v19  ;;  %v8096_v23 = vld [vmem:[#allocation2 + $0x6d8] sm:$0xf0] }
 0xada   :  { %5303 = vmatpush.bf16.msra.mxu0 %v7315_v5  ;;  %5296 = vmatmul.bf16.vlgmr.msra.gmra.mxu3 %v11695_v17  ;;  %v8653_v5 = vld [vmem:[#allocation2 + $0xc] sm:$0xf]  ;;  %v7824_v37 = vld [vmem:[#allocation2 + $0x4b8] sm:$0xf0] }
 0xadb   :  { %5340 = vmatpush.bf16.msrb.mxu3 %v7731_v7  ;;  %v5039_v24 = vpop.f32.mrf.mxu3  ;;  %v7504_v7 = vld [vmem:[#allocation2 + $0x238] sm:$0xf0]  ;;  %v7235_v32 = vor.u32 %v8653_v5, %v7232_v14 }
 0xadc   :  { %5316 = vmatpush.bf16.msrb.mxu1 %v7443_v12  ;;  %5329 = vmatpush.bf16.msrb.mxu2 %v7571_v26  ;;  %v7379_v12 = vor.u32 %v8689_v45, %v7376_v8  ;;  %v7507_v26 = vor.u32 %v8721_v9, %v7504_v7  ;;  %v8833_v24 = vld [vmem:[#allocation2 + $0x5ac] sm:$0xf]  ;;  %v7952_v45 = vld [vmem:[#allocation2 + $0x5b8] sm:$0xf0]  ;;  %v8243_v8 = vor.u32 %v8905_v11, %v8240_v31 }
 0xadd   :  { %v8080_v9 = vld [vmem:[#allocation2 + $0x6b8] sm:$0xf0]  ;;  %v8901_v7 = vld [vmem:[#allocation2 + $0x7cc] sm:$0xf]  ;;  %v7955_v5 = vor.u32 %v8833_v24, %v7952_v45 }
 0xade   :  { %5304 = vmatpush.bf16.msra.mxu0 %v7299_v42  ;;  %v7984_v42 = vld [vmem:[#allocation2 + $0x5f8] sm:$0xf0]  ;;  %v8817_v24 = vld [vmem:[#allocation2 + $0x52c] sm:$0xf] }
 0xadf   :  { %5341 = vmatpush.bf16.msrb.mxu3 %v7715_v48  ;;  %v11721_v30 = vpop.f32.mrf.mxu0  ;;  %v8809_v48 = vld [vmem:[#allocation2 + $0x4ec] sm:$0xf]  ;;  %v7987_v4 = vor.u32 %v8841_v47, %v7984_v42  ;;  %v8224_v53 = vld [vmem:[#allocation2 + $0x7d8] sm:$0xf0] }
 0xae0   :  { %5317 = vmatpush.bf16.msrb.mxu1 %v7427_v3  ;;  %5330 = vmatpush.bf16.msrb.mxu2 %v7555_v33  ;;  %v7632_v3 = vld [vmem:[#allocation2 + $0x338] sm:$0xf0]  ;;  %v7859_v2 = vor.u32 %v8809_v48, %v7856_v51 }
 0xae1   :  { %v8112_v33 = vld [vmem:[#allocation2 + $0x6f8] sm:$0xf0] }
 0xae2   :  { %5305 = vmatpush.bf16.msra.mxu0 %v7283_v46  ;;  %v7635_v46 = vor.u32 %v8753_v43, %v7632_v3  ;;  %v8115_v54 = vor.u32 %v8873_v58, %v8112_v33  ;;  %v7808_v14 = vld [vmem:[#allocation2 + $0x498] sm:$0xf0] }
 0xae3   :  { %5342 = vmatpush.bf16.msrb.mxu3 %v7699_v21  ;;  %v8064_v43 = vld [vmem:[#allocation2 + $0x698] sm:$0xf0] }
 0xae4   :  { %5318 = vmatpush.bf16.msrb.mxu1 %v7411_v15  ;;  %5331 = vmatpush.bf16.msrb.mxu2 %v7539_v13  ;;  %v11723_v21 = vpop.f32.mrf.mxu1  ;;  %v8749_v15 = vld [vmem:[#allocation2 + $0x30c] sm:$0xf]  ;;  %v7968_v13 = vld [vmem:[#allocation2 + $0x5d8] sm:$0xf0] }
 0xae5   :  { %v7619_v19 = vor.u32 %v8749_v15, %v7616_v52  ;;  %v8208_v39 = vld [vmem:[#allocation2 + $0x7b8] sm:$0xf0] }
 0xae6   :  { %5306 = vmatpush.bf16.msra.mxu0 %v7267_v57  ;;  %v7971_v57 = vor.u32 %v8837_v20, %v7968_v13  ;;  %v7792_v47 = vld [vmem:[#allocation2 + $0x478] sm:$0xf0]  ;;  %v8821_v20 = vld [vmem:[#allocation2 + $0x54c] sm:$0xf] }
 0xae7   :  { %5343 = vmatpush.bf16.msrb.mxu3 %v7683_v0  ;;  %v5052_v40 = vpop.f32.mrf.mxu0  ;;  %v8869_v0 = vld [vmem:[#allocation2 + $0x6cc] sm:$0xf]  ;;  %v7920_v58 = vld [vmem:[#allocation2 + $0x578] sm:$0xf0] }
 0xae8   :  { %5319 = vmatpush.bf16.msrb.mxu1 %v7395_v63  ;;  %5332 = vmatpush.bf16.msrb.mxu2 %v7523_v55  ;;  %v8801_v63 = vld [vmem:[#allocation2 + $0x4ac] sm:$0xf]  ;;  %v8099_v55 = vor.u32 %v8869_v0, %v8096_v23  ;;  %v7776_v15 = vld [vmem:[#allocation2 + $0x458] sm:$0xf0] }
 0xae9   :  { %v7827_v59 = vor.u32 %v8801_v63, %v7824_v37  ;;  %v7904_v13 = vld [vmem:[#allocation2 + $0x558] sm:$0xf0]  ;;  %v8853_v40 = vld [vmem:[#allocation2 + $0x64c] sm:$0xf] }
 0xaea   :  { %5307 = vmatpush.bf16.msra.mxu0 %v7251_v49  ;;  %v8032_v0 = vld [vmem:[#allocation2 + $0x658] sm:$0xf0]  ;;  %v8889_v23 = vld [vmem:[#allocation2 + $0x76c] sm:$0xf] }
 0xaeb   :  { %5344 = vmatpush.bf16.msrb.mxu3 %v7667_v22  ;;  %v8865_v22 = vld [vmem:[#allocation2 + $0x6ac] sm:$0xf]  ;;  %v8176_v11 = vld [vmem:[#allocation2 + $0x778] sm:$0xf0] }
 0xaec   :  { %5320 = vmatpush.bf16.msrb.mxu1 %v7379_v12  ;;  %5333 = vmatpush.bf16.msrb.mxu2 %v7507_v26  ;;  %v5065_v49 = vpop.f32.mrf.mxu1  ;;  %v8797_v12 = vld [vmem:[#allocation2 + $0x48c] sm:$0xf]  ;;  %v8083_v35 = vor.u32 %v8865_v22, %v8080_v9  ;;  %v7760_v37 = vld [vmem:[#allocation2 + $0x438] sm:$0xf0] }
 0xaed   :  { %v8861_v26 = vld [vmem:[#allocation2 + $0x68c] sm:$0xf]  ;;  %v7811_v48 = vor.u32 %v8797_v12, %v7808_v14  ;;  %v7888_v45 = vld [vmem:[#allocation2 + $0x538] sm:$0xf0] }
 0xaee   :  { %5308 = vmatpush.bf16.msra.mxu0 %v7235_v32  ;;  %v8067_v3 = vor.u32 %v8861_v26, %v8064_v43  ;;  %v8825_v32 = vld [vmem:[#allocation2 + $0x56c] sm:$0xf]  ;;  %v8016_v9 = vld [vmem:[#allocation2 + $0x638] sm:$0xf0]  ;;  %v7891_v12 = vor.u32 %v8817_v24, %v7888_v45 }
 0xaef   :  { %5345 = vmatpush.bf16.msrb.mxu3 %v7651_v28  ;;  %v7923_v62 = vor.u32 %v8825_v32, %v7920_v58  ;;  %v8785_v63 = vld [vmem:[#allocation2 + $0x42c] sm:$0xf]  ;;  %v11740_v32 = vld [vmem:[%s13072_s2 + $0x78] sm:$0xff] }
 0xaf0   :  { %5321 = vmatpush.bf16.msrb.mxu1 %v7363_v1  ;;  %5334 = vmatpush.bf16.msrb.mxu2 %v7491_v6  ;;  %v11729_v51 = vpop.f32.mrf.mxu0  ;;  %v8857_v1 = vld [vmem:[#allocation2 + $0x66c] sm:$0xf]  ;;  %v11819_v24 = vld [vmem:[%s13072_s2 + $0x158] sm:$0xff] }
 0xaf1   :  { %5309 = vmatmul.bf16.vlgmr.msra.gmra.mxu0 %v11502_v16  ;;  %v7936_v16 = vld [vmem:[#allocation2 + $0x598] sm:$0xf0]  ;;  %v11731_v42 = vpop.f32.mrf.mxu2  ;;  %v8893_v6 = vld [vmem:[#allocation2 + $0x78c] sm:$0xf] }
 0xaf2   :  { %5353 = vmatpush.bf16.msrb.mxu0 %v7859_v2  ;;  %v7939_v28 = vor.u32 %v8829_v27, %v7936_v16  ;;  %v8048_v2 = vld [vmem:[#allocation2 + $0x678] sm:$0xf0]  ;;  %v8849_v22 = vld [vmem:[#allocation2 + $0x62c] sm:$0xf] }
 0xaf3   :  { %5346 = vmatpush.bf16.msrb.mxu3 %v7635_v46  ;;  %5322 = vmatmul.bf16.vlgmr.msrb.gmra.mxu1 %v11573_v18  ;;  %v8227_v18 = vor.u32 %v8901_v7, %v8224_v53  ;;  %v8789_v46 = vld [vmem:[#allocation2 + $0x44c] sm:$0xf]  ;;  %v8160_v53 = vld [vmem:[#allocation2 + $0x758] sm:$0xf0]  ;;  %v8019_v27 = vor.u32 %v8849_v22, %v8016_v9  ;;  %v11830_v9 = vld [vmem:[%s13072_s2 + $0xc0] sm:$0xff] }
 0xaf4   :  { %5366 = vmatpush.bf16.msra.mxu1 %v7987_v4  ;;  %5379 = vmatpush.bf16.msra.mxu2 %v8115_v54  ;;  %v8192_v4 = vld [vmem:[#allocation2 + $0x798] sm:$0xf0]  ;;  %v11733_v38 = vpop.f32.mrf.mxu1  ;;  %v8051_v54 = vor.u32 %v8857_v1, %v8048_v2  ;;  %v7779_v31 = vor.u32 %v8789_v46, %v7776_v15  ;;  %v8885_v7 = vld [vmem:[#allocation2 + $0x74c] sm:$0xf] }
 0xaf5   :  { %5335 = vmatmul.bf16.vlgmr.msrb.gmra.mxu2 %v11618_v41  ;;  %v8897_v41 = vld [vmem:[#allocation2 + $0x7ac] sm:$0xf]  ;;  %v8195_v52 = vor.u32 %v8893_v6, %v8192_v4  ;;  %v8163_v26 = vor.u32 %v8885_v7, %v8160_v53  ;;  %v8128_v2 = vld [vmem:[#allocation2 + $0x718] sm:$0xf0]  ;;  %v11747_v4 = vld [vmem:[%s13072_s2 + $0x70] sm:$0xff] }
 0xaf6   :  { %5354 = vmatpush.bf16.msrb.mxu0 %v7843_v61  ;;  %v8211_v33 = vor.u32 %v8897_v41, %v8208_v39  ;;  %v8781_v14 = vld [vmem:[#allocation2 + $0x40c] sm:$0xf]  ;;  %v8000_v41 = vld [vmem:[#allocation2 + $0x618] sm:$0xf0]  ;;  %v11833_v7 = vld [vmem:[%s13072_s2 + $0x150] sm:$0xff] }
 0xaf7   :  { %5347 = vmatpush.bf16.msrb.mxu3 %v7619_v19  ;;  %v8813_v16 = vld [vmem:[#allocation2 + $0x50c] sm:$0xf] }
 0xaf8   :  { %5367 = vmatpush.bf16.msra.mxu1 %v7971_v57  ;;  %5380 = vmatpush.bf16.msra.mxu2 %v8099_v55  ;;  %v5104_v61 = vpop.f32.mrf.mxu0  ;;  %v7907_v57 = vor.u32 %v8821_v20, %v7904_v13  ;;  %v8035_v55 = vor.u32 %v8853_v40, %v8032_v0  ;;  %v8845_v43 = vld [vmem:[#allocation2 + $0x60c] sm:$0xf]  ;;  %v11780_v0 = vld [vmem:[%s13072_s2 + $0xe0] sm:$0xff] }
 0xaf9   :  { %v5078_v19 = vpop.f32.mrf.mxu2  ;;  %v8881_v39 = vld [vmem:[#allocation2 + $0x72c] sm:$0xf] }
 0xafa   :  { %5355 = vmatpush.bf16.msrb.mxu0 %v7827_v59  ;;  %5348 = vmatmul.bf16.vlgmr.msrb.gmra.mxu3 %v11650_v44  ;;  %v7795_v44 = vor.u32 %v8793_v10, %v7792_v47  ;;  %v7763_v59 = vor.u32 %v8785_v63, %v7760_v37  ;;  %v8877_v1 = vld [vmem:[#allocation2 + $0x70c] sm:$0xf]  ;;  %v11804_v37 = vld [vmem:[%s13072_s2 + $0xd0] sm:$0xff]  ;;  %v11807_v19 = vld [vmem:[%s13072_s2 + $0x160] sm:$0xff] }
 0xafb   :  { %5392 = vmatpush.bf16.msra.mxu3 %v8243_v8  ;;  %v8179_v8 = vor.u32 %v8889_v23, %v8176_v11  ;;  %v8131_v46 = vor.u32 %v8877_v1, %v8128_v2  ;;  %v11758_v15 = vld [vmem:[%s13072_s2 + $0x68] sm:$0xff]  ;;  %v11789_v23 = vld [vmem:[%s13072_s2 + $0xd8] sm:$0xff] }
 0xafc   :  { %5368 = vmatpush.bf16.msra.mxu1 %v7955_v5  ;;  %5381 = vmatpush.bf16.msra.mxu2 %v8083_v35  ;;  %v11735_v49 = vpop.f32.mrf.mxu3  ;;  %v5117_v5 = vpop.f32.mrf.mxu1  ;;  %v7744_v35 = vld [vmem:[#allocation2 + $0x418] sm:$0xf0]  ;;  %v11766_v20 = vld [vmem:[%s13072_s2 + $0xe8] sm:$0xff] }
 0xafd   :  { %v11793_v11 = vld [vmem:[%s13072_s2 + $0x168] sm:$0xff] }
 0xafe   :  { %5356 = vmatpush.bf16.msrb.mxu0 %v7811_v48  ;;  %v8144_v48 = vld [vmem:[#allocation2 + $0x738] sm:$0xf0]  ;;  %v11847_v5 = vld [vmem:[%s13072_s2 + $0x148] sm:$0xff] }
 0xaff   :  { %5393 = vmatpush.bf16.msra.mxu3 %v8227_v18  ;;  %v7872_v18 = vld [vmem:[#allocation2 + $0x518] sm:$0xf0]  ;;  %v8147_v58 = vor.u32 %v8881_v39, %v8144_v48  ;;  %v11869_v39 = vld [vmem:[%s13072_s2 + $0xa8] sm:$0xff] }
 0xb00   :  { %5369 = vmatpush.bf16.msra.mxu1 %v7939_v28  ;;  %5382 = vmatpush.bf16.msra.mxu2 %v8067_v3  ;;  %v7747_v28 = vor.u32 %v8781_v14, %v7744_v35  ;;  %v7875_v10 = vor.u32 %v8813_v16, %v7872_v18  ;;  %v8003_v3 = vor.u32 %v8845_v43, %v8000_v41  ;;  %v11856_v14 = vld [vmem:[%s13072_s2 + $0xb0] sm:$0xff]  ;;  %v11859_v35 = vld [vmem:[%s13072_s2 + $0x140] sm:$0xff]  ;;  %v11897_v1 = vld [vmem:[%s13072_s2 + $0x128] sm:$0xff] }
 0xb01   :  { %v11737_v47 = vpop.f32.mrf.mxu2 }
 0xb02   :  { %5357 = vmatpush.bf16.msrb.mxu0 %v7795_v44  ;;  %v11750_v44 = vld [vmem:[%s13073_s7] sm:$0xf] }
 0xb03   :  { %5394 = vmatpush.bf16.msra.mxu3 %v8211_v33  ;;  %v11743_v33 = vld [vmem:[%s13072_s2 + $0xf8] sm:$0xff]  ;;  %v3645_v13 = vperm.slane %v11750_v44, 0  ;;  %v3646_v40 = vperm.slane %v11750_v44, 1 }
 0xb04   :  { %5370 = vmatpush.bf16.msra.mxu1 %v7923_v62  ;;  %5383 = vmatpush.bf16.msra.mxu2 %v8051_v54  ;;  %v5091_v6 = vpop.f32.mrf.mxu3  ;;  %v11754_v62 = vld [vmem:[%s13072_s2 + $0xf0] sm:$0xff]  ;;  %v11761_v54 = vld [vmem:[%s13072_s2 + $0x178] sm:$0xff] }
 0xb05   :  { %v5103_v63 = vadd.f32 %v11729_v51, %v3646_v40  ;;  %v11907_v40 = vld [vmem:[%s13072_s2 + $0x90] sm:$0xff] }
 0xb06   :  { %5358 = vmatpush.bf16.msrb.mxu0 %v7779_v31  ;;  %v4999_v31 = vadd.f32 %v11709_v60, %v3645_v13 }
 0xb07   :  { %5395 = vmatpush.bf16.msra.mxu3 %v8195_v52  ;;  %v11775_v52 = vld [vmem:[%s13072_s2 + $0x170] sm:$0xff]  ;;  %v5116_v22 = vadd.f32 %v11733_v38, %v5103_v63  ;;  %v11844_v38 = vld [vmem:[%s13072_s2 + $0xb8] sm:$0xff] }
 0xb08   :  { %5371 = vmatpush.bf16.msra.mxu1 %v7907_v57  ;;  %5384 = vmatpush.bf16.msra.mxu2 %v8035_v55  ;;  %v11798_v57 = vld [vmem:[%s13072_s2 + $0x50] sm:$0xff]  ;;  %v11811_v55 = vld [vmem:[%s13072_s2 + $0x48] sm:$0xff]  ;;  %v5012_v45 = vadd.f32 %v11711_v34, %v4999_v31  ;;  %v11838_v34 = vld [vmem:[%s13072_s2 + $0x38] sm:$0xff] }
 0xb0a   :  { %5359 = vmatpush.bf16.msrb.mxu0 %v7763_v59  ;;  %v5025_v53 = vadd.f32 %v11713_v25, %v5012_v45  ;;  %v5129_v59 = vadd.f32 %v11737_v47, %v5116_v22  ;;  %v11851_v25 = vld [vmem:[%s13072_s2 + $0x30] sm:$0xff]  ;;  %v11882_v47 = vld [vmem:[%s13072_s2 + $0xa0] sm:$0xff] }
 0xb0b   :  { %5396 = vmatpush.bf16.msra.mxu3 %v8179_v8  ;;  %v11824_v8 = vld [vmem:[%s13072_s2 + $0x40] sm:$0xff] }
 0xb0c   :  { %5372 = vmatpush.bf16.msra.mxu1 %v7891_v12  ;;  %5385 = vmatpush.bf16.msra.mxu2 %v8019_v27  ;;  %v5141_v61 = vpop.f32.mrf.mxu3  ;;  %v5038_v27 = vadd.f32 %v11719_v56, %v5025_v53  ;;  %v11872_v56 = vld [vmem:[%s13072_s2 + $0x138] sm:$0xff]  ;;  %v11927_v45 = vld [vmem:[%s13072_s2] sm:$0xff] }
 0xb0d   :  { %v5142_v43 = vadd.f32 %v5141_v61, %v5129_v59  ;;  %v11915_v61 = vld [vmem:[%s13072_s2 + $0x8] sm:$0xff]  ;;  %v11943_v59 = vld [vmem:[%s13072_s2 + $0x110] sm:$0xff] }
 0xb0e   :  { %5360 = vmatpush.bf16.msrb.mxu0 %v7747_v28  ;;  %v5154_v60 = vpop.f32.mrf.mxu0  ;;  %v5051_v48 = vadd.f32 %v11721_v30, %v5038_v27  ;;  %v11877_v28 = vld [vmem:[%s13072_s2 + $0x20] sm:$0xff]  ;;  %v11894_v30 = vld [vmem:[%s13072_s2 + $0x98] sm:$0xff] }
 0xb0f   :  { %5397 = vmatpush.bf16.msra.mxu3 %v8163_v26  ;;  %v11864_v26 = vld [vmem:[%s13072_s2 + $0x28] sm:$0xff]  ;;  %v11956_v27 = vld [vmem:[%s13072_s2 + $0x100] sm:$0xff] }
 0xb10   :  { %5373 = vmatpush.bf16.msra.mxu1 %v7875_v10  ;;  %5386 = vmatpush.bf16.msra.mxu2 %v8003_v3  ;;  %v5167_v51 = vpop.f32.mrf.mxu1  ;;  %v5155_v10 = vadd.f32 %v5154_v60, %v5142_v43  ;;  %v11885_v3 = vld [vmem:[%s13072_s2 + $0x130] sm:$0xff]  ;;  %v5064_v2 = vadd.f32 %v11723_v21, %v5051_v48  ;;  %v11920_v60 = vld [vmem:[%s13072_s2 + $0x88] sm:$0xff] }
 0xb11   :  { %5361 = vmatmul.bf16.vlgmr.msrb.gmra.mxu0 %v11682_v36  ;;  %v11772_v36 = vld [vmem:[%s13072_s2 + $0x60] sm:$0xff] }
 0xb12   :  { %5483 = vmatpush.msra.mxu0 %v11740_v32  ;;  %v5168_v13 = vadd.f32 %v5167_v51, %v5155_v10  ;;  %v5077_v21 = vadd.f32 %v11731_v42, %v5064_v2  ;;  %v11923_v51 = vld [vmem:[%s13072_s2 + $0x118] sm:$0xff]  ;;  %v11932_v42 = vld [vmem:[%s13072_s2 + $0x80] sm:$0xff] }
 0xb13   :  { %5398 = vmatpush.bf16.msra.mxu3 %v8147_v58  ;;  %5374 = vmatmul.bf16.vlgmr.msra.gmra.mxu1 %v11686_v29  ;;  %v5130_v29 = vpop.f32.mrf.mxu2  ;;  %v11889_v58 = vld [vmem:[%s13072_s2 + $0x18] sm:$0xff] }
 0xb14   :  { %5503 = vmatpush.msrb.mxu1 %v11743_v33  ;;  %5484 = vmatpush.msra.mxu0 %v11747_v4  ;;  %v5143_v12 = vpop.f32.mrf.mxu3  ;;  %v11910_v29 = vld [vmem:[%s13072_s2 + $0x120] sm:$0xff]  ;;  %v11935_v22 = vadd.f32 %v11735_v49, %v5077_v21  ;;  %v11950_v49 = vld [vmem:[%s13072_s2 + $0x108] sm:$0xff]  ;;  %v5460_v10 = vld [vmem:[%s13072_s2 + $0x198] sm:$0xff] }
 0xb15   :  { %5387 = vmatmul.bf16.vlgmr.msra.gmra.mxu2 %v11690_v50  ;;  %v11785_v50 = vld [vmem:[%s13072_s2 + $0x58] sm:$0xff] }
 0xb16   :  { %5504 = vmatpush.msrb.mxu1 %v11754_v62  ;;  %5485 = vmatpush.msra.mxu0 %v11758_v15  ;;  %v5156_v18 = vpop.f32.mrf.mxu0 }
 0xb17   :  { %5523 = vmatpush.msrb.mxu2 %v11761_v54  ;;  %5399 = vmatpush.bf16.msra.mxu3 %v8131_v46  ;;  %v11902_v46 = vld [vmem:[%s13072_s2 + $0x10] sm:$0xff] }
 0xb18   :  { %5505 = vmatpush.msrb.mxu1 %v11766_v20  ;;  %5486 = vmatpush.msra.mxu0 %v11772_v36  ;;  %v5169_v41 = vpop.f32.mrf.mxu1 }
 0xb19   :  { %5524 = vmatpush.msrb.mxu2 %v11775_v52 }
 0xb1a   :  { %5506 = vmatpush.msrb.mxu1 %v11780_v0  ;;  %5400 = vmatmul.bf16.vlgmr.msra.gmra.mxu3 %v11695_v17  ;;  %v11816_v17 = vld [vmem:[%s13072_s2 + $0xc8] sm:$0xff] }
 0xb1b   :  { %5487 = vmatpush.msra.mxu0 %v11785_v50  ;;  %5525 = vmatpush.msrb.mxu2 %v11793_v11  ;;  %v5180_v16 = vpop.f32.mrf.mxu2 }
 0xb1c   :  { %5507 = vmatpush.msrb.mxu1 %v11789_v23  ;;  %v5181_v63 = vadd.f32 %v5180_v16, %v5168_v13 }
 0xb1d   :  { %5488 = vmatpush.msra.mxu0 %v11798_v57  ;;  %5526 = vmatpush.msrb.mxu2 %v11807_v19  ;;  %v5193_v6 = vpop.f32.mrf.mxu3 }
 0xb1e   :  { %5508 = vmatpush.msrb.mxu1 %v11804_v37  ;;  %v11939_v53 = vadd.f32 %v5193_v6, %v5181_v63 }
 0xb1f   :  { %5489 = vmatpush.msra.mxu0 %v11811_v55  ;;  %5527 = vmatpush.msrb.mxu2 %v11819_v24 }
 0xb20   :  { %5509 = vmatpush.msrb.mxu1 %v11816_v17 }
 0xb21   :  { %5490 = vmatpush.msra.mxu0 %v11824_v8  ;;  %5528 = vmatpush.msrb.mxu2 %v11833_v7 }
 0xb22   :  { %5510 = vmatpush.msrb.mxu1 %v11830_v9 }
 0xb23   :  { %5491 = vmatpush.msra.mxu0 %v11838_v34  ;;  %5529 = vmatpush.msrb.mxu2 %v11847_v5  ;;  %v5182_v31 = vpop.f32.mrf.mxu2 }
 0xb24   :  { %5511 = vmatpush.msrb.mxu1 %v11844_v38 }
 0xb25   :  { %5492 = vmatpush.msra.mxu0 %v11851_v25  ;;  %5530 = vmatpush.msrb.mxu2 %v11859_v35  ;;  %v5195_v12 = vpop.f32.mrf.mxu3 }
 0xb26   :  { %5512 = vmatpush.msrb.mxu1 %v11856_v14 }
 0xb27   :  { %5493 = vmatpush.msra.mxu0 %v11864_v26  ;;  %5531 = vmatpush.msrb.mxu2 %v11872_v56 }
 0xb28   :  { %5513 = vmatpush.msrb.mxu1 %v11869_v39 }
 0xb29   :  { %5494 = vmatpush.msra.mxu0 %v11877_v28  ;;  %5532 = vmatpush.msrb.mxu2 %v11885_v3 }
 0xb2a   :  { %5514 = vmatpush.msrb.mxu1 %v11882_v47 }
 0xb2b   :  { %5495 = vmatpush.msra.mxu0 %v11889_v58  ;;  %5533 = vmatpush.msrb.mxu2 %v11897_v1 }
 0xb2c   :  { %5515 = vmatpush.msrb.mxu1 %v11894_v30 }
 0xb2d   :  { %5496 = vmatpush.msra.mxu0 %v11902_v46  ;;  %5534 = vmatpush.msrb.mxu2 %v11910_v29 }
 0xb2e   :  { %5516 = vmatpush.msrb.mxu1 %v11907_v40 }
 0xb2f   :  { %5497 = vmatpush.msra.mxu0 %v11915_v61  ;;  %5535 = vmatpush.msrb.mxu2 %v11923_v51 }
 0xb30   :  { %5517 = vmatpush.msrb.mxu1 %v11920_v60 }
 0xb31   :  { %5498 = vmatpush.msra.mxu0 %v11927_v45  ;;  %5536 = vmatpush.msrb.mxu2 %v11943_v59 }
 0xb32   :  { %5518 = vmatpush.msrb.mxu1 %v11932_v42  ;;  %5499 = vmatmul.f32.vlgmr.msra.gmra.mxu0 %v11935_v22 }
 0xb33   :  { %5519 = vmatmul.f32.vlgmr.msrb.gmra.mxu1 %v11939_v53  ;;  %5564 = vmatpush.msrb.mxu0 %v11740_v32  ;;  %v5206_v32 = vpop.f32.mrf.mxu0 }
 0xb34   :  { %5584 = vmatpush.msra.mxu1 %v11743_v33  ;;  %5537 = vmatpush.msrb.mxu2 %v11950_v49  ;;  %v5219_v33 = vpop.f32.mrf.mxu1 }
 0xb35   :  { %5565 = vmatpush.msrb.mxu0 %v11747_v4 }
 0xb36   :  { %5585 = vmatpush.msra.mxu1 %v11754_v62  ;;  %5538 = vmatpush.msrb.mxu2 %v11956_v27 }
 0xb37   :  { %5566 = vmatpush.msrb.mxu0 %v11758_v15 }
 0xb38   :  { %5586 = vmatpush.msra.mxu1 %v11766_v20  ;;  %5604 = vmatpush.msra.mxu2 %v11761_v54  ;;  %v5232_v4 = vpop.f32.mrf.mxu2 }
 0xb39   :  { %5567 = vmatpush.msrb.mxu0 %v11772_v36  ;;  %v3647_v36 = vperm.slane %v11750_v44, 2 }
 0xb3a   :  { %5587 = vmatpush.msra.mxu1 %v11780_v0  ;;  %5605 = vmatpush.msra.mxu2 %v11775_v52  ;;  %v11995_v52 = vld [vmem:[%s13072_s2 + $0x1f8] sm:$0xff]  ;;  %v12000_v0 = vld [vmem:[%s13072_s2 + $0x1f0] sm:$0xff] }
 0xb3b   :  { %5568 = vmatpush.msrb.mxu0 %v11785_v50  ;;  %v5208_v62 = vpop.f32.mrf.mxu0  ;;  %5543 = vmatpush.msrb.mxu3 %v11995_v52  ;;  %v5207_v50 = vadd.f32 %v5206_v32, %v3647_v36 }
 0xb3c   :  { %5588 = vmatpush.msra.mxu1 %v11789_v23  ;;  %5606 = vmatpush.msra.mxu2 %v11793_v11  ;;  %v5221_v15 = vpop.f32.mrf.mxu1  ;;  %v5405_v11 = vmul.f32 %v11935_v22, %v11935_v22 }
 0xb3d   :  { %5569 = vmatpush.msrb.mxu0 %v11798_v57  ;;  %v5245_v54 = vpop.f32.mrf.mxu3  ;;  %5544 = vmatpush.msrb.mxu3 %v12000_v0  ;;  %v5406_v57 = vmul.f32 %v11939_v53, %v11939_v53 }
 0xb3e   :  { %5589 = vmatpush.msra.mxu1 %v11804_v37  ;;  %5607 = vmatpush.msra.mxu2 %v11807_v19  ;;  %v5470_v37 = vld [vmem:[%s13072_s2 + $0x1e8] sm:$0xff]  ;;  %v5220_v19 = vadd.f32 %v5219_v33, %v5207_v50 }
 0xb3f   :  { %5570 = vmatpush.msrb.mxu0 %v11811_v55  ;;  %v5469_v55 = vld [vmem:[%s13072_s2 + $0x1e0] sm:$0xff]  ;;  %5545 = vmatpush.msrb.mxu3 %v5470_v37  ;;  %v5478_v50 = vld [vmem:[%s13074_s10 + $0x28] sm:$0xff] }
 0xb40   :  { %5590 = vmatpush.msra.mxu1 %v11816_v17  ;;  %5608 = vmatpush.msra.mxu2 %v11819_v24  ;;  %v5234_v20 = vpop.f32.mrf.mxu2  ;;  %v5233_v17 = vadd.f32 %v5232_v4, %v5220_v19  ;;  %v5468_v24 = vld [vmem:[%s13072_s2 + $0x1d8] sm:$0xff] }
 0xb41   :  { %5571 = vmatpush.msrb.mxu0 %v11824_v8  ;;  %5546 = vmatpush.msrb.mxu3 %v5469_v55  ;;  %v5476_v19 = vld [vmem:[%s13074_s10 + $0x18] sm:$0xff] }
 0xb42   :  { %5591 = vmatpush.msra.mxu1 %v11830_v9  ;;  %5609 = vmatpush.msra.mxu2 %v11833_v7  ;;  %v5467_v9 = vld [vmem:[%s13072_s2 + $0x1d0] sm:$0xff] }
 0xb43   :  { %5572 = vmatpush.msrb.mxu0 %v11838_v34  ;;  %5547 = vmatpush.msrb.mxu3 %v5468_v24  ;;  %v5246_v34 = vadd.f32 %v5245_v54, %v5233_v17 }
 0xb44   :  { %5592 = vmatpush.msra.mxu1 %v11844_v38  ;;  %5610 = vmatpush.msra.mxu2 %v11847_v5  ;;  %v5466_v38 = vld [vmem:[%s13072_s2 + $0x1c8] sm:$0xff] }
 0xb45   :  { %5573 = vmatpush.msrb.mxu0 %v11851_v25  ;;  %v5247_v23 = vpop.f32.mrf.mxu3  ;;  %5548 = vmatpush.msrb.mxu3 %v5467_v9  ;;  %v5465_v25 = vld [vmem:[%s13072_s2 + $0x1c0] sm:$0xff] }
 0xb46   :  { %5593 = vmatpush.msra.mxu1 %v11856_v14  ;;  %5611 = vmatpush.msra.mxu2 %v11859_v35  ;;  %v5464_v14 = vld [vmem:[%s13072_s2 + $0x1b8] sm:$0xff] }
 0xb47   :  { %5574 = vmatpush.msrb.mxu0 %v11864_v26  ;;  %5549 = vmatpush.msrb.mxu3 %v5466_v38  ;;  %v5463_v26 = vld [vmem:[%s13072_s2 + $0x1b0] sm:$0xff]  ;;  %v5480_v23 = vld [vmem:[%s13074_s10 + $0x38] sm:$0xff] }
 0xb48   :  { %5594 = vmatpush.msra.mxu1 %v11869_v39  ;;  %5612 = vmatpush.msra.mxu2 %v11872_v56  ;;  %v5462_v39 = vld [vmem:[%s13072_s2 + $0x1a8] sm:$0xff]  ;;  %v5461_v56 = vld [vmem:[%s13072_s2 + $0x1a0] sm:$0xff] }
 0xb49   :  { %5575 = vmatpush.msrb.mxu0 %v11877_v28  ;;  %5550 = vmatpush.msrb.mxu3 %v5465_v25 }
 0xb4a   :  { %5595 = vmatpush.msra.mxu1 %v11882_v47  ;;  %5613 = vmatpush.msra.mxu2 %v11885_v3  ;;  %v5459_v3 = vld [vmem:[%s13072_s2 + $0x190] sm:$0xff] }
 0xb4b   :  { %5576 = vmatpush.msrb.mxu0 %v11889_v58  ;;  %5551 = vmatpush.msrb.mxu3 %v5464_v14  ;;  %v5458_v58 = vld [vmem:[%s13072_s2 + $0x188] sm:$0xff] }
 0xb4c   :  { %5596 = vmatpush.msra.mxu1 %v11894_v30  ;;  %5614 = vmatpush.msra.mxu2 %v11897_v1  ;;  %v5457_v30 = vld [vmem:[%s13072_s2 + $0x180] sm:$0xff] }
 0xb4d   :  { %5577 = vmatpush.msrb.mxu0 %v11902_v46  ;;  %5552 = vmatpush.msrb.mxu3 %v5463_v26 }
 0xb4e   :  { %5597 = vmatpush.msra.mxu1 %v11907_v40  ;;  %5615 = vmatpush.msra.mxu2 %v11910_v29  ;;  %v5258_v8 = vpop.f32.mrf.mxu0 }
 0xb4f   :  { %5578 = vmatpush.msrb.mxu0 %v11915_v61  ;;  %v5259_v5 = vadd.f32 %v5258_v8, %v5246_v34  ;;  %5553 = vmatpush.msrb.mxu3 %v5462_v39  ;;  %v3648_v61 = vperm.slane %v11750_v44, 3 }
 0xb50   :  { %5598 = vmatpush.msra.mxu1 %v11920_v60  ;;  %5616 = vmatpush.msra.mxu2 %v11923_v51  ;;  %v5271_v7 = vpop.f32.mrf.mxu1 }
 0xb51   :  { %5579 = vmatpush.msrb.mxu0 %v11927_v45  ;;  %v5272_v16 = vadd.f32 %v5271_v7, %v5259_v5  ;;  %5554 = vmatpush.msrb.mxu3 %v5461_v56 }
 0xb52   :  { %5599 = vmatpush.msra.mxu1 %v11932_v42  ;;  %5580 = vmatmul.f32.vlgmr.msrb.gmra.mxu0 %v5405_v11  ;;  %v5473_v11 = vld [vmem:[%s13074_s10] sm:$0xff] }
 0xb53   :  { %5600 = vmatmul.f32.vlgmr.msra.gmra.mxu1 %v5406_v57  ;;  %5617 = vmatpush.msra.mxu2 %v11943_v59  ;;  %v5474_v57 = vld [vmem:[%s13074_s10 + $0x8] sm:$0xff] }
 0xb54   :  { %5555 = vmatpush.msrb.mxu3 %v5460_v10  ;;  %5685 = vmatpush.msrb.mxu1 %v5478_v50 }
 0xb55   :  { %5618 = vmatpush.msra.mxu2 %v11950_v49 }
 0xb56   :  { %v5260_v18 = vpop.f32.mrf.mxu0  ;;  %5556 = vmatpush.msrb.mxu3 %v5459_v3  ;;  %5686 = vmatpush.msrb.mxu1 %v5474_v57 }
 0xb57   :  { %5619 = vmatpush.msra.mxu2 %v11956_v27 }
 0xb58   :  { %v5284_v35 = vpop.f32.mrf.mxu2  ;;  %v5273_v43 = vpop.f32.mrf.mxu1  ;;  %5557 = vmatpush.msrb.mxu3 %v5458_v58  ;;  %5768 = vmatpush.msra.mxu1 %v5478_v50  ;;  %v12089_v50 = vld [vmem:[%s13076_s15] sm:$0xf] }
 0xb59   :  { %v5285_v41 = vadd.f32 %v5284_v35, %v5272_v16 }
 0xb5a   :  { %5558 = vmatpush.msrb.mxu3 %v5457_v30  ;;  %5769 = vmatpush.msra.mxu1 %v5474_v57  ;;  %v8933_v57 = vld [vmem:[%s13075_s11 + $0xc4] sm:$0xf0] }
 0xb5c   :  { %5624 = vmatpush.msra.mxu3 %v11995_v52  ;;  %v5479_v52 = vld [vmem:[%s13074_s10 + $0x30] sm:$0xff] }
 0xb5d   :  { %v5297_v48 = vpop.f32.mrf.mxu3 }
 0xb5e   :  { %v12028_v28 = vadd.f32 %v5297_v48, %v5285_v41  ;;  %5625 = vmatpush.msra.mxu3 %v12000_v0  ;;  %v5477_v0 = vld [vmem:[%s13074_s10 + $0x20] sm:$0xff]  ;;  %v8310_v48 = vld [vmem:[%s13075_s11 + $0x70] sm:$0xf] }
 0xb5f   :  { %5665 = vmatpush.msra.mxu0 %v5477_v0 }
 0xb60   :  { %v5286_v47 = vpop.f32.mrf.mxu2  ;;  %5539 = vmatmul.f32.vlgmr.msrb.gmra.mxu2 %v12028_v28  ;;  %v5407_v2 = vmul.f32 %v12028_v28, %v12028_v28  ;;  %5626 = vmatpush.msra.mxu3 %v5470_v37  ;;  %v5475_v37 = vld [vmem:[%s13074_s10 + $0x10] sm:$0xff] }
 0xb61   :  { %5705 = vmatpush.msrb.mxu2 %v5479_v52  ;;  %5666 = vmatpush.msra.mxu0 %v5473_v11  ;;  %v8374_v47 = vld [vmem:[%s13075_s11 + $0xf0] sm:$0xf] }
 0xb62   :  { %5627 = vmatpush.msra.mxu3 %v5469_v55 }
 0xb63   :  { %5706 = vmatpush.msrb.mxu2 %v5475_v37  ;;  %5748 = vmatpush.msrb.mxu0 %v5477_v0  ;;  %v8350_v0 = vld [vmem:[%s13075_s11 + $0xc0] sm:$0xf] }
 0xb64   :  { %5628 = vmatpush.msra.mxu3 %v5468_v24 }
 0xb65   :  { %v5299_v1 = vpop.f32.mrf.mxu3  ;;  %5749 = vmatpush.msrb.mxu0 %v5473_v11 }
 0xb66   :  { %5629 = vmatpush.msra.mxu3 %v5467_v9  ;;  %v8921_v1 = vld [vmem:[%s13075_s11 + $0x64] sm:$0xf0] }
 0xb68   :  { %5620 = vmatmul.f32.vlgmr.msra.gmra.mxu2 %v5407_v2  ;;  %5630 = vmatpush.msra.mxu3 %v5466_v38 }
 0xb69   :  { %5788 = vmatpush.msra.mxu2 %v5479_v52  ;;  %v8917_v52 = vld [vmem:[%s13075_s11 + $0x44] sm:$0xf0] }
 0xb6a   :  { %5631 = vmatpush.msra.mxu3 %v5465_v25 }
 0xb6b   :  { %5789 = vmatpush.msra.mxu2 %v5475_v37  ;;  %v8422_v37 = vld [vmem:[%s13075_s11 + $0x150] sm:$0xf] }
 0xb6c   :  { %5632 = vmatpush.msra.mxu3 %v5464_v14 }
 0xb6e   :  { %v5310_v6 = vpop.f32.mrf.mxu0  ;;  %5633 = vmatpush.msra.mxu3 %v5463_v26 }
 0xb6f   :  { %v5311_v63 = vadd.f32 %v5310_v6, %v3648_v61  ;;  %v8366_v6 = vld [vmem:[%s13075_s11 + $0xe0] sm:$0xf] }
 0xb70   :  { %v5323_v46 = vpop.f32.mrf.mxu1  ;;  %5634 = vmatpush.msra.mxu3 %v5462_v39 }
 0xb71   :  { %v5324_v51 = vadd.f32 %v5323_v46, %v5311_v63  ;;  %v8937_v46 = vld [vmem:[%s13075_s11 + $0xe4] sm:$0xf0]  ;;  %v8971_v63 = vld [vmem:[%s13075_s11 + $0x1f4] sm:$0xf0] }
 0xb72   :  { %5635 = vmatpush.msra.mxu3 %v5461_v56 }
 0xb74   :  { %5636 = vmatpush.msra.mxu3 %v5460_v10  ;;  %v8923_v10 = vld [vmem:[%s13075_s11 + $0x74] sm:$0xf0] }
 0xb76   :  { %v5312_v40 = vpop.f32.mrf.mxu0  ;;  %5637 = vmatpush.msra.mxu3 %v5459_v3  ;;  %v8311_v3 = vor.u32 %v8923_v10, %v8310_v48  ;;  %v8414_v48 = vld [vmem:[%s13075_s11 + $0x140] sm:$0xf]  ;;  %v8949_v10 = vld [vmem:[%s13075_s11 + $0x144] sm:$0xf0] }
 0xb77   :  { %v8367_v40 = vor.u32 %v8937_v46, %v8366_v6 }
 0xb78   :  { %v5336_v13 = vpop.f32.mrf.mxu2  ;;  %v5325_v29 = vpop.f32.mrf.mxu1  ;;  %5638 = vmatpush.msra.mxu3 %v5458_v58  ;;  %v8939_v58 = vld [vmem:[%s13075_s11 + $0xf4] sm:$0xf0] }
 0xb79   :  { %v5337_v45 = vadd.f32 %v5336_v13, %v5324_v51  ;;  %v8375_v2 = vor.u32 %v8939_v58, %v8374_v47  ;;  %v8438_v29 = vld [vmem:[%s13075_s11 + $0x170] sm:$0xf]  ;;  %v8919_v51 = vld [vmem:[%s13075_s11 + $0x54] sm:$0xf0]  ;;  %v8478_v47 = vld [vmem:[%s13075_s11 + $0x1c0] sm:$0xf]  ;;  %v8415_v58 = vor.u32 %v8949_v10, %v8414_v48 }
 0xb7a   :  { %5639 = vmatpush.msra.mxu3 %v5457_v30  ;;  %v8302_v30 = vld [vmem:[%s13075_s11 + $0x60] sm:$0xf] }
 0xb7b   :  { %v8303_v13 = vor.u32 %v8921_v1, %v8302_v30  ;;  %v8270_v30 = vld [vmem:[%s13075_s11 + $0x20] sm:$0xf]  ;;  %v8913_v1 = vld [vmem:[%s13075_s11 + $0x24] sm:$0xf0] }
 0xb7c   :  { %v8271_v46 = vor.u32 %v8913_v1, %v8270_v30 }
 0xb7d   :  { %v5349_v21 = vpop.f32.mrf.mxu3 }
 0xb7e   :  { %v5350_v12 = vadd.f32 %v5349_v21, %v5337_v45  ;;  %v8955_v21 = vld [vmem:[%s13075_s11 + $0x174] sm:$0xf0] }
 0xb7f   :  { %v8439_v61 = vor.u32 %v8955_v21, %v8438_v29  ;;  %v8947_v29 = vld [vmem:[%s13075_s11 + $0x134] sm:$0xf0] }
 0xb80   :  { %v5338_v31 = vpop.f32.mrf.mxu2 }
 0xb81   :  { %v8502_v31 = vld [vmem:[%s13075_s11 + $0x1f0] sm:$0xf] }
 0xb82   :  { %v8503_v45 = vor.u32 %v8971_v63, %v8502_v31  ;;  %v8963_v63 = vld [vmem:[%s13075_s11 + $0x1b4] sm:$0xf0] }
 0xb85   :  { %v5351_v60 = vpop.f32.mrf.mxu3 }
 0xb86   :  { %v8294_v60 = vld [vmem:[%s13075_s11 + $0x50] sm:$0xf] }
 0xb8e   :  { %v5362_v42 = vpop.f32.mrf.mxu0 }
 0xb8f   :  { %v5363_v49 = vadd.f32 %v5362_v42, %v5350_v12  ;;  %v8295_v42 = vor.u32 %v8919_v51, %v8294_v60  ;;  %v8935_v12 = vld [vmem:[%s13075_s11 + $0xd4] sm:$0xf0]  ;;  %v8262_v60 = vld [vmem:[%s13075_s11 + $0x10] sm:$0xf] }
 0xb90   :  { %v5375_v59 = vpop.f32.mrf.mxu1 }
 0xb91   :  { %v5376_v27 = vadd.f32 %v5375_v59, %v5363_v49  ;;  %v8358_v59 = vld [vmem:[%s13075_s11 + $0xd0] sm:$0xf]  ;;  %v8430_v49 = vld [vmem:[%s13075_s11 + $0x160] sm:$0xf] }
 0xb96   :  { %v5364_v44 = vpop.f32.mrf.mxu0 }
 0xb97   :  { %v8494_v44 = vld [vmem:[%s13075_s11 + $0x1e0] sm:$0xf] }
 0xb98   :  { %v5388_v32 = vpop.f32.mrf.mxu2  ;;  %v5377_v33 = vpop.f32.mrf.mxu1 }
 0xb99   :  { %v5389_v4 = vadd.f32 %v5388_v32, %v5376_v27  ;;  %v8359_v27 = vor.u32 %v8935_v12, %v8358_v59  ;;  %v8953_v32 = vld [vmem:[%s13075_s11 + $0x164] sm:$0xf0]  ;;  %v8927_v59 = vld [vmem:[%s13075_s11 + $0x94] sm:$0xf0] }
 0xb9a   :  { %v8969_v33 = vld [vmem:[%s13075_s11 + $0x1e4] sm:$0xf0] }
 0xb9d   :  { %v5401_v62 = vpop.f32.mrf.mxu3 }
 0xb9e   :  { %v12040_v15 = vadd.f32 %v5401_v62, %v5389_v4  ;;  %v8431_v4 = vor.u32 %v8953_v32, %v8430_v49  ;;  %v8495_v62 = vor.u32 %v8969_v33, %v8494_v44  ;;  %v8398_v44 = vld [vmem:[%s13075_s11 + $0x120] sm:$0xf]  ;;  %v8945_v33 = vld [vmem:[%s13075_s11 + $0x124] sm:$0xf0] }
 0xba0   :  { %5559 = vmatmul.f32.vlgmr.msrb.gmra.mxu3 %v12040_v15  ;;  %v5390_v54 = vpop.f32.mrf.mxu2  ;;  %v5408_v36 = vmul.f32 %v12040_v15, %v12040_v15 }
 0xba1   :  { %5725 = vmatpush.msrb.mxu3 %v5480_v23 }
 0xba3   :  { %5726 = vmatpush.msrb.mxu3 %v5476_v19 }
 0xba5   :  { %v5403_v20 = vpop.f32.mrf.mxu3 }
 0xba8   :  { %5640 = vmatmul.f32.vlgmr.msra.gmra.mxu3 %v5408_v36  ;;  %v8286_v36 = vld [vmem:[%s13075_s11 + $0x40] sm:$0xf] }
 0xba9   :  { %5808 = vmatpush.msra.mxu3 %v5480_v23  ;;  %v12092_v23 = vld [vmem:[%s13077_s16] sm:$0xf]  ;;  %v8287_v11 = vor.u32 %v8917_v52, %v8286_v36  ;;  %v8961_v52 = vld [vmem:[%s13075_s11 + $0x1a4] sm:$0xf0] }
 0xbab   :  { %5809 = vmatpush.msra.mxu3 %v5476_v19  ;;  %v8951_v19 = vld [vmem:[%s13075_s11 + $0x154] sm:$0xf0] }
 0xbaf   :  { %v5500_v55 = vpop.f32.mrf.mxu0 }
 0xbb0   :  { %v5520_v17 = vpop.f32.mrf.mxu1 }
 0xbb1   :  { %v5521_v8 = vadd.f32 %v5520_v17, %v5500_v55  ;;  %v8351_v55 = vor.u32 %v8933_v57, %v8350_v0  ;;  %v8423_v17 = vor.u32 %v8951_v19, %v8422_v37  ;;  %v8254_v57 = vld [vmem:[%s13075_s11] sm:$0xf]  ;;  %v8909_v37 = vld [vmem:[%s13075_s11 + $0x4] sm:$0xf0] }
 0xbb2   :  { %v8318_v19 = vld [vmem:[%s13075_s11 + $0x80] sm:$0xf] }
 0xbcf   :  { %v5581_v38 = vpop.f32.mrf.mxu0 }
 0xbd0   :  { %v5601_v5 = vpop.f32.mrf.mxu1 }
 0xbd1   :  { %v5602_v35 = vadd.f32 %v5601_v5, %v5581_v38  ;;  %v8342_v38 = vld [vmem:[%s13075_s11 + $0xb0] sm:$0xf]  ;;  %v8931_v5 = vld [vmem:[%s13075_s11 + $0xb4] sm:$0xf0] }
 0xbe3   :  { %v5540_v24 = vpop.f32.mrf.mxu2 }
 0xbe4   :  { %v5541_v9 = vadd.f32 %v5540_v24, %v5521_v8  ;;  %v8486_v24 = vld [vmem:[%s13075_s11 + $0x1d0] sm:$0xf]  ;;  %v8967_v8 = vld [vmem:[%s13075_s11 + $0x1d4] sm:$0xf0] }
 0xbeb   :  { %v5621_v14 = vpop.f32.mrf.mxu2 }
 0xbec   :  { %v5622_v16 = vadd.f32 %v5621_v14, %v5602_v35  ;;  %v8343_v14 = vor.u32 %v8931_v5, %v8342_v38  ;;  %v5856_v38 = vperm.slane %v12089_v50, 1  ;;  %v5873_v5 = vperm.slane %v12092_v23, 1 }
 0xc23   :  { %v5560_v7 = vpop.f32.mrf.mxu3 }
 0xc24   :  { %v5561_v34 = vadd.f32 %v5560_v7, %v5541_v9  ;;  %v8278_v9 = vld [vmem:[%s13075_s11 + $0x30] sm:$0xf]  ;;  %v8487_v7 = vor.u32 %v8967_v8, %v8486_v24  ;;  %v8925_v8 = vld [vmem:[%s13075_s11 + $0x84] sm:$0xf0] }
 0xc25   :  { %v8319_v48 = vor.u32 %v8925_v8, %v8318_v19  ;;  %v8970_v8 = vld [vmem:[%s13075_s11 + $0x1f4] sm:$0xf] }
 0xc26   :  { %v5563_v25 = vmul.f32 0.03125, %v5561_v34  ;;  %v8915_v34 = vld [vmem:[%s13075_s11 + $0x34] sm:$0xf0] }
 0xc28   :  { %8244 = vmatmul.msk.f32.vlgmr.msra.gmra.mxu0 %vm2562_vm2, %v5563_v25  ;;  %8245 = vmatmul.msk.f32.vlgmr.msrb.gmra.mxu1 %vm2562_vm2, %v5563_v25  ;;  %v5645_v41 = vmul.f32 %v5563_v25, %v5563_v25 }
 0xc29   :  { %8246 = vmatmul.msk.f32.vlgmr.msrb.gmra.mxu2 %vm2562_vm2, %v5563_v25  ;;  %8247 = vmatmul.msk.f32.vlgmr.msrb.gmra.mxu3 %vm2562_vm2, %v5563_v25  ;;  %v8279_v25 = vor.u32 %v8915_v34, %v8278_v9  ;;  %v8922_v9 = vld [vmem:[%s13075_s11 + $0x74] sm:$0xf] }
 0xc2a   :  { %6290 = vmatpush.bf16.msra.mxu0 %v8311_v3  ;;  %6303 = vmatpush.bf16.msrb.mxu1 %v8375_v2  ;;  %v8965_v3 = vld [vmem:[%s13075_s11 + $0x1c4] sm:$0xf0]  ;;  %v8334_v2 = vld [vmem:[%s13075_s11 + $0xa0] sm:$0xf] }
 0xc2b   :  { %v5641_v18 = vpop.f32.mrf.mxu3  ;;  %6316 = vmatpush.bf16.msrb.mxu2 %v8439_v61  ;;  %6329 = vmatpush.bf16.msrb.mxu3 %v8503_v45  ;;  %v8479_v6 = vor.u32 %v8965_v3, %v8478_v47  ;;  %v8470_v61 = vld [vmem:[%s13075_s11 + $0x1b0] sm:$0xf]  ;;  %v8911_v45 = vld [vmem:[%s13075_s11 + $0x14] sm:$0xf0] }
 0xc2c   :  { %v5642_v26 = vadd.f32 %v5641_v18, %v5622_v16  ;;  %v8471_v51 = vor.u32 %v8963_v63, %v8470_v61  ;;  %v8390_v47 = vld [vmem:[%s13075_s11 + $0x110] sm:$0xf]  ;;  %v8943_v3 = vld [vmem:[%s13075_s11 + $0x114] sm:$0xf0]  ;;  %v5874_v63 = vperm.slane %v12092_v23, 2 }
 0xc2d   :  { %v8391_v1 = vor.u32 %v8943_v3, %v8390_v47  ;;  %v8360_v47 = vld [vmem:[%s13075_s11 + $0xd8] sm:$0xf0] }
 0xc2e   :  { %v5644_v43 = vmul.f32 0.03125, %v5642_v26  ;;  %6291 = vmatpush.bf16.msra.mxu0 %v8303_v13  ;;  %6304 = vmatpush.bf16.msrb.mxu1 %v8367_v40  ;;  %v5855_v26 = vperm.slane %v12089_v50, 0  ;;  %v8929_v13 = vld [vmem:[%s13075_s11 + $0xa4] sm:$0xf0]  ;;  %v8406_v40 = vld [vmem:[%s13075_s11 + $0x130] sm:$0xf] }
 0xc2f   :  { %6317 = vmatpush.bf16.msrb.mxu2 %v8431_v4  ;;  %6330 = vmatpush.bf16.msrb.mxu3 %v8495_v62  ;;  %v8335_v21 = vor.u32 %v8929_v13, %v8334_v2  ;;  %v8407_v31 = vor.u32 %v8947_v29, %v8406_v40  ;;  %v8462_v4 = vld [vmem:[%s13075_s11 + $0x1a0] sm:$0xf]  ;;  %v8454_v2 = vld [vmem:[%s13075_s11 + $0x190] sm:$0xf]  ;;  %v5857_v40 = vperm.slane %v12089_v50, 2 }
 0xc30   :  { %v5646_v39 = vsub.f32 %v5644_v43, %v5645_v41  ;;  %v5872_v43 = vperm.slane %v12092_v23, 0  ;;  %v8463_v24 = vor.u32 %v8961_v52, %v8462_v4  ;;  %v8957_v52 = vld [vmem:[%s13075_s11 + $0x184] sm:$0xf0] }
 0xc32   :  { %v5647_v56 = vmax.f32 %v5646_v39, 0.0  ;;  %6292 = vmatpush.bf16.msra.mxu0 %v8295_v42  ;;  %6305 = vmatpush.bf16.msrb.mxu1 %v8359_v27  ;;  %v8326_v42 = vld [vmem:[%s13075_s11 + $0x90] sm:$0xf]  ;;  %v8263_v27 = vor.u32 %v8911_v45, %v8262_v60  ;;  %v8382_v45 = vld [vmem:[%s13075_s11 + $0x100] sm:$0xf] }
 0xc33   :  { %6318 = vmatpush.bf16.msrb.mxu2 %v8423_v17  ;;  %6331 = vmatpush.bf16.msrb.mxu3 %v8487_v7  ;;  %v8327_v32 = vor.u32 %v8927_v59, %v8326_v42  ;;  %v8312_v7 = vld [vmem:[%s13075_s11 + $0x78] sm:$0xf0] }
 0xc34   :  { %8248 = vmatmul.msk.f32.vlgmr.msrb.gmra.mxu0 %vm2562_vm2, %v5647_v56  ;;  %8249 = vmatmul.msk.f32.vlgmr.msra.gmra.mxu1 %vm2562_vm2, %v5647_v56  ;;  %v8315_v10 = vor.u32 %v8922_v9, %v8312_v7 }
 0xc35   :  { %8250 = vmatmul.msk.f32.vlgmr.msra.gmra.mxu2 %vm2562_vm2, %v5647_v56  ;;  %8251 = vmatmul.msk.f32.vlgmr.msra.gmra.mxu3 %vm2562_vm2, %v5647_v56 }
 0xc36   :  { %6293 = vmatpush.bf16.msra.mxu0 %v8287_v11  ;;  %6306 = vmatpush.bf16.msrb.mxu1 %v8351_v55  ;;  %v8399_v11 = vor.u32 %v8945_v33, %v8398_v44 }
 0xc37   :  { %6319 = vmatpush.bf16.msrb.mxu2 %v8415_v58  ;;  %6332 = vmatpush.bf16.msrb.mxu3 %v8479_v6  ;;  %v8959_v6 = vld [vmem:[%s13075_s11 + $0x194] sm:$0xf0] }
 0xc38   :  { %v8455_v29 = vor.u32 %v8959_v6, %v8454_v2  ;;  %v8432_v2 = vld [vmem:[%s13075_s11 + $0x168] sm:$0xf0] }
 0xc3a   :  { %6294 = vmatpush.bf16.msra.mxu0 %v8279_v25  ;;  %6307 = vmatpush.bf16.msrb.mxu1 %v8343_v14  ;;  %v8938_v25 = vld [vmem:[%s13075_s11 + $0xf4] sm:$0xf]  ;;  %v8376_v14 = vld [vmem:[%s13075_s11 + $0xf8] sm:$0xf0] }
 0xc3b   :  { %6320 = vmatpush.bf16.msrb.mxu2 %v8407_v31  ;;  %6333 = vmatpush.bf16.msrb.mxu3 %v8471_v51  ;;  %v8379_v30 = vor.u32 %v8938_v25, %v8376_v14  ;;  %v8936_v31 = vld [vmem:[%s13075_s11 + $0xe4] sm:$0xf]  ;;  %v8368_v51 = vld [vmem:[%s13075_s11 + $0xe8] sm:$0xf0]  ;;  %v8504_v25 = vld [vmem:[%s13075_s11 + $0x1f8] sm:$0xf0] }
 0xc3c   :  { %v8918_v14 = vld [vmem:[%s13075_s11 + $0x54] sm:$0xf] }
 0xc3e   :  { %6295 = vmatpush.bf16.msra.mxu0 %v8271_v46  ;;  %6308 = vmatpush.bf16.msrb.mxu1 %v8335_v21  ;;  %v8920_v46 = vld [vmem:[%s13075_s11 + $0x64] sm:$0xf]  ;;  %v8304_v21 = vld [vmem:[%s13075_s11 + $0x68] sm:$0xf0] }
 0xc3f   :  { %6321 = vmatpush.bf16.msrb.mxu2 %v8399_v11  ;;  %6334 = vmatpush.bf16.msrb.mxu3 %v8463_v24  ;;  %v8307_v60 = vor.u32 %v8920_v46, %v8304_v21  ;;  %v8954_v11 = vld [vmem:[%s13075_s11 + $0x174] sm:$0xf]  ;;  %v8440_v24 = vld [vmem:[%s13075_s11 + $0x178] sm:$0xf0]  ;;  %v8496_v21 = vld [vmem:[%s13075_s11 + $0x1e8] sm:$0xf0] }
 0xc42   :  { %6296 = vmatpush.bf16.msra.mxu0 %v8263_v27  ;;  %6309 = vmatpush.bf16.msrb.mxu1 %v8327_v32  ;;  %v8446_v27 = vld [vmem:[%s13075_s11 + $0x180] sm:$0xf] }
 0xc43   :  { %6322 = vmatpush.bf16.msrb.mxu2 %v8391_v1  ;;  %6335 = vmatpush.bf16.msrb.mxu3 %v8455_v29  ;;  %v8952_v1 = vld [vmem:[%s13075_s11 + $0x164] sm:$0xf] }
 0xc44   :  { %v8435_v29 = vor.u32 %v8952_v1, %v8432_v2  ;;  %v8928_v1 = vld [vmem:[%s13075_s11 + $0xa4] sm:$0xf]  ;;  %v8336_v2 = vld [vmem:[%s13075_s11 + $0xa8] sm:$0xf0] }
 0xc46   :  { %6310 = vmatpush.bf16.msrb.mxu1 %v8319_v48  ;;  %v8296_v48 = vld [vmem:[%s13075_s11 + $0x58] sm:$0xf0] }
 0xc4a   :  { %6355 = vmatpush.bf16.msra.mxu1 %v8379_v30 }
 0xca5   :  { %v12081_v54 = vpop.f32.mrf.mxu0  ;;  %v12083_v20 = vpop.f32.mrf.mxu1 }
 0xcac   :  { %v12103_v35 = vpop.f32.mrf.mxu2  ;;  %v12105_v16 = vpop.f32.mrf.mxu3 }
 0xcb1   :  { %v5751_v18 = vpop.f32.mrf.mxu0  ;;  %v5771_v41 = vpop.f32.mrf.mxu1 }
 0xcb2   :  { %v12109_v39 = vadd.f32 1e-05, %v5751_v18  ;;  %v12111_v56 = vadd.f32 1e-05, %v5771_v41  ;;  %v8255_v41 = vor.u32 %v8909_v37, %v8254_v57 }
 0xcb4   :  { %9075 = vrsqrt.f32 %v12109_v39  ;;  %6297 = vmatpush.bf16.msra.mxu0 %v8255_v41  ;;  %vm5820_vm13 = vweird.f32 %v12109_v39  ;;  %vm5830_vm4 = vweird.f32 %v12111_v56  ;;  %v8507_v41 = vor.u32 %v8970_v8, %v8504_v25 }
 0xcb5   :  { %9077 = vrsqrt.f32 %v12111_v56 }
 0xcb8   :  { %v5791_v12 = vpop.f32.mrf.mxu2  ;;  %v5811_v49 = vpop.f32.mrf.mxu3  ;;  %6342 = vmatpush.bf16.msrb.mxu0 %v8315_v10  ;;  %v8934_v10 = vld [vmem:[%s13075_s11 + $0xd4] sm:$0xf] }
 0xcb9   :  { %v12134_v62 = vadd.f32 1e-05, %v5791_v12  ;;  %v12136_v36 = vadd.f32 1e-05, %v5811_v49  ;;  %v8371_v12 = vor.u32 %v8936_v31, %v8368_v51  ;;  %v8941_v49 = vld [vmem:[%s13075_s11 + $0x104] sm:$0xf0] }
 0xcba   :  { %v12139_v0 = vpop.eup %9075  ;;  %v8383_v4 = vor.u32 %v8941_v49, %v8382_v45  ;;  %v8352_v49 = vld [vmem:[%s13075_s11 + $0xc8] sm:$0xf0] }
 0xcbb   :  { %v12144_v55 = vpop.eup %9077  ;;  %v5815_v17 = vmul.f32 %v12139_v0, %v12109_v39  ;;  %9079 = vrsqrt.f32 %v12134_v62  ;;  %vm5821_vm3 = vweird.f32 %v12139_v0  ;;  %vm5840_vm7 = vweird.f32 %v12134_v62  ;;  %6356 = vmatpush.bf16.msra.mxu1 %v8371_v12  ;;  %v8932_v12 = vld [vmem:[%s13075_s11 + $0xc4] sm:$0xf]  ;;  %v8344_v39 = vld [vmem:[%s13075_s11 + $0xb8] sm:$0xf0] }
 0xcbc   :  { %v5825_v34 = vmul.f32 %v12144_v55, %v12111_v56  ;;  %9081 = vrsqrt.f32 %v12136_v36  ;;  %vm5831_vm14 = vweird.f32 %v12144_v55  ;;  %vm12191_vm6 = vmor %vm5820_vm13, %vm5821_vm3  ;;  %6343 = vmatpush.bf16.msrb.mxu0 %v8307_v60  ;;  %6323 = vmatpush.bf16.msrb.mxu2 %v8383_v4  ;;  %vm5850_vm1 = vweird.f32 %v12136_v36  ;;  %v8916_v60 = vld [vmem:[%s13075_s11 + $0x44] sm:$0xf]  ;;  %v8950_v4 = vld [vmem:[%s13075_s11 + $0x154] sm:$0xf] }
 0xcbd   :  { %v5816_v18 = vmul.f32 %v12139_v0, %v5815_v17  ;;  %v8447_v17 = vor.u32 %v8957_v52, %v8446_v27  ;;  %vm12205_vm5 = vmor %vm5830_vm4, %vm5831_vm14  ;;  %v8424_v52 = vld [vmem:[%s13075_s11 + $0x158] sm:$0xf0]  ;;  %vm6814_vm14 = vcmask 9216  }
 0xcbe   :  { %v5826_v58 = vmul.f32 %v12144_v55, %v5825_v34  ;;  %v8443_v34 = vor.u32 %v8954_v11, %v8440_v24  ;;  %v8966_v11 = vld [vmem:[%s13075_s11 + $0x1d4] sm:$0xf]  ;;  %v8280_v24 = vld [vmem:[%s13075_s11 + $0x38] sm:$0xf0] }
 0xcbf   :  { %v5817_v13 = vmul.f32 0.5, %v5816_v18  ;;  %6336 = vmatpush.bf16.msrb.mxu3 %v8447_v17  ;;  %v8488_v17 = vld [vmem:[%s13075_s11 + $0x1d8] sm:$0xf0] }
 0xcc0   :  { %v5827_v61 = vmul.f32 0.5, %v5826_v58  ;;  %6368 = vmatpush.bf16.msra.mxu2 %v8443_v34 }
 0xcc1   :  { %v12173_v42 = vpop.eup %9079  ;;  %v5818_v59 = vsub.f32 1.5, %v5817_v13  ;;  %v8363_v13 = vor.u32 %v8934_v10, %v8360_v47  ;;  %v5875_v10 = vperm.slane %v12092_v23, 3  ;;  %v8328_v23 = vld [vmem:[%s13075_s11 + $0x98] sm:$0xf0] }
 0xcc2   :  { %v12179_v32 = vpop.eup %9081  ;;  %v5828_v44 = vsub.f32 1.5, %v5827_v61  ;;  %v5835_v33 = vmul.f32 %v12173_v42, %v12134_v62  ;;  %vm5841_vm8 = vweird.f32 %v12173_v42  ;;  %v8910_v61 = vld [vmem:[%s13075_s11 + $0x14] sm:$0xf]  ;;  %v8944_v62 = vld [vmem:[%s13075_s11 + $0x124] sm:$0xf] }
 0xcc3   :  { %v5819_v57 = vmul.f32 %v12139_v0, %v5818_v59  ;;  %v5845_v19 = vmul.f32 %v12179_v32, %v12136_v36  ;;  %vm5851_vm15 = vweird.f32 %v12179_v32  ;;  %vm12237_vm0 = vmor %vm5840_vm7, %vm5841_vm8  ;;  %6381 = vmatpush.bf16.msra.mxu3 %v8507_v41  ;;  %v5858_v59 = vperm.slane %v12089_v50, 3  ;;  %6357 = vmatpush.bf16.msra.mxu1 %v8363_v13  ;;  %v8480_v41 = vld [vmem:[%s13075_s11 + $0x1c8] sm:$0xf0]  ;;  %v8912_v50 = vld [vmem:[%s13075_s11 + $0x24] sm:$0xf] }
 0xcc4   :  { %v5829_v9 = vmul.f32 %v12144_v55, %v5828_v44  ;;  %v5836_v7 = vmul.f32 %v12173_v42, %v5835_v33  ;;  %vm12247_vm9 = vmor %vm5850_vm1, %vm5851_vm15  ;;  %v8355_v33 = vor.u32 %v8932_v12, %v8352_v49  ;;  %6369 = vmatpush.bf16.msra.mxu2 %v8435_v29  ;;  %v8408_v29 = vld [vmem:[%s13075_s11 + $0x138] sm:$0xf0]  ;;  %v8400_v12 = vld [vmem:[%s13075_s11 + $0x128] sm:$0xf0] }
 0xcc5   :  { %v5823_v18 = vsel %vm12191_vm6, %v12139_v0, %v5819_v57  ;;  %v5846_v56 = vmul.f32 %v12179_v32, %v5845_v19  ;;  %v8299_v0 = vor.u32 %v8918_v14, %v8296_v48  ;;  %v8960_v49 = vld [vmem:[%s13075_s11 + $0x1a4] sm:$0xf] }
 0xcc6   :  { %v5863_v3 = vmul.f32 %v5855_v26, %v5823_v18  ;;  %v5833_v58 = vsel %vm12205_vm5, %v12144_v55, %v5829_v9  ;;  %v5837_v30 = vmul.f32 0.5, %v5836_v7  ;;  %v8968_v26 = vld [vmem:[%s13075_s11 + $0x1e4] sm:$0xf]  ;;  %v8491_v9 = vor.u32 %v8966_v11, %v8488_v17  ;;  %v8416_v18 = vld [vmem:[%s13075_s11 + $0x148] sm:$0xf0] }
 0xcc7   :  { %v5864_v6 = vmul.f32 %v5856_v38, %v5833_v58  ;;  %v5847_v46 = vmul.f32 0.5, %v5846_v56  ;;  %6344 = vmatpush.bf16.msrb.mxu0 %v8299_v0  ;;  %v8499_v38 = vor.u32 %v8968_v26, %v8496_v21  ;;  %v8948_v7 = vld [vmem:[%s13075_s11 + $0x144] sm:$0xf]  ;;  %6358 = vmatpush.bf16.msra.mxu1 %v8355_v33 }
 0xcc8   :  { %v5867_v55 = vmul.f32 %v5863_v3, %v12081_v54  ;;  %v5838_v31 = vsub.f32 1.5, %v5837_v30  ;;  %v8288_v54 = vld [vmem:[%s13075_s11 + $0x48] sm:$0xf0]  ;;  %v8964_v56 = vld [vmem:[%s13075_s11 + $0x1c4] sm:$0xf]  ;;  %v8419_v0 = vor.u32 %v8948_v7, %v8416_v18 }
 0xcc9   :  { %v5868_v51 = vmul.f32 %v5864_v6, %v12083_v20  ;;  %v5848_v45 = vsub.f32 1.5, %v5847_v46  ;;  %v8291_v36 = vor.u32 %v8916_v60, %v8288_v54  ;;  %v5884_v20 = vmul.f32 %v5863_v3, %v11935_v22  ;;  %v8914_v22 = vld [vmem:[%s13075_s11 + $0x34] sm:$0xf]  ;;  %6382 = vmatpush.bf16.msra.mxu3 %v8499_v38  ;;  %v8264_v38 = vld [vmem:[%s13075_s11 + $0x18] sm:$0xf0] }
 0xcca   :  { %v5880_v27 = vsub.f32 %v5872_v43, %v5867_v55  ;;  %v5839_v44 = vmul.f32 %v12173_v42, %v5838_v31  ;;  %v5885_v37 = vmul.f32 %v5864_v6, %v11939_v53  ;;  %v8427_v43 = vor.u32 %v8950_v4, %v8424_v52  ;;  %v8930_v53 = vld [vmem:[%s13075_s11 + $0xb4] sm:$0xf]  ;;  %v8908_v33 = vld [vmem:[%s13075_s11 + $0x4] sm:$0xf]  ;;  %v8256_v4 = vld [vmem:[%s13075_s11 + $0x8] sm:$0xf0] }
 0xccb   :  { %v5881_v57 = vsub.f32 %v5873_v5, %v5868_v51  ;;  %v5849_v19 = vmul.f32 %v12179_v32, %v5848_v45  ;;  %6345 = vmatpush.bf16.msrb.mxu0 %v8291_v36  ;;  %v8347_v3 = vor.u32 %v8930_v53, %v8344_v39  ;;  %v8483_v13 = vor.u32 %v8964_v56, %v8480_v41  ;;  %v8926_v51 = vld [vmem:[%s13075_s11 + $0x94] sm:$0xf]  ;;  %v8924_v11 = vld [vmem:[%s13075_s11 + $0x84] sm:$0xf]  ;;  %v8456_v53 = vld [vmem:[%s13075_s11 + $0x198] sm:$0xf0] }
 0xccc   :  { %v5843_v8 = vsel %vm12237_vm0, %v12173_v42, %v5839_v44  ;;  %v5888_v5 = vadd.f32 %v5884_v20, %v5880_v27  ;;  %v8283_v42 = vor.u32 %v8914_v22, %v8280_v24  ;;  %6370 = vmatpush.bf16.msra.mxu2 %v8427_v43  ;;  %v8339_v31 = vor.u32 %v8928_v1, %v8336_v2  ;;  %v8464_v27 = vld [vmem:[%s13075_s11 + $0x1a8] sm:$0xf0]  ;;  %v8942_v24 = vld [vmem:[%s13075_s11 + $0x114] sm:$0xf]  ;;  %v6411_v39 = vld [vmem:[%s13086_s18 + $0x78] sm:$0xff] }
 0xccd   :  { %v5865_v34 = vmul.f32 %v5857_v40, %v5843_v8  ;;  %v5853_v25 = vsel %vm12247_vm9, %v12179_v32, %v5849_v19  ;;  %v5889_v14 = vadd.f32 %v5885_v37, %v5881_v57  ;;  %v8272_v40 = vld [vmem:[%s13075_s11 + $0x28] sm:$0xf0]  ;;  %6383 = vmatpush.bf16.msra.mxu3 %v8491_v9  ;;  %6359 = vmatpush.bf16.msra.mxu1 %v8347_v3  ;;  %v8392_v8 = vld [vmem:[%s13075_s11 + $0x118] sm:$0xf0]  ;;  %v8956_v18 = vld [vmem:[%s13075_s11 + $0x184] sm:$0xf] }
 0xcce   :  { %v5866_v48 = vmul.f32 %v5858_v59, %v5853_v25  ;;  %v5892_v47 = vmax.f32 %v5888_v5, 0.0  ;;  %v8275_v55 = vor.u32 %v8912_v50, %v8272_v40  ;;  %v8331_v44 = vor.u32 %v8926_v51, %v8328_v23  ;;  %v8320_v57 = vld [vmem:[%s13075_s11 + $0x88] sm:$0xf0]  ;;  %v8958_v5 = vld [vmem:[%s13075_s11 + $0x194] sm:$0xf]  ;;  %v6407_v3 = vld [vmem:[%s13086_s18 + $0x58] sm:$0xff] }
 0xccf   :  { %v5869_v32 = vmul.f32 %v5865_v34, %v12103_v35  ;;  %v5886_v58 = vmul.f32 %v5865_v34, %v12028_v28  ;;  %v5893_v30 = vmax.f32 %v5889_v14, 0.0  ;;  %6346 = vmatpush.bf16.msrb.mxu0 %v8283_v42  ;;  %v8946_v35 = vld [vmem:[%s13075_s11 + $0x134] sm:$0xf]  ;;  %v8403_v19 = vor.u32 %v8944_v62, %v8400_v12  ;;  %v8940_v25 = vld [vmem:[%s13075_s11 + $0x104] sm:$0xf]  ;;  %v6409_v41 = vld [vmem:[%s13086_s18 + $0x68] sm:$0xff] }
 0xcd0   :  { %v5870_v6 = vmul.f32 %v5866_v48, %v12105_v16  ;;  %v12290_v46 = vpack.c.bf16 %v5892_v47, %v5892_v47  ;;  %v8962_v28 = vld [vmem:[%s13075_s11 + $0x1b4] sm:$0xf]  ;;  %v8472_v16 = vld [vmem:[%s13075_s11 + $0x1b8] sm:$0xf0]  ;;  %v5887_v54 = vmul.f32 %v5866_v48, %v12040_v15  ;;  %6371 = vmatpush.bf16.msra.mxu2 %v8419_v0  ;;  %v8411_v45 = vor.u32 %v8946_v35, %v8408_v29  ;;  %v8384_v14 = vld [vmem:[%s13075_s11 + $0x108] sm:$0xf0] }
 0xcd1   :  { %v5882_v26 = vsub.f32 %v5874_v63, %v5869_v32  ;;  %v12297_v21 = vpack.c.bf16 %v5893_v30, %v5893_v30  ;;  %6384 = vmatpush.bf16.msra.mxu3 %v8483_v13  ;;  %v8475_v36 = vor.u32 %v8962_v28, %v8472_v16  ;;  %v8267_v15 = vor.u32 %v8910_v61, %v8264_v38  ;;  %v6410_v42 = vld [vmem:[%s13086_s18 + $0x70] sm:$0xff]  ;;  %v8448_v56 = vld [vmem:[%s13075_s11 + $0x188] sm:$0xf0]  ;;  %v6408_v47 = vld [vmem:[%s13086_s18 + $0x60] sm:$0xff] }
 0xcd2   :  { %v5883_v60 = vsub.f32 %v5875_v10, %v5870_v6  ;;  %6298 = vmatmul.bf16.vlgmr.msra.gmra.mxu0 %v12290_v46  ;;  %6360 = vmatpush.bf16.msra.mxu1 %v8339_v31  ;;  %v8467_v17 = vor.u32 %v8960_v49, %v8464_v27  ;;  %v8259_v22 = vor.u32 %v8908_v33, %v8256_v4  ;;  %v6406_v50 = vld [vmem:[%s13086_s18 + $0x50] sm:$0xff]  ;;  %v6405_v40 = vld [vmem:[%s13086_s18 + $0x48] sm:$0xff]  ;;  %v6404_v32 = vld [vmem:[%s13086_s18 + $0x40] sm:$0xff] }
 0xcd3   :  { %6311 = vmatmul.bf16.vlgmr.msrb.gmra.mxu1 %v12297_v21  ;;  %v5890_v63 = vadd.f32 %v5886_v58, %v5882_v26  ;;  %6347 = vmatpush.bf16.msrb.mxu0 %v8275_v55  ;;  %v8323_v9 = vor.u32 %v8924_v11, %v8320_v57  ;;  %v8395_v7 = vor.u32 %v8942_v24, %v8392_v8  ;;  %v6403_v58 = vld [vmem:[%s13086_s18 + $0x38] sm:$0xff]  ;;  %v6426_v0 = vld [vmem:[%s13086_s18 + $0xf0] sm:$0xff]  ;;  %v6425_v2 = vld [vmem:[%s13086_s18 + $0xe8] sm:$0xff] }
 0xcd4   :  { %v5891_v59 = vadd.f32 %v5887_v54, %v5883_v60  ;;  %6372 = vmatpush.bf16.msra.mxu2 %v8411_v45  ;;  %v8459_v34 = vor.u32 %v8958_v5, %v8456_v53  ;;  %v8387_v48 = vor.u32 %v8940_v25, %v8384_v14  ;;  %v8451_v10 = vor.u32 %v8956_v18, %v8448_v56  ;;  %v6427_v30 = vld [vmem:[%s13086_s18 + $0xf8] sm:$0xff]  ;;  %v6402_v1 = vld [vmem:[%s13086_s18 + $0x30] sm:$0xff]  ;;  %v6401_v6 = vld [vmem:[%s13086_s18 + $0x28] sm:$0xff] }
 0xcd5   :  { %v5894_v20 = vmax.f32 %v5890_v63, 0.0  ;;  %6385 = vmatpush.bf16.msra.mxu3 %v8475_v36  ;;  %v6424_v13 = vld [vmem:[%s13086_s18 + $0xe0] sm:$0xff]  ;;  %v6423_v35 = vld [vmem:[%s13086_s18 + $0xd8] sm:$0xff]  ;;  %v6398_v28 = vld [vmem:[%s13086_s18 + $0x10] sm:$0xff] }
 0xcd6   :  { %v5895_v52 = vmax.f32 %v5891_v59, 0.0  ;;  %6361 = vmatpush.bf16.msra.mxu1 %v8331_v44  ;;  %v6399_v29 = vld [vmem:[%s13086_s18 + $0x18] sm:$0xff]  ;;  %v6422_v26 = vld [vmem:[%s13086_s18 + $0xd0] sm:$0xff]  ;;  %v6421_v55 = vld [vmem:[%s13086_s18 + $0xc8] sm:$0xff] }
 0xcd7   :  { %v5962_v37 = vpack.c.bf16 %v5894_v20, %v5894_v20  ;;  %6348 = vmatpush.bf16.msrb.mxu0 %v8267_v15  ;;  %v6396_v31 = vld [vmem:[%s13086_s18] sm:$0xff]  ;;  %v6419_v61 = vld [vmem:[%s13086_s18 + $0xb8] sm:$0xff]  ;;  %v6418_v38 = vld [vmem:[%s13086_s18 + $0xb0] sm:$0xff] }
 0xcd8   :  { %v5963_v43 = vpack.c.bf16 %v5895_v52, %v5895_v52  ;;  %6373 = vmatpush.bf16.msra.mxu2 %v8403_v19  ;;  %v6420_v16 = vld [vmem:[%s13086_s18 + $0xc0] sm:$0xff]  ;;  %v6417_v60 = vld [vmem:[%s13086_s18 + $0xa8] sm:$0xff]  ;;  %v6415_v51 = vld [vmem:[%s13086_s18 + $0x98] sm:$0xff] }
 0xcd9   :  { %6324 = vmatmul.bf16.vlgmr.msrb.gmra.mxu2 %v5962_v37  ;;  %6386 = vmatpush.bf16.msra.mxu3 %v8467_v17  ;;  %v6416_v54 = vld [vmem:[%s13086_s18 + $0xa0] sm:$0xff]  ;;  %v6414_v62 = vld [vmem:[%s13086_s18 + $0x90] sm:$0xff]  ;;  %v6413_v59 = vld [vmem:[%s13086_s18 + $0x88] sm:$0xff] }
 0xcda   :  { %6337 = vmatmul.bf16.vlgmr.msrb.gmra.mxu3 %v5963_v43  ;;  %6362 = vmatpush.bf16.msra.mxu1 %v8323_v9  ;;  %v5964_v63 = vld [vmem:[%s13087_s0] sm:$0x3]  ;;  %v6431_v18 = vld [vmem:[%s9410_s12 + $0x18] sm:$0xff] }
 0xcdb   :  { %6349 = vmatpush.bf16.msrb.mxu0 %v8259_v22  ;;  %v5966_v36 = vperm.slane %v5964_v63, 0  ;;  %v6412_v15 = vld [vmem:[%s13086_s18 + $0x80] sm:$0xff]  ;;  %v5967_v19 = vperm.slane %v5964_v63, 1 }
 0xcdc   :  { %6374 = vmatpush.bf16.msra.mxu2 %v8395_v7  ;;  %v6428_v56 = vld [vmem:[%s9410_s12] sm:$0xff] }
 0xcdd   :  { %6387 = vmatpush.bf16.msra.mxu3 %v8459_v34 }
 0xcde   :  { %6454 = vmatpush.msrb.mxu1 %v6427_v30 }
 0xcdf   :  { %6434 = vmatpush.msra.mxu0 %v6411_v39 }
 0xce0   :  { %6375 = vmatpush.bf16.msra.mxu2 %v8387_v48  ;;  %6455 = vmatpush.msrb.mxu1 %v6426_v0 }
 0xce1   :  { %6435 = vmatpush.msra.mxu0 %v6410_v42  ;;  %6388 = vmatpush.bf16.msra.mxu3 %v8451_v10 }
 0xce2   :  { %6350 = vmatmul.bf16.vlgmr.msrb.gmra.mxu0 %v12290_v46  ;;  %6456 = vmatpush.msrb.mxu1 %v6425_v2  ;;  %v6400_v46 = vld [vmem:[%s13086_s18 + $0x20] sm:$0xff] }
 0xce3   :  { %6436 = vmatpush.msra.mxu0 %v6409_v41  ;;  %6363 = vmatmul.bf16.vlgmr.msra.gmra.mxu1 %v12297_v21  ;;  %v6397_v21 = vld [vmem:[%s13086_s18 + $0x8] sm:$0xff] }
 0xce4   :  { %6475 = vmatpush.msrb.mxu2 %v6411_v39  ;;  %6457 = vmatpush.msrb.mxu1 %v6424_v13 }
 0xce5   :  { %6437 = vmatpush.msra.mxu0 %v6408_v47  ;;  %6495 = vmatpush.msrb.mxu3 %v6427_v30 }
 0xce6   :  { %6476 = vmatpush.msrb.mxu2 %v6410_v42  ;;  %6458 = vmatpush.msrb.mxu1 %v6423_v35  ;;  %v6430_v42 = vld [vmem:[%s9410_s12 + $0x10] sm:$0xff] }
 0xce7   :  { %6438 = vmatpush.msra.mxu0 %v6407_v3  ;;  %6496 = vmatpush.msrb.mxu3 %v6426_v0 }
 0xce8   :  { %6477 = vmatpush.msrb.mxu2 %v6409_v41  ;;  %6459 = vmatpush.msrb.mxu1 %v6422_v26  ;;  %v6429_v41 = vld [vmem:[%s9410_s12 + $0x8] sm:$0xff]  ;;  %s13088_s12 = sld [smem:[#allocation33_spill]] }
 0xce9   :  { %6376 = vmatmul.bf16.vlgmr.msra.gmra.mxu2 %v5962_v37  ;;  %6439 = vmatpush.msra.mxu0 %v6406_v50 }
 0xcea   :  { %6389 = vmatmul.bf16.vlgmr.msra.gmra.mxu3 %v5963_v43  ;;  %6478 = vmatpush.msrb.mxu2 %v6408_v47 }
 0xceb   :  { %6440 = vmatpush.msra.mxu0 %v6405_v40  ;;  %6497 = vmatpush.msrb.mxu3 %v6425_v2  ;;  %v8979_v2 = vld [vmem:[%s9415_s19 + $0x38] sm:$0xff] }
 0xcec   :  { %6479 = vmatpush.msrb.mxu2 %v6407_v3  ;;  %6460 = vmatpush.msrb.mxu1 %v6421_v55 }
 0xced   :  { %6441 = vmatpush.msra.mxu0 %v6404_v32  ;;  %6498 = vmatpush.msrb.mxu3 %v6424_v13  ;;  %v8986_v13 = vld [vmem:[%s9415_s19 + $0x70] sm:$0xff] }
 0xcee   :  { %6480 = vmatpush.msrb.mxu2 %v6406_v50  ;;  %6461 = vmatpush.msrb.mxu1 %v6420_v16 }
 0xcef   :  { %6442 = vmatpush.msra.mxu0 %v6403_v58  ;;  %6499 = vmatpush.msrb.mxu3 %v6423_v35 }
 0xcf0   :  { %6481 = vmatpush.msrb.mxu2 %v6405_v40  ;;  %6462 = vmatpush.msrb.mxu1 %v6419_v61 }
 0xcf1   :  { %6443 = vmatpush.msra.mxu0 %v6402_v1  ;;  %6500 = vmatpush.msrb.mxu3 %v6422_v26 }
 0xcf2   :  { %6482 = vmatpush.msrb.mxu2 %v6404_v32  ;;  %6463 = vmatpush.msrb.mxu1 %v6418_v38 }
 0xcf3   :  { %6444 = vmatpush.msra.mxu0 %v6401_v6  ;;  %6501 = vmatpush.msrb.mxu3 %v6421_v55  ;;  %v8985_v55 = vld [vmem:[%s9415_s19 + $0x68] sm:$0xff] }
 0xcf4   :  { %6483 = vmatpush.msrb.mxu2 %v6403_v58  ;;  %6464 = vmatpush.msrb.mxu1 %v6417_v60 }
 0xcf5   :  { %6445 = vmatpush.msra.mxu0 %v6400_v46  ;;  %6502 = vmatpush.msrb.mxu3 %v6420_v16  ;;  %v8984_v16 = vld [vmem:[%s9415_s19 + $0x60] sm:$0xff] }
 0xcf6   :  { %6484 = vmatpush.msrb.mxu2 %v6402_v1  ;;  %6465 = vmatpush.msrb.mxu1 %v6416_v54 }
 0xcf7   :  { %6446 = vmatpush.msra.mxu0 %v6399_v29  ;;  %6503 = vmatpush.msrb.mxu3 %v6419_v61 }
 0xcf8   :  { %6485 = vmatpush.msrb.mxu2 %v6401_v6  ;;  %6466 = vmatpush.msrb.mxu1 %v6415_v51  ;;  %v8987_v6 = vld [vmem:[%s9415_s19 + $0x78] sm:$0xff] }
 0xcf9   :  { %6447 = vmatpush.msra.mxu0 %v6398_v28  ;;  %6504 = vmatpush.msrb.mxu3 %v6418_v38 }
 0xcfa   :  { %6486 = vmatpush.msrb.mxu2 %v6400_v46  ;;  %6467 = vmatpush.msrb.mxu1 %v6414_v62  ;;  %v8978_v46 = vld [vmem:[%s9415_s19 + $0x30] sm:$0xff] }
 0xcfb   :  { %6448 = vmatpush.msra.mxu0 %v6397_v21  ;;  %6505 = vmatpush.msrb.mxu3 %v6417_v60 }
 0xcfc   :  { %6487 = vmatpush.msrb.mxu2 %v6399_v29  ;;  %6468 = vmatpush.msrb.mxu1 %v6413_v59 }
 0xcfd   :  { %6449 = vmatpush.msra.mxu0 %v6396_v31  ;;  %6506 = vmatpush.msrb.mxu3 %v6416_v54  ;;  %v8975_v54 = vld [vmem:[%s9415_s19 + $0x18] sm:$0xff] }
 0xcfe   :  { %6488 = vmatpush.msrb.mxu2 %v6398_v28  ;;  %6469 = vmatpush.msrb.mxu1 %v6412_v15 }
 0xcff   :  { %6507 = vmatpush.msrb.mxu3 %v6415_v51  ;;  %6536 = vmatpush.msrb.mxu0 %v6430_v42  ;;  %v8983_v51 = vld [vmem:[%s9415_s19 + $0x58] sm:$0xff] }
 0xd00   :  { %6489 = vmatpush.msrb.mxu2 %v6397_v21  ;;  %6556 = vmatpush.msra.mxu1 %v6431_v18  ;;  %v8977_v21 = vld [vmem:[%s9415_s19 + $0x28] sm:$0xff] }
 0xd01   :  { %6508 = vmatpush.msrb.mxu3 %v6414_v62  ;;  %6537 = vmatpush.msrb.mxu0 %v6428_v56  ;;  %v6432_v62 = vld [vmem:[%s13088_s12] sm:$0x3] }
 0xd02   :  { %6490 = vmatpush.msrb.mxu2 %v6396_v31  ;;  %6557 = vmatpush.msra.mxu1 %v6429_v41  ;;  %v8976_v31 = vld [vmem:[%s9415_s19 + $0x20] sm:$0xff] }
 0xd03   :  { %6509 = vmatpush.msrb.mxu3 %v6413_v59 }
 0xd04   :  { %6579 = vmatpush.msra.mxu2 %v6430_v42 }
 0xd05   :  { %6510 = vmatpush.msrb.mxu3 %v6412_v15  ;;  %v8982_v15 = vld [vmem:[%s9415_s19 + $0x50] sm:$0xff] }
 0xd06   :  { %6580 = vmatpush.msra.mxu2 %v6428_v56 }
 0xd07   :  { %6599 = vmatpush.msra.mxu3 %v6431_v18 }
 0xd09   :  { %6600 = vmatpush.msra.mxu3 %v6429_v41 }
 0xd4f   :  { %v6299_v23 = vpop.f32.mrf.mxu0 }
 0xd50   :  { %v6312_v45 = vpop.f32.mrf.mxu1  ;;  %v6300_v12 = vadd.f32 %v6299_v23, %v5966_v36  ;;  %v8974_v36 = vld [vmem:[%s9415_s19 + $0x10] sm:$0xff] }
 0xd52   :  { %v6313_v20 = vadd.f32 %v6312_v45, %v6300_v12 }
 0xd57   :  { %v6301_v49 = vpop.f32.mrf.mxu0 }
 0xd58   :  { %v6314_v27 = vpop.f32.mrf.mxu1 }
 0xd59   :  { %v6626_v27 = vperm.slane %v6432_v62, 0 }
 0xd5c   :  { %v6325_v44 = vpop.f32.mrf.mxu2 }
 0xd5d   :  { %v6326_v33 = vadd.f32 %v6325_v44, %v6313_v20  ;;  %v6338_v4 = vpop.f32.mrf.mxu3  ;;  %v6433_v44 = vld [vmem:[%s13089_s22] sm:$0x3] }
 0xd5f   :  { %v12358_v52 = vadd.f32 %v6338_v4, %v6326_v33  ;;  %v6351_v11 = vpop.f32.mrf.mxu0  ;;  %v6627_v4 = vperm.slane %v6432_v62, 1 }
 0xd60   :  { %v6364_v57 = vpop.f32.mrf.mxu1  ;;  %v6352_v22 = vadd.f32 %v6351_v11, %v5967_v19  ;;  %v8973_v11 = vld [vmem:[%s9415_s19 + $0x8] sm:$0xff] }
 0xd61   :  { %v6394_v37 = vmul.f32 %v12358_v52, %v12358_v52  ;;  %6450 = vmatmul.f32.vlgmr.msra.gmra.mxu0 %v12358_v52 }
 0xd62   :  { %v6365_v9 = vadd.f32 %v6364_v57, %v6352_v22  ;;  %6781 = vmatpush.bf16.msra.mxu0 %v8979_v2  ;;  %v8981_v57 = vld [vmem:[%s9415_s19 + $0x48] sm:$0xff] }
 0xd63   :  { %6491 = vmatmul.f32.vlgmr.msrb.gmra.mxu2 %v6394_v37 }
 0xd64   :  { %v6327_v43 = vpop.f32.mrf.mxu2 }
 0xd65   :  { %v6340_v17 = vpop.f32.mrf.mxu3 }
 0xd66   :  { %6782 = vmatpush.bf16.msra.mxu0 %v8978_v46  ;;  %v6635_v17 = vperm.slane %v6433_v44, 0 }
 0xd67   :  { %v6353_v24 = vpop.f32.mrf.mxu0 }
 0xd68   :  { %v6366_v8 = vpop.f32.mrf.mxu1 }
 0xd6a   :  { %6783 = vmatpush.bf16.msra.mxu0 %v8977_v21 }
 0xd6c   :  { %v6377_v5 = vpop.f32.mrf.mxu2 }
 0xd6d   :  { %v6378_v53 = vadd.f32 %v6377_v5, %v6365_v9  ;;  %v6390_v39 = vpop.f32.mrf.mxu3  ;;  %v6636_v9 = vperm.slane %v6433_v44, 1  ;;  %v8972_v5 = vld [vmem:[%s9415_s19] sm:$0xff] }
 0xd6e   :  { %6784 = vmatpush.bf16.msra.mxu0 %v8976_v31 }
 0xd6f   :  { %v12363_v7 = vadd.f32 %v6390_v39, %v6378_v53  ;;  %v8980_v53 = vld [vmem:[%s9415_s19 + $0x40] sm:$0xff]  ;;  %s9191_s19 = smov [#allocation5]  }
 0xd70   :  { %s6821_s5 = sshll.u32 %s9191_s19, 4  ;;  %s6822_s5 = int_to_ptr.vmem [resolvable:$true] %s6821_s5 }
 0xd71   :  { %v6395_v34 = vmul.f32 %v12363_v7, %v12363_v7  ;;  %6470 = vmatmul.f32.vlgmr.msrb.gmra.mxu1 %v12363_v7 }
 0xd72   :  { %6794 = vmatpush.bf16.msrb.mxu1 %v8987_v6  ;;  %6785 = vmatpush.bf16.msra.mxu0 %v8975_v54 }
 0xd73   :  { %6511 = vmatmul.f32.vlgmr.msrb.gmra.mxu3 %v6395_v34 }
 0xd74   :  { %v6379_v25 = vpop.f32.mrf.mxu2 }
 0xd75   :  { %v6392_v14 = vpop.f32.mrf.mxu3 }
 0xd76   :  { %6795 = vmatpush.bf16.msrb.mxu1 %v8986_v13  ;;  %6786 = vmatpush.bf16.msra.mxu0 %v8974_v36 }
 0xd7a   :  { %6796 = vmatpush.bf16.msrb.mxu1 %v8985_v55  ;;  %6787 = vmatpush.bf16.msra.mxu0 %v8973_v11 }
 0xd7e   :  { %6797 = vmatpush.bf16.msrb.mxu1 %v8984_v16  ;;  %6788 = vmatpush.bf16.msra.mxu0 %v8972_v5 }
 0xd82   :  { %6798 = vmatpush.bf16.msrb.mxu1 %v8983_v51 }
 0xd86   :  { %6799 = vmatpush.bf16.msrb.mxu1 %v8982_v15 }
 0xd8a   :  { %6800 = vmatpush.bf16.msrb.mxu1 %v8981_v57 }
 0xd8e   :  { %6801 = vmatpush.bf16.msrb.mxu1 %v8980_v53 }
 0xdde   :  { %v6451_v48 = vpop.f32.mrf.mxu0 }
 0xde6   :  { %v6492_v50 = vpop.f32.mrf.mxu2 }
 0xdee   :  { %v6471_v10 = vpop.f32.mrf.mxu1 }
 0xdef   :  { %v6472_v47 = vadd.f32 %v6471_v10, %v6451_v48 }
 0xdf1   :  { %v6474_v3 = vmul.f32 0.0625, %v6472_v47 }
 0xdf3   :  { %8508 = vmatmul.msk.f32.vlgmr.msrb.gmra.mxu0 %vm2562_vm2, %v6474_v3  ;;  %8509 = vmatmul.msk.f32.vlgmr.msra.gmra.mxu1 %vm2562_vm2, %v6474_v3  ;;  %v6516_v30 = vmul.f32 %v6474_v3, %v6474_v3 }
 0xdf6   :  { %v6512_v40 = vpop.f32.mrf.mxu3 }
 0xdf7   :  { %v6513_v32 = vadd.f32 %v6512_v40, %v6492_v50  ;;  %v9050_v40 = vld [vmem:[%s9420_s27] ss:$0 sm:$0xff]  ;;  %s9127_s27 = sshra.s32 %s6824_s9, 4  ;;  %s9128_s27 = int_to_ptr.hbm [resolvable:$true] %s9127_s27 }
 0xdf8   :  { %s9129_s13 = scalar_lea.hbm %s9128_s27, 2  ;;  %p9132_p6 = scmp.lt.s32.totalorder %s9128_s27, %s9425_s4 }
 0xdf9   :  { %v6515_v58 = vmul.f32 0.0625, %v6513_v32  ;;  %p9130_p5 = scmp.ne.s32.totalorder %s9128_s27, %s9129_s13  ;;  %p9133_p7 = scmp.lt.s32.totalorder %s9131_s17, %s9129_s13 }
 0xdfb   :  { %v6517_v0 = vsub.f32 %v6515_v58, %v6516_v30  ;;  %p9134_p8 = por %p9133_p7, %p9132_p6 }
 0xdfd   :  { %v6518_v1 = vmax.f32 %v6517_v0, 0.0  ;;  %p9135_p9 = pnand %p9134_p8, %p9130_p5 }
 0xdff   :  { %8510 = vmatmul.msk.f32.vlgmr.msra.gmra.mxu2 %vm2562_vm2, %v6518_v1  ;;  %8511 = vmatmul.msk.f32.vlgmr.msra.gmra.mxu3 %vm2562_vm2, %v6518_v1 }
 0xe70   :  { %v6539_v24 = vpop.f32.mrf.mxu0  ;;  %v6559_v39 = vpop.f32.mrf.mxu1 }
 0xe82   :  { %v6582_v35 = vpop.f32.mrf.mxu2  ;;  %v6602_v29 = vpop.f32.mrf.mxu3 }
 0xe83   :  { %v6583_v28 = vadd.f32 1e-05, %v6582_v35  ;;  %v6603_v26 = vadd.f32 1e-05, %v6602_v29 }
 0xe85   :  { %9083 = vrsqrt.f32 %v6583_v28  ;;  %vm6611_vm12 = vweird.f32 %v6583_v28  ;;  %vm6621_vm3 = vweird.f32 %v6603_v26 }
 0xe86   :  { %9085 = vrsqrt.f32 %v6603_v26 }
 0xe8b   :  { %v9084_v61 = vpop.eup %9083 }
 0xe8c   :  { %v9086_v38 = vpop.eup %9085  ;;  %v6606_v60 = vmul.f32 %v9084_v61, %v6583_v28  ;;  %vm6612_vm2 = vweird.f32 %v9084_v61 }
 0xe8d   :  { %v6616_v23 = vmul.f32 %v9086_v38, %v6603_v26  ;;  %vm6622_vm11 = vweird.f32 %v9086_v38  ;;  %vm6613_vm10 = vmor %vm6611_vm12, %vm6612_vm2 }
 0xe8e   :  { %v6607_v63 = vmul.f32 %v9084_v61, %v6606_v60  ;;  %vm6623_vm13 = vmor %vm6621_vm3, %vm6622_vm11 }
 0xe8f   :  { %v6617_v45 = vmul.f32 %v9086_v38, %v6616_v23 }
 0xe90   :  { %v6608_v59 = vmul.f32 0.5, %v6607_v63 }
 0xe91   :  { %v6618_v12 = vmul.f32 0.5, %v6617_v45 }
 0xe92   :  { %v6609_v49 = vsub.f32 1.5, %v6608_v59 }
 0xe93   :  { %v6619_v20 = vsub.f32 1.5, %v6618_v12 }
 0xe94   :  { %v6610_v33 = vmul.f32 %v9084_v61, %v6609_v49 }
 0xe95   :  { %v6620_v37 = vmul.f32 %v9086_v38, %v6619_v20 }
 0xe96   :  { %v6614_v19 = vsel %vm6613_vm10, %v9084_v61, %v6610_v33 }
 0xe97   :  { %v6630_v43 = vmul.f32 %v6626_v27, %v6614_v19  ;;  %v6624_v22 = vsel %vm6623_vm13, %v9086_v38, %v6620_v37 }
 0xe98   :  { %v6631_v8 = vmul.f32 %v6627_v4, %v6624_v22 }
 0xe99   :  { %v6632_v34 = vmul.f32 %v6630_v43, %v6539_v24  ;;  %v6641_v42 = vmul.f32 %v6630_v43, %v12358_v52 }
 0xe9a   :  { %v6633_v25 = vmul.f32 %v6631_v8, %v6559_v39  ;;  %v6642_v56 = vmul.f32 %v6631_v8, %v12363_v7 }
 0xe9b   :  { %v6639_v14 = vsub.f32 %v6635_v17, %v6632_v34 }
 0xe9c   :  { %v6640_v18 = vsub.f32 %v6636_v9, %v6633_v25 }
 0xe9d   :  { %v6643_v41 = vadd.f32 %v6641_v42, %v6639_v14 }
 0xe9e   :  { %v6644_v48 = vadd.f32 %v6642_v56, %v6640_v18 }
 0xe9f   :  { %v6645_v10 = vmax.f32 %v6643_v41, 0.0 }
 0xea0   :  { %v6646_v47 = vmax.f32 %v6644_v48, 0.0 }
 0xea1   :  { %v6679_v3 = vpack.c.bf16 %v6645_v10, %v6645_v10 }
 0xea2   :  { %v6680_v50 = vpack.c.bf16 %v6646_v47, %v6646_v47 }
 0xea3   :  { %6789 = vmatmul.bf16.vlgmr.msra.gmra.mxu0 %v6679_v3 }
 0xea4   :  { %6802 = vmatmul.bf16.vlgmr.msrb.gmra.mxu1 %v6680_v50 }
 0xf20   :  { %v6790_v32 = vpop.f32.mrf.mxu0 }
 0xf21   :  { %v6791_v58 = vadd.f32 %v9050_v40, %v6790_v32  ;;  %v6803_v30 = vpop.f32.mrf.mxu1 }
 0xf23   :  { %v6804_v0 = vadd.f32 %v6803_v30, %v6791_v58 }
 0xf25   :  { %v6808_v52 = vmul.f32 1.442695, %v6804_v0  ;;  %vm6807_vm4 = vcmp.gt.f32.partialorder %v6804_v0, 20.0 }
 0xf27   :  { %9087 = vpow2.f32 %v6808_v52 }
 0xf28   :  { %v6792_v1 = vpop.f32.mrf.mxu0 }
 0xf29   :  { %v6805_v7 = vpop.f32.mrf.mxu1 }
 0xf2d   :  { %v9088_v2 = vpop.eup %9087 }
 0xf2e   :  { %v6810_v6 = vadd.f32 1.0, %v9088_v2 }
 0xf30   :  { %9089 = vlog2.f32 %v6810_v6 }
 0xf36   :  { %v9090_v46 = vpop.eup %9089 }
 0xf37   :  { %v6812_v13 = vmul.f32 0.6931472, %v9090_v46 }
 0xf39   :  { %v6813_v35 = vsel %vm6807_vm4, %v6804_v0, %v6812_v13 }
 0xf3a   :  { %6815 = vst.msk [vmem:[#allocation5] sm:$0x3] %vm6814_vm14, %v6813_v35 }
 0xf3b   :  { %9138 = shalt.err (!%p9135_p9)
}
 0xf3c   :  { %6826 = dma.vmem_to_hbm [thread:$0]  %s6822_s5, 32, %s6824_s9, [#allocation4]  }
 0xf3d   :  { %9141 = dma.done.wait [#allocation4], 32  }
 0xf3e   :  { %9142 = vsyncadd [#allocation4], 4294967264 }
 0xf3f   :  { %6831 = vsyncpa [#allocation3], 1 }
 0xf40   :  { %6832 = vsyncpa [#allocation4], 1 }

</bundles_post_ra>
